<compile_context>
chip_gen: v6e
topology: v6e:2x2x1
jax: 0.10.0
libtpu: 0.0.40
codegen_flags: <defaults>
</compile_context>

<pallas_src>
import jax
import jax.numpy as jnp
from jax import lax
from jax.experimental import pallas as pl
from jax.experimental.pallas import tpu as pltpu


def _round_up(x, m):
    return ((x + m - 1) // m) * m


def _tpu_vmem_capacity():
    """Per-core VMEM bytes for this generation; conservative fallback."""
    try:
        cap = getattr(pltpu.get_tpu_info(), "vmem_capacity_bytes", None)
        if cap:
            return int(cap)
    except Exception:
        pass
    return 64 << 20  # assume the smallest (v7x-like) per-core VMEM


def _pick_time_block(T, Bp, Hp, din_max, vmem_cap):
    """Largest time block whose streamed VMEM footprint fits a VMEM fraction."""
    budget = max(4 << 20, vmem_cap // 8)
    # double-buffered x & out blocks + the in-kernel gate scratch, all f32
    per_step = Bp * 4 * (2 * (din_max + Hp) + 4 * Hp)
    return int(max(1, min(T, budget // per_step)))


def _make_lstm_kernel(T_blk, Bp, Hp, T_real, num_tb, unroll):
    """Recurrent kernel for one (direction, time-block) grid step.

    Refs:
      x_ref    : (T_blk*Bp, Din)   input rows for this time block (row = t*Bp + b)
      wih_ref  : (Din, 4*Hp)       W_ih^T for this direction, gate-padded layout
      whh_ref  : (Hp, 4*Hp)        W_hh^T for this direction
      b_ref    : (1, 4*Hp)         b_ih + b_hh for this direction
      out_ref  : (T_blk*Bp, Hp)    hidden states (this direction's lane block)
      gx_sc    : (T_blk*Bp, 4*Hp)  per-block gate pre-activations (VMEM scratch)
      h_sc/c_sc: (Bp, Hp)          recurrent state, persists across time blocks
    """
    padded_t = (num_tb * T_blk) != T_real

    def kernel(x_ref, wih_ref, whh_ref, b_ref, out_ref, gx_sc, h_sc, c_sc):
        d = pl.program_id(0)       # 0 = forward, 1 = reverse
        tb = pl.program_id(1)      # time-block index in traversal order

        @pl.when(tb == 0)
        def _():
            h_sc[...] = jnp.zeros_like(h_sc)
            c_sc[...] = jnp.zeros_like(c_sc)

        # Fused input projection for the whole block: one MXU matmul per grid
        # step; only h @ W_hh^T remains inside the serial time loop.
        gx_sc[...] = jnp.dot(x_ref[...], wih_ref[...],
                             preferred_element_type=jnp.float32) + b_ref[...]

        whh = whh_ref[...]         # (Hp, 4*Hp), hoisted out of the time loop

        def run(reverse):
            # Array-order index of this grid step's time block (the reverse
            # direction walks time blocks back-to-front via the index_map and
            # walks the rows inside the block back-to-front here).
            blk = (num_tb - 1 - tb) if reverse else tb

            def step(s, carry):
                h, c = carry
                t = (T_blk - 1 - s) if reverse else s
                row = pl.multiple_of(t * Bp, Bp)
                gates = gx_sc[pl.ds(row, Bp), :] + jnp.dot(
                    h, whh, preferred_element_type=jnp.float32)
                # PyTorch gate order i, f, g, o; each gate owns a whole Hp-lane
                # slab, so these are full-vreg static extracts.
                i = jax.nn.sigmoid(gates[:, 0 * Hp:1 * Hp])
                f = jax.nn.sigmoid(gates[:, 1 * Hp:2 * Hp])
                g = jnp.tanh(gates[:, 2 * Hp:3 * Hp])
                o = jax.nn.sigmoid(gates[:, 3 * Hp:4 * Hp])
                c_new = f * c + i * g
                h_new = o * jnp.tanh(c_new)
                if padded_t:
                    # Hold the state on padded timesteps so the reverse pass
                    # enters the real sequence with h = c = 0.
                    valid = (blk * T_blk + t) < T_real
                    h_new = jnp.where(valid, h_new, h)
                    c_new = jnp.where(valid, c_new, c)
                out_ref[pl.ds(row, Bp), :] = h_new.astype(out_ref.dtype)
                return h_new, c_new

            h, c = lax.fori_loop(0, T_blk, step, (h_sc[...], c_sc[...]),
                                 unroll=unroll)
            h_sc[...] = h
            c_sc[...] = c

        # Static traversal per direction branch: no per-step index arithmetic
        # on the runtime direction scalar, and aligned (8,128) loads/stores.
        @pl.when(d == 0)
        def _():
            run(False)

        @pl.when(d == 1)
        def _():
            run(True)

        # TODO(synk): on single-TensorCore chips (v5e/v6e) interleave the fwd
        # and rev dependency chains inside one grid step for ~2x ILP.

    return kernel


def _bilstm_layer(x2d, wih, whh, bias, *, T_real, T_blk, Bp, Hp, vmem_cap):
    """One bidirectional LSTM layer.  x2d: (T_pad*Bp, Din) -> (T_pad*Bp, 2*Hp)."""
    rows, Din = x2d.shape
    T_pad = rows // Bp
    num_tb = T_pad // T_blk
    G = 4 * Hp
    unroll = min(T_blk, 8)

    kernel = _make_lstm_kernel(T_blk, Bp, Hp, T_real, num_tb, unroll)

    def blk_idx(d, tb):
        # Forward walks time blocks front-to-back, reverse back-to-front.
        return tb + d * (num_tb - 1 - 2 * tb)

    # Double-buffered streamed blocks + weights + scratch, with headroom, but
    # never more than 3/4 of this generation's physical per-core VMEM.
    need = 4 * (2 * T_blk * Bp * (Din + Hp) + 2 * (Din + Hp + 1) * G
                + T_blk * Bp * G + 2 * Bp * Hp)
    vmem_limit = int(min(max(need + (4 << 20), 16 << 20), (vmem_cap * 3) // 4))

    # TODO(synk): single-buffer the grid-constant weight specs (pl.Buffered(1))
    # and stream x/out in bf16 to cut VMEM/HBM traffic further (kept f32 here
    # to preserve exact parity with the f32 reference).
    return pl.pallas_call(
        kernel,
        out_shape=jax.ShapeDtypeStruct((T_pad * Bp, 2 * Hp), jnp.float32),
        grid_spec=pltpu.PrefetchScalarGridSpec(
            num_scalar_prefetch=0,
            grid=(2, num_tb),
            in_specs=[
                pl.BlockSpec((T_blk * Bp, Din), lambda d, tb: (blk_idx(d, tb), 0)),
                pl.BlockSpec((None, Din, G), lambda d, tb: (d, 0, 0)),
                pl.BlockSpec((None, Hp, G), lambda d, tb: (d, 0, 0)),
                pl.BlockSpec((None, 1, G), lambda d, tb: (d, 0, 0)),
            ],
            # Direction d writes its own Hp-wide lane block of the (.., 2*Hp)
            # output -> no post-kernel concatenate, lane-dense unmasked stores.
            out_specs=pl.BlockSpec((T_blk * Bp, Hp),
                                   lambda d, tb: (blk_idx(d, tb), d)),
            scratch_shapes=[
                pltpu.VMEM((T_blk * Bp, G), jnp.float32),  # block gate pre-acts
                pltpu.VMEM((Bp, Hp), jnp.float32),         # h state
                pltpu.VMEM((Bp, Hp), jnp.float32),         # c state
            ],
        ),
        # TODO(synk): on v7x force the direction axis onto separate TensorCores
        # (pltpu.CORE_PARALLEL) once verified that each core keeps private h/c.
        compiler_params=pltpu.CompilerParams(
            dimension_semantics=("parallel", "arbitrary"),
            vmem_limit_bytes=vmem_limit,
        ),
    )(x2d, wih, whh, bias)


# ----------------------- weight preparation (lane-aligned layout) -----------------------
def _prep_direction(w_ih, w_hh, b_ih, b_hh, H, Hp, first_layer):
    """Pad one direction's weights into the lane-aligned gate layout.

    Gate g (PyTorch order i,f,g,o) occupies output lanes [g*Hp, g*Hp + H);
    padded lanes get zero weights/bias so padded h/c lanes stay exactly 0.
    """
    G = 4 * Hp

    def pad_gate_cols(m):  # (K, 4H) -> (K, 4Hp)
        K = m.shape[0]
        return (jnp.zeros((K, 4, Hp), m.dtype)
                .at[:, :, :H].set(m.reshape(K, 4, H)).reshape(K, G))

    wih_t = pad_gate_cols(w_ih.T)                      # (Din_raw, 4Hp)
    if first_layer:
        wih = wih_t                                    # (D, 4Hp)
    else:
        # Input rows follow the padded [fwd | pad | rev | pad] 2*Hp layout.
        wih = (jnp.zeros((2 * Hp, G), wih_t.dtype)
               .at[:H].set(wih_t[:H])
               .at[Hp:Hp + H].set(wih_t[H:2 * H]))
    whh = jnp.zeros((Hp, G), w_hh.dtype).at[:H].set(pad_gate_cols(w_hh.T))
    bias = pad_gate_cols((b_ih + b_hh).reshape(1, 4 * H))  # (1, 4Hp)
    return wih, whh, bias


def _prep_layer(layer, H, Hp, first_layer):
    f = _prep_direction(layer["w_ih_f"], layer["w_hh_f"],
                        layer["b_ih_f"], layer["b_hh_f"], H, Hp, first_layer)
    r = _prep_direction(layer["w_ih_r"], layer["w_hh_r"],
                        layer["b_ih_r"], layer["b_hh_r"], H, Hp, first_layer)
    return tuple(jnp.stack(p) for p in zip(f, r))      # each (2, ...) per-direction


# ----------------------- forward pass -----------------------
def bilstm_forward(x, params, *, time_block=None):
    """Equivalent of BiLSTM.forward: x (B, T, D) batch_first -> (B, T, 2H)."""
    B, T, D = x.shape
    H = params[0]["w_hh_f"].shape[1]
    Hp = _round_up(H, 128)                  # lane-aligned hidden dim in-kernel
    Bp = _round_up(B, 8)                    # full-sublane batch

    vmem_cap = _tpu_vmem_capacity()
    T_blk = int(time_block) if time_block else _pick_time_block(
        T, Bp, Hp, max(D, 2 * Hp), vmem_cap)
    T_blk = max(1, min(T_blk, T))
    T_pad = _round_up(T, T_blk)

    # batch_first -> time-major, pad batch/time once, flatten to row = t*Bp + b.
    h = jnp.transpose(x, (1, 0, 2))
    h = jnp.pad(h, ((0, T_pad - T), (0, Bp - B), (0, 0)))
    h = h.reshape(T_pad * Bp, D)

    # NOTE: weight padding/transposition is tiny vs. the recurrence; in a real
    # model it would be done once at parameter-load time.
    for li, layer in enumerate(params):
        wih, whh, bias = _prep_layer(layer, H, Hp, first_layer=(li == 0))
        h = _bilstm_layer(h, wih, whh, bias, T_real=T, T_blk=T_blk, Bp=Bp,
                          Hp=Hp, vmem_cap=vmem_cap)

    # (T_pad*Bp, 2*Hp) -> (B, T, 2H): drop time/batch/lane padding.
    h = h.reshape(T_pad, Bp, 2 * Hp)
    out = jnp.concatenate([h[:T, :B, :H], h[:T, :B, Hp:Hp + H]], axis=-1)
    return jnp.transpose(out, (1, 0, 2))


# ----------------------- pure-JAX reference (for checking) -----------------------
def _lstm_ref_dir(x_tm, w_ih, w_hh, b_ih, b_hh):
    H = w_hh.shape[1]
    B = x_tm.shape[1]

    def step(carry, x_t):
        h, c = carry
        gates = x_t @ w_ih.T + h @ w_hh.T + b_ih + b_hh
        i = jax.nn.sigmoid(gates[:, 0 * H:1 * H])
        f = jax.nn.sigmoid(gates[:, 1 * H:2 * H])
        g = jnp.tanh(gates[:, 2 * H:3 * H])
        o = jax.nn.sigmoid(gates[:, 3 * H:4 * H])
        c = f * c + i * g
        h = o * jnp.tanh(c)
        return (h, c), h

    init = (jnp.zeros((B, H), jnp.float32), jnp.zeros((B, H), jnp.float32))
    _, ys = lax.scan(step, init, x_tm)
    return ys


def bilstm_ref(x, params):
    h = x
    for layer in params:
        x_tm = jnp.transpose(h, (1, 0, 2))
        out_f = _lstm_ref_dir(
            x_tm, layer["w_ih_f"], layer["w_hh_f"], layer["b_ih_f"], layer["b_hh_f"])
        out_r = _lstm_ref_dir(
            x_tm[::-1], layer["w_ih_r"], layer["w_hh_r"], layer["b_ih_r"], layer["b_hh_r"])[::-1]
        h = jnp.transpose(jnp.concatenate([out_f, out_r], axis=-1), (1, 0, 2))
    return h


# ----------------------- deterministic parameter init -----------------------
def init_params(key, input_dim, hidden_dim, num_layers):
    """Mimic nn.LSTM param shapes: per layer & direction W_ih (4H, D_in),
    W_hh (4H, H), b_ih (4H,), b_hh (4H,), init ~ U(-1/sqrt(H), 1/sqrt(H))."""
    bound = 1.0 / (hidden_dim ** 0.5)
    params = []
    for l in range(num_layers):
        d_in = input_dim if l == 0 else 2 * hidden_dim
        layer = {}
        for suffix in ("f", "r"):
            key, k1, k2, k3, k4 = jax.random.split(key, 5)
            layer[f"w_ih_{suffix}"] = jax.random.uniform(
                k1, (4 * hidden_dim, d_in), jnp.float32, -bound, bound)
            layer[f"w_hh_{suffix}"] = jax.random.uniform(
                k2, (4 * hidden_dim, hidden_dim), jnp.float32, -bound, bound)
            layer[f"b_ih_{suffix}"] = jax.random.uniform(
                k3, (4 * hidden_dim,), jnp.float32, -bound, bound)
            layer[f"b_hh_{suffix}"] = jax.random.uniform(
                k4, (4 * hidden_dim,), jnp.float32, -bound, bound)
        params.append(layer)
    return params


if __name__ == "__main__":
    B, T, D, H, L = 2, 8, 16, 32, 2  # batch, seq, input_dim, hidden_dim, num_layers

    key = jax.random.PRNGKey(0)
    kx, kp = jax.random.split(key)
    x = jax.random.normal(kx, (B, T, D), dtype=jnp.float32)
    params = init_params(kp, D, H, L)

    out = jax.block_until_ready(jax.jit(bilstm_forward)(x, params))
    assert out.shape == (B, T, 2 * H), out.shape
    ref = bilstm_ref(x, params)
    assert jnp.allclose(out, ref, atol=2e-3, rtol=2e-3), float(jnp.max(jnp.abs(out - ref)))

    # Exercise multi-time-block streaming + non-divisible T (padding/mask path).
    x2 = jax.random.normal(jax.random.PRNGKey(1), (3, 10, D), dtype=jnp.float32)
    out2 = jax.block_until_ready(
        jax.jit(lambda a: bilstm_forward(a, params, time_block=4))(x2))
    ref2 = bilstm_ref(x2, params)
    assert jnp.allclose(out2, ref2, atol=2e-3, rtol=2e-3), float(jnp.max(jnp.abs(out2 - ref2)))

    print("KERNEL_OK")
</pallas_src>

<mosaic_0001>
module attributes {stable_mosaic.version = 11 : i64} {
  func.func @kernel(%arg0: i32, %arg1: i32, %arg2: memref<64x16xf32, #tpu.memory_space<vmem>>, %arg3: memref<1x16x512xf32, #tpu.memory_space<vmem>>, %arg4: memref<1x128x512xf32, #tpu.memory_space<vmem>>, %arg5: memref<1x1x512xf32, #tpu.memory_space<vmem>>, %arg6: memref<64x128xf32, #tpu.memory_space<vmem>>, %arg7: memref<64x512xf32, #tpu.memory_space<vmem>>, %arg8: memref<8x128xf32, #tpu.memory_space<vmem>>, %arg9: memref<8x128xf32, #tpu.memory_space<vmem>>) attributes {dimension_semantics = [#tpu.dimension_semantics<parallel>, #tpu.dimension_semantics<arbitrary>], iteration_bounds = array<i64: 2, 1>, scalar_prefetch = 0 : i64, scratch_operands = 3 : i64, tpu.core_type = #tpu.core_type<tc>, window_params = [{transform_indices = @transform_0, window_bounds = array<i64: 64, 16>}, {transform_indices = @transform_1, window_bounds = array<i64: 1, 16, 512>}, {transform_indices = @transform_2, window_bounds = array<i64: 1, 128, 512>}, {transform_indices = @transform_3, window_bounds = array<i64: 1, 1, 512>}, {transform_indices = @transform_4, window_bounds = array<i64: 64, 128>}]} {
    %c0_i32 = arith.constant 0 : i32
    %0 = arith.cmpi eq, %arg1, %c0_i32 : i32
    %1 = arith.extui %0 : i1 to i32
    %c0_i32_0 = arith.constant 0 : i32
    %2 = arith.cmpi ne, %1, %c0_i32_0 : i32
    scf.if %2 {
      %cst_16 = arith.constant 0.000000e+00 : f32
      %20 = vector.broadcast %cst_16 : f32 to vector<8x128xf32>
      %c0_17 = arith.constant 0 : index
      %c0_18 = arith.constant 0 : index
      %21 = vector.load %arg8[%c0_17, %c0_18] : memref<8x128xf32, #tpu.memory_space<vmem>>, vector<8x128xf32>
      tpu.vector_store %arg8[%c0_17, %c0_18], %20 {strides = array<i32>} : memref<8x128xf32, #tpu.memory_space<vmem>>, vector<8x128xf32>,
      %cst_19 = arith.constant 0.000000e+00 : f32
      %22 = vector.broadcast %cst_19 : f32 to vector<8x128xf32>
      %c0_20 = arith.constant 0 : index
      %c0_21 = arith.constant 0 : index
      %23 = vector.load %arg9[%c0_20, %c0_21] : memref<8x128xf32, #tpu.memory_space<vmem>>, vector<8x128xf32>
      tpu.vector_store %arg9[%c0_20, %c0_21], %22 {strides = array<i32>} : memref<8x128xf32, #tpu.memory_space<vmem>>, vector<8x128xf32>,
    } else {
    }
    %c0 = arith.constant 0 : index
    %c0_1 = arith.constant 0 : index
    %3 = vector.load %arg2[%c0, %c0_1] : memref<64x16xf32, #tpu.memory_space<vmem>>, vector<64x16xf32>
    %c0_2 = arith.constant 0 : index
    %c0_3 = arith.constant 0 : index
    %c0_4 = arith.constant 0 : index
    %4 = vector.load %arg3[%c0_2, %c0_3, %c0_4] : memref<1x16x512xf32, #tpu.memory_space<vmem>>, vector<1x16x512xf32>
    %5 = vector.shape_cast %4 : vector<1x16x512xf32> to vector<16x512xf32>
    %cst = arith.constant dense<0.000000e+00> : vector<64x512xf32>
    %6 = tpu.matmul %3, %5, %cst {dimension_numbers = #tpu.dot_dimension_numbers<[1], [0], [0], [1], [0, 0, 1, 1], [], []>} : vector<64x16xf32>, vector<16x512xf32>, vector<64x512xf32> -> vector<64x512xf32>
    %c0_5 = arith.constant 0 : index
    %c0_6 = arith.constant 0 : index
    %c0_7 = arith.constant 0 : index
    %7 = vector.load %arg5[%c0_5, %c0_6, %c0_7] : memref<1x1x512xf32, #tpu.memory_space<vmem>>, vector<1x1x512xf32>
    %8 = vector.shape_cast %7 : vector<1x1x512xf32> to vector<1x512xf32>
    %9 = vector.broadcast %8 : vector<1x512xf32> to vector<64x512xf32>
    %10 = arith.addf %6, %9 : vector<64x512xf32>
    %c0_8 = arith.constant 0 : index
    %c0_9 = arith.constant 0 : index
    %11 = vector.load %arg7[%c0_8, %c0_9] : memref<64x512xf32, #tpu.memory_space<vmem>>, vector<64x512xf32>
    tpu.vector_store %arg7[%c0_8, %c0_9], %10 {strides = array<i32>} : memref<64x512xf32, #tpu.memory_space<vmem>>, vector<64x512xf32>,
    %c0_10 = arith.constant 0 : index
    %c0_11 = arith.constant 0 : index
    %c0_12 = arith.constant 0 : index
    %12 = vector.load %arg4[%c0_10, %c0_11, %c0_12] : memref<1x128x512xf32, #tpu.memory_space<vmem>>, vector<1x128x512xf32>
    %13 = vector.shape_cast %12 : vector<1x128x512xf32> to vector<128x512xf32>
    %c0_i32_13 = arith.constant 0 : i32
    %14 = arith.cmpi eq, %arg0, %c0_i32_13 : i32
    %15 = arith.extui %14 : i1 to i32
    %c0_i32_14 = arith.constant 0 : i32
    %16 = arith.cmpi ne, %15, %c0_i32_14 : i32
    scf.if %16 {
      %c0_16 = arith.constant 0 : index
      %c0_17 = arith.constant 0 : index
      %20 = vector.load %arg8[%c0_16, %c0_17] : memref<8x128xf32, #tpu.memory_space<vmem>>, vector<8x128xf32>
      %c0_18 = arith.constant 0 : index
      %c0_19 = arith.constant 0 : index
      %21 = vector.load %arg9[%c0_18, %c0_19] : memref<8x128xf32, #tpu.memory_space<vmem>>, vector<8x128xf32>
      %c0_i32_20 = arith.constant 0 : i32
      %c8_i32 = arith.constant 8 : i32
      %22 = arith.muli %c0_i32_20, %c8_i32 : i32
      %23 = tpu.assume_multiple %22, 8 : i32
      %24 = arith.index_cast %23 : i32 to index
      %c0_21 = arith.constant 0 : index
      %25 = vector.load %arg7[%24, %c0_21] : memref<64x512xf32, #tpu.memory_space<vmem>>, vector<8x512xf32>
      %cst_22 = arith.constant dense<0.000000e+00> : vector<8x512xf32>
      %26 = tpu.matmul %20, %13, %cst_22 {dimension_numbers = #tpu.dot_dimension_numbers<[1], [0], [0], [1], [0, 0, 1, 1], [], []>} : vector<8x128xf32>, vector<128x512xf32>, vector<8x512xf32> -> vector<8x512xf32>
      %27 = arith.addf %25, %26 : vector<8x512xf32>
      %28 = vector.extract_strided_slice %27 {offsets = [0, 0], sizes = [8, 128], strides = [1, 1]} : vector<8x512xf32> to vector<8x128xf32>
      %29 = arith.negf %28 : vector<8x128xf32>
      %30 = math.exp %29 : vector<8x128xf32>
      %cst_23 = arith.constant 1.000000e+00 : f32
      %31 = vector.broadcast %cst_23 : f32 to vector<8x128xf32>
      %32 = arith.addf %31, %30 : vector<8x128xf32>
      %33 = arith.divf %31, %32 : vector<8x128xf32>
      %34 = vector.extract_strided_slice %27 {offsets = [0, 128], sizes = [8, 128], strides = [1, 1]} : vector<8x512xf32> to vector<8x128xf32>
      %35 = arith.negf %34 : vector<8x128xf32>
      %36 = math.exp %35 : vector<8x128xf32>
      %cst_24 = arith.constant 1.000000e+00 : f32
      %37 = vector.broadcast %cst_24 : f32 to vector<8x128xf32>
      %38 = arith.addf %37, %36 : vector<8x128xf32>
      %39 = arith.divf %37, %38 : vector<8x128xf32>
      %40 = vector.extract_strided_slice %27 {offsets = [0, 256], sizes = [8, 128], strides = [1, 1]} : vector<8x512xf32> to vector<8x128xf32>
      %41 = math.tanh %40 : vector<8x128xf32>
      %42 = vector.extract_strided_slice %27 {offsets = [0, 384], sizes = [8, 128], strides = [1, 1]} : vector<8x512xf32> to vector<8x128xf32>
      %43 = arith.negf %42 : vector<8x128xf32>
      %44 = math.exp %43 : vector<8x128xf32>
      %cst_25 = arith.constant 1.000000e+00 : f32
      %45 = vector.broadcast %cst_25 : f32 to vector<8x128xf32>
      %46 = arith.addf %45, %44 : vector<8x128xf32>
      %47 = arith.divf %45, %46 : vector<8x128xf32>
      %48 = arith.mulf %39, %21 : vector<8x128xf32>
      %49 = arith.mulf %33, %41 : vector<8x128xf32>
      %50 = arith.addf %48, %49 : vector<8x128xf32>
      %51 = math.tanh %50 : vector<8x128xf32>
      %52 = arith.mulf %47, %51 : vector<8x128xf32>
      %53 = arith.index_cast %23 : i32 to index
      %c0_26 = arith.constant 0 : index
      %54 = vector.load %arg6[%53, %c0_26] : memref<64x128xf32, #tpu.memory_space<vmem>>, vector<8x128xf32>
      tpu.vector_store %arg6[%53, %c0_26], %52 {strides = array<i32>} : memref<64x128xf32, #tpu.memory_space<vmem>>, vector<8x128xf32>,
      %c1_i32_27 = arith.constant 1 : i32
      %c8_i32_28 = arith.constant 8 : i32
      %55 = arith.muli %c1_i32_27, %c8_i32_28 : i32
      %56 = tpu.assume_multiple %55, 8 : i32
      %57 = arith.index_cast %56 : i32 to index
      %c0_29 = arith.constant 0 : index
      %58 = vector.load %arg7[%57, %c0_29] : memref<64x512xf32, #tpu.memory_space<vmem>>, vector<8x512xf32>
      %cst_30 = arith.constant dense<0.000000e+00> : vector<8x512xf32>
      %59 = tpu.matmul %52, %13, %cst_30 {dimension_numbers = #tpu.dot_dimension_numbers<[1], [0], [0], [1], [0, 0, 1, 1], [], []>} : vector<8x128xf32>, vector<128x512xf32>, vector<8x512xf32> -> vector<8x512xf32>
      %60 = arith.addf %58, %59 : vector<8x512xf32>
      %61 = vector.extract_strided_slice %60 {offsets = [0, 0], sizes = [8, 128], strides = [1, 1]} : vector<8x512xf32> to vector<8x128xf32>
      %62 = arith.negf %61 : vector<8x128xf32>
      %63 = math.exp %62 : vector<8x128xf32>
      %cst_31 = arith.constant 1.000000e+00 : f32
      %64 = vector.broadcast %cst_31 : f32 to vector<8x128xf32>
      %65 = arith.addf %64, %63 : vector<8x128xf32>
      %66 = arith.divf %64, %65 : vector<8x128xf32>
      %67 = vector.extract_strided_slice %60 {offsets = [0, 128], sizes = [8, 128], strides = [1, 1]} : vector<8x512xf32> to vector<8x128xf32>
      %68 = arith.negf %67 : vector<8x128xf32>
      %69 = math.exp %68 : vector<8x128xf32>
      %cst_32 = arith.constant 1.000000e+00 : f32
      %70 = vector.broadcast %cst_32 : f32 to vector<8x128xf32>
      %71 = arith.addf %70, %69 : vector<8x128xf32>
      %72 = arith.divf %70, %71 : vector<8x128xf32>
      %73 = vector.extract_strided_slice %60 {offsets = [0, 256], sizes = [8, 128], strides = [1, 1]} : vector<8x512xf32> to vector<8x128xf32>
      %74 = math.tanh %73 : vector<8x128xf32>
      %75 = vector.extract_strided_slice %60 {offsets = [0, 384], sizes = [8, 128], strides = [1, 1]} : vector<8x512xf32> to vector<8x128xf32>
      %76 = arith.negf %75 : vector<8x128xf32>
      %77 = math.exp %76 : vector<8x128xf32>
      %cst_33 = arith.constant 1.000000e+00 : f32
      %78 = vector.broadcast %cst_33 : f32 to vector<8x128xf32>
      %79 = arith.addf %78, %77 : vector<8x128xf32>
      %80 = arith.divf %78, %79 : vector<8x128xf32>
      %81 = arith.mulf %72, %50 : vector<8x128xf32>
      %82 = arith.mulf %66, %74 : vector<8x128xf32>
      %83 = arith.addf %81, %82 : vector<8x128xf32>
      %84 = math.tanh %83 : vector<8x128xf32>
      %85 = arith.mulf %80, %84 : vector<8x128xf32>
      %86 = arith.index_cast %56 : i32 to index
      %c0_34 = arith.constant 0 : index
      %87 = vector.load %arg6[%86, %c0_34] : memref<64x128xf32, #tpu.memory_space<vmem>>, vector<8x128xf32>
      tpu.vector_store %arg6[%86, %c0_34], %85 {strides = array<i32>} : memref<64x128xf32, #tpu.memory_space<vmem>>, vector<8x128xf32>,
      %c2_i32 = arith.constant 2 : i32
      %c8_i32_35 = arith.constant 8 : i32
      %88 = arith.muli %c2_i32, %c8_i32_35 : i32
      %89 = tpu.assume_multiple %88, 8 : i32
      %90 = arith.index_cast %89 : i32 to index
      %c0_36 = arith.constant 0 : index
      %91 = vector.load %arg7[%90, %c0_36] : memref<64x512xf32, #tpu.memory_space<vmem>>, vector<8x512xf32>
      %cst_37 = arith.constant dense<0.000000e+00> : vector<8x512xf32>
      %92 = tpu.matmul %85, %13, %cst_37 {dimension_numbers = #tpu.dot_dimension_numbers<[1], [0], [0], [1], [0, 0, 1, 1], [], []>} : vector<8x128xf32>, vector<128x512xf32>, vector<8x512xf32> -> vector<8x512xf32>
      %93 = arith.addf %91, %92 : vector<8x512xf32>
      %94 = vector.extract_strided_slice %93 {offsets = [0, 0], sizes = [8, 128], strides = [1, 1]} : vector<8x512xf32> to vector<8x128xf32>
      %95 = arith.negf %94 : vector<8x128xf32>
      %96 = math.exp %95 : vector<8x128xf32>
      %cst_38 = arith.constant 1.000000e+00 : f32
      %97 = vector.broadcast %cst_38 : f32 to vector<8x128xf32>
      %98 = arith.addf %97, %96 : vector<8x128xf32>
      %99 = arith.divf %97, %98 : vector<8x128xf32>
      %100 = vector.extract_strided_slice %93 {offsets = [0, 128], sizes = [8, 128], strides = [1, 1]} : vector<8x512xf32> to vector<8x128xf32>
      %101 = arith.negf %100 : vector<8x128xf32>
      %102 = math.exp %101 : vector<8x128xf32>
      %cst_39 = arith.constant 1.000000e+00 : f32
      %103 = vector.broadcast %cst_39 : f32 to vector<8x128xf32>
      %104 = arith.addf %103, %102 : vector<8x128xf32>
      %105 = arith.divf %103, %104 : vector<8x128xf32>
      %106 = vector.extract_strided_slice %93 {offsets = [0, 256], sizes = [8, 128], strides = [1, 1]} : vector<8x512xf32> to vector<8x128xf32>
      %107 = math.tanh %106 : vector<8x128xf32>
      %108 = vector.extract_strided_slice %93 {offsets = [0, 384], sizes = [8, 128], strides = [1, 1]} : vector<8x512xf32> to vector<8x128xf32>
      %109 = arith.negf %108 : vector<8x128xf32>
      %110 = math.exp %109 : vector<8x128xf32>
      %cst_40 = arith.constant 1.000000e+00 : f32
      %111 = vector.broadcast %cst_40 : f32 to vector<8x128xf32>
      %112 = arith.addf %111, %110 : vector<8x128xf32>
      %113 = arith.divf %111, %112 : vector<8x128xf32>
      %114 = arith.mulf %105, %83 : vector<8x128xf32>
      %115 = arith.mulf %99, %107 : vector<8x128xf32>
      %116 = arith.addf %114, %115 : vector<8x128xf32>
      %117 = math.tanh %116 : vector<8x128xf32>
      %118 = arith.mulf %113, %117 : vector<8x128xf32>
      %119 = arith.index_cast %89 : i32 to index
      %c0_41 = arith.constant 0 : index
      %120 = vector.load %arg6[%119, %c0_41] : memref<64x128xf32, #tpu.memory_space<vmem>>, vector<8x128xf32>
      tpu.vector_store %arg6[%119, %c0_41], %118 {strides = array<i32>} : memref<64x128xf32, #tpu.memory_space<vmem>>, vector<8x128xf32>,
      %c3_i32 = arith.constant 3 : i32
      %c8_i32_42 = arith.constant 8 : i32
      %121 = arith.muli %c3_i32, %c8_i32_42 : i32
      %122 = tpu.assume_multiple %121, 8 : i32
      %123 = arith.index_cast %122 : i32 to index
      %c0_43 = arith.constant 0 : index
      %124 = vector.load %arg7[%123, %c0_43] : memref<64x512xf32, #tpu.memory_space<vmem>>, vector<8x512xf32>
      %cst_44 = arith.constant dense<0.000000e+00> : vector<8x512xf32>
      %125 = tpu.matmul %118, %13, %cst_44 {dimension_numbers = #tpu.dot_dimension_numbers<[1], [0], [0], [1], [0, 0, 1, 1], [], []>} : vector<8x128xf32>, vector<128x512xf32>, vector<8x512xf32> -> vector<8x512xf32>
      %126 = arith.addf %124, %125 : vector<8x512xf32>
      %127 = vector.extract_strided_slice %126 {offsets = [0, 0], sizes = [8, 128], strides = [1, 1]} : vector<8x512xf32> to vector<8x128xf32>
      %128 = arith.negf %127 : vector<8x128xf32>
      %129 = math.exp %128 : vector<8x128xf32>
      %cst_45 = arith.constant 1.000000e+00 : f32
      %130 = vector.broadcast %cst_45 : f32 to vector<8x128xf32>
      %131 = arith.addf %130, %129 : vector<8x128xf32>
      %132 = arith.divf %130, %131 : vector<8x128xf32>
      %133 = vector.extract_strided_slice %126 {offsets = [0, 128], sizes = [8, 128], strides = [1, 1]} : vector<8x512xf32> to vector<8x128xf32>
      %134 = arith.negf %133 : vector<8x128xf32>
      %135 = math.exp %134 : vector<8x128xf32>
      %cst_46 = arith.constant 1.000000e+00 : f32
      %136 = vector.broadcast %cst_46 : f32 to vector<8x128xf32>
      %137 = arith.addf %136, %135 : vector<8x128xf32>
      %138 = arith.divf %136, %137 : vector<8x128xf32>
      %139 = vector.extract_strided_slice %126 {offsets = [0, 256], sizes = [8, 128], strides = [1, 1]} : vector<8x512xf32> to vector<8x128xf32>
      %140 = math.tanh %139 : vector<8x128xf32>
      %141 = vector.extract_strided_slice %126 {offsets = [0, 384], sizes = [8, 128], strides = [1, 1]} : vector<8x512xf32> to vector<8x128xf32>
      %142 = arith.negf %141 : vector<8x128xf32>
      %143 = math.exp %142 : vector<8x128xf32>
      %cst_47 = arith.constant 1.000000e+00 : f32
      %144 = vector.broadcast %cst_47 : f32 to vector<8x128xf32>
      %145 = arith.addf %144, %143 : vector<8x128xf32>
      %146 = arith.divf %144, %145 : vector<8x128xf32>
      %147 = arith.mulf %138, %116 : vector<8x128xf32>
      %148 = arith.mulf %132, %140 : vector<8x128xf32>
      %149 = arith.addf %147, %148 : vector<8x128xf32>
      %150 = math.tanh %149 : vector<8x128xf32>
      %151 = arith.mulf %146, %150 : vector<8x128xf32>
      %152 = arith.index_cast %122 : i32 to index
      %c0_48 = arith.constant 0 : index
      %153 = vector.load %arg6[%152, %c0_48] : memref<64x128xf32, #tpu.memory_space<vmem>>, vector<8x128xf32>
      tpu.vector_store %arg6[%152, %c0_48], %151 {strides = array<i32>} : memref<64x128xf32, #tpu.memory_space<vmem>>, vector<8x128xf32>,
      %c4_i32 = arith.constant 4 : i32
      %c8_i32_49 = arith.constant 8 : i32
      %154 = arith.muli %c4_i32, %c8_i32_49 : i32
      %155 = tpu.assume_multiple %154, 8 : i32
      %156 = arith.index_cast %155 : i32 to index
      %c0_50 = arith.constant 0 : index
      %157 = vector.load %arg7[%156, %c0_50] : memref<64x512xf32, #tpu.memory_space<vmem>>, vector<8x512xf32>
      %cst_51 = arith.constant dense<0.000000e+00> : vector<8x512xf32>
      %158 = tpu.matmul %151, %13, %cst_51 {dimension_numbers = #tpu.dot_dimension_numbers<[1], [0], [0], [1], [0, 0, 1, 1], [], []>} : vector<8x128xf32>, vector<128x512xf32>, vector<8x512xf32> -> vector<8x512xf32>
      %159 = arith.addf %157, %158 : vector<8x512xf32>
      %160 = vector.extract_strided_slice %159 {offsets = [0, 0], sizes = [8, 128], strides = [1, 1]} : vector<8x512xf32> to vector<8x128xf32>
      %161 = arith.negf %160 : vector<8x128xf32>
      %162 = math.exp %161 : vector<8x128xf32>
      %cst_52 = arith.constant 1.000000e+00 : f32
      %163 = vector.broadcast %cst_52 : f32 to vector<8x128xf32>
      %164 = arith.addf %163, %162 : vector<8x128xf32>
      %165 = arith.divf %163, %164 : vector<8x128xf32>
      %166 = vector.extract_strided_slice %159 {offsets = [0, 128], sizes = [8, 128], strides = [1, 1]} : vector<8x512xf32> to vector<8x128xf32>
      %167 = arith.negf %166 : vector<8x128xf32>
      %168 = math.exp %167 : vector<8x128xf32>
      %cst_53 = arith.constant 1.000000e+00 : f32
      %169 = vector.broadcast %cst_53 : f32 to vector<8x128xf32>
      %170 = arith.addf %169, %168 : vector<8x128xf32>
      %171 = arith.divf %169, %170 : vector<8x128xf32>
      %172 = vector.extract_strided_slice %159 {offsets = [0, 256], sizes = [8, 128], strides = [1, 1]} : vector<8x512xf32> to vector<8x128xf32>
      %173 = math.tanh %172 : vector<8x128xf32>
      %174 = vector.extract_strided_slice %159 {offsets = [0, 384], sizes = [8, 128], strides = [1, 1]} : vector<8x512xf32> to vector<8x128xf32>
      %175 = arith.negf %174 : vector<8x128xf32>
      %176 = math.exp %175 : vector<8x128xf32>
      %cst_54 = arith.constant 1.000000e+00 : f32
      %177 = vector.broadcast %cst_54 : f32 to vector<8x128xf32>
      %178 = arith.addf %177, %176 : vector<8x128xf32>
      %179 = arith.divf %177, %178 : vector<8x128xf32>
      %180 = arith.mulf %171, %149 : vector<8x128xf32>
      %181 = arith.mulf %165, %173 : vector<8x128xf32>
      %182 = arith.addf %180, %181 : vector<8x128xf32>
      %183 = math.tanh %182 : vector<8x128xf32>
      %184 = arith.mulf %179, %183 : vector<8x128xf32>
      %185 = arith.index_cast %155 : i32 to index
      %c0_55 = arith.constant 0 : index
      %186 = vector.load %arg6[%185, %c0_55] : memref<64x128xf32, #tpu.memory_space<vmem>>, vector<8x128xf32>
      tpu.vector_store %arg6[%185, %c0_55], %184 {strides = array<i32>} : memref<64x128xf32, #tpu.memory_space<vmem>>, vector<8x128xf32>,
      %c5_i32 = arith.constant 5 : i32
      %c8_i32_56 = arith.constant 8 : i32
      %187 = arith.muli %c5_i32, %c8_i32_56 : i32
      %188 = tpu.assume_multiple %187, 8 : i32
      %189 = arith.index_cast %188 : i32 to index
      %c0_57 = arith.constant 0 : index
      %190 = vector.load %arg7[%189, %c0_57] : memref<64x512xf32, #tpu.memory_space<vmem>>, vector<8x512xf32>
      %cst_58 = arith.constant dense<0.000000e+00> : vector<8x512xf32>
      %191 = tpu.matmul %184, %13, %cst_58 {dimension_numbers = #tpu.dot_dimension_numbers<[1], [0], [0], [1], [0, 0, 1, 1], [], []>} : vector<8x128xf32>, vector<128x512xf32>, vector<8x512xf32> -> vector<8x512xf32>
      %192 = arith.addf %190, %191 : vector<8x512xf32>
      %193 = vector.extract_strided_slice %192 {offsets = [0, 0], sizes = [8, 128], strides = [1, 1]} : vector<8x512xf32> to vector<8x128xf32>
      %194 = arith.negf %193 : vector<8x128xf32>
      %195 = math.exp %194 : vector<8x128xf32>
      %cst_59 = arith.constant 1.000000e+00 : f32
      %196 = vector.broadcast %cst_59 : f32 to vector<8x128xf32>
      %197 = arith.addf %196, %195 : vector<8x128xf32>
      %198 = arith.divf %196, %197 : vector<8x128xf32>
      %199 = vector.extract_strided_slice %192 {offsets = [0, 128], sizes = [8, 128], strides = [1, 1]} : vector<8x512xf32> to vector<8x128xf32>
      %200 = arith.negf %199 : vector<8x128xf32>
      %201 = math.exp %200 : vector<8x128xf32>
      %cst_60 = arith.constant 1.000000e+00 : f32
      %202 = vector.broadcast %cst_60 : f32 to vector<8x128xf32>
      %203 = arith.addf %202, %201 : vector<8x128xf32>
      %204 = arith.divf %202, %203 : vector<8x128xf32>
      %205 = vector.extract_strided_slice %192 {offsets = [0, 256], sizes = [8, 128], strides = [1, 1]} : vector<8x512xf32> to vector<8x128xf32>
      %206 = math.tanh %205 : vector<8x128xf32>
      %207 = vector.extract_strided_slice %192 {offsets = [0, 384], sizes = [8, 128], strides = [1, 1]} : vector<8x512xf32> to vector<8x128xf32>
      %208 = arith.negf %207 : vector<8x128xf32>
      %209 = math.exp %208 : vector<8x128xf32>
      %cst_61 = arith.constant 1.000000e+00 : f32
      %210 = vector.broadcast %cst_61 : f32 to vector<8x128xf32>
      %211 = arith.addf %210, %209 : vector<8x128xf32>
      %212 = arith.divf %210, %211 : vector<8x128xf32>
      %213 = arith.mulf %204, %182 : vector<8x128xf32>
      %214 = arith.mulf %198, %206 : vector<8x128xf32>
      %215 = arith.addf %213, %214 : vector<8x128xf32>
      %216 = math.tanh %215 : vector<8x128xf32>
      %217 = arith.mulf %212, %216 : vector<8x128xf32>
      %218 = arith.index_cast %188 : i32 to index
      %c0_62 = arith.constant 0 : index
      %219 = vector.load %arg6[%218, %c0_62] : memref<64x128xf32, #tpu.memory_space<vmem>>, vector<8x128xf32>
      tpu.vector_store %arg6[%218, %c0_62], %217 {strides = array<i32>} : memref<64x128xf32, #tpu.memory_space<vmem>>, vector<8x128xf32>,
      %c6_i32 = arith.constant 6 : i32
      %c8_i32_63 = arith.constant 8 : i32
      %220 = arith.muli %c6_i32, %c8_i32_63 : i32
      %221 = tpu.assume_multiple %220, 8 : i32
      %222 = arith.index_cast %221 : i32 to index
      %c0_64 = arith.constant 0 : index
      %223 = vector.load %arg7[%222, %c0_64] : memref<64x512xf32, #tpu.memory_space<vmem>>, vector<8x512xf32>
      %cst_65 = arith.constant dense<0.000000e+00> : vector<8x512xf32>
      %224 = tpu.matmul %217, %13, %cst_65 {dimension_numbers = #tpu.dot_dimension_numbers<[1], [0], [0], [1], [0, 0, 1, 1], [], []>} : vector<8x128xf32>, vector<128x512xf32>, vector<8x512xf32> -> vector<8x512xf32>
      %225 = arith.addf %223, %224 : vector<8x512xf32>
      %226 = vector.extract_strided_slice %225 {offsets = [0, 0], sizes = [8, 128], strides = [1, 1]} : vector<8x512xf32> to vector<8x128xf32>
      %227 = arith.negf %226 : vector<8x128xf32>
      %228 = math.exp %227 : vector<8x128xf32>
      %cst_66 = arith.constant 1.000000e+00 : f32
      %229 = vector.broadcast %cst_66 : f32 to vector<8x128xf32>
      %230 = arith.addf %229, %228 : vector<8x128xf32>
      %231 = arith.divf %229, %230 : vector<8x128xf32>
      %232 = vector.extract_strided_slice %225 {offsets = [0, 128], sizes = [8, 128], strides = [1, 1]} : vector<8x512xf32> to vector<8x128xf32>
      %233 = arith.negf %232 : vector<8x128xf32>
      %234 = math.exp %233 : vector<8x128xf32>
      %cst_67 = arith.constant 1.000000e+00 : f32
      %235 = vector.broadcast %cst_67 : f32 to vector<8x128xf32>
      %236 = arith.addf %235, %234 : vector<8x128xf32>
      %237 = arith.divf %235, %236 : vector<8x128xf32>
      %238 = vector.extract_strided_slice %225 {offsets = [0, 256], sizes = [8, 128], strides = [1, 1]} : vector<8x512xf32> to vector<8x128xf32>
      %239 = math.tanh %238 : vector<8x128xf32>
      %240 = vector.extract_strided_slice %225 {offsets = [0, 384], sizes = [8, 128], strides = [1, 1]} : vector<8x512xf32> to vector<8x128xf32>
      %241 = arith.negf %240 : vector<8x128xf32>
      %242 = math.exp %241 : vector<8x128xf32>
      %cst_68 = arith.constant 1.000000e+00 : f32
      %243 = vector.broadcast %cst_68 : f32 to vector<8x128xf32>
      %244 = arith.addf %243, %242 : vector<8x128xf32>
      %245 = arith.divf %243, %244 : vector<8x128xf32>
      %246 = arith.mulf %237, %215 : vector<8x128xf32>
      %247 = arith.mulf %231, %239 : vector<8x128xf32>
      %248 = arith.addf %246, %247 : vector<8x128xf32>
      %249 = math.tanh %248 : vector<8x128xf32>
      %250 = arith.mulf %245, %249 : vector<8x128xf32>
      %251 = arith.index_cast %221 : i32 to index
      %c0_69 = arith.constant 0 : index
      %252 = vector.load %arg6[%251, %c0_69] : memref<64x128xf32, #tpu.memory_space<vmem>>, vector<8x128xf32>
      tpu.vector_store %arg6[%251, %c0_69], %250 {strides = array<i32>} : memref<64x128xf32, #tpu.memory_space<vmem>>, vector<8x128xf32>,
      %c7_i32 = arith.constant 7 : i32
      %c8_i32_70 = arith.constant 8 : i32
      %253 = arith.muli %c7_i32, %c8_i32_70 : i32
      %254 = tpu.assume_multiple %253, 8 : i32
      %255 = arith.index_cast %254 : i32 to index
      %c0_71 = arith.constant 0 : index
      %256 = vector.load %arg7[%255, %c0_71] : memref<64x512xf32, #tpu.memory_space<vmem>>, vector<8x512xf32>
      %cst_72 = arith.constant dense<0.000000e+00> : vector<8x512xf32>
      %257 = tpu.matmul %250, %13, %cst_72 {dimension_numbers = #tpu.dot_dimension_numbers<[1], [0], [0], [1], [0, 0, 1, 1], [], []>} : vector<8x128xf32>, vector<128x512xf32>, vector<8x512xf32> -> vector<8x512xf32>
      %258 = arith.addf %256, %257 : vector<8x512xf32>
      %259 = vector.extract_strided_slice %258 {offsets = [0, 0], sizes = [8, 128], strides = [1, 1]} : vector<8x512xf32> to vector<8x128xf32>
      %260 = arith.negf %259 : vector<8x128xf32>
      %261 = math.exp %260 : vector<8x128xf32>
      %cst_73 = arith.constant 1.000000e+00 : f32
      %262 = vector.broadcast %cst_73 : f32 to vector<8x128xf32>
      %263 = arith.addf %262, %261 : vector<8x128xf32>
      %264 = arith.divf %262, %263 : vector<8x128xf32>
      %265 = vector.extract_strided_slice %258 {offsets = [0, 128], sizes = [8, 128], strides = [1, 1]} : vector<8x512xf32> to vector<8x128xf32>
      %266 = arith.negf %265 : vector<8x128xf32>
      %267 = math.exp %266 : vector<8x128xf32>
      %cst_74 = arith.constant 1.000000e+00 : f32
      %268 = vector.broadcast %cst_74 : f32 to vector<8x128xf32>
      %269 = arith.addf %268, %267 : vector<8x128xf32>
      %270 = arith.divf %268, %269 : vector<8x128xf32>
      %271 = vector.extract_strided_slice %258 {offsets = [0, 256], sizes = [8, 128], strides = [1, 1]} : vector<8x512xf32> to vector<8x128xf32>
      %272 = math.tanh %271 : vector<8x128xf32>
      %273 = vector.extract_strided_slice %258 {offsets = [0, 384], sizes = [8, 128], strides = [1, 1]} : vector<8x512xf32> to vector<8x128xf32>
      %274 = arith.negf %273 : vector<8x128xf32>
      %275 = math.exp %274 : vector<8x128xf32>
      %cst_75 = arith.constant 1.000000e+00 : f32
      %276 = vector.broadcast %cst_75 : f32 to vector<8x128xf32>
      %277 = arith.addf %276, %275 : vector<8x128xf32>
      %278 = arith.divf %276, %277 : vector<8x128xf32>
      %279 = arith.mulf %270, %248 : vector<8x128xf32>
      %280 = arith.mulf %264, %272 : vector<8x128xf32>
      %281 = arith.addf %279, %280 : vector<8x128xf32>
      %282 = math.tanh %281 : vector<8x128xf32>
      %283 = arith.mulf %278, %282 : vector<8x128xf32>
      %284 = arith.index_cast %254 : i32 to index
      %c0_76 = arith.constant 0 : index
      %285 = vector.load %arg6[%284, %c0_76] : memref<64x128xf32, #tpu.memory_space<vmem>>, vector<8x128xf32>
      tpu.vector_store %arg6[%284, %c0_76], %283 {strides = array<i32>} : memref<64x128xf32, #tpu.memory_space<vmem>>, vector<8x128xf32>,
      %c8_i32_77 = arith.constant 8 : i32
      %c0_78 = arith.constant 0 : index
      %c0_79 = arith.constant 0 : index
      %286 = vector.load %arg8[%c0_78, %c0_79] : memref<8x128xf32, #tpu.memory_space<vmem>>, vector<8x128xf32>
      tpu.vector_store %arg8[%c0_78, %c0_79], %283 {strides = array<i32>} : memref<8x128xf32, #tpu.memory_space<vmem>>, vector<8x128xf32>,
      %c0_80 = arith.constant 0 : index
      %c0_81 = arith.constant 0 : index
      %287 = vector.load %arg9[%c0_80, %c0_81] : memref<8x128xf32, #tpu.memory_space<vmem>>, vector<8x128xf32>
      tpu.vector_store %arg9[%c0_80, %c0_81], %281 {strides = array<i32>} : memref<8x128xf32, #tpu.memory_space<vmem>>, vector<8x128xf32>,
    } else {
    }
    %c1_i32 = arith.constant 1 : i32
    %17 = arith.cmpi eq, %arg0, %c1_i32 : i32
    %18 = arith.extui %17 : i1 to i32
    %c0_i32_15 = arith.constant 0 : i32
    %19 = arith.cmpi ne, %18, %c0_i32_15 : i32
    scf.if %19 {
      %c0_16 = arith.constant 0 : index
      %c0_17 = arith.constant 0 : index
      %20 = vector.load %arg8[%c0_16, %c0_17] : memref<8x128xf32, #tpu.memory_space<vmem>>, vector<8x128xf32>
      %c0_18 = arith.constant 0 : index
      %c0_19 = arith.constant 0 : index
      %21 = vector.load %arg9[%c0_18, %c0_19] : memref<8x128xf32, #tpu.memory_space<vmem>>, vector<8x128xf32>
      %c0_i32_20 = arith.constant 0 : i32
      %c7_i32 = arith.constant 7 : i32
      %22 = arith.subi %c7_i32, %c0_i32_20 : i32
      %c8_i32 = arith.constant 8 : i32
      %23 = arith.muli %22, %c8_i32 : i32
      %24 = tpu.assume_multiple %23, 8 : i32
      %25 = arith.index_cast %24 : i32 to index
      %c0_21 = arith.constant 0 : index
      %26 = vector.load %arg7[%25, %c0_21] : memref<64x512xf32, #tpu.memory_space<vmem>>, vector<8x512xf32>
      %cst_22 = arith.constant dense<0.000000e+00> : vector<8x512xf32>
      %27 = tpu.matmul %20, %13, %cst_22 {dimension_numbers = #tpu.dot_dimension_numbers<[1], [0], [0], [1], [0, 0, 1, 1], [], []>} : vector<8x128xf32>, vector<128x512xf32>, vector<8x512xf32> -> vector<8x512xf32>
      %28 = arith.addf %26, %27 : vector<8x512xf32>
      %29 = vector.extract_strided_slice %28 {offsets = [0, 0], sizes = [8, 128], strides = [1, 1]} : vector<8x512xf32> to vector<8x128xf32>
      %30 = arith.negf %29 : vector<8x128xf32>
      %31 = math.exp %30 : vector<8x128xf32>
      %cst_23 = arith.constant 1.000000e+00 : f32
      %32 = vector.broadcast %cst_23 : f32 to vector<8x128xf32>
      %33 = arith.addf %32, %31 : vector<8x128xf32>
      %34 = arith.divf %32, %33 : vector<8x128xf32>
      %35 = vector.extract_strided_slice %28 {offsets = [0, 128], sizes = [8, 128], strides = [1, 1]} : vector<8x512xf32> to vector<8x128xf32>
      %36 = arith.negf %35 : vector<8x128xf32>
      %37 = math.exp %36 : vector<8x128xf32>
      %cst_24 = arith.constant 1.000000e+00 : f32
      %38 = vector.broadcast %cst_24 : f32 to vector<8x128xf32>
      %39 = arith.addf %38, %37 : vector<8x128xf32>
      %40 = arith.divf %38, %39 : vector<8x128xf32>
      %41 = vector.extract_strided_slice %28 {offsets = [0, 256], sizes = [8, 128], strides = [1, 1]} : vector<8x512xf32> to vector<8x128xf32>
      %42 = math.tanh %41 : vector<8x128xf32>
      %43 = vector.extract_strided_slice %28 {offsets = [0, 384], sizes = [8, 128], strides = [1, 1]} : vector<8x512xf32> to vector<8x128xf32>
      %44 = arith.negf %43 : vector<8x128xf32>
      %45 = math.exp %44 : vector<8x128xf32>
      %cst_25 = arith.constant 1.000000e+00 : f32
      %46 = vector.broadcast %cst_25 : f32 to vector<8x128xf32>
      %47 = arith.addf %46, %45 : vector<8x128xf32>
      %48 = arith.divf %46, %47 : vector<8x128xf32>
      %49 = arith.mulf %40, %21 : vector<8x128xf32>
      %50 = arith.mulf %34, %42 : vector<8x128xf32>
      %51 = arith.addf %49, %50 : vector<8x128xf32>
      %52 = math.tanh %51 : vector<8x128xf32>
      %53 = arith.mulf %48, %52 : vector<8x128xf32>
      %54 = arith.index_cast %24 : i32 to index
      %c0_26 = arith.constant 0 : index
      %55 = vector.load %arg6[%54, %c0_26] : memref<64x128xf32, #tpu.memory_space<vmem>>, vector<8x128xf32>
      tpu.vector_store %arg6[%54, %c0_26], %53 {strides = array<i32>} : memref<64x128xf32, #tpu.memory_space<vmem>>, vector<8x128xf32>,
      %c1_i32_27 = arith.constant 1 : i32
      %c7_i32_28 = arith.constant 7 : i32
      %56 = arith.subi %c7_i32_28, %c1_i32_27 : i32
      %c8_i32_29 = arith.constant 8 : i32
      %57 = arith.muli %56, %c8_i32_29 : i32
      %58 = tpu.assume_multiple %57, 8 : i32
      %59 = arith.index_cast %58 : i32 to index
      %c0_30 = arith.constant 0 : index
      %60 = vector.load %arg7[%59, %c0_30] : memref<64x512xf32, #tpu.memory_space<vmem>>, vector<8x512xf32>
      %cst_31 = arith.constant dense<0.000000e+00> : vector<8x512xf32>
      %61 = tpu.matmul %53, %13, %cst_31 {dimension_numbers = #tpu.dot_dimension_numbers<[1], [0], [0], [1], [0, 0, 1, 1], [], []>} : vector<8x128xf32>, vector<128x512xf32>, vector<8x512xf32> -> vector<8x512xf32>
      %62 = arith.addf %60, %61 : vector<8x512xf32>
      %63 = vector.extract_strided_slice %62 {offsets = [0, 0], sizes = [8, 128], strides = [1, 1]} : vector<8x512xf32> to vector<8x128xf32>
      %64 = arith.negf %63 : vector<8x128xf32>
      %65 = math.exp %64 : vector<8x128xf32>
      %cst_32 = arith.constant 1.000000e+00 : f32
      %66 = vector.broadcast %cst_32 : f32 to vector<8x128xf32>
      %67 = arith.addf %66, %65 : vector<8x128xf32>
      %68 = arith.divf %66, %67 : vector<8x128xf32>
      %69 = vector.extract_strided_slice %62 {offsets = [0, 128], sizes = [8, 128], strides = [1, 1]} : vector<8x512xf32> to vector<8x128xf32>
      %70 = arith.negf %69 : vector<8x128xf32>
      %71 = math.exp %70 : vector<8x128xf32>
      %cst_33 = arith.constant 1.000000e+00 : f32
      %72 = vector.broadcast %cst_33 : f32 to vector<8x128xf32>
      %73 = arith.addf %72, %71 : vector<8x128xf32>
      %74 = arith.divf %72, %73 : vector<8x128xf32>
      %75 = vector.extract_strided_slice %62 {offsets = [0, 256], sizes = [8, 128], strides = [1, 1]} : vector<8x512xf32> to vector<8x128xf32>
      %76 = math.tanh %75 : vector<8x128xf32>
      %77 = vector.extract_strided_slice %62 {offsets = [0, 384], sizes = [8, 128], strides = [1, 1]} : vector<8x512xf32> to vector<8x128xf32>
      %78 = arith.negf %77 : vector<8x128xf32>
      %79 = math.exp %78 : vector<8x128xf32>
      %cst_34 = arith.constant 1.000000e+00 : f32
      %80 = vector.broadcast %cst_34 : f32 to vector<8x128xf32>
      %81 = arith.addf %80, %79 : vector<8x128xf32>
      %82 = arith.divf %80, %81 : vector<8x128xf32>
      %83 = arith.mulf %74, %51 : vector<8x128xf32>
      %84 = arith.mulf %68, %76 : vector<8x128xf32>
      %85 = arith.addf %83, %84 : vector<8x128xf32>
      %86 = math.tanh %85 : vector<8x128xf32>
      %87 = arith.mulf %82, %86 : vector<8x128xf32>
      %88 = arith.index_cast %58 : i32 to index
      %c0_35 = arith.constant 0 : index
      %89 = vector.load %arg6[%88, %c0_35] : memref<64x128xf32, #tpu.memory_space<vmem>>, vector<8x128xf32>
      tpu.vector_store %arg6[%88, %c0_35], %87 {strides = array<i32>} : memref<64x128xf32, #tpu.memory_space<vmem>>, vector<8x128xf32>,
      %c2_i32 = arith.constant 2 : i32
      %c7_i32_36 = arith.constant 7 : i32
      %90 = arith.subi %c7_i32_36, %c2_i32 : i32
      %c8_i32_37 = arith.constant 8 : i32
      %91 = arith.muli %90, %c8_i32_37 : i32
      %92 = tpu.assume_multiple %91, 8 : i32
      %93 = arith.index_cast %92 : i32 to index
      %c0_38 = arith.constant 0 : index
      %94 = vector.load %arg7[%93, %c0_38] : memref<64x512xf32, #tpu.memory_space<vmem>>, vector<8x512xf32>
      %cst_39 = arith.constant dense<0.000000e+00> : vector<8x512xf32>
      %95 = tpu.matmul %87, %13, %cst_39 {dimension_numbers = #tpu.dot_dimension_numbers<[1], [0], [0], [1], [0, 0, 1, 1], [], []>} : vector<8x128xf32>, vector<128x512xf32>, vector<8x512xf32> -> vector<8x512xf32>
      %96 = arith.addf %94, %95 : vector<8x512xf32>
      %97 = vector.extract_strided_slice %96 {offsets = [0, 0], sizes = [8, 128], strides = [1, 1]} : vector<8x512xf32> to vector<8x128xf32>
      %98 = arith.negf %97 : vector<8x128xf32>
      %99 = math.exp %98 : vector<8x128xf32>
      %cst_40 = arith.constant 1.000000e+00 : f32
      %100 = vector.broadcast %cst_40 : f32 to vector<8x128xf32>
      %101 = arith.addf %100, %99 : vector<8x128xf32>
      %102 = arith.divf %100, %101 : vector<8x128xf32>
      %103 = vector.extract_strided_slice %96 {offsets = [0, 128], sizes = [8, 128], strides = [1, 1]} : vector<8x512xf32> to vector<8x128xf32>
      %104 = arith.negf %103 : vector<8x128xf32>
      %105 = math.exp %104 : vector<8x128xf32>
      %cst_41 = arith.constant 1.000000e+00 : f32
      %106 = vector.broadcast %cst_41 : f32 to vector<8x128xf32>
      %107 = arith.addf %106, %105 : vector<8x128xf32>
      %108 = arith.divf %106, %107 : vector<8x128xf32>
      %109 = vector.extract_strided_slice %96 {offsets = [0, 256], sizes = [8, 128], strides = [1, 1]} : vector<8x512xf32> to vector<8x128xf32>
      %110 = math.tanh %109 : vector<8x128xf32>
      %111 = vector.extract_strided_slice %96 {offsets = [0, 384], sizes = [8, 128], strides = [1, 1]} : vector<8x512xf32> to vector<8x128xf32>
      %112 = arith.negf %111 : vector<8x128xf32>
      %113 = math.exp %112 : vector<8x128xf32>
      %cst_42 = arith.constant 1.000000e+00 : f32
      %114 = vector.broadcast %cst_42 : f32 to vector<8x128xf32>
      %115 = arith.addf %114, %113 : vector<8x128xf32>
      %116 = arith.divf %114, %115 : vector<8x128xf32>
      %117 = arith.mulf %108, %85 : vector<8x128xf32>
      %118 = arith.mulf %102, %110 : vector<8x128xf32>
      %119 = arith.addf %117, %118 : vector<8x128xf32>
      %120 = math.tanh %119 : vector<8x128xf32>
      %121 = arith.mulf %116, %120 : vector<8x128xf32>
      %122 = arith.index_cast %92 : i32 to index
      %c0_43 = arith.constant 0 : index
      %123 = vector.load %arg6[%122, %c0_43] : memref<64x128xf32, #tpu.memory_space<vmem>>, vector<8x128xf32>
      tpu.vector_store %arg6[%122, %c0_43], %121 {strides = array<i32>} : memref<64x128xf32, #tpu.memory_space<vmem>>, vector<8x128xf32>,
      %c3_i32 = arith.constant 3 : i32
      %c7_i32_44 = arith.constant 7 : i32
      %124 = arith.subi %c7_i32_44, %c3_i32 : i32
      %c8_i32_45 = arith.constant 8 : i32
      %125 = arith.muli %124, %c8_i32_45 : i32
      %126 = tpu.assume_multiple %125, 8 : i32
      %127 = arith.index_cast %126 : i32 to index
      %c0_46 = arith.constant 0 : index
      %128 = vector.load %arg7[%127, %c0_46] : memref<64x512xf32, #tpu.memory_space<vmem>>, vector<8x512xf32>
      %cst_47 = arith.constant dense<0.000000e+00> : vector<8x512xf32>
      %129 = tpu.matmul %121, %13, %cst_47 {dimension_numbers = #tpu.dot_dimension_numbers<[1], [0], [0], [1], [0, 0, 1, 1], [], []>} : vector<8x128xf32>, vector<128x512xf32>, vector<8x512xf32> -> vector<8x512xf32>
      %130 = arith.addf %128, %129 : vector<8x512xf32>
      %131 = vector.extract_strided_slice %130 {offsets = [0, 0], sizes = [8, 128], strides = [1, 1]} : vector<8x512xf32> to vector<8x128xf32>
      %132 = arith.negf %131 : vector<8x128xf32>
      %133 = math.exp %132 : vector<8x128xf32>
      %cst_48 = arith.constant 1.000000e+00 : f32
      %134 = vector.broadcast %cst_48 : f32 to vector<8x128xf32>
      %135 = arith.addf %134, %133 : vector<8x128xf32>
      %136 = arith.divf %134, %135 : vector<8x128xf32>
      %137 = vector.extract_strided_slice %130 {offsets = [0, 128], sizes = [8, 128], strides = [1, 1]} : vector<8x512xf32> to vector<8x128xf32>
      %138 = arith.negf %137 : vector<8x128xf32>
      %139 = math.exp %138 : vector<8x128xf32>
      %cst_49 = arith.constant 1.000000e+00 : f32
      %140 = vector.broadcast %cst_49 : f32 to vector<8x128xf32>
      %141 = arith.addf %140, %139 : vector<8x128xf32>
      %142 = arith.divf %140, %141 : vector<8x128xf32>
      %143 = vector.extract_strided_slice %130 {offsets = [0, 256], sizes = [8, 128], strides = [1, 1]} : vector<8x512xf32> to vector<8x128xf32>
      %144 = math.tanh %143 : vector<8x128xf32>
      %145 = vector.extract_strided_slice %130 {offsets = [0, 384], sizes = [8, 128], strides = [1, 1]} : vector<8x512xf32> to vector<8x128xf32>
      %146 = arith.negf %145 : vector<8x128xf32>
      %147 = math.exp %146 : vector<8x128xf32>
      %cst_50 = arith.constant 1.000000e+00 : f32
      %148 = vector.broadcast %cst_50 : f32 to vector<8x128xf32>
      %149 = arith.addf %148, %147 : vector<8x128xf32>
      %150 = arith.divf %148, %149 : vector<8x128xf32>
      %151 = arith.mulf %142, %119 : vector<8x128xf32>
      %152 = arith.mulf %136, %144 : vector<8x128xf32>
      %153 = arith.addf %151, %152 : vector<8x128xf32>
      %154 = math.tanh %153 : vector<8x128xf32>
      %155 = arith.mulf %150, %154 : vector<8x128xf32>
      %156 = arith.index_cast %126 : i32 to index
      %c0_51 = arith.constant 0 : index
      %157 = vector.load %arg6[%156, %c0_51] : memref<64x128xf32, #tpu.memory_space<vmem>>, vector<8x128xf32>
      tpu.vector_store %arg6[%156, %c0_51], %155 {strides = array<i32>} : memref<64x128xf32, #tpu.memory_space<vmem>>, vector<8x128xf32>,
      %c4_i32 = arith.constant 4 : i32
      %c7_i32_52 = arith.constant 7 : i32
      %158 = arith.subi %c7_i32_52, %c4_i32 : i32
      %c8_i32_53 = arith.constant 8 : i32
      %159 = arith.muli %158, %c8_i32_53 : i32
      %160 = tpu.assume_multiple %159, 8 : i32
      %161 = arith.index_cast %160 : i32 to index
      %c0_54 = arith.constant 0 : index
      %162 = vector.load %arg7[%161, %c0_54] : memref<64x512xf32, #tpu.memory_space<vmem>>, vector<8x512xf32>
      %cst_55 = arith.constant dense<0.000000e+00> : vector<8x512xf32>
      %163 = tpu.matmul %155, %13, %cst_55 {dimension_numbers = #tpu.dot_dimension_numbers<[1], [0], [0], [1], [0, 0, 1, 1], [], []>} : vector<8x128xf32>, vector<128x512xf32>, vector<8x512xf32> -> vector<8x512xf32>
      %164 = arith.addf %162, %163 : vector<8x512xf32>
      %165 = vector.extract_strided_slice %164 {offsets = [0, 0], sizes = [8, 128], strides = [1, 1]} : vector<8x512xf32> to vector<8x128xf32>
      %166 = arith.negf %165 : vector<8x128xf32>
      %167 = math.exp %166 : vector<8x128xf32>
      %cst_56 = arith.constant 1.000000e+00 : f32
      %168 = vector.broadcast %cst_56 : f32 to vector<8x128xf32>
      %169 = arith.addf %168, %167 : vector<8x128xf32>
      %170 = arith.divf %168, %169 : vector<8x128xf32>
      %171 = vector.extract_strided_slice %164 {offsets = [0, 128], sizes = [8, 128], strides = [1, 1]} : vector<8x512xf32> to vector<8x128xf32>
      %172 = arith.negf %171 : vector<8x128xf32>
      %173 = math.exp %172 : vector<8x128xf32>
      %cst_57 = arith.constant 1.000000e+00 : f32
      %174 = vector.broadcast %cst_57 : f32 to vector<8x128xf32>
      %175 = arith.addf %174, %173 : vector<8x128xf32>
      %176 = arith.divf %174, %175 : vector<8x128xf32>
      %177 = vector.extract_strided_slice %164 {offsets = [0, 256], sizes = [8, 128], strides = [1, 1]} : vector<8x512xf32> to vector<8x128xf32>
      %178 = math.tanh %177 : vector<8x128xf32>
      %179 = vector.extract_strided_slice %164 {offsets = [0, 384], sizes = [8, 128], strides = [1, 1]} : vector<8x512xf32> to vector<8x128xf32>
      %180 = arith.negf %179 : vector<8x128xf32>
      %181 = math.exp %180 : vector<8x128xf32>
      %cst_58 = arith.constant 1.000000e+00 : f32
      %182 = vector.broadcast %cst_58 : f32 to vector<8x128xf32>
      %183 = arith.addf %182, %181 : vector<8x128xf32>
      %184 = arith.divf %182, %183 : vector<8x128xf32>
      %185 = arith.mulf %176, %153 : vector<8x128xf32>
      %186 = arith.mulf %170, %178 : vector<8x128xf32>
      %187 = arith.addf %185, %186 : vector<8x128xf32>
      %188 = math.tanh %187 : vector<8x128xf32>
      %189 = arith.mulf %184, %188 : vector<8x128xf32>
      %190 = arith.index_cast %160 : i32 to index
      %c0_59 = arith.constant 0 : index
      %191 = vector.load %arg6[%190, %c0_59] : memref<64x128xf32, #tpu.memory_space<vmem>>, vector<8x128xf32>
      tpu.vector_store %arg6[%190, %c0_59], %189 {strides = array<i32>} : memref<64x128xf32, #tpu.memory_space<vmem>>, vector<8x128xf32>,
      %c5_i32 = arith.constant 5 : i32
      %c7_i32_60 = arith.constant 7 : i32
      %192 = arith.subi %c7_i32_60, %c5_i32 : i32
      %c8_i32_61 = arith.constant 8 : i32
      %193 = arith.muli %192, %c8_i32_61 : i32
      %194 = tpu.assume_multiple %193, 8 : i32
      %195 = arith.index_cast %194 : i32 to index
      %c0_62 = arith.constant 0 : index
      %196 = vector.load %arg7[%195, %c0_62] : memref<64x512xf32, #tpu.memory_space<vmem>>, vector<8x512xf32>
      %cst_63 = arith.constant dense<0.000000e+00> : vector<8x512xf32>
      %197 = tpu.matmul %189, %13, %cst_63 {dimension_numbers = #tpu.dot_dimension_numbers<[1], [0], [0], [1], [0, 0, 1, 1], [], []>} : vector<8x128xf32>, vector<128x512xf32>, vector<8x512xf32> -> vector<8x512xf32>
      %198 = arith.addf %196, %197 : vector<8x512xf32>
      %199 = vector.extract_strided_slice %198 {offsets = [0, 0], sizes = [8, 128], strides = [1, 1]} : vector<8x512xf32> to vector<8x128xf32>
      %200 = arith.negf %199 : vector<8x128xf32>
      %201 = math.exp %200 : vector<8x128xf32>
      %cst_64 = arith.constant 1.000000e+00 : f32
      %202 = vector.broadcast %cst_64 : f32 to vector<8x128xf32>
      %203 = arith.addf %202, %201 : vector<8x128xf32>
      %204 = arith.divf %202, %203 : vector<8x128xf32>
      %205 = vector.extract_strided_slice %198 {offsets = [0, 128], sizes = [8, 128], strides = [1, 1]} : vector<8x512xf32> to vector<8x128xf32>
      %206 = arith.negf %205 : vector<8x128xf32>
      %207 = math.exp %206 : vector<8x128xf32>
      %cst_65 = arith.constant 1.000000e+00 : f32
      %208 = vector.broadcast %cst_65 : f32 to vector<8x128xf32>
      %209 = arith.addf %208, %207 : vector<8x128xf32>
      %210 = arith.divf %208, %209 : vector<8x128xf32>
      %211 = vector.extract_strided_slice %198 {offsets = [0, 256], sizes = [8, 128], strides = [1, 1]} : vector<8x512xf32> to vector<8x128xf32>
      %212 = math.tanh %211 : vector<8x128xf32>
      %213 = vector.extract_strided_slice %198 {offsets = [0, 384], sizes = [8, 128], strides = [1, 1]} : vector<8x512xf32> to vector<8x128xf32>
      %214 = arith.negf %213 : vector<8x128xf32>
      %215 = math.exp %214 : vector<8x128xf32>
      %cst_66 = arith.constant 1.000000e+00 : f32
      %216 = vector.broadcast %cst_66 : f32 to vector<8x128xf32>
      %217 = arith.addf %216, %215 : vector<8x128xf32>
      %218 = arith.divf %216, %217 : vector<8x128xf32>
      %219 = arith.mulf %210, %187 : vector<8x128xf32>
      %220 = arith.mulf %204, %212 : vector<8x128xf32>
      %221 = arith.addf %219, %220 : vector<8x128xf32>
      %222 = math.tanh %221 : vector<8x128xf32>
      %223 = arith.mulf %218, %222 : vector<8x128xf32>
      %224 = arith.index_cast %194 : i32 to index
      %c0_67 = arith.constant 0 : index
      %225 = vector.load %arg6[%224, %c0_67] : memref<64x128xf32, #tpu.memory_space<vmem>>, vector<8x128xf32>
      tpu.vector_store %arg6[%224, %c0_67], %223 {strides = array<i32>} : memref<64x128xf32, #tpu.memory_space<vmem>>, vector<8x128xf32>,
      %c6_i32 = arith.constant 6 : i32
      %c7_i32_68 = arith.constant 7 : i32
      %226 = arith.subi %c7_i32_68, %c6_i32 : i32
      %c8_i32_69 = arith.constant 8 : i32
      %227 = arith.muli %226, %c8_i32_69 : i32
      %228 = tpu.assume_multiple %227, 8 : i32
      %229 = arith.index_cast %228 : i32 to index
      %c0_70 = arith.constant 0 : index
      %230 = vector.load %arg7[%229, %c0_70] : memref<64x512xf32, #tpu.memory_space<vmem>>, vector<8x512xf32>
      %cst_71 = arith.constant dense<0.000000e+00> : vector<8x512xf32>
      %231 = tpu.matmul %223, %13, %cst_71 {dimension_numbers = #tpu.dot_dimension_numbers<[1], [0], [0], [1], [0, 0, 1, 1], [], []>} : vector<8x128xf32>, vector<128x512xf32>, vector<8x512xf32> -> vector<8x512xf32>
      %232 = arith.addf %230, %231 : vector<8x512xf32>
      %233 = vector.extract_strided_slice %232 {offsets = [0, 0], sizes = [8, 128], strides = [1, 1]} : vector<8x512xf32> to vector<8x128xf32>
      %234 = arith.negf %233 : vector<8x128xf32>
      %235 = math.exp %234 : vector<8x128xf32>
      %cst_72 = arith.constant 1.000000e+00 : f32
      %236 = vector.broadcast %cst_72 : f32 to vector<8x128xf32>
      %237 = arith.addf %236, %235 : vector<8x128xf32>
      %238 = arith.divf %236, %237 : vector<8x128xf32>
      %239 = vector.extract_strided_slice %232 {offsets = [0, 128], sizes = [8, 128], strides = [1, 1]} : vector<8x512xf32> to vector<8x128xf32>
      %240 = arith.negf %239 : vector<8x128xf32>
      %241 = math.exp %240 : vector<8x128xf32>
      %cst_73 = arith.constant 1.000000e+00 : f32
      %242 = vector.broadcast %cst_73 : f32 to vector<8x128xf32>
      %243 = arith.addf %242, %241 : vector<8x128xf32>
      %244 = arith.divf %242, %243 : vector<8x128xf32>
      %245 = vector.extract_strided_slice %232 {offsets = [0, 256], sizes = [8, 128], strides = [1, 1]} : vector<8x512xf32> to vector<8x128xf32>
      %246 = math.tanh %245 : vector<8x128xf32>
      %247 = vector.extract_strided_slice %232 {offsets = [0, 384], sizes = [8, 128], strides = [1, 1]} : vector<8x512xf32> to vector<8x128xf32>
      %248 = arith.negf %247 : vector<8x128xf32>
      %249 = math.exp %248 : vector<8x128xf32>
      %cst_74 = arith.constant 1.000000e+00 : f32
      %250 = vector.broadcast %cst_74 : f32 to vector<8x128xf32>
      %251 = arith.addf %250, %249 : vector<8x128xf32>
      %252 = arith.divf %250, %251 : vector<8x128xf32>
      %253 = arith.mulf %244, %221 : vector<8x128xf32>
      %254 = arith.mulf %238, %246 : vector<8x128xf32>
      %255 = arith.addf %253, %254 : vector<8x128xf32>
      %256 = math.tanh %255 : vector<8x128xf32>
      %257 = arith.mulf %252, %256 : vector<8x128xf32>
      %258 = arith.index_cast %228 : i32 to index
      %c0_75 = arith.constant 0 : index
      %259 = vector.load %arg6[%258, %c0_75] : memref<64x128xf32, #tpu.memory_space<vmem>>, vector<8x128xf32>
      tpu.vector_store %arg6[%258, %c0_75], %257 {strides = array<i32>} : memref<64x128xf32, #tpu.memory_space<vmem>>, vector<8x128xf32>,
      %c7_i32_76 = arith.constant 7 : i32
      %c7_i32_77 = arith.constant 7 : i32
      %260 = arith.subi %c7_i32_77, %c7_i32_76 : i32
      %c8_i32_78 = arith.constant 8 : i32
      %261 = arith.muli %260, %c8_i32_78 : i32
      %262 = tpu.assume_multiple %261, 8 : i32
      %263 = arith.index_cast %262 : i32 to index
      %c0_79 = arith.constant 0 : index
      %264 = vector.load %arg7[%263, %c0_79] : memref<64x512xf32, #tpu.memory_space<vmem>>, vector<8x512xf32>
      %cst_80 = arith.constant dense<0.000000e+00> : vector<8x512xf32>
      %265 = tpu.matmul %257, %13, %cst_80 {dimension_numbers = #tpu.dot_dimension_numbers<[1], [0], [0], [1], [0, 0, 1, 1], [], []>} : vector<8x128xf32>, vector<128x512xf32>, vector<8x512xf32> -> vector<8x512xf32>
      %266 = arith.addf %264, %265 : vector<8x512xf32>
      %267 = vector.extract_strided_slice %266 {offsets = [0, 0], sizes = [8, 128], strides = [1, 1]} : vector<8x512xf32> to vector<8x128xf32>
      %268 = arith.negf %267 : vector<8x128xf32>
      %269 = math.exp %268 : vector<8x128xf32>
      %cst_81 = arith.constant 1.000000e+00 : f32
      %270 = vector.broadcast %cst_81 : f32 to vector<8x128xf32>
      %271 = arith.addf %270, %269 : vector<8x128xf32>
      %272 = arith.divf %270, %271 : vector<8x128xf32>
      %273 = vector.extract_strided_slice %266 {offsets = [0, 128], sizes = [8, 128], strides = [1, 1]} : vector<8x512xf32> to vector<8x128xf32>
      %274 = arith.negf %273 : vector<8x128xf32>
      %275 = math.exp %274 : vector<8x128xf32>
      %cst_82 = arith.constant 1.000000e+00 : f32
      %276 = vector.broadcast %cst_82 : f32 to vector<8x128xf32>
      %277 = arith.addf %276, %275 : vector<8x128xf32>
      %278 = arith.divf %276, %277 : vector<8x128xf32>
      %279 = vector.extract_strided_slice %266 {offsets = [0, 256], sizes = [8, 128], strides = [1, 1]} : vector<8x512xf32> to vector<8x128xf32>
      %280 = math.tanh %279 : vector<8x128xf32>
      %281 = vector.extract_strided_slice %266 {offsets = [0, 384], sizes = [8, 128], strides = [1, 1]} : vector<8x512xf32> to vector<8x128xf32>
      %282 = arith.negf %281 : vector<8x128xf32>
      %283 = math.exp %282 : vector<8x128xf32>
      %cst_83 = arith.constant 1.000000e+00 : f32
      %284 = vector.broadcast %cst_83 : f32 to vector<8x128xf32>
      %285 = arith.addf %284, %283 : vector<8x128xf32>
      %286 = arith.divf %284, %285 : vector<8x128xf32>
      %287 = arith.mulf %278, %255 : vector<8x128xf32>
      %288 = arith.mulf %272, %280 : vector<8x128xf32>
      %289 = arith.addf %287, %288 : vector<8x128xf32>
      %290 = math.tanh %289 : vector<8x128xf32>
      %291 = arith.mulf %286, %290 : vector<8x128xf32>
      %292 = arith.index_cast %262 : i32 to index
      %c0_84 = arith.constant 0 : index
      %293 = vector.load %arg6[%292, %c0_84] : memref<64x128xf32, #tpu.memory_space<vmem>>, vector<8x128xf32>
      tpu.vector_store %arg6[%292, %c0_84], %291 {strides = array<i32>} : memref<64x128xf32, #tpu.memory_space<vmem>>, vector<8x128xf32>,
      %c8_i32_85 = arith.constant 8 : i32
      %c0_86 = arith.constant 0 : index
      %c0_87 = arith.constant 0 : index
      %294 = vector.load %arg8[%c0_86, %c0_87] : memref<8x128xf32, #tpu.memory_space<vmem>>, vector<8x128xf32>
      tpu.vector_store %arg8[%c0_86, %c0_87], %291 {strides = array<i32>} : memref<8x128xf32, #tpu.memory_space<vmem>>, vector<8x128xf32>,
      %c0_88 = arith.constant 0 : index
      %c0_89 = arith.constant 0 : index
      %295 = vector.load %arg9[%c0_88, %c0_89] : memref<8x128xf32, #tpu.memory_space<vmem>>, vector<8x128xf32>
      tpu.vector_store %arg9[%c0_88, %c0_89], %289 {strides = array<i32>} : memref<8x128xf32, #tpu.memory_space<vmem>>, vector<8x128xf32>,
    } else {
    }
    return
  }
  func.func @transform_0(%arg0: i32, %arg1: i32) -> (i32, i32) {
    %c2_i32 = arith.constant 2 : i32
    %0 = arith.muli %c2_i32, %arg1 : i32
    %c0_i32 = arith.constant 0 : i32
    %1 = arith.subi %c0_i32, %0 : i32
    %2 = arith.muli %arg0, %1 : i32
    %3 = arith.addi %arg1, %2 : i32
    %c0_i32_0 = arith.constant 0 : i32
    %c0_i32_1 = arith.constant 0 : i32
    return %3, %c0_i32_0 : i32, i32
  }
  func.func @transform_1(%arg0: i32, %arg1: i32) -> (i32, i32, i32) {
    %c0_i32 = arith.constant 0 : i32
    %c0_i32_0 = arith.constant 0 : i32
    %c0_i32_1 = arith.constant 0 : i32
    return %arg0, %c0_i32, %c0_i32_0 : i32, i32, i32
  }
  func.func @transform_2(%arg0: i32, %arg1: i32) -> (i32, i32, i32) {
    %c0_i32 = arith.constant 0 : i32
    %c0_i32_0 = arith.constant 0 : i32
    %c0_i32_1 = arith.constant 0 : i32
    return %arg0, %c0_i32, %c0_i32_0 : i32, i32, i32
  }
  func.func @transform_3(%arg0: i32, %arg1: i32) -> (i32, i32, i32) {
    %c0_i32 = arith.constant 0 : i32
    %c0_i32_0 = arith.constant 0 : i32
    %c0_i32_1 = arith.constant 0 : i32
    return %arg0, %c0_i32, %c0_i32_0 : i32, i32, i32
  }
  func.func @transform_4(%arg0: i32, %arg1: i32) -> (i32, i32) {
    %c2_i32 = arith.constant 2 : i32
    %0 = arith.muli %c2_i32, %arg1 : i32
    %c0_i32 = arith.constant 0 : i32
    %1 = arith.subi %c0_i32, %0 : i32
    %2 = arith.muli %arg0, %1 : i32
    %3 = arith.addi %arg1, %2 : i32
    %c0_i32_0 = arith.constant 0 : i32
    return %3, %arg0 : i32, i32
  }
}

module attributes {stable_mosaic.version = 11 : i64} {
  func.func @kernel(%arg0: i32, %arg1: i32, %arg2: memref<64x256xf32, #tpu.memory_space<vmem>>, %arg3: memref<1x256x512xf32, #tpu.memory_space<vmem>>, %arg4: memref<1x128x512xf32, #tpu.memory_space<vmem>>, %arg5: memref<1x1x512xf32, #tpu.memory_space<vmem>>, %arg6: memref<64x128xf32, #tpu.memory_space<vmem>>, %arg7: memref<64x512xf32, #tpu.memory_space<vmem>>, %arg8: memref<8x128xf32, #tpu.memory_space<vmem>>, %arg9: memref<8x128xf32, #tpu.memory_space<vmem>>) attributes {dimension_semantics = [#tpu.dimension_semantics<parallel>, #tpu.dimension_semantics<arbitrary>], iteration_bounds = array<i64: 2, 1>, scalar_prefetch = 0 : i64, scratch_operands = 3 : i64, tpu.core_type = #tpu.core_type<tc>, window_params = [{transform_indices = @transform_0, window_bounds = array<i64: 64, 256>}, {transform_indices = @transform_1, window_bounds = array<i64: 1, 256, 512>}, {transform_indices = @transform_2, window_bounds = array<i64: 1, 128, 512>}, {transform_indices = @transform_3, window_bounds = array<i64: 1, 1, 512>}, {transform_indices = @transform_4, window_bounds = array<i64: 64, 128>}]} {
    %c0_i32 = arith.constant 0 : i32
    %0 = arith.cmpi eq, %arg1, %c0_i32 : i32
    %1 = arith.extui %0 : i1 to i32
    %c0_i32_0 = arith.constant 0 : i32
    %2 = arith.cmpi ne, %1, %c0_i32_0 : i32
    scf.if %2 {
      %cst_16 = arith.constant 0.000000e+00 : f32
      %20 = vector.broadcast %cst_16 : f32 to vector<8x128xf32>
      %c0_17 = arith.constant 0 : index
      %c0_18 = arith.constant 0 : index
      %21 = vector.load %arg8[%c0_17, %c0_18] : memref<8x128xf32, #tpu.memory_space<vmem>>, vector<8x128xf32>
      tpu.vector_store %arg8[%c0_17, %c0_18], %20 {strides = array<i32>} : memref<8x128xf32, #tpu.memory_space<vmem>>, vector<8x128xf32>,
      %cst_19 = arith.constant 0.000000e+00 : f32
      %22 = vector.broadcast %cst_19 : f32 to vector<8x128xf32>
      %c0_20 = arith.constant 0 : index
      %c0_21 = arith.constant 0 : index
      %23 = vector.load %arg9[%c0_20, %c0_21] : memref<8x128xf32, #tpu.memory_space<vmem>>, vector<8x128xf32>
      tpu.vector_store %arg9[%c0_20, %c0_21], %22 {strides = array<i32>} : memref<8x128xf32, #tpu.memory_space<vmem>>, vector<8x128xf32>,
    } else {
    }
    %c0 = arith.constant 0 : index
    %c0_1 = arith.constant 0 : index
    %3 = vector.load %arg2[%c0, %c0_1] : memref<64x256xf32, #tpu.memory_space<vmem>>, vector<64x256xf32>
    %c0_2 = arith.constant 0 : index
    %c0_3 = arith.constant 0 : index
    %c0_4 = arith.constant 0 : index
    %4 = vector.load %arg3[%c0_2, %c0_3, %c0_4] : memref<1x256x512xf32, #tpu.memory_space<vmem>>, vector<1x256x512xf32>
    %5 = vector.shape_cast %4 : vector<1x256x512xf32> to vector<256x512xf32>
    %cst = arith.constant dense<0.000000e+00> : vector<64x512xf32>
    %6 = tpu.matmul %3, %5, %cst {dimension_numbers = #tpu.dot_dimension_numbers<[1], [0], [0], [1], [0, 0, 1, 1], [], []>} : vector<64x256xf32>, vector<256x512xf32>, vector<64x512xf32> -> vector<64x512xf32>
    %c0_5 = arith.constant 0 : index
    %c0_6 = arith.constant 0 : index
    %c0_7 = arith.constant 0 : index
    %7 = vector.load %arg5[%c0_5, %c0_6, %c0_7] : memref<1x1x512xf32, #tpu.memory_space<vmem>>, vector<1x1x512xf32>
    %8 = vector.shape_cast %7 : vector<1x1x512xf32> to vector<1x512xf32>
    %9 = vector.broadcast %8 : vector<1x512xf32> to vector<64x512xf32>
    %10 = arith.addf %6, %9 : vector<64x512xf32>
    %c0_8 = arith.constant 0 : index
    %c0_9 = arith.constant 0 : index
    %11 = vector.load %arg7[%c0_8, %c0_9] : memref<64x512xf32, #tpu.memory_space<vmem>>, vector<64x512xf32>
    tpu.vector_store %arg7[%c0_8, %c0_9], %10 {strides = array<i32>} : memref<64x512xf32, #tpu.memory_space<vmem>>, vector<64x512xf32>,
    %c0_10 = arith.constant 0 : index
    %c0_11 = arith.constant 0 : index
    %c0_12 = arith.constant 0 : index
    %12 = vector.load %arg4[%c0_10, %c0_11, %c0_12] : memref<1x128x512xf32, #tpu.memory_space<vmem>>, vector<1x128x512xf32>
    %13 = vector.shape_cast %12 : vector<1x128x512xf32> to vector<128x512xf32>
    %c0_i32_13 = arith.constant 0 : i32
    %14 = arith.cmpi eq, %arg0, %c0_i32_13 : i32
    %15 = arith.extui %14 : i1 to i32
    %c0_i32_14 = arith.constant 0 : i32
    %16 = arith.cmpi ne, %15, %c0_i32_14 : i32
    scf.if %16 {
      %c0_16 = arith.constant 0 : index
      %c0_17 = arith.constant 0 : index
      %20 = vector.load %arg8[%c0_16, %c0_17] : memref<8x128xf32, #tpu.memory_space<vmem>>, vector<8x128xf32>
      %c0_18 = arith.constant 0 : index
      %c0_19 = arith.constant 0 : index
      %21 = vector.load %arg9[%c0_18, %c0_19] : memref<8x128xf32, #tpu.memory_space<vmem>>, vector<8x128xf32>
      %c0_i32_20 = arith.constant 0 : i32
      %c8_i32 = arith.constant 8 : i32
      %22 = arith.muli %c0_i32_20, %c8_i32 : i32
      %23 = tpu.assume_multiple %22, 8 : i32
      %24 = arith.index_cast %23 : i32 to index
      %c0_21 = arith.constant 0 : index
      %25 = vector.load %arg7[%24, %c0_21] : memref<64x512xf32, #tpu.memory_space<vmem>>, vector<8x512xf32>
      %cst_22 = arith.constant dense<0.000000e+00> : vector<8x512xf32>
      %26 = tpu.matmul %20, %13, %cst_22 {dimension_numbers = #tpu.dot_dimension_numbers<[1], [0], [0], [1], [0, 0, 1, 1], [], []>} : vector<8x128xf32>, vector<128x512xf32>, vector<8x512xf32> -> vector<8x512xf32>
      %27 = arith.addf %25, %26 : vector<8x512xf32>
      %28 = vector.extract_strided_slice %27 {offsets = [0, 0], sizes = [8, 128], strides = [1, 1]} : vector<8x512xf32> to vector<8x128xf32>
      %29 = arith.negf %28 : vector<8x128xf32>
      %30 = math.exp %29 : vector<8x128xf32>
      %cst_23 = arith.constant 1.000000e+00 : f32
      %31 = vector.broadcast %cst_23 : f32 to vector<8x128xf32>
      %32 = arith.addf %31, %30 : vector<8x128xf32>
      %33 = arith.divf %31, %32 : vector<8x128xf32>
      %34 = vector.extract_strided_slice %27 {offsets = [0, 128], sizes = [8, 128], strides = [1, 1]} : vector<8x512xf32> to vector<8x128xf32>
      %35 = arith.negf %34 : vector<8x128xf32>
      %36 = math.exp %35 : vector<8x128xf32>
      %cst_24 = arith.constant 1.000000e+00 : f32
      %37 = vector.broadcast %cst_24 : f32 to vector<8x128xf32>
      %38 = arith.addf %37, %36 : vector<8x128xf32>
      %39 = arith.divf %37, %38 : vector<8x128xf32>
      %40 = vector.extract_strided_slice %27 {offsets = [0, 256], sizes = [8, 128], strides = [1, 1]} : vector<8x512xf32> to vector<8x128xf32>
      %41 = math.tanh %40 : vector<8x128xf32>
      %42 = vector.extract_strided_slice %27 {offsets = [0, 384], sizes = [8, 128], strides = [1, 1]} : vector<8x512xf32> to vector<8x128xf32>
      %43 = arith.negf %42 : vector<8x128xf32>
      %44 = math.exp %43 : vector<8x128xf32>
      %cst_25 = arith.constant 1.000000e+00 : f32
      %45 = vector.broadcast %cst_25 : f32 to vector<8x128xf32>
      %46 = arith.addf %45, %44 : vector<8x128xf32>
      %47 = arith.divf %45, %46 : vector<8x128xf32>
      %48 = arith.mulf %39, %21 : vector<8x128xf32>
      %49 = arith.mulf %33, %41 : vector<8x128xf32>
      %50 = arith.addf %48, %49 : vector<8x128xf32>
      %51 = math.tanh %50 : vector<8x128xf32>
      %52 = arith.mulf %47, %51 : vector<8x128xf32>
      %53 = arith.index_cast %23 : i32 to index
      %c0_26 = arith.constant 0 : index
      %54 = vector.load %arg6[%53, %c0_26] : memref<64x128xf32, #tpu.memory_space<vmem>>, vector<8x128xf32>
      tpu.vector_store %arg6[%53, %c0_26], %52 {strides = array<i32>} : memref<64x128xf32, #tpu.memory_space<vmem>>, vector<8x128xf32>,
      %c1_i32_27 = arith.constant 1 : i32
      %c8_i32_28 = arith.constant 8 : i32
      %55 = arith.muli %c1_i32_27, %c8_i32_28 : i32
      %56 = tpu.assume_multiple %55, 8 : i32
      %57 = arith.index_cast %56 : i32 to index
      %c0_29 = arith.constant 0 : index
      %58 = vector.load %arg7[%57, %c0_29] : memref<64x512xf32, #tpu.memory_space<vmem>>, vector<8x512xf32>
      %cst_30 = arith.constant dense<0.000000e+00> : vector<8x512xf32>
      %59 = tpu.matmul %52, %13, %cst_30 {dimension_numbers = #tpu.dot_dimension_numbers<[1], [0], [0], [1], [0, 0, 1, 1], [], []>} : vector<8x128xf32>, vector<128x512xf32>, vector<8x512xf32> -> vector<8x512xf32>
      %60 = arith.addf %58, %59 : vector<8x512xf32>
      %61 = vector.extract_strided_slice %60 {offsets = [0, 0], sizes = [8, 128], strides = [1, 1]} : vector<8x512xf32> to vector<8x128xf32>
      %62 = arith.negf %61 : vector<8x128xf32>
      %63 = math.exp %62 : vector<8x128xf32>
      %cst_31 = arith.constant 1.000000e+00 : f32
      %64 = vector.broadcast %cst_31 : f32 to vector<8x128xf32>
      %65 = arith.addf %64, %63 : vector<8x128xf32>
      %66 = arith.divf %64, %65 : vector<8x128xf32>
      %67 = vector.extract_strided_slice %60 {offsets = [0, 128], sizes = [8, 128], strides = [1, 1]} : vector<8x512xf32> to vector<8x128xf32>
      %68 = arith.negf %67 : vector<8x128xf32>
      %69 = math.exp %68 : vector<8x128xf32>
      %cst_32 = arith.constant 1.000000e+00 : f32
      %70 = vector.broadcast %cst_32 : f32 to vector<8x128xf32>
      %71 = arith.addf %70, %69 : vector<8x128xf32>
      %72 = arith.divf %70, %71 : vector<8x128xf32>
      %73 = vector.extract_strided_slice %60 {offsets = [0, 256], sizes = [8, 128], strides = [1, 1]} : vector<8x512xf32> to vector<8x128xf32>
      %74 = math.tanh %73 : vector<8x128xf32>
      %75 = vector.extract_strided_slice %60 {offsets = [0, 384], sizes = [8, 128], strides = [1, 1]} : vector<8x512xf32> to vector<8x128xf32>
      %76 = arith.negf %75 : vector<8x128xf32>
      %77 = math.exp %76 : vector<8x128xf32>
      %cst_33 = arith.constant 1.000000e+00 : f32
      %78 = vector.broadcast %cst_33 : f32 to vector<8x128xf32>
      %79 = arith.addf %78, %77 : vector<8x128xf32>
      %80 = arith.divf %78, %79 : vector<8x128xf32>
      %81 = arith.mulf %72, %50 : vector<8x128xf32>
      %82 = arith.mulf %66, %74 : vector<8x128xf32>
      %83 = arith.addf %81, %82 : vector<8x128xf32>
      %84 = math.tanh %83 : vector<8x128xf32>
      %85 = arith.mulf %80, %84 : vector<8x128xf32>
      %86 = arith.index_cast %56 : i32 to index
      %c0_34 = arith.constant 0 : index
      %87 = vector.load %arg6[%86, %c0_34] : memref<64x128xf32, #tpu.memory_space<vmem>>, vector<8x128xf32>
      tpu.vector_store %arg6[%86, %c0_34], %85 {strides = array<i32>} : memref<64x128xf32, #tpu.memory_space<vmem>>, vector<8x128xf32>,
      %c2_i32 = arith.constant 2 : i32
      %c8_i32_35 = arith.constant 8 : i32
      %88 = arith.muli %c2_i32, %c8_i32_35 : i32
      %89 = tpu.assume_multiple %88, 8 : i32
      %90 = arith.index_cast %89 : i32 to index
      %c0_36 = arith.constant 0 : index
      %91 = vector.load %arg7[%90, %c0_36] : memref<64x512xf32, #tpu.memory_space<vmem>>, vector<8x512xf32>
      %cst_37 = arith.constant dense<0.000000e+00> : vector<8x512xf32>
      %92 = tpu.matmul %85, %13, %cst_37 {dimension_numbers = #tpu.dot_dimension_numbers<[1], [0], [0], [1], [0, 0, 1, 1], [], []>} : vector<8x128xf32>, vector<128x512xf32>, vector<8x512xf32> -> vector<8x512xf32>
      %93 = arith.addf %91, %92 : vector<8x512xf32>
      %94 = vector.extract_strided_slice %93 {offsets = [0, 0], sizes = [8, 128], strides = [1, 1]} : vector<8x512xf32> to vector<8x128xf32>
      %95 = arith.negf %94 : vector<8x128xf32>
      %96 = math.exp %95 : vector<8x128xf32>
      %cst_38 = arith.constant 1.000000e+00 : f32
      %97 = vector.broadcast %cst_38 : f32 to vector<8x128xf32>
      %98 = arith.addf %97, %96 : vector<8x128xf32>
      %99 = arith.divf %97, %98 : vector<8x128xf32>
      %100 = vector.extract_strided_slice %93 {offsets = [0, 128], sizes = [8, 128], strides = [1, 1]} : vector<8x512xf32> to vector<8x128xf32>
      %101 = arith.negf %100 : vector<8x128xf32>
      %102 = math.exp %101 : vector<8x128xf32>
      %cst_39 = arith.constant 1.000000e+00 : f32
      %103 = vector.broadcast %cst_39 : f32 to vector<8x128xf32>
      %104 = arith.addf %103, %102 : vector<8x128xf32>
      %105 = arith.divf %103, %104 : vector<8x128xf32>
      %106 = vector.extract_strided_slice %93 {offsets = [0, 256], sizes = [8, 128], strides = [1, 1]} : vector<8x512xf32> to vector<8x128xf32>
      %107 = math.tanh %106 : vector<8x128xf32>
      %108 = vector.extract_strided_slice %93 {offsets = [0, 384], sizes = [8, 128], strides = [1, 1]} : vector<8x512xf32> to vector<8x128xf32>
      %109 = arith.negf %108 : vector<8x128xf32>
      %110 = math.exp %109 : vector<8x128xf32>
      %cst_40 = arith.constant 1.000000e+00 : f32
      %111 = vector.broadcast %cst_40 : f32 to vector<8x128xf32>
      %112 = arith.addf %111, %110 : vector<8x128xf32>
      %113 = arith.divf %111, %112 : vector<8x128xf32>
      %114 = arith.mulf %105, %83 : vector<8x128xf32>
      %115 = arith.mulf %99, %107 : vector<8x128xf32>
      %116 = arith.addf %114, %115 : vector<8x128xf32>
      %117 = math.tanh %116 : vector<8x128xf32>
      %118 = arith.mulf %113, %117 : vector<8x128xf32>
      %119 = arith.index_cast %89 : i32 to index
      %c0_41 = arith.constant 0 : index
      %120 = vector.load %arg6[%119, %c0_41] : memref<64x128xf32, #tpu.memory_space<vmem>>, vector<8x128xf32>
      tpu.vector_store %arg6[%119, %c0_41], %118 {strides = array<i32>} : memref<64x128xf32, #tpu.memory_space<vmem>>, vector<8x128xf32>,
      %c3_i32 = arith.constant 3 : i32
      %c8_i32_42 = arith.constant 8 : i32
      %121 = arith.muli %c3_i32, %c8_i32_42 : i32
      %122 = tpu.assume_multiple %121, 8 : i32
      %123 = arith.index_cast %122 : i32 to index
      %c0_43 = arith.constant 0 : index
      %124 = vector.load %arg7[%123, %c0_43] : memref<64x512xf32, #tpu.memory_space<vmem>>, vector<8x512xf32>
      %cst_44 = arith.constant dense<0.000000e+00> : vector<8x512xf32>
      %125 = tpu.matmul %118, %13, %cst_44 {dimension_numbers = #tpu.dot_dimension_numbers<[1], [0], [0], [1], [0, 0, 1, 1], [], []>} : vector<8x128xf32>, vector<128x512xf32>, vector<8x512xf32> -> vector<8x512xf32>
      %126 = arith.addf %124, %125 : vector<8x512xf32>
      %127 = vector.extract_strided_slice %126 {offsets = [0, 0], sizes = [8, 128], strides = [1, 1]} : vector<8x512xf32> to vector<8x128xf32>
      %128 = arith.negf %127 : vector<8x128xf32>
      %129 = math.exp %128 : vector<8x128xf32>
      %cst_45 = arith.constant 1.000000e+00 : f32
      %130 = vector.broadcast %cst_45 : f32 to vector<8x128xf32>
      %131 = arith.addf %130, %129 : vector<8x128xf32>
      %132 = arith.divf %130, %131 : vector<8x128xf32>
      %133 = vector.extract_strided_slice %126 {offsets = [0, 128], sizes = [8, 128], strides = [1, 1]} : vector<8x512xf32> to vector<8x128xf32>
      %134 = arith.negf %133 : vector<8x128xf32>
      %135 = math.exp %134 : vector<8x128xf32>
      %cst_46 = arith.constant 1.000000e+00 : f32
      %136 = vector.broadcast %cst_46 : f32 to vector<8x128xf32>
      %137 = arith.addf %136, %135 : vector<8x128xf32>
      %138 = arith.divf %136, %137 : vector<8x128xf32>
      %139 = vector.extract_strided_slice %126 {offsets = [0, 256], sizes = [8, 128], strides = [1, 1]} : vector<8x512xf32> to vector<8x128xf32>
      %140 = math.tanh %139 : vector<8x128xf32>
      %141 = vector.extract_strided_slice %126 {offsets = [0, 384], sizes = [8, 128], strides = [1, 1]} : vector<8x512xf32> to vector<8x128xf32>
      %142 = arith.negf %141 : vector<8x128xf32>
      %143 = math.exp %142 : vector<8x128xf32>
      %cst_47 = arith.constant 1.000000e+00 : f32
      %144 = vector.broadcast %cst_47 : f32 to vector<8x128xf32>
      %145 = arith.addf %144, %143 : vector<8x128xf32>
      %146 = arith.divf %144, %145 : vector<8x128xf32>
      %147 = arith.mulf %138, %116 : vector<8x128xf32>
      %148 = arith.mulf %132, %140 : vector<8x128xf32>
      %149 = arith.addf %147, %148 : vector<8x128xf32>
      %150 = math.tanh %149 : vector<8x128xf32>
      %151 = arith.mulf %146, %150 : vector<8x128xf32>
      %152 = arith.index_cast %122 : i32 to index
      %c0_48 = arith.constant 0 : index
      %153 = vector.load %arg6[%152, %c0_48] : memref<64x128xf32, #tpu.memory_space<vmem>>, vector<8x128xf32>
      tpu.vector_store %arg6[%152, %c0_48], %151 {strides = array<i32>} : memref<64x128xf32, #tpu.memory_space<vmem>>, vector<8x128xf32>,
      %c4_i32 = arith.constant 4 : i32
      %c8_i32_49 = arith.constant 8 : i32
      %154 = arith.muli %c4_i32, %c8_i32_49 : i32
      %155 = tpu.assume_multiple %154, 8 : i32
      %156 = arith.index_cast %155 : i32 to index
      %c0_50 = arith.constant 0 : index
      %157 = vector.load %arg7[%156, %c0_50] : memref<64x512xf32, #tpu.memory_space<vmem>>, vector<8x512xf32>
      %cst_51 = arith.constant dense<0.000000e+00> : vector<8x512xf32>
      %158 = tpu.matmul %151, %13, %cst_51 {dimension_numbers = #tpu.dot_dimension_numbers<[1], [0], [0], [1], [0, 0, 1, 1], [], []>} : vector<8x128xf32>, vector<128x512xf32>, vector<8x512xf32> -> vector<8x512xf32>
      %159 = arith.addf %157, %158 : vector<8x512xf32>
      %160 = vector.extract_strided_slice %159 {offsets = [0, 0], sizes = [8, 128], strides = [1, 1]} : vector<8x512xf32> to vector<8x128xf32>
      %161 = arith.negf %160 : vector<8x128xf32>
      %162 = math.exp %161 : vector<8x128xf32>
      %cst_52 = arith.constant 1.000000e+00 : f32
      %163 = vector.broadcast %cst_52 : f32 to vector<8x128xf32>
      %164 = arith.addf %163, %162 : vector<8x128xf32>
      %165 = arith.divf %163, %164 : vector<8x128xf32>
      %166 = vector.extract_strided_slice %159 {offsets = [0, 128], sizes = [8, 128], strides = [1, 1]} : vector<8x512xf32> to vector<8x128xf32>
      %167 = arith.negf %166 : vector<8x128xf32>
      %168 = math.exp %167 : vector<8x128xf32>
      %cst_53 = arith.constant 1.000000e+00 : f32
      %169 = vector.broadcast %cst_53 : f32 to vector<8x128xf32>
      %170 = arith.addf %169, %168 : vector<8x128xf32>
      %171 = arith.divf %169, %170 : vector<8x128xf32>
      %172 = vector.extract_strided_slice %159 {offsets = [0, 256], sizes = [8, 128], strides = [1, 1]} : vector<8x512xf32> to vector<8x128xf32>
      %173 = math.tanh %172 : vector<8x128xf32>
      %174 = vector.extract_strided_slice %159 {offsets = [0, 384], sizes = [8, 128], strides = [1, 1]} : vector<8x512xf32> to vector<8x128xf32>
      %175 = arith.negf %174 : vector<8x128xf32>
      %176 = math.exp %175 : vector<8x128xf32>
      %cst_54 = arith.constant 1.000000e+00 : f32
      %177 = vector.broadcast %cst_54 : f32 to vector<8x128xf32>
      %178 = arith.addf %177, %176 : vector<8x128xf32>
      %179 = arith.divf %177, %178 : vector<8x128xf32>
      %180 = arith.mulf %171, %149 : vector<8x128xf32>
      %181 = arith.mulf %165, %173 : vector<8x128xf32>
      %182 = arith.addf %180, %181 : vector<8x128xf32>
      %183 = math.tanh %182 : vector<8x128xf32>
      %184 = arith.mulf %179, %183 : vector<8x128xf32>
      %185 = arith.index_cast %155 : i32 to index
      %c0_55 = arith.constant 0 : index
      %186 = vector.load %arg6[%185, %c0_55] : memref<64x128xf32, #tpu.memory_space<vmem>>, vector<8x128xf32>
      tpu.vector_store %arg6[%185, %c0_55], %184 {strides = array<i32>} : memref<64x128xf32, #tpu.memory_space<vmem>>, vector<8x128xf32>,
      %c5_i32 = arith.constant 5 : i32
      %c8_i32_56 = arith.constant 8 : i32
      %187 = arith.muli %c5_i32, %c8_i32_56 : i32
      %188 = tpu.assume_multiple %187, 8 : i32
      %189 = arith.index_cast %188 : i32 to index
      %c0_57 = arith.constant 0 : index
      %190 = vector.load %arg7[%189, %c0_57] : memref<64x512xf32, #tpu.memory_space<vmem>>, vector<8x512xf32>
      %cst_58 = arith.constant dense<0.000000e+00> : vector<8x512xf32>
      %191 = tpu.matmul %184, %13, %cst_58 {dimension_numbers = #tpu.dot_dimension_numbers<[1], [0], [0], [1], [0, 0, 1, 1], [], []>} : vector<8x128xf32>, vector<128x512xf32>, vector<8x512xf32> -> vector<8x512xf32>
      %192 = arith.addf %190, %191 : vector<8x512xf32>
      %193 = vector.extract_strided_slice %192 {offsets = [0, 0], sizes = [8, 128], strides = [1, 1]} : vector<8x512xf32> to vector<8x128xf32>
      %194 = arith.negf %193 : vector<8x128xf32>
      %195 = math.exp %194 : vector<8x128xf32>
      %cst_59 = arith.constant 1.000000e+00 : f32
      %196 = vector.broadcast %cst_59 : f32 to vector<8x128xf32>
      %197 = arith.addf %196, %195 : vector<8x128xf32>
      %198 = arith.divf %196, %197 : vector<8x128xf32>
      %199 = vector.extract_strided_slice %192 {offsets = [0, 128], sizes = [8, 128], strides = [1, 1]} : vector<8x512xf32> to vector<8x128xf32>
      %200 = arith.negf %199 : vector<8x128xf32>
      %201 = math.exp %200 : vector<8x128xf32>
      %cst_60 = arith.constant 1.000000e+00 : f32
      %202 = vector.broadcast %cst_60 : f32 to vector<8x128xf32>
      %203 = arith.addf %202, %201 : vector<8x128xf32>
      %204 = arith.divf %202, %203 : vector<8x128xf32>
      %205 = vector.extract_strided_slice %192 {offsets = [0, 256], sizes = [8, 128], strides = [1, 1]} : vector<8x512xf32> to vector<8x128xf32>
      %206 = math.tanh %205 : vector<8x128xf32>
      %207 = vector.extract_strided_slice %192 {offsets = [0, 384], sizes = [8, 128], strides = [1, 1]} : vector<8x512xf32> to vector<8x128xf32>
      %208 = arith.negf %207 : vector<8x128xf32>
      %209 = math.exp %208 : vector<8x128xf32>
      %cst_61 = arith.constant 1.000000e+00 : f32
      %210 = vector.broadcast %cst_61 : f32 to vector<8x128xf32>
      %211 = arith.addf %210, %209 : vector<8x128xf32>
      %212 = arith.divf %210, %211 : vector<8x128xf32>
      %213 = arith.mulf %204, %182 : vector<8x128xf32>
      %214 = arith.mulf %198, %206 : vector<8x128xf32>
      %215 = arith.addf %213, %214 : vector<8x128xf32>
      %216 = math.tanh %215 : vector<8x128xf32>
      %217 = arith.mulf %212, %216 : vector<8x128xf32>
      %218 = arith.index_cast %188 : i32 to index
      %c0_62 = arith.constant 0 : index
      %219 = vector.load %arg6[%218, %c0_62] : memref<64x128xf32, #tpu.memory_space<vmem>>, vector<8x128xf32>
      tpu.vector_store %arg6[%218, %c0_62], %217 {strides = array<i32>} : memref<64x128xf32, #tpu.memory_space<vmem>>, vector<8x128xf32>,
      %c6_i32 = arith.constant 6 : i32
      %c8_i32_63 = arith.constant 8 : i32
      %220 = arith.muli %c6_i32, %c8_i32_63 : i32
      %221 = tpu.assume_multiple %220, 8 : i32
      %222 = arith.index_cast %221 : i32 to index
      %c0_64 = arith.constant 0 : index
      %223 = vector.load %arg7[%222, %c0_64] : memref<64x512xf32, #tpu.memory_space<vmem>>, vector<8x512xf32>
      %cst_65 = arith.constant dense<0.000000e+00> : vector<8x512xf32>
      %224 = tpu.matmul %217, %13, %cst_65 {dimension_numbers = #tpu.dot_dimension_numbers<[1], [0], [0], [1], [0, 0, 1, 1], [], []>} : vector<8x128xf32>, vector<128x512xf32>, vector<8x512xf32> -> vector<8x512xf32>
      %225 = arith.addf %223, %224 : vector<8x512xf32>
      %226 = vector.extract_strided_slice %225 {offsets = [0, 0], sizes = [8, 128], strides = [1, 1]} : vector<8x512xf32> to vector<8x128xf32>
      %227 = arith.negf %226 : vector<8x128xf32>
      %228 = math.exp %227 : vector<8x128xf32>
      %cst_66 = arith.constant 1.000000e+00 : f32
      %229 = vector.broadcast %cst_66 : f32 to vector<8x128xf32>
      %230 = arith.addf %229, %228 : vector<8x128xf32>
      %231 = arith.divf %229, %230 : vector<8x128xf32>
      %232 = vector.extract_strided_slice %225 {offsets = [0, 128], sizes = [8, 128], strides = [1, 1]} : vector<8x512xf32> to vector<8x128xf32>
      %233 = arith.negf %232 : vector<8x128xf32>
      %234 = math.exp %233 : vector<8x128xf32>
      %cst_67 = arith.constant 1.000000e+00 : f32
      %235 = vector.broadcast %cst_67 : f32 to vector<8x128xf32>
      %236 = arith.addf %235, %234 : vector<8x128xf32>
      %237 = arith.divf %235, %236 : vector<8x128xf32>
      %238 = vector.extract_strided_slice %225 {offsets = [0, 256], sizes = [8, 128], strides = [1, 1]} : vector<8x512xf32> to vector<8x128xf32>
      %239 = math.tanh %238 : vector<8x128xf32>
      %240 = vector.extract_strided_slice %225 {offsets = [0, 384], sizes = [8, 128], strides = [1, 1]} : vector<8x512xf32> to vector<8x128xf32>
      %241 = arith.negf %240 : vector<8x128xf32>
      %242 = math.exp %241 : vector<8x128xf32>
      %cst_68 = arith.constant 1.000000e+00 : f32
      %243 = vector.broadcast %cst_68 : f32 to vector<8x128xf32>
      %244 = arith.addf %243, %242 : vector<8x128xf32>
      %245 = arith.divf %243, %244 : vector<8x128xf32>
      %246 = arith.mulf %237, %215 : vector<8x128xf32>
      %247 = arith.mulf %231, %239 : vector<8x128xf32>
      %248 = arith.addf %246, %247 : vector<8x128xf32>
      %249 = math.tanh %248 : vector<8x128xf32>
      %250 = arith.mulf %245, %249 : vector<8x128xf32>
      %251 = arith.index_cast %221 : i32 to index
      %c0_69 = arith.constant 0 : index
      %252 = vector.load %arg6[%251, %c0_69] : memref<64x128xf32, #tpu.memory_space<vmem>>, vector<8x128xf32>
      tpu.vector_store %arg6[%251, %c0_69], %250 {strides = array<i32>} : memref<64x128xf32, #tpu.memory_space<vmem>>, vector<8x128xf32>,
      %c7_i32 = arith.constant 7 : i32
      %c8_i32_70 = arith.constant 8 : i32
      %253 = arith.muli %c7_i32, %c8_i32_70 : i32
      %254 = tpu.assume_multiple %253, 8 : i32
      %255 = arith.index_cast %254 : i32 to index
      %c0_71 = arith.constant 0 : index
      %256 = vector.load %arg7[%255, %c0_71] : memref<64x512xf32, #tpu.memory_space<vmem>>, vector<8x512xf32>
      %cst_72 = arith.constant dense<0.000000e+00> : vector<8x512xf32>
      %257 = tpu.matmul %250, %13, %cst_72 {dimension_numbers = #tpu.dot_dimension_numbers<[1], [0], [0], [1], [0, 0, 1, 1], [], []>} : vector<8x128xf32>, vector<128x512xf32>, vector<8x512xf32> -> vector<8x512xf32>
      %258 = arith.addf %256, %257 : vector<8x512xf32>
      %259 = vector.extract_strided_slice %258 {offsets = [0, 0], sizes = [8, 128], strides = [1, 1]} : vector<8x512xf32> to vector<8x128xf32>
      %260 = arith.negf %259 : vector<8x128xf32>
      %261 = math.exp %260 : vector<8x128xf32>
      %cst_73 = arith.constant 1.000000e+00 : f32
      %262 = vector.broadcast %cst_73 : f32 to vector<8x128xf32>
      %263 = arith.addf %262, %261 : vector<8x128xf32>
      %264 = arith.divf %262, %263 : vector<8x128xf32>
      %265 = vector.extract_strided_slice %258 {offsets = [0, 128], sizes = [8, 128], strides = [1, 1]} : vector<8x512xf32> to vector<8x128xf32>
      %266 = arith.negf %265 : vector<8x128xf32>
      %267 = math.exp %266 : vector<8x128xf32>
      %cst_74 = arith.constant 1.000000e+00 : f32
      %268 = vector.broadcast %cst_74 : f32 to vector<8x128xf32>
      %269 = arith.addf %268, %267 : vector<8x128xf32>
      %270 = arith.divf %268, %269 : vector<8x128xf32>
      %271 = vector.extract_strided_slice %258 {offsets = [0, 256], sizes = [8, 128], strides = [1, 1]} : vector<8x512xf32> to vector<8x128xf32>
      %272 = math.tanh %271 : vector<8x128xf32>
      %273 = vector.extract_strided_slice %258 {offsets = [0, 384], sizes = [8, 128], strides = [1, 1]} : vector<8x512xf32> to vector<8x128xf32>
      %274 = arith.negf %273 : vector<8x128xf32>
      %275 = math.exp %274 : vector<8x128xf32>
      %cst_75 = arith.constant 1.000000e+00 : f32
      %276 = vector.broadcast %cst_75 : f32 to vector<8x128xf32>
      %277 = arith.addf %276, %275 : vector<8x128xf32>
      %278 = arith.divf %276, %277 : vector<8x128xf32>
      %279 = arith.mulf %270, %248 : vector<8x128xf32>
      %280 = arith.mulf %264, %272 : vector<8x128xf32>
      %281 = arith.addf %279, %280 : vector<8x128xf32>
      %282 = math.tanh %281 : vector<8x128xf32>
      %283 = arith.mulf %278, %282 : vector<8x128xf32>
      %284 = arith.index_cast %254 : i32 to index
      %c0_76 = arith.constant 0 : index
      %285 = vector.load %arg6[%284, %c0_76] : memref<64x128xf32, #tpu.memory_space<vmem>>, vector<8x128xf32>
      tpu.vector_store %arg6[%284, %c0_76], %283 {strides = array<i32>} : memref<64x128xf32, #tpu.memory_space<vmem>>, vector<8x128xf32>,
      %c8_i32_77 = arith.constant 8 : i32
      %c0_78 = arith.constant 0 : index
      %c0_79 = arith.constant 0 : index
      %286 = vector.load %arg8[%c0_78, %c0_79] : memref<8x128xf32, #tpu.memory_space<vmem>>, vector<8x128xf32>
      tpu.vector_store %arg8[%c0_78, %c0_79], %283 {strides = array<i32>} : memref<8x128xf32, #tpu.memory_space<vmem>>, vector<8x128xf32>,
      %c0_80 = arith.constant 0 : index
      %c0_81 = arith.constant 0 : index
      %287 = vector.load %arg9[%c0_80, %c0_81] : memref<8x128xf32, #tpu.memory_space<vmem>>, vector<8x128xf32>
      tpu.vector_store %arg9[%c0_80, %c0_81], %281 {strides = array<i32>} : memref<8x128xf32, #tpu.memory_space<vmem>>, vector<8x128xf32>,
    } else {
    }
    %c1_i32 = arith.constant 1 : i32
    %17 = arith.cmpi eq, %arg0, %c1_i32 : i32
    %18 = arith.extui %17 : i1 to i32
    %c0_i32_15 = arith.constant 0 : i32
    %19 = arith.cmpi ne, %18, %c0_i32_15 : i32
    scf.if %19 {
      %c0_16 = arith.constant 0 : index
      %c0_17 = arith.constant 0 : index
      %20 = vector.load %arg8[%c0_16, %c0_17] : memref<8x128xf32, #tpu.memory_space<vmem>>, vector<8x128xf32>
      %c0_18 = arith.constant 0 : index
      %c0_19 = arith.constant 0 : index
      %21 = vector.load %arg9[%c0_18, %c0_19] : memref<8x128xf32, #tpu.memory_space<vmem>>, vector<8x128xf32>
      %c0_i32_20 = arith.constant 0 : i32
      %c7_i32 = arith.constant 7 : i32
      %22 = arith.subi %c7_i32, %c0_i32_20 : i32
      %c8_i32 = arith.constant 8 : i32
      %23 = arith.muli %22, %c8_i32 : i32
      %24 = tpu.assume_multiple %23, 8 : i32
      %25 = arith.index_cast %24 : i32 to index
      %c0_21 = arith.constant 0 : index
      %26 = vector.load %arg7[%25, %c0_21] : memref<64x512xf32, #tpu.memory_space<vmem>>, vector<8x512xf32>
      %cst_22 = arith.constant dense<0.000000e+00> : vector<8x512xf32>
      %27 = tpu.matmul %20, %13, %cst_22 {dimension_numbers = #tpu.dot_dimension_numbers<[1], [0], [0], [1], [0, 0, 1, 1], [], []>} : vector<8x128xf32>, vector<128x512xf32>, vector<8x512xf32> -> vector<8x512xf32>
      %28 = arith.addf %26, %27 : vector<8x512xf32>
      %29 = vector.extract_strided_slice %28 {offsets = [0, 0], sizes = [8, 128], strides = [1, 1]} : vector<8x512xf32> to vector<8x128xf32>
      %30 = arith.negf %29 : vector<8x128xf32>
      %31 = math.exp %30 : vector<8x128xf32>
      %cst_23 = arith.constant 1.000000e+00 : f32
      %32 = vector.broadcast %cst_23 : f32 to vector<8x128xf32>
      %33 = arith.addf %32, %31 : vector<8x128xf32>
      %34 = arith.divf %32, %33 : vector<8x128xf32>
      %35 = vector.extract_strided_slice %28 {offsets = [0, 128], sizes = [8, 128], strides = [1, 1]} : vector<8x512xf32> to vector<8x128xf32>
      %36 = arith.negf %35 : vector<8x128xf32>
      %37 = math.exp %36 : vector<8x128xf32>
      %cst_24 = arith.constant 1.000000e+00 : f32
      %38 = vector.broadcast %cst_24 : f32 to vector<8x128xf32>
      %39 = arith.addf %38, %37 : vector<8x128xf32>
      %40 = arith.divf %38, %39 : vector<8x128xf32>
      %41 = vector.extract_strided_slice %28 {offsets = [0, 256], sizes = [8, 128], strides = [1, 1]} : vector<8x512xf32> to vector<8x128xf32>
      %42 = math.tanh %41 : vector<8x128xf32>
      %43 = vector.extract_strided_slice %28 {offsets = [0, 384], sizes = [8, 128], strides = [1, 1]} : vector<8x512xf32> to vector<8x128xf32>
      %44 = arith.negf %43 : vector<8x128xf32>
      %45 = math.exp %44 : vector<8x128xf32>
      %cst_25 = arith.constant 1.000000e+00 : f32
      %46 = vector.broadcast %cst_25 : f32 to vector<8x128xf32>
      %47 = arith.addf %46, %45 : vector<8x128xf32>
      %48 = arith.divf %46, %47 : vector<8x128xf32>
      %49 = arith.mulf %40, %21 : vector<8x128xf32>
      %50 = arith.mulf %34, %42 : vector<8x128xf32>
      %51 = arith.addf %49, %50 : vector<8x128xf32>
      %52 = math.tanh %51 : vector<8x128xf32>
      %53 = arith.mulf %48, %52 : vector<8x128xf32>
      %54 = arith.index_cast %24 : i32 to index
      %c0_26 = arith.constant 0 : index
      %55 = vector.load %arg6[%54, %c0_26] : memref<64x128xf32, #tpu.memory_space<vmem>>, vector<8x128xf32>
      tpu.vector_store %arg6[%54, %c0_26], %53 {strides = array<i32>} : memref<64x128xf32, #tpu.memory_space<vmem>>, vector<8x128xf32>,
      %c1_i32_27 = arith.constant 1 : i32
      %c7_i32_28 = arith.constant 7 : i32
      %56 = arith.subi %c7_i32_28, %c1_i32_27 : i32
      %c8_i32_29 = arith.constant 8 : i32
      %57 = arith.muli %56, %c8_i32_29 : i32
      %58 = tpu.assume_multiple %57, 8 : i32
      %59 = arith.index_cast %58 : i32 to index
      %c0_30 = arith.constant 0 : index
      %60 = vector.load %arg7[%59, %c0_30] : memref<64x512xf32, #tpu.memory_space<vmem>>, vector<8x512xf32>
      %cst_31 = arith.constant dense<0.000000e+00> : vector<8x512xf32>
      %61 = tpu.matmul %53, %13, %cst_31 {dimension_numbers = #tpu.dot_dimension_numbers<[1], [0], [0], [1], [0, 0, 1, 1], [], []>} : vector<8x128xf32>, vector<128x512xf32>, vector<8x512xf32> -> vector<8x512xf32>
      %62 = arith.addf %60, %61 : vector<8x512xf32>
      %63 = vector.extract_strided_slice %62 {offsets = [0, 0], sizes = [8, 128], strides = [1, 1]} : vector<8x512xf32> to vector<8x128xf32>
      %64 = arith.negf %63 : vector<8x128xf32>
      %65 = math.exp %64 : vector<8x128xf32>
      %cst_32 = arith.constant 1.000000e+00 : f32
      %66 = vector.broadcast %cst_32 : f32 to vector<8x128xf32>
      %67 = arith.addf %66, %65 : vector<8x128xf32>
      %68 = arith.divf %66, %67 : vector<8x128xf32>
      %69 = vector.extract_strided_slice %62 {offsets = [0, 128], sizes = [8, 128], strides = [1, 1]} : vector<8x512xf32> to vector<8x128xf32>
      %70 = arith.negf %69 : vector<8x128xf32>
      %71 = math.exp %70 : vector<8x128xf32>
      %cst_33 = arith.constant 1.000000e+00 : f32
      %72 = vector.broadcast %cst_33 : f32 to vector<8x128xf32>
      %73 = arith.addf %72, %71 : vector<8x128xf32>
      %74 = arith.divf %72, %73 : vector<8x128xf32>
      %75 = vector.extract_strided_slice %62 {offsets = [0, 256], sizes = [8, 128], strides = [1, 1]} : vector<8x512xf32> to vector<8x128xf32>
      %76 = math.tanh %75 : vector<8x128xf32>
      %77 = vector.extract_strided_slice %62 {offsets = [0, 384], sizes = [8, 128], strides = [1, 1]} : vector<8x512xf32> to vector<8x128xf32>
      %78 = arith.negf %77 : vector<8x128xf32>
      %79 = math.exp %78 : vector<8x128xf32>
      %cst_34 = arith.constant 1.000000e+00 : f32
      %80 = vector.broadcast %cst_34 : f32 to vector<8x128xf32>
      %81 = arith.addf %80, %79 : vector<8x128xf32>
      %82 = arith.divf %80, %81 : vector<8x128xf32>
      %83 = arith.mulf %74, %51 : vector<8x128xf32>
      %84 = arith.mulf %68, %76 : vector<8x128xf32>
      %85 = arith.addf %83, %84 : vector<8x128xf32>
      %86 = math.tanh %85 : vector<8x128xf32>
      %87 = arith.mulf %82, %86 : vector<8x128xf32>
      %88 = arith.index_cast %58 : i32 to index
      %c0_35 = arith.constant 0 : index
      %89 = vector.load %arg6[%88, %c0_35] : memref<64x128xf32, #tpu.memory_space<vmem>>, vector<8x128xf32>
      tpu.vector_store %arg6[%88, %c0_35], %87 {strides = array<i32>} : memref<64x128xf32, #tpu.memory_space<vmem>>, vector<8x128xf32>,
      %c2_i32 = arith.constant 2 : i32
      %c7_i32_36 = arith.constant 7 : i32
      %90 = arith.subi %c7_i32_36, %c2_i32 : i32
      %c8_i32_37 = arith.constant 8 : i32
      %91 = arith.muli %90, %c8_i32_37 : i32
      %92 = tpu.assume_multiple %91, 8 : i32
      %93 = arith.index_cast %92 : i32 to index
      %c0_38 = arith.constant 0 : index
      %94 = vector.load %arg7[%93, %c0_38] : memref<64x512xf32, #tpu.memory_space<vmem>>, vector<8x512xf32>
      %cst_39 = arith.constant dense<0.000000e+00> : vector<8x512xf32>
      %95 = tpu.matmul %87, %13, %cst_39 {dimension_numbers = #tpu.dot_dimension_numbers<[1], [0], [0], [1], [0, 0, 1, 1], [], []>} : vector<8x128xf32>, vector<128x512xf32>, vector<8x512xf32> -> vector<8x512xf32>
      %96 = arith.addf %94, %95 : vector<8x512xf32>
      %97 = vector.extract_strided_slice %96 {offsets = [0, 0], sizes = [8, 128], strides = [1, 1]} : vector<8x512xf32> to vector<8x128xf32>
      %98 = arith.negf %97 : vector<8x128xf32>
      %99 = math.exp %98 : vector<8x128xf32>
      %cst_40 = arith.constant 1.000000e+00 : f32
      %100 = vector.broadcast %cst_40 : f32 to vector<8x128xf32>
      %101 = arith.addf %100, %99 : vector<8x128xf32>
      %102 = arith.divf %100, %101 : vector<8x128xf32>
      %103 = vector.extract_strided_slice %96 {offsets = [0, 128], sizes = [8, 128], strides = [1, 1]} : vector<8x512xf32> to vector<8x128xf32>
      %104 = arith.negf %103 : vector<8x128xf32>
      %105 = math.exp %104 : vector<8x128xf32>
      %cst_41 = arith.constant 1.000000e+00 : f32
      %106 = vector.broadcast %cst_41 : f32 to vector<8x128xf32>
      %107 = arith.addf %106, %105 : vector<8x128xf32>
      %108 = arith.divf %106, %107 : vector<8x128xf32>
      %109 = vector.extract_strided_slice %96 {offsets = [0, 256], sizes = [8, 128], strides = [1, 1]} : vector<8x512xf32> to vector<8x128xf32>
      %110 = math.tanh %109 : vector<8x128xf32>
      %111 = vector.extract_strided_slice %96 {offsets = [0, 384], sizes = [8, 128], strides = [1, 1]} : vector<8x512xf32> to vector<8x128xf32>
      %112 = arith.negf %111 : vector<8x128xf32>
      %113 = math.exp %112 : vector<8x128xf32>
      %cst_42 = arith.constant 1.000000e+00 : f32
      %114 = vector.broadcast %cst_42 : f32 to vector<8x128xf32>
      %115 = arith.addf %114, %113 : vector<8x128xf32>
      %116 = arith.divf %114, %115 : vector<8x128xf32>
      %117 = arith.mulf %108, %85 : vector<8x128xf32>
      %118 = arith.mulf %102, %110 : vector<8x128xf32>
      %119 = arith.addf %117, %118 : vector<8x128xf32>
      %120 = math.tanh %119 : vector<8x128xf32>
      %121 = arith.mulf %116, %120 : vector<8x128xf32>
      %122 = arith.index_cast %92 : i32 to index
      %c0_43 = arith.constant 0 : index
      %123 = vector.load %arg6[%122, %c0_43] : memref<64x128xf32, #tpu.memory_space<vmem>>, vector<8x128xf32>
      tpu.vector_store %arg6[%122, %c0_43], %121 {strides = array<i32>} : memref<64x128xf32, #tpu.memory_space<vmem>>, vector<8x128xf32>,
      %c3_i32 = arith.constant 3 : i32
      %c7_i32_44 = arith.constant 7 : i32
      %124 = arith.subi %c7_i32_44, %c3_i32 : i32
      %c8_i32_45 = arith.constant 8 : i32
      %125 = arith.muli %124, %c8_i32_45 : i32
      %126 = tpu.assume_multiple %125, 8 : i32
      %127 = arith.index_cast %126 : i32 to index
      %c0_46 = arith.constant 0 : index
      %128 = vector.load %arg7[%127, %c0_46] : memref<64x512xf32, #tpu.memory_space<vmem>>, vector<8x512xf32>
      %cst_47 = arith.constant dense<0.000000e+00> : vector<8x512xf32>
      %129 = tpu.matmul %121, %13, %cst_47 {dimension_numbers = #tpu.dot_dimension_numbers<[1], [0], [0], [1], [0, 0, 1, 1], [], []>} : vector<8x128xf32>, vector<128x512xf32>, vector<8x512xf32> -> vector<8x512xf32>
      %130 = arith.addf %128, %129 : vector<8x512xf32>
      %131 = vector.extract_strided_slice %130 {offsets = [0, 0], sizes = [8, 128], strides = [1, 1]} : vector<8x512xf32> to vector<8x128xf32>
      %132 = arith.negf %131 : vector<8x128xf32>
      %133 = math.exp %132 : vector<8x128xf32>
      %cst_48 = arith.constant 1.000000e+00 : f32
      %134 = vector.broadcast %cst_48 : f32 to vector<8x128xf32>
      %135 = arith.addf %134, %133 : vector<8x128xf32>
      %136 = arith.divf %134, %135 : vector<8x128xf32>
      %137 = vector.extract_strided_slice %130 {offsets = [0, 128], sizes = [8, 128], strides = [1, 1]} : vector<8x512xf32> to vector<8x128xf32>
      %138 = arith.negf %137 : vector<8x128xf32>
      %139 = math.exp %138 : vector<8x128xf32>
      %cst_49 = arith.constant 1.000000e+00 : f32
      %140 = vector.broadcast %cst_49 : f32 to vector<8x128xf32>
      %141 = arith.addf %140, %139 : vector<8x128xf32>
      %142 = arith.divf %140, %141 : vector<8x128xf32>
      %143 = vector.extract_strided_slice %130 {offsets = [0, 256], sizes = [8, 128], strides = [1, 1]} : vector<8x512xf32> to vector<8x128xf32>
      %144 = math.tanh %143 : vector<8x128xf32>
      %145 = vector.extract_strided_slice %130 {offsets = [0, 384], sizes = [8, 128], strides = [1, 1]} : vector<8x512xf32> to vector<8x128xf32>
      %146 = arith.negf %145 : vector<8x128xf32>
      %147 = math.exp %146 : vector<8x128xf32>
      %cst_50 = arith.constant 1.000000e+00 : f32
      %148 = vector.broadcast %cst_50 : f32 to vector<8x128xf32>
      %149 = arith.addf %148, %147 : vector<8x128xf32>
      %150 = arith.divf %148, %149 : vector<8x128xf32>
      %151 = arith.mulf %142, %119 : vector<8x128xf32>
      %152 = arith.mulf %136, %144 : vector<8x128xf32>
      %153 = arith.addf %151, %152 : vector<8x128xf32>
      %154 = math.tanh %153 : vector<8x128xf32>
      %155 = arith.mulf %150, %154 : vector<8x128xf32>
      %156 = arith.index_cast %126 : i32 to index
      %c0_51 = arith.constant 0 : index
      %157 = vector.load %arg6[%156, %c0_51] : memref<64x128xf32, #tpu.memory_space<vmem>>, vector<8x128xf32>
      tpu.vector_store %arg6[%156, %c0_51], %155 {strides = array<i32>} : memref<64x128xf32, #tpu.memory_space<vmem>>, vector<8x128xf32>,
      %c4_i32 = arith.constant 4 : i32
      %c7_i32_52 = arith.constant 7 : i32
      %158 = arith.subi %c7_i32_52, %c4_i32 : i32
      %c8_i32_53 = arith.constant 8 : i32
      %159 = arith.muli %158, %c8_i32_53 : i32
      %160 = tpu.assume_multiple %159, 8 : i32
      %161 = arith.index_cast %160 : i32 to index
      %c0_54 = arith.constant 0 : index
      %162 = vector.load %arg7[%161, %c0_54] : memref<64x512xf32, #tpu.memory_space<vmem>>, vector<8x512xf32>
      %cst_55 = arith.constant dense<0.000000e+00> : vector<8x512xf32>
      %163 = tpu.matmul %155, %13, %cst_55 {dimension_numbers = #tpu.dot_dimension_numbers<[1], [0], [0], [1], [0, 0, 1, 1], [], []>} : vector<8x128xf32>, vector<128x512xf32>, vector<8x512xf32> -> vector<8x512xf32>
      %164 = arith.addf %162, %163 : vector<8x512xf32>
      %165 = vector.extract_strided_slice %164 {offsets = [0, 0], sizes = [8, 128], strides = [1, 1]} : vector<8x512xf32> to vector<8x128xf32>
      %166 = arith.negf %165 : vector<8x128xf32>
      %167 = math.exp %166 : vector<8x128xf32>
      %cst_56 = arith.constant 1.000000e+00 : f32
      %168 = vector.broadcast %cst_56 : f32 to vector<8x128xf32>
      %169 = arith.addf %168, %167 : vector<8x128xf32>
      %170 = arith.divf %168, %169 : vector<8x128xf32>
      %171 = vector.extract_strided_slice %164 {offsets = [0, 128], sizes = [8, 128], strides = [1, 1]} : vector<8x512xf32> to vector<8x128xf32>
      %172 = arith.negf %171 : vector<8x128xf32>
      %173 = math.exp %172 : vector<8x128xf32>
      %cst_57 = arith.constant 1.000000e+00 : f32
      %174 = vector.broadcast %cst_57 : f32 to vector<8x128xf32>
      %175 = arith.addf %174, %173 : vector<8x128xf32>
      %176 = arith.divf %174, %175 : vector<8x128xf32>
      %177 = vector.extract_strided_slice %164 {offsets = [0, 256], sizes = [8, 128], strides = [1, 1]} : vector<8x512xf32> to vector<8x128xf32>
      %178 = math.tanh %177 : vector<8x128xf32>
      %179 = vector.extract_strided_slice %164 {offsets = [0, 384], sizes = [8, 128], strides = [1, 1]} : vector<8x512xf32> to vector<8x128xf32>
      %180 = arith.negf %179 : vector<8x128xf32>
      %181 = math.exp %180 : vector<8x128xf32>
      %cst_58 = arith.constant 1.000000e+00 : f32
      %182 = vector.broadcast %cst_58 : f32 to vector<8x128xf32>
      %183 = arith.addf %182, %181 : vector<8x128xf32>
      %184 = arith.divf %182, %183 : vector<8x128xf32>
      %185 = arith.mulf %176, %153 : vector<8x128xf32>
      %186 = arith.mulf %170, %178 : vector<8x128xf32>
      %187 = arith.addf %185, %186 : vector<8x128xf32>
      %188 = math.tanh %187 : vector<8x128xf32>
      %189 = arith.mulf %184, %188 : vector<8x128xf32>
      %190 = arith.index_cast %160 : i32 to index
      %c0_59 = arith.constant 0 : index
      %191 = vector.load %arg6[%190, %c0_59] : memref<64x128xf32, #tpu.memory_space<vmem>>, vector<8x128xf32>
      tpu.vector_store %arg6[%190, %c0_59], %189 {strides = array<i32>} : memref<64x128xf32, #tpu.memory_space<vmem>>, vector<8x128xf32>,
      %c5_i32 = arith.constant 5 : i32
      %c7_i32_60 = arith.constant 7 : i32
      %192 = arith.subi %c7_i32_60, %c5_i32 : i32
      %c8_i32_61 = arith.constant 8 : i32
      %193 = arith.muli %192, %c8_i32_61 : i32
      %194 = tpu.assume_multiple %193, 8 : i32
      %195 = arith.index_cast %194 : i32 to index
      %c0_62 = arith.constant 0 : index
      %196 = vector.load %arg7[%195, %c0_62] : memref<64x512xf32, #tpu.memory_space<vmem>>, vector<8x512xf32>
      %cst_63 = arith.constant dense<0.000000e+00> : vector<8x512xf32>
      %197 = tpu.matmul %189, %13, %cst_63 {dimension_numbers = #tpu.dot_dimension_numbers<[1], [0], [0], [1], [0, 0, 1, 1], [], []>} : vector<8x128xf32>, vector<128x512xf32>, vector<8x512xf32> -> vector<8x512xf32>
      %198 = arith.addf %196, %197 : vector<8x512xf32>
      %199 = vector.extract_strided_slice %198 {offsets = [0, 0], sizes = [8, 128], strides = [1, 1]} : vector<8x512xf32> to vector<8x128xf32>
      %200 = arith.negf %199 : vector<8x128xf32>
      %201 = math.exp %200 : vector<8x128xf32>
      %cst_64 = arith.constant 1.000000e+00 : f32
      %202 = vector.broadcast %cst_64 : f32 to vector<8x128xf32>
      %203 = arith.addf %202, %201 : vector<8x128xf32>
      %204 = arith.divf %202, %203 : vector<8x128xf32>
      %205 = vector.extract_strided_slice %198 {offsets = [0, 128], sizes = [8, 128], strides = [1, 1]} : vector<8x512xf32> to vector<8x128xf32>
      %206 = arith.negf %205 : vector<8x128xf32>
      %207 = math.exp %206 : vector<8x128xf32>
      %cst_65 = arith.constant 1.000000e+00 : f32
      %208 = vector.broadcast %cst_65 : f32 to vector<8x128xf32>
      %209 = arith.addf %208, %207 : vector<8x128xf32>
      %210 = arith.divf %208, %209 : vector<8x128xf32>
      %211 = vector.extract_strided_slice %198 {offsets = [0, 256], sizes = [8, 128], strides = [1, 1]} : vector<8x512xf32> to vector<8x128xf32>
      %212 = math.tanh %211 : vector<8x128xf32>
      %213 = vector.extract_strided_slice %198 {offsets = [0, 384], sizes = [8, 128], strides = [1, 1]} : vector<8x512xf32> to vector<8x128xf32>
      %214 = arith.negf %213 : vector<8x128xf32>
      %215 = math.exp %214 : vector<8x128xf32>
      %cst_66 = arith.constant 1.000000e+00 : f32
      %216 = vector.broadcast %cst_66 : f32 to vector<8x128xf32>
      %217 = arith.addf %216, %215 : vector<8x128xf32>
      %218 = arith.divf %216, %217 : vector<8x128xf32>
      %219 = arith.mulf %210, %187 : vector<8x128xf32>
      %220 = arith.mulf %204, %212 : vector<8x128xf32>
      %221 = arith.addf %219, %220 : vector<8x128xf32>
      %222 = math.tanh %221 : vector<8x128xf32>
      %223 = arith.mulf %218, %222 : vector<8x128xf32>
      %224 = arith.index_cast %194 : i32 to index
      %c0_67 = arith.constant 0 : index
      %225 = vector.load %arg6[%224, %c0_67] : memref<64x128xf32, #tpu.memory_space<vmem>>, vector<8x128xf32>
      tpu.vector_store %arg6[%224, %c0_67], %223 {strides = array<i32>} : memref<64x128xf32, #tpu.memory_space<vmem>>, vector<8x128xf32>,
      %c6_i32 = arith.constant 6 : i32
      %c7_i32_68 = arith.constant 7 : i32
      %226 = arith.subi %c7_i32_68, %c6_i32 : i32
      %c8_i32_69 = arith.constant 8 : i32
      %227 = arith.muli %226, %c8_i32_69 : i32
      %228 = tpu.assume_multiple %227, 8 : i32
      %229 = arith.index_cast %228 : i32 to index
      %c0_70 = arith.constant 0 : index
      %230 = vector.load %arg7[%229, %c0_70] : memref<64x512xf32, #tpu.memory_space<vmem>>, vector<8x512xf32>
      %cst_71 = arith.constant dense<0.000000e+00> : vector<8x512xf32>
      %231 = tpu.matmul %223, %13, %cst_71 {dimension_numbers = #tpu.dot_dimension_numbers<[1], [0], [0], [1], [0, 0, 1, 1], [], []>} : vector<8x128xf32>, vector<128x512xf32>, vector<8x512xf32> -> vector<8x512xf32>
      %232 = arith.addf %230, %231 : vector<8x512xf32>
      %233 = vector.extract_strided_slice %232 {offsets = [0, 0], sizes = [8, 128], strides = [1, 1]} : vector<8x512xf32> to vector<8x128xf32>
      %234 = arith.negf %233 : vector<8x128xf32>
      %235 = math.exp %234 : vector<8x128xf32>
      %cst_72 = arith.constant 1.000000e+00 : f32
      %236 = vector.broadcast %cst_72 : f32 to vector<8x128xf32>
      %237 = arith.addf %236, %235 : vector<8x128xf32>
      %238 = arith.divf %236, %237 : vector<8x128xf32>
      %239 = vector.extract_strided_slice %232 {offsets = [0, 128], sizes = [8, 128], strides = [1, 1]} : vector<8x512xf32> to vector<8x128xf32>
      %240 = arith.negf %239 : vector<8x128xf32>
      %241 = math.exp %240 : vector<8x128xf32>
      %cst_73 = arith.constant 1.000000e+00 : f32
      %242 = vector.broadcast %cst_73 : f32 to vector<8x128xf32>
      %243 = arith.addf %242, %241 : vector<8x128xf32>
      %244 = arith.divf %242, %243 : vector<8x128xf32>
      %245 = vector.extract_strided_slice %232 {offsets = [0, 256], sizes = [8, 128], strides = [1, 1]} : vector<8x512xf32> to vector<8x128xf32>
      %246 = math.tanh %245 : vector<8x128xf32>
      %247 = vector.extract_strided_slice %232 {offsets = [0, 384], sizes = [8, 128], strides = [1, 1]} : vector<8x512xf32> to vector<8x128xf32>
      %248 = arith.negf %247 : vector<8x128xf32>
      %249 = math.exp %248 : vector<8x128xf32>
      %cst_74 = arith.constant 1.000000e+00 : f32
      %250 = vector.broadcast %cst_74 : f32 to vector<8x128xf32>
      %251 = arith.addf %250, %249 : vector<8x128xf32>
      %252 = arith.divf %250, %251 : vector<8x128xf32>
      %253 = arith.mulf %244, %221 : vector<8x128xf32>
      %254 = arith.mulf %238, %246 : vector<8x128xf32>
      %255 = arith.addf %253, %254 : vector<8x128xf32>
      %256 = math.tanh %255 : vector<8x128xf32>
      %257 = arith.mulf %252, %256 : vector<8x128xf32>
      %258 = arith.index_cast %228 : i32 to index
      %c0_75 = arith.constant 0 : index
      %259 = vector.load %arg6[%258, %c0_75] : memref<64x128xf32, #tpu.memory_space<vmem>>, vector<8x128xf32>
      tpu.vector_store %arg6[%258, %c0_75], %257 {strides = array<i32>} : memref<64x128xf32, #tpu.memory_space<vmem>>, vector<8x128xf32>,
      %c7_i32_76 = arith.constant 7 : i32
      %c7_i32_77 = arith.constant 7 : i32
      %260 = arith.subi %c7_i32_77, %c7_i32_76 : i32
      %c8_i32_78 = arith.constant 8 : i32
      %261 = arith.muli %260, %c8_i32_78 : i32
      %262 = tpu.assume_multiple %261, 8 : i32
      %263 = arith.index_cast %262 : i32 to index
      %c0_79 = arith.constant 0 : index
      %264 = vector.load %arg7[%263, %c0_79] : memref<64x512xf32, #tpu.memory_space<vmem>>, vector<8x512xf32>
      %cst_80 = arith.constant dense<0.000000e+00> : vector<8x512xf32>
      %265 = tpu.matmul %257, %13, %cst_80 {dimension_numbers = #tpu.dot_dimension_numbers<[1], [0], [0], [1], [0, 0, 1, 1], [], []>} : vector<8x128xf32>, vector<128x512xf32>, vector<8x512xf32> -> vector<8x512xf32>
      %266 = arith.addf %264, %265 : vector<8x512xf32>
      %267 = vector.extract_strided_slice %266 {offsets = [0, 0], sizes = [8, 128], strides = [1, 1]} : vector<8x512xf32> to vector<8x128xf32>
      %268 = arith.negf %267 : vector<8x128xf32>
      %269 = math.exp %268 : vector<8x128xf32>
      %cst_81 = arith.constant 1.000000e+00 : f32
      %270 = vector.broadcast %cst_81 : f32 to vector<8x128xf32>
      %271 = arith.addf %270, %269 : vector<8x128xf32>
      %272 = arith.divf %270, %271 : vector<8x128xf32>
      %273 = vector.extract_strided_slice %266 {offsets = [0, 128], sizes = [8, 128], strides = [1, 1]} : vector<8x512xf32> to vector<8x128xf32>
      %274 = arith.negf %273 : vector<8x128xf32>
      %275 = math.exp %274 : vector<8x128xf32>
      %cst_82 = arith.constant 1.000000e+00 : f32
      %276 = vector.broadcast %cst_82 : f32 to vector<8x128xf32>
      %277 = arith.addf %276, %275 : vector<8x128xf32>
      %278 = arith.divf %276, %277 : vector<8x128xf32>
      %279 = vector.extract_strided_slice %266 {offsets = [0, 256], sizes = [8, 128], strides = [1, 1]} : vector<8x512xf32> to vector<8x128xf32>
      %280 = math.tanh %279 : vector<8x128xf32>
      %281 = vector.extract_strided_slice %266 {offsets = [0, 384], sizes = [8, 128], strides = [1, 1]} : vector<8x512xf32> to vector<8x128xf32>
      %282 = arith.negf %281 : vector<8x128xf32>
      %283 = math.exp %282 : vector<8x128xf32>
      %cst_83 = arith.constant 1.000000e+00 : f32
      %284 = vector.broadcast %cst_83 : f32 to vector<8x128xf32>
      %285 = arith.addf %284, %283 : vector<8x128xf32>
      %286 = arith.divf %284, %285 : vector<8x128xf32>
      %287 = arith.mulf %278, %255 : vector<8x128xf32>
      %288 = arith.mulf %272, %280 : vector<8x128xf32>
      %289 = arith.addf %287, %288 : vector<8x128xf32>
      %290 = math.tanh %289 : vector<8x128xf32>
      %291 = arith.mulf %286, %290 : vector<8x128xf32>
      %292 = arith.index_cast %262 : i32 to index
      %c0_84 = arith.constant 0 : index
      %293 = vector.load %arg6[%292, %c0_84] : memref<64x128xf32, #tpu.memory_space<vmem>>, vector<8x128xf32>
      tpu.vector_store %arg6[%292, %c0_84], %291 {strides = array<i32>} : memref<64x128xf32, #tpu.memory_space<vmem>>, vector<8x128xf32>,
      %c8_i32_85 = arith.constant 8 : i32
      %c0_86 = arith.constant 0 : index
      %c0_87 = arith.constant 0 : index
      %294 = vector.load %arg8[%c0_86, %c0_87] : memref<8x128xf32, #tpu.memory_space<vmem>>, vector<8x128xf32>
      tpu.vector_store %arg8[%c0_86, %c0_87], %291 {strides = array<i32>} : memref<8x128xf32, #tpu.memory_space<vmem>>, vector<8x128xf32>,
      %c0_88 = arith.constant 0 : index
      %c0_89 = arith.constant 0 : index
      %295 = vector.load %arg9[%c0_88, %c0_89] : memref<8x128xf32, #tpu.memory_space<vmem>>, vector<8x128xf32>
      tpu.vector_store %arg9[%c0_88, %c0_89], %289 {strides = array<i32>} : memref<8x128xf32, #tpu.memory_space<vmem>>, vector<8x128xf32>,
    } else {
    }
    return
  }
  func.func @transform_0(%arg0: i32, %arg1: i32) -> (i32, i32) {
    %c2_i32 = arith.constant 2 : i32
    %0 = arith.muli %c2_i32, %arg1 : i32
    %c0_i32 = arith.constant 0 : i32
    %1 = arith.subi %c0_i32, %0 : i32
    %2 = arith.muli %arg0, %1 : i32
    %3 = arith.addi %arg1, %2 : i32
    %c0_i32_0 = arith.constant 0 : i32
    %c0_i32_1 = arith.constant 0 : i32
    return %3, %c0_i32_0 : i32, i32
  }
  func.func @transform_1(%arg0: i32, %arg1: i32) -> (i32, i32, i32) {
    %c0_i32 = arith.constant 0 : i32
    %c0_i32_0 = arith.constant 0 : i32
    %c0_i32_1 = arith.constant 0 : i32
    return %arg0, %c0_i32, %c0_i32_0 : i32, i32, i32
  }
  func.func @transform_2(%arg0: i32, %arg1: i32) -> (i32, i32, i32) {
    %c0_i32 = arith.constant 0 : i32
    %c0_i32_0 = arith.constant 0 : i32
    %c0_i32_1 = arith.constant 0 : i32
    return %arg0, %c0_i32, %c0_i32_0 : i32, i32, i32
  }
  func.func @transform_3(%arg0: i32, %arg1: i32) -> (i32, i32, i32) {
    %c0_i32 = arith.constant 0 : i32
    %c0_i32_0 = arith.constant 0 : i32
    %c0_i32_1 = arith.constant 0 : i32
    return %arg0, %c0_i32, %c0_i32_0 : i32, i32, i32
  }
  func.func @transform_4(%arg0: i32, %arg1: i32) -> (i32, i32) {
    %c2_i32 = arith.constant 2 : i32
    %0 = arith.muli %c2_i32, %arg1 : i32
    %c0_i32 = arith.constant 0 : i32
    %1 = arith.subi %c0_i32, %0 : i32
    %2 = arith.muli %arg0, %1 : i32
    %3 = arith.addi %arg1, %2 : i32
    %c0_i32_0 = arith.constant 0 : i32
    return %3, %arg0 : i32, i32
  }
}

</mosaic_0001>

<bundles_post_ra>
// kernel: bilstm_forward.2
= control target key start
LH: loop header
LB: loop body
LE: loop exit
PB: predicated region body
PF: predicated region fallthrough
CT: control target
= control target key end

     0   :  { %s4229_s15 = smov 0   ;;  %s4231_s16 = smov 0   ;;  %s5743_s0 = inlined_call_operand.vmem [shape: f32[64,16], index: 0, kind: input, shape index: {}]   ;;  %s5744_s1 = inlined_call_operand.vmem [shape: f32[2,16,512], index: 1, kind: input, shape index: {}]   ;;  %s5745_s2 = inlined_call_operand.vmem [shape: f32[2,128,512], index: 2, kind: input, shape index: {}]   ;;  %s5746_s3 = inlined_call_operand.vmem [shape: f32[2,1,512], index: 3, kind: input, shape index: {}]   ;;  %s5747_s4 = inlined_call_operand.vmem [shape: f32[64,256], index: 4, kind: output, shape index: {}]  }
   0x1   :  { %s4233_s17 = smov 0   ;;  %s4235_s18 = smov 0  }
   0x2   :  { %s4237_s19 = smov 0  }
   0x3 LB: > { %s3764_s20 = sadd.s32 4294967295, %s4199_s19   ;;  %s26_s21 = sadd.s32 1, %s4195_s18  ;;  %s4199_s19 = sphi %s4237_s19, %s14_s19   ;;  %s4195_s18 = sphi %s4235_s18, %s6162_s18   ;;  %s4191_s17 = sphi %s4233_s17, %s6161_s17   ;;  %s4187_s16 = sphi %s4231_s16, %s6160_s16   ;;  %s4183_s15 = sphi %s4229_s15, %s6159_s15  }
   0x4   : > { %p28_p0 = scmp.ge.s32.totalorder %s26_s21, 2  ;;  %s155_s22 = sadd.s32 1, %s4187_s16 }
   0x5   : > { %p165_p1 = scmp.ne.s32.totalorder %s4187_s16, %s4183_s15  ;;  %p166_p2 = scmp.eq.s32.totalorder %s3764_s20, 1 }
   0x6   : > { %s6164_s21 = smov (%p28_p0, %s26_s21), 0  ;;  %p3769_p4 = scmp.ge.s32.totalorder %s4199_s19, 1 }
   0x7   : > { %p4258_p3 = por %p166_p2, %p165_p1  ;;  %s151_s24 = ssub.s32 %s4195_s18, %s6164_s21 }
   0x8   : > { %p230_p5 = scmp.lt.s32.totalorder %s4199_s19, 3  ;;  %p153_p6 = scmp.eq.s32.totalorder %s151_s24, 0 }
   0xa   : > { %p231_p7 = pnand %p3769_p4, %p230_p5 }
   0xb   : > { %s4267_s25 = scalar_select %p153_p6, %s4187_s16, %s155_s22  }
   0xc   : > { %234 = sbr.rel (%p231_p7) target bundleno = 4345 (0x10f9), region = 36 }
  0x11   : > { %s270_s26 = sand.u32 1, %s4183_s15   ;;  %p287_p8 = scmp.lt.s32.totalorder %s4191_s17, 1  ;;  %v5748_v0 = vmov 0.0   ;;  %vm350_vm0 = vcmask 130048  }
  0x12   : > { %s4270_s27 = sshll.u32 %s270_s26, 6  ;;  %310 = vst [vmem:[#allocation3] sm:$0xff] %v5748_v0  ;;  %311 = vst [vmem:[#allocation4] sm:$0xff] %v5748_v0  ;;  %439 = vmatprep.mubr.f32.mxu0 %v5748_v0  ;;  %552 = vmatprep.mubr.f32.mxu1 %v5748_v0  ;;  %p3792_p9 = scmp.ne.s32.totalorder %s4191_s17, 0 }
  0x13   : > { %s4277_s28 = scalar_select %p287_p8, %s4191_s17, 1 }
  0x15   : > { %s3860_s29 = sshll.u32 %s4277_s28, 6  ;;  %s3861_s30 = sshll.u32 %s4277_s28, 9 }
  0x16   : > { %s4284_s7 = scalar_lea.vmem %s5744_s1, %s3860_s29  ;;  %s4289_s10 = scalar_lea.vmem %s5745_s2, %s3861_s30 }
  0x17   : > { %v325_v1 = vld [vmem:[%s4284_s7 + $0x28] sm:$0xff]  ;;  %v4293_v2 = vld [vmem:[%s4289_s10] sm:$0xff]  ;;  %v4299_v4 = vld [vmem:[%s4289_s10 + $0x10] sm:$0xff] }
  0x18   : > { %5847 = vst [vmem:[#allocation6_spill] sm:$0xff] %v4293_v2  ;;  %v4296_v3 = vld [vmem:[%s4289_s10 + $0x8] sm:$0xff]  ;;  %403 = vmatprep.subr.mxu0 %v325_v1  ;;  %5849 = vst [vmem:[#allocation8_spill] sm:$0xff] %v4299_v4  ;;  %v4302_v5 = vld [vmem:[%s4289_s10 + $0x18] sm:$0xff] }
  0x19   : > { %5848 = vst [vmem:[#allocation7_spill] sm:$0xff] %v4296_v3  ;;  %5850 = vst [vmem:[#allocation9_spill] sm:$0xff] %v4302_v5  ;;  %v4305_v6 = vld [vmem:[%s4289_s10 + $0x20] sm:$0xff]  ;;  %v4308_v7 = vld [vmem:[%s4289_s10 + $0x28] sm:$0xff] }
  0x1a   : > { %5851 = vst [vmem:[#allocation10_spill] sm:$0xff] %v4305_v6  ;;  %5852 = vst [vmem:[#allocation11_spill] sm:$0xff] %v4308_v7  ;;  %v4311_v8 = vld [vmem:[%s4289_s10 + $0x30] sm:$0xff]  ;;  %v4314_v9 = vld [vmem:[%s4289_s10 + $0x38] sm:$0xff]  ;;  %v5868_v7 = vmov 0.0  }
  0x1b   : > { %5853 = vst [vmem:[#allocation12_spill] sm:$0xff] %v4311_v8  ;;  %5854 = vst [vmem:[#allocation13_spill] sm:$0xff] %v4314_v9  ;;  %v4317_v10 = vld [vmem:[%s4289_s10 + $0x40] sm:$0xff]  ;;  %v4320_v11 = vld [vmem:[%s4289_s10 + $0x48] sm:$0xff] }
  0x1c   : > { %5855 = vst [vmem:[#allocation14_spill] sm:$0xff] %v4317_v10  ;;  %5856 = vst [vmem:[#allocation15_spill] sm:$0xff] %v4320_v11  ;;  %v4323_v12 = vld [vmem:[%s4289_s10 + $0x50] sm:$0xff]  ;;  %v4326_v13 = vld [vmem:[%s4289_s10 + $0x58] sm:$0xff] }
  0x1d   : > { %5857 = vst [vmem:[#allocation16_spill] sm:$0xff] %v4323_v12  ;;  %5858 = vst [vmem:[#allocation17_spill] sm:$0xff] %v4326_v13  ;;  %v4329_v14 = vld [vmem:[%s4289_s10 + $0x60] sm:$0xff]  ;;  %v4332_v15 = vld [vmem:[%s4289_s10 + $0x68] sm:$0xff] }
  0x1e   : > { %5859 = vst [vmem:[#allocation18_spill] sm:$0xff] %v4329_v14  ;;  %5860 = vst [vmem:[#allocation19_spill] sm:$0xff] %v4332_v15  ;;  %v4335_v16 = vld [vmem:[%s4289_s10 + $0x70] sm:$0xff]  ;;  %v4338_v17 = vld [vmem:[%s4289_s10 + $0x78] sm:$0xff] }
  0x1f   : > { %5861 = vst [vmem:[#allocation20_spill] sm:$0xff] %v4335_v16  ;;  %5862 = vst [vmem:[#allocation21_spill] sm:$0xff] %v4338_v17  ;;  %v4341_v18 = vld [vmem:[%s4289_s10 + $0x80] sm:$0xff]  ;;  %v4344_v19 = vld [vmem:[%s4289_s10 + $0x88] sm:$0xff] }
  0x20   : > { %5863 = vst [vmem:[#allocation22_spill] sm:$0xff] %v4341_v18  ;;  %v4347_v20 = vld [vmem:[%s4289_s10 + $0x90] sm:$0xff]  ;;  %v4350_v21 = vld [vmem:[%s4289_s10 + $0x98] sm:$0xff]  ;;  %v4353_v22 = vld [vmem:[%s4289_s10 + $0xa0] sm:$0xff] }
  0x21   : > { %5864 = vst [vmem:[#allocation23_spill] sm:$0xff] %v4347_v20  ;;  %v4356_v23 = vld [vmem:[%s4289_s10 + $0xa8] sm:$0xff]  ;;  %v4359_v24 = vld [vmem:[%s4289_s10 + $0xb0] sm:$0xff]  ;;  %v4362_v25 = vld [vmem:[%s4289_s10 + $0xb8] sm:$0xff] }
  0x22   : > { %5865 = vst [vmem:[#allocation24_spill] sm:$0xff] %v4359_v24  ;;  %v4365_v26 = vld [vmem:[%s4289_s10 + $0xc0] sm:$0xff]  ;;  %v4368_v27 = vld [vmem:[%s4289_s10 + $0xc8] sm:$0xff]  ;;  %v4371_v28 = vld [vmem:[%s4289_s10 + $0xd0] sm:$0xff] }
  0x23   : > { %v4374_v29 = vld [vmem:[%s4289_s10 + $0xd8] sm:$0xff]  ;;  %v4377_v30 = vld [vmem:[%s4289_s10 + $0xe0] sm:$0xff]  ;;  %v4380_v31 = vld [vmem:[%s4289_s10 + $0xe8] sm:$0xff] }
  0x24   : > { %v4383_v32 = vld [vmem:[%s4289_s10 + $0xf0] sm:$0xff]  ;;  %v4386_v33 = vld [vmem:[%s4289_s10 + $0xf8] sm:$0xff]  ;;  %v4389_v34 = vld [vmem:[%s4289_s10 + $0x100] sm:$0xff] }
  0x25   : > { %v4392_v35 = vld [vmem:[%s4289_s10 + $0x108] sm:$0xff]  ;;  %v4395_v36 = vld [vmem:[%s4289_s10 + $0x110] sm:$0xff]  ;;  %v4398_v37 = vld [vmem:[%s4289_s10 + $0x118] sm:$0xff] }
  0x26   : > { %v4401_v38 = vld [vmem:[%s4289_s10 + $0x120] sm:$0xff]  ;;  %v4404_v39 = vld [vmem:[%s4289_s10 + $0x128] sm:$0xff]  ;;  %v4407_v40 = vld [vmem:[%s4289_s10 + $0x130] sm:$0xff] }
  0x27   : > { %v4410_v41 = vld [vmem:[%s4289_s10 + $0x138] sm:$0xff]  ;;  %v4413_v42 = vld [vmem:[%s4289_s10 + $0x140] sm:$0xff]  ;;  %v4416_v43 = vld [vmem:[%s4289_s10 + $0x148] sm:$0xff] }
  0x28   : > { %v4419_v44 = vld [vmem:[%s4289_s10 + $0x150] sm:$0xff]  ;;  %v4422_v45 = vld [vmem:[%s4289_s10 + $0x158] sm:$0xff]  ;;  %v4425_v46 = vld [vmem:[%s4289_s10 + $0x160] sm:$0xff] }
  0x29   : > { %v4428_v47 = vld [vmem:[%s4289_s10 + $0x168] sm:$0xff]  ;;  %v4431_v48 = vld [vmem:[%s4289_s10 + $0x170] sm:$0xff]  ;;  %v4434_v49 = vld [vmem:[%s4289_s10 + $0x178] sm:$0xff] }
  0x2a   : > { %v4437_v50 = vld [vmem:[%s4289_s10 + $0x180] sm:$0xff]  ;;  %v4440_v51 = vld [vmem:[%s4289_s10 + $0x188] sm:$0xff]  ;;  %v4443_v52 = vld [vmem:[%s4289_s10 + $0x190] sm:$0xff] }
  0x2b   : > { %v4446_v53 = vld [vmem:[%s4289_s10 + $0x198] sm:$0xff]  ;;  %v4449_v54 = vld [vmem:[%s4289_s10 + $0x1a0] sm:$0xff]  ;;  %v4452_v55 = vld [vmem:[%s4289_s10 + $0x1a8] sm:$0xff] }
  0x2c   : > { %v4455_v56 = vld [vmem:[%s4289_s10 + $0x1b0] sm:$0xff]  ;;  %v4458_v57 = vld [vmem:[%s4289_s10 + $0x1b8] sm:$0xff]  ;;  %v4461_v58 = vld [vmem:[%s4289_s10 + $0x1c0] sm:$0xff] }
  0x2d   : > { %v4464_v59 = vld [vmem:[%s4289_s10 + $0x1c8] sm:$0xff]  ;;  %v4467_v60 = vld [vmem:[%s4289_s10 + $0x1d0] sm:$0xff]  ;;  %v4470_v61 = vld [vmem:[%s4289_s10 + $0x1d8] sm:$0xff] }
  0x2e   : > { %v4473_v62 = vld [vmem:[%s4289_s10 + $0x1e0] sm:$0xff]  ;;  %v4476_v63 = vld [vmem:[%s4289_s10 + $0x1e8] sm:$0xff]  ;;  %v4479_v1 = vld [vmem:[%s4289_s10 + $0x1f0] sm:$0xff] }
  0x2f   : > { %5866 = vst [vmem:[#allocation25_spill] sm:$0xff] %v4476_v63  ;;  %v4482_v0 = vld [vmem:[%s4289_s10 + $0x1f8] sm:$0xff]  ;;  %v312_v4 = vld [vmem:[%s5743_s0] sm:$0xff]  ;;  %v326_v8 = vld [vmem:[%s4284_s7 + $0x30] sm:$0xff]  ;;  %s3775_s10 = sshll.u32 %s4277_s28, 2  ;;  %s4590_s28 = scalar_lea.vmem [#allocation5], %s4270_s27 }
  0x30   : > { %5867 = vst [vmem:[#allocation26_spill] sm:$0xff] %v4482_v0  ;;  %v327_v5 = vld [vmem:[%s4284_s7 + $0x38] sm:$0xff]  ;;  %v324_v2 = vld [vmem:[%s4284_s7 + $0x20] sm:$0xff]  ;;  %v321_v3 = vld [vmem:[%s4284_s7 + $0x8] sm:$0xff]  ;;  %s300_s13 = scalar_lea.vmem %s5746_s3, %s3775_s10 }
  0x31   : > { %516 = vmatprep.subr.mxu1 %v327_v5  ;;  %404 = vmatpush1.msra.mxu0 %v324_v2  ;;  %v323_v9 = vld [vmem:[%s4284_s7 + $0x18] sm:$0xff]  ;;  %v320_v6 = vld [vmem:[%s4284_s7] sm:$0xff]  ;;  %v322_v12 = vld [vmem:[%s4284_s7 + $0x10] sm:$0xff] }
  0x32   : > { %517 = vmatpush1.msra.mxu1 %v326_v8  ;;  %405 = vmatprep.subr.mxu0 %v321_v3  ;;  %v313_v2 = vld [vmem:[%s5743_s0 + $0x8] sm:$0xff]  ;;  %v314_v3 = vld [vmem:[%s5743_s0 + $0x10] sm:$0xff]  ;;  %v316_v5 = vld [vmem:[%s5743_s0 + $0x20] sm:$0xff] }
  0x33   : > { %518 = vmatprep.subr.mxu1 %v323_v9  ;;  %406 = vmatpush1.msra.mxu0 %v320_v6  ;;  %v317_v6 = vld [vmem:[%s5743_s0 + $0x28] sm:$0xff]  ;;  %v318_v8 = vld [vmem:[%s5743_s0 + $0x30] sm:$0xff]  ;;  %v319_v9 = vld [vmem:[%s5743_s0 + $0x38] sm:$0xff] }
  0x34   : > { %519 = vmatpush1.msra.mxu1 %v322_v12  ;;  %3776 = vmatmul.mubr.msk.f32.vlgmr.msra.gmra.mxu0 %vm350_vm0, %v312_v4  ;;  %v330_v12 = vlaneseq }
  0x35   : > { %3784 = vmatmul.mubr.msk.f32.vlgmr.msra.gmra.mxu1 %vm350_vm0, %v312_v4  ;;  %445 = vmatprep.mubr.f32.mxu0 %v5868_v7  ;;  %v315_v4 = vld [vmem:[%s5743_s0 + $0x18] sm:$0xff] }
  0x36   : > { %558 = vmatprep.mubr.f32.mxu1 %v5868_v7 }
  0x38   : > { %3777 = vmatmul.mubr.msk.f32.gmra.mxu0 %vm350_vm0, %v313_v2 }
  0x39   : > { %3785 = vmatmul.mubr.msk.f32.gmra.mxu1 %vm350_vm0, %v313_v2  ;;  %451 = vmatprep.mubr.f32.mxu0 %v5868_v7  ;;  %v331_v2 = vshrl.u32 %v330_v12, 7 }
  0x3a   : > { %564 = vmatprep.mubr.f32.mxu1 %v5868_v7 }
  0x3c   : > { %3778 = vmatmul.mubr.msk.f32.gmra.mxu0 %vm350_vm0, %v314_v3 }
  0x3d   : > { %3786 = vmatmul.mubr.msk.f32.gmra.mxu1 %vm350_vm0, %v314_v3  ;;  %457 = vmatprep.mubr.f32.mxu0 %v5868_v7  ;;  %v332_v3 = vsub.s32 0, %v331_v2 }
  0x3e   : > { %570 = vmatprep.mubr.f32.mxu1 %v5868_v7 }
  0x40   : > { %3779 = vmatmul.mubr.msk.f32.gmra.mxu0 %vm350_vm0, %v315_v4 }
  0x41   : > { %3787 = vmatmul.mubr.msk.f32.gmra.mxu1 %vm350_vm0, %v315_v4  ;;  %463 = vmatprep.mubr.f32.mxu0 %v5868_v7  ;;  %v328_v4 = vld [vmem:[%s300_s13] sm:$0xf] }
  0x42   : > { %576 = vmatprep.mubr.f32.mxu1 %v5868_v7  ;;  %v4549_v13 = vrot.slane %v328_v4, %v332_v3 }
  0x44   : > { %3780 = vmatmul.mubr.msk.f32.gmra.mxu0 %vm350_vm0, %v316_v5 }
  0x45   : > { %3788 = vmatmul.mubr.msk.f32.gmra.mxu1 %vm350_vm0, %v316_v5  ;;  %469 = vmatprep.mubr.f32.mxu0 %v5868_v7  ;;  %v340_v5 = vsub.s32 2, %v331_v2 }
  0x46   : > { %582 = vmatprep.mubr.f32.mxu1 %v5868_v7 }
  0x47   : > { %v4551_v10 = vrot.slane %v328_v4, %v340_v5 }
  0x48   : > { %3781 = vmatmul.mubr.msk.f32.gmra.mxu0 %vm350_vm0, %v317_v6 }
  0x49   : > { %3789 = vmatmul.mubr.msk.f32.gmra.mxu1 %vm350_vm0, %v317_v6  ;;  %475 = vmatprep.mubr.f32.mxu0 %v5868_v7  ;;  %v336_v6 = vsub.s32 1, %v331_v2 }
  0x4a   : > { %588 = vmatprep.mubr.f32.mxu1 %v5868_v7 }
  0x4c   : > { %3782 = vmatmul.mubr.msk.f32.gmra.mxu0 %vm350_vm0, %v318_v8 }
  0x4d   : > { %3790 = vmatmul.mubr.msk.f32.gmra.mxu1 %vm350_vm0, %v318_v8  ;;  %481 = vmatprep.mubr.f32.mxu0 %v5868_v7  ;;  %v344_v8 = vsub.s32 3, %v331_v2 }
  0x4e   : > { %594 = vmatprep.mubr.f32.mxu1 %v5868_v7  ;;  %v4553_v7 = vrot.slane %v328_v4, %v336_v6 }
  0x50   : > { %3783 = vmatmul.mubr.msk.f32.gmra.mxu0 %vm350_vm0, %v319_v9 }
  0x51   : > { %3791 = vmatmul.mubr.msk.f32.gmra.mxu1 %vm350_vm0, %v319_v9  ;;  %v4555_v9 = vrot.slane %v328_v4, %v344_v8 }
  0xf4   : > { %v441_v16 = vpop.f32.mrf.mxu0 }
  0xf5   : > { %v442_v12 = vadd.f32 %v441_v16, %v4549_v13  ;;  %v554_v11 = vpop.f32.mrf.mxu1 }
  0xf6   : > { %v555_v17 = vadd.f32 %v554_v11, %v4551_v10  ;;  %v443_v14 = vpop.f32.mrf.mxu0 }
  0xf7   : > { %601 = vst [vmem:[#allocation2 + $0xb0] sm:$0xff] %v442_v12  ;;  %v444_v20 = vadd.f32 %v443_v14, %v4553_v7  ;;  %v556_v15 = vpop.f32.mrf.mxu1 }
  0xf8   : > { %603 = vst [vmem:[#allocation2 + $0xd8] sm:$0xff] %v555_v17  ;;  %v557_v2 = vadd.f32 %v556_v15, %v4555_v9  ;;  %v447_v3 = vpop.f32.mrf.mxu0 }
  0xf9   : > { %602 = vst [vmem:[#allocation2] sm:$0xff] %v444_v20  ;;  %v448_v5 = vadd.f32 %v447_v3, %v4549_v13  ;;  %v560_v6 = vpop.f32.mrf.mxu1 }
  0xfa   : > { %604 = vst [vmem:[#allocation2 + $0x18] sm:$0xff] %v557_v2  ;;  %v561_v4 = vadd.f32 %v560_v6, %v4551_v10  ;;  %v449_v16 = vpop.f32.mrf.mxu0 }
  0xfb   : > { %605 = vst [vmem:[#allocation2 + $0x50] sm:$0xff] %v448_v5  ;;  %v450_v11 = vadd.f32 %v449_v16, %v4553_v7  ;;  %v562_v8 = vpop.f32.mrf.mxu1 }
  0xfc   : > { %607 = vst [vmem:[#allocation2 + $0x30] sm:$0xff] %v561_v4  ;;  %v563_v14 = vadd.f32 %v562_v8, %v4555_v9  ;;  %v453_v12 = vpop.f32.mrf.mxu0 }
  0xfd   : > { %606 = vst [vmem:[#allocation2 + $0x68] sm:$0xff] %v450_v11  ;;  %v454_v15 = vadd.f32 %v453_v12, %v4549_v13  ;;  %v566_v17 = vpop.f32.mrf.mxu1 }
  0xfe   : > { %608 = vst [vmem:[#allocation2 + $0x48] sm:$0xff] %v563_v14  ;;  %v567_v20 = vadd.f32 %v566_v17, %v4551_v10  ;;  %v455_v3 = vpop.f32.mrf.mxu0 }
  0xff   : > { %609 = vst [vmem:[#allocation2 + $0x80] sm:$0xff] %v454_v15  ;;  %v456_v2 = vadd.f32 %v455_v3, %v4553_v7  ;;  %v568_v6 = vpop.f32.mrf.mxu1 }
 0x100   : > { %611 = vst [vmem:[#allocation2 + $0xe8] sm:$0xff] %v567_v20  ;;  %v569_v5 = vadd.f32 %v568_v6, %v4555_v9  ;;  %v459_v16 = vpop.f32.mrf.mxu0 }
 0x101   : > { %610 = vst [vmem:[#allocation2 + $0x88] sm:$0xff] %v456_v2  ;;  %v460_v4 = vadd.f32 %v459_v16, %v4549_v13  ;;  %v572_v8 = vpop.f32.mrf.mxu1 }
 0x102   : > { %612 = vst [vmem:[#allocation2 + $0xb8] sm:$0xff] %v569_v5  ;;  %v573_v11 = vadd.f32 %v572_v8, %v4551_v10  ;;  %v461_v12 = vpop.f32.mrf.mxu0 }
 0x103   : > { %613 = vst [vmem:[#allocation2 + $0x60] sm:$0xff] %v460_v4  ;;  %v462_v14 = vadd.f32 %v461_v12, %v4553_v7  ;;  %v574_v17 = vpop.f32.mrf.mxu1 }
 0x104   : > { %615 = vst [vmem:[#allocation2 + $0x8] sm:$0xff] %v573_v11  ;;  %v575_v15 = vadd.f32 %v574_v17, %v4555_v9  ;;  %v465_v3 = vpop.f32.mrf.mxu0 }
 0x105   : > { %614 = vst [vmem:[#allocation2 + $0xf0] sm:$0xff] %v462_v14  ;;  %v466_v20 = vadd.f32 %v465_v3, %v4549_v13  ;;  %v578_v6 = vpop.f32.mrf.mxu1 }
 0x106   : > { %616 = vst [vmem:[#allocation2 + $0x78] sm:$0xff] %v575_v15  ;;  %v579_v2 = vadd.f32 %v578_v6, %v4551_v10  ;;  %v467_v16 = vpop.f32.mrf.mxu0 }
 0x107   : > { %617 = vst [vmem:[#allocation2 + $0x38] sm:$0xff] %v466_v20  ;;  %v468_v5 = vadd.f32 %v467_v16, %v4553_v7  ;;  %v580_v8 = vpop.f32.mrf.mxu1 }
 0x108   : > { %619 = vst [vmem:[#allocation2 + $0x40] sm:$0xff] %v579_v2  ;;  %v581_v4 = vadd.f32 %v580_v8, %v4555_v9  ;;  %v471_v12 = vpop.f32.mrf.mxu0 }
 0x109   : > { %618 = vst [vmem:[#allocation2 + $0x58] sm:$0xff] %v468_v5  ;;  %v472_v11 = vadd.f32 %v471_v12, %v4549_v13  ;;  %v584_v17 = vpop.f32.mrf.mxu1 }
 0x10a   : > { %620 = vst [vmem:[#allocation2 + $0xc8] sm:$0xff] %v581_v4  ;;  %v585_v14 = vadd.f32 %v584_v17, %v4551_v10  ;;  %v473_v3 = vpop.f32.mrf.mxu0 }
 0x10b   : > { %621 = vst [vmem:[#allocation2 + $0xe0] sm:$0xff] %v472_v11  ;;  %v474_v15 = vadd.f32 %v473_v3, %v4553_v7  ;;  %v586_v6 = vpop.f32.mrf.mxu1 }
 0x10c   : > { %623 = vst [vmem:[#allocation2 + $0x70] sm:$0xff] %v585_v14  ;;  %v587_v20 = vadd.f32 %v586_v6, %v4555_v9  ;;  %v477_v16 = vpop.f32.mrf.mxu0 }
 0x10d   : > { %622 = vst [vmem:[#allocation2 + $0x90] sm:$0xff] %v474_v15  ;;  %v478_v2 = vadd.f32 %v477_v16, %v4549_v13  ;;  %v590_v8 = vpop.f32.mrf.mxu1 }
 0x10e   : > { %624 = vst [vmem:[#allocation2 + $0xc0] sm:$0xff] %v587_v20  ;;  %v591_v5 = vadd.f32 %v590_v8, %v4551_v10  ;;  %v479_v12 = vpop.f32.mrf.mxu0 }
 0x10f   : > { %625 = vst [vmem:[#allocation2 + $0xa8] sm:$0xff] %v478_v2  ;;  %v480_v4 = vadd.f32 %v479_v12, %v4553_v7  ;;  %v592_v17 = vpop.f32.mrf.mxu1 }
 0x110   : > { %627 = vst [vmem:[#allocation2 + $0x10] sm:$0xff] %v591_v5  ;;  %v593_v11 = vadd.f32 %v592_v17, %v4555_v9  ;;  %v483_v14 = vpop.f32.mrf.mxu0 }
 0x111   : > { %626 = vst [vmem:[#allocation2 + $0xd0] sm:$0xff] %v480_v4  ;;  %v484_v3 = vadd.f32 %v483_v14, %v4549_v13  ;;  %v596_v15 = vpop.f32.mrf.mxu1 }
 0x112   : > { %628 = vst [vmem:[#allocation2 + $0x28] sm:$0xff] %v593_v11  ;;  %v597_v6 = vadd.f32 %v596_v15, %v4551_v10  ;;  %v485_v20 = vpop.f32.mrf.mxu0  ;;  %700 = sbr.rel (%p3792_p9) target bundleno = 2304 (0x900), region = 44 }
 0x113   : > { %629 = vst [vmem:[#allocation2 + $0xa0] sm:$0xff] %v484_v3  ;;  %v486_v16 = vadd.f32 %v485_v20, %v4553_v7  ;;  %v598_v2 = vpop.f32.mrf.mxu1 }
 0x114   : > { %631 = vst [vmem:[#allocation2 + $0x20] sm:$0xff] %v597_v6  ;;  %v599_v8 = vadd.f32 %v598_v2, %v4555_v9 }
 0x115   : > { %630 = vst [vmem:[#allocation2 + $0xf8] sm:$0xff] %v486_v16 }
 0x116   : > { %632 = vst [vmem:[#allocation2 + $0x98] sm:$0xff] %v599_v8 }
 0x117   : > { %710 = vmatprep.subr.mxu0 %v4476_v63  ;;  %781 = vmatprep.subr.mxu1 %v4482_v0  ;;  %v5784_v10 = vmov 0.0   ;;  %v5869_v13 = vld [vmem:[#allocation19_spill] sm:$0xff]  ;;  %v5871_v9 = vld [vmem:[#allocation18_spill] sm:$0xff]  ;;  %v5872_v5 = vld [vmem:[#allocation21_spill] sm:$0xff] }
 0x118   : > { %711 = vmatpush1.msra.mxu0 %v4473_v62  ;;  %782 = vmatpush1.msra.mxu1 %v4479_v1  ;;  %v5870_v7 = vld [vmem:[#allocation23_spill] sm:$0xff]  ;;  %v5874_v4 = vld [vmem:[#allocation20_spill] sm:$0xff]  ;;  %v5875_v17 = vld [vmem:[#allocation14_spill] sm:$0xff] }
 0x119   : > { %712 = vmatprep.subr.mxu0 %v4464_v59  ;;  %783 = vmatprep.subr.mxu1 %v4470_v61  ;;  %v5873_v12 = vld [vmem:[#allocation15_spill] sm:$0xff]  ;;  %v5876_v11 = vld [vmem:[#allocation17_spill] sm:$0xff]  ;;  %v5878_v3 = vld [vmem:[#allocation16_spill] sm:$0xff] }
 0x11a   : > { %713 = vmatpush1.msra.mxu0 %v4461_v58  ;;  %784 = vmatpush1.msra.mxu1 %v4467_v60  ;;  %v5877_v14 = vld [vmem:[#allocation11_spill] sm:$0xff]  ;;  %v5879_v15 = vld [vmem:[#allocation10_spill] sm:$0xff]  ;;  %v701_v6 = vld [vmem:[#allocation3] sm:$0xff] }
 0x11b   : > { %714 = vmatprep.subr.mxu0 %v4452_v55  ;;  %785 = vmatprep.subr.mxu1 %v4458_v57  ;;  %v5880_v20 = vld [vmem:[#allocation13_spill] sm:$0xff]  ;;  %v5881_v16 = vld [vmem:[#allocation7_spill] sm:$0xff]  ;;  %v5882_v2 = vld [vmem:[#allocation12_spill] sm:$0xff] }
 0x11c   : > { %715 = vmatpush1.msra.mxu0 %v4449_v54  ;;  %786 = vmatpush1.msra.mxu1 %v4455_v56  ;;  %v5883_v8 = vld [vmem:[#allocation6_spill] sm:$0xff] }
 0x11d   : > { %716 = vmatprep.subr.mxu0 %v4440_v51  ;;  %787 = vmatprep.subr.mxu1 %v4446_v53 }
 0x11e   : > { %717 = vmatpush1.msra.mxu0 %v4437_v50  ;;  %788 = vmatpush1.msra.mxu1 %v4443_v52 }
 0x11f   : > { %718 = vmatprep.subr.mxu0 %v4428_v47  ;;  %789 = vmatprep.subr.mxu1 %v4434_v49 }
 0x120   : > { %719 = vmatpush1.msra.mxu0 %v4425_v46  ;;  %790 = vmatpush1.msra.mxu1 %v4431_v48 }
 0x121   : > { %720 = vmatprep.subr.mxu0 %v4416_v43  ;;  %791 = vmatprep.subr.mxu1 %v4422_v45 }
 0x122   : > { %721 = vmatpush1.msra.mxu0 %v4413_v42  ;;  %792 = vmatpush1.msra.mxu1 %v4419_v44 }
 0x123   : > { %722 = vmatprep.subr.mxu0 %v4404_v39  ;;  %793 = vmatprep.subr.mxu1 %v4410_v41 }
 0x124   : > { %723 = vmatpush1.msra.mxu0 %v4401_v38  ;;  %794 = vmatpush1.msra.mxu1 %v4407_v40 }
 0x125   : > { %724 = vmatprep.subr.mxu0 %v4392_v35  ;;  %795 = vmatprep.subr.mxu1 %v4398_v37 }
 0x126   : > { %725 = vmatpush1.msra.mxu0 %v4389_v34  ;;  %774 = vmatprep.mubr.f32.mxu0 %v5784_v10  ;;  %v5884_v10 = vld [vmem:[#allocation9_spill] sm:$0xff] }
 0x127   : > { %726 = vmatprep.subr.mxu0 %v4380_v31  ;;  %796 = vmatpush1.msra.mxu1 %v4395_v36 }
 0x128   : > { %727 = vmatpush1.msra.mxu0 %v4377_v30  ;;  %797 = vmatprep.subr.mxu1 %v4386_v33 }
 0x129   : > { %728 = vmatprep.subr.mxu0 %v4368_v27  ;;  %798 = vmatpush1.msra.mxu1 %v4383_v32 }
 0x12a   : > { %729 = vmatpush1.msra.mxu0 %v4365_v26  ;;  %799 = vmatprep.subr.mxu1 %v4374_v29 }
 0x12b   : > { %730 = vmatprep.subr.mxu0 %v4356_v23  ;;  %800 = vmatpush1.msra.mxu1 %v4371_v28 }
 0x12c   : > { %731 = vmatpush1.msra.mxu0 %v4353_v22  ;;  %801 = vmatprep.subr.mxu1 %v4362_v25 }
 0x12d   : > { %732 = vmatprep.subr.mxu0 %v4344_v19  ;;  %802 = vmatpush1.msra.mxu1 %v4359_v24 }
 0x12e   : > { %733 = vmatpush1.msra.mxu0 %v4341_v18  ;;  %803 = vmatprep.subr.mxu1 %v4350_v21 }
 0x12f   : > { %734 = vmatprep.subr.mxu0 %v5869_v13  ;;  %804 = vmatpush1.msra.mxu1 %v5870_v7 }
 0x130   : > { %735 = vmatpush1.msra.mxu0 %v5871_v9  ;;  %805 = vmatprep.subr.mxu1 %v5872_v5 }
 0x131   : > { %736 = vmatprep.subr.mxu0 %v5873_v12  ;;  %806 = vmatpush1.msra.mxu1 %v5874_v4 }
 0x132   : > { %737 = vmatpush1.msra.mxu0 %v5875_v17  ;;  %807 = vmatprep.subr.mxu1 %v5876_v11  ;;  %v5885_v17 = vld [vmem:[#allocation8_spill] sm:$0xff]  ;;  %v5886_v11 = vmov 0.0  }
 0x133   : > { %738 = vmatprep.subr.mxu0 %v5877_v14  ;;  %808 = vmatpush1.msra.mxu1 %v5878_v3 }
 0x134   : > { %739 = vmatpush1.msra.mxu0 %v5879_v15  ;;  %809 = vmatprep.subr.mxu1 %v5880_v20 }
 0x135   : > { %740 = vmatprep.subr.mxu0 %v5881_v16  ;;  %810 = vmatpush1.msra.mxu1 %v5882_v2 }
 0x136   : > { %741 = vmatpush1.msra.mxu0 %v5883_v8  ;;  %811 = vmatprep.subr.mxu1 %v5884_v10 }
 0x137   : > { %775 = vmatmul.mubr.f32.vlgmr.msra.gmra.mxu0 %v701_v6  ;;  %812 = vmatpush1.msra.mxu1 %v5885_v17 }
 0x138   : > { %845 = vmatprep.mubr.f32.mxu1 %v5886_v11  ;;  %888 = vmatprep.subr.mxu0 %v4476_v63 }
 0x139   : > { %846 = vmatmul.mubr.f32.vlgmr.msra.gmra.mxu1 %v701_v6  ;;  %959 = vmatprep.subr.mxu1 %v4482_v0  ;;  %v5887_v6 = vld [vmem:[#allocation17_spill] sm:$0xff] }
 0x13a   : > { %889 = vmatpush1.msra.mxu0 %v4473_v62  ;;  %960 = vmatpush1.msra.mxu1 %v4479_v1 }
 0x13b   : > { %890 = vmatprep.subr.mxu0 %v4464_v59  ;;  %961 = vmatprep.subr.mxu1 %v4470_v61 }
 0x13c   : > { %891 = vmatpush1.msra.mxu0 %v4461_v58  ;;  %962 = vmatpush1.msra.mxu1 %v4467_v60 }
 0x13d   : > { %892 = vmatprep.subr.mxu0 %v4452_v55  ;;  %963 = vmatprep.subr.mxu1 %v4458_v57 }
 0x13e   : > { %893 = vmatpush1.msra.mxu0 %v4449_v54  ;;  %964 = vmatpush1.msra.mxu1 %v4455_v56 }
 0x13f   : > { %894 = vmatprep.subr.mxu0 %v4440_v51  ;;  %965 = vmatprep.subr.mxu1 %v4446_v53 }
 0x140   : > { %895 = vmatpush1.msra.mxu0 %v4437_v50  ;;  %966 = vmatpush1.msra.mxu1 %v4443_v52 }
 0x141   : > { %896 = vmatprep.subr.mxu0 %v4428_v47  ;;  %967 = vmatprep.subr.mxu1 %v4434_v49 }
 0x142   : > { %897 = vmatpush1.msra.mxu0 %v4425_v46  ;;  %968 = vmatpush1.msra.mxu1 %v4431_v48 }
 0x143   : > { %898 = vmatprep.subr.mxu0 %v4416_v43  ;;  %969 = vmatprep.subr.mxu1 %v4422_v45 }
 0x144   : > { %899 = vmatpush1.msra.mxu0 %v4413_v42  ;;  %970 = vmatpush1.msra.mxu1 %v4419_v44 }
 0x145   : > { %900 = vmatprep.subr.mxu0 %v4404_v39  ;;  %971 = vmatprep.subr.mxu1 %v4410_v41 }
 0x146   : > { %901 = vmatpush1.msra.mxu0 %v4401_v38  ;;  %972 = vmatpush1.msra.mxu1 %v4407_v40 }
 0x147   : > { %902 = vmatprep.subr.mxu0 %v4392_v35  ;;  %973 = vmatprep.subr.mxu1 %v4398_v37 }
 0x148   : > { %903 = vmatpush1.msra.mxu0 %v4389_v34  ;;  %974 = vmatpush1.msra.mxu1 %v4395_v36 }
 0x149   : > { %904 = vmatprep.subr.mxu0 %v4380_v31  ;;  %975 = vmatprep.subr.mxu1 %v4386_v33 }
 0x14a   : > { %905 = vmatpush1.msra.mxu0 %v4377_v30  ;;  %976 = vmatpush1.msra.mxu1 %v4383_v32 }
 0x14b   : > { %906 = vmatprep.subr.mxu0 %v4368_v27  ;;  %977 = vmatprep.subr.mxu1 %v4374_v29 }
 0x14c   : > { %907 = vmatpush1.msra.mxu0 %v4365_v26  ;;  %978 = vmatpush1.msra.mxu1 %v4371_v28 }
 0x14d   : > { %908 = vmatprep.subr.mxu0 %v4356_v23  ;;  %979 = vmatprep.subr.mxu1 %v4362_v25 }
 0x14e   : > { %909 = vmatpush1.msra.mxu0 %v4353_v22  ;;  %980 = vmatpush1.msra.mxu1 %v4359_v24  ;;  %v5888_v24 = vld [vmem:[#allocation14_spill] sm:$0xff] }
 0x14f   : > { %910 = vmatprep.subr.mxu0 %v4344_v19  ;;  %981 = vmatprep.subr.mxu1 %v4350_v21 }
 0x150   : > { %911 = vmatpush1.msra.mxu0 %v4341_v18  ;;  %982 = vmatpush1.msra.mxu1 %v5870_v7 }
 0x151   : > { %912 = vmatprep.subr.mxu0 %v5869_v13  ;;  %983 = vmatprep.subr.mxu1 %v5872_v5 }
 0x152   : > { %913 = vmatpush1.msra.mxu0 %v5871_v9  ;;  %984 = vmatpush1.msra.mxu1 %v5874_v4 }
 0x153   : > { %914 = vmatprep.subr.mxu0 %v5873_v12  ;;  %985 = vmatprep.subr.mxu1 %v5887_v6  ;;  %v709_v6 = vld [vmem:[#allocation2 + $0x18] sm:$0xff] }
 0x154   : > { %915 = vmatpush1.msra.mxu0 %v5888_v24  ;;  %986 = vmatpush1.msra.mxu1 %v5878_v3 }
 0x155   : > { %916 = vmatprep.subr.mxu0 %v5877_v14  ;;  %987 = vmatprep.subr.mxu1 %v5880_v20  ;;  %v706_v20 = vld [vmem:[#allocation2 + $0xb0] sm:$0xff]  ;;  %v707_v14 = vld [vmem:[#allocation2] sm:$0xff] }
 0x156   : > { %917 = vmatpush1.msra.mxu0 %v5879_v15  ;;  %988 = vmatpush1.msra.mxu1 %v5882_v2 }
 0x157   : > { %918 = vmatprep.subr.mxu0 %v5881_v16  ;;  %989 = vmatprep.subr.mxu1 %v5884_v10 }
 0x158   : > { %919 = vmatpush1.msra.mxu0 %v5883_v8  ;;  %952 = vmatprep.mubr.f32.mxu0 %v5886_v11 }
 0x159   : > { %990 = vmatpush1.msra.mxu1 %v5885_v17  ;;  %1023 = vmatprep.mubr.f32.mxu1 %v5886_v11  ;;  %v708_v17 = vld [vmem:[#allocation2 + $0xd8] sm:$0xff] }
 0x15a   : > { %1067 = vmatprep.subr.mxu0 %v4476_v63  ;;  %1138 = vmatprep.subr.mxu1 %v4482_v0 }
 0x1f7   : > { %v776_v15 = vpop.f32.mrf.mxu0 }
 0x1f8   : > { %v852_v2 = vadd.f32 %v776_v15, %v706_v20  ;;  %v702_v20 = vld [vmem:[#allocation4] sm:$0xff] }
 0x1f9   : > { %v778_v3 = vpop.f32.mrf.mxu0  ;;  %v847_v8 = vpop.f32.mrf.mxu1 }
 0x1fa   : > { %v3793_v16 = vmul.f32 -1.442695, %v852_v2  ;;  %v853_v24 = vadd.f32 %v778_v3, %v707_v14  ;;  %v854_v11 = vadd.f32 %v847_v8, %v708_v17  ;;  %v5892_v17 = vld [vmem:[#allocation18_spill] sm:$0xff]  ;;  %v5894_v8 = vld [vmem:[#allocation15_spill] sm:$0xff] }
 0x1fb   : > { %v849_v12 = vpop.f32.mrf.mxu1 }
 0x1fc   : > { %3905 = vpow2.f32 %v3793_v16  ;;  %v3794_v10 = vmul.f32 -1.442695, %v853_v24  ;;  %v855_v4 = vadd.f32 %v849_v12, %v709_v6  ;;  %v5895_v6 = vld [vmem:[#allocation17_spill] sm:$0xff] }
 0x1fe   : > { %3907 = vpow2.f32 %v3794_v10  ;;  %v3795_v9 = vmul.f32 -1.442695, %v855_v4 }
 0x1ff   : > { %3909 = vtanh.f32 %v854_v11  ;;  %v5893_v11 = vld [vmem:[#allocation20_spill] sm:$0xff] }
 0x200   : > { %3911 = vpow2.f32 %v3795_v9 }
 0x209   : > { %v3906_v63 = vpop.eup %3905 }
 0x20a   : > { %v859_v5 = vadd.f32 1.0, %v3906_v63 }
 0x20b   : > { %v3908_v0 = vpop.eup %3907 }
 0x20c   : > { %3913 = vrcp.f32 %v859_v5  ;;  %v865_v15 = vadd.f32 1.0, %v3908_v0  ;;  %v3910_v14 = vpop.eup %3909  ;;  %v5889_v0 = vld [vmem:[#allocation24_spill] sm:$0xff]  ;;  %v5891_v5 = vld [vmem:[#allocation21_spill] sm:$0xff] }
 0x20d   : > { %v3912_v3 = vpop.eup %3911 }
 0x20e   : > { %3915 = vrcp.f32 %v865_v15  ;;  %v872_v16 = vadd.f32 1.0, %v3912_v3  ;;  %v5896_v15 = vld [vmem:[#allocation14_spill] sm:$0xff]  ;;  %v5898_v3 = vld [vmem:[#allocation11_spill] sm:$0xff] }
 0x210   : > { %3917 = vrcp.f32 %v872_v16  ;;  %v5902_v16 = vld [vmem:[#allocation7_spill] sm:$0xff] }
 0x219   : > { %v3914_v24 = vpop.eup %3913 }
 0x21a   : > { %v876_v13 = vmul.f32 %v3914_v24, %v3910_v14  ;;  %v5897_v14 = vld [vmem:[#allocation16_spill] sm:$0xff]  ;;  %v5899_v24 = vld [vmem:[#allocation13_spill] sm:$0xff] }
 0x21b   : > { %v3916_v10 = vpop.eup %3915 }
 0x21c   : > { %v875_v2 = vmul.f32 %v3916_v10, %v702_v20  ;;  %v5900_v20 = vld [vmem:[#allocation10_spill] sm:$0xff]  ;;  %v5901_v10 = vld [vmem:[#allocation12_spill] sm:$0xff] }
 0x21d   : > { %v3918_v63 = vpop.eup %3917 }
 0x21e   : > { %v4727_v12 = vadd.f32 %v876_v13, %v875_v2  ;;  %v5890_v13 = vld [vmem:[#allocation19_spill] sm:$0xff]  ;;  %v5903_v2 = vld [vmem:[#allocation9_spill] sm:$0xff] }
 0x220   : > { %3919 = vtanh.f32 %v4727_v12 }
 0x22d   : > { %v3920_v4 = vpop.eup %3919 }
 0x22e   : > { %v879_v9 = vmul.f32 %v3920_v4, %v3918_v63  ;;  %v5904_v63 = vld [vmem:[#allocation6_spill] sm:$0xff]  ;;  %v5905_v4 = vmov 0.0  }
 0x230   : > { %880 = vst [vmem:[%s4590_s28] sm:$0xff] %v879_v9  ;;  %953 = vmatmul.mubr.f32.vlgmr.msra.gmra.mxu0 %v879_v9  ;;  %1024 = vmatmul.mubr.f32.vlgmr.msra.gmra.mxu1 %v879_v9  ;;  %v5906_v9 = vld [vmem:[#allocation8_spill] sm:$0xff] }
 0x231   : > { %1068 = vmatpush1.msra.mxu0 %v4473_v62  ;;  %1139 = vmatpush1.msra.mxu1 %v4479_v1 }
 0x232   : > { %1069 = vmatprep.subr.mxu0 %v4464_v59  ;;  %1140 = vmatprep.subr.mxu1 %v4470_v61 }
 0x233   : > { %1070 = vmatpush1.msra.mxu0 %v4461_v58  ;;  %1141 = vmatpush1.msra.mxu1 %v4467_v60 }
 0x234   : > { %1071 = vmatprep.subr.mxu0 %v4452_v55  ;;  %1142 = vmatprep.subr.mxu1 %v4458_v57 }
 0x235   : > { %1072 = vmatpush1.msra.mxu0 %v4449_v54  ;;  %1143 = vmatpush1.msra.mxu1 %v4455_v56 }
 0x236   : > { %1073 = vmatprep.subr.mxu0 %v4440_v51  ;;  %1144 = vmatprep.subr.mxu1 %v4446_v53 }
 0x237   : > { %1074 = vmatpush1.msra.mxu0 %v4437_v50  ;;  %1145 = vmatpush1.msra.mxu1 %v4443_v52 }
 0x238   : > { %1075 = vmatprep.subr.mxu0 %v4428_v47  ;;  %1146 = vmatprep.subr.mxu1 %v4434_v49 }
 0x239   : > { %1076 = vmatpush1.msra.mxu0 %v4425_v46  ;;  %1147 = vmatpush1.msra.mxu1 %v4431_v48 }
 0x23a   : > { %1077 = vmatprep.subr.mxu0 %v4416_v43  ;;  %1148 = vmatprep.subr.mxu1 %v4422_v45 }
 0x23b   : > { %1078 = vmatpush1.msra.mxu0 %v4413_v42  ;;  %1149 = vmatpush1.msra.mxu1 %v4419_v44 }
 0x23c   : > { %1079 = vmatprep.subr.mxu0 %v4404_v39  ;;  %1150 = vmatprep.subr.mxu1 %v4410_v41 }
 0x23d   : > { %1080 = vmatpush1.msra.mxu0 %v4401_v38  ;;  %1151 = vmatpush1.msra.mxu1 %v4407_v40 }
 0x23e   : > { %1081 = vmatprep.subr.mxu0 %v4392_v35  ;;  %1152 = vmatprep.subr.mxu1 %v4398_v37 }
 0x23f   : > { %1082 = vmatpush1.msra.mxu0 %v4389_v34  ;;  %1153 = vmatpush1.msra.mxu1 %v4395_v36 }
 0x240   : > { %1083 = vmatprep.subr.mxu0 %v4380_v31  ;;  %1154 = vmatprep.subr.mxu1 %v4386_v33 }
 0x241   : > { %1084 = vmatpush1.msra.mxu0 %v4377_v30  ;;  %1155 = vmatpush1.msra.mxu1 %v4383_v32 }
 0x242   : > { %1085 = vmatprep.subr.mxu0 %v4368_v27  ;;  %1156 = vmatprep.subr.mxu1 %v4374_v29 }
 0x243   : > { %1086 = vmatpush1.msra.mxu0 %v4365_v26  ;;  %1157 = vmatpush1.msra.mxu1 %v4371_v28 }
 0x244   : > { %1087 = vmatprep.subr.mxu0 %v4356_v23  ;;  %1158 = vmatprep.subr.mxu1 %v4362_v25 }
 0x245   : > { %1088 = vmatpush1.msra.mxu0 %v4353_v22  ;;  %1159 = vmatpush1.msra.mxu1 %v5889_v0 }
 0x246   : > { %1089 = vmatprep.subr.mxu0 %v4344_v19  ;;  %1160 = vmatprep.subr.mxu1 %v4350_v21 }
 0x247   : > { %1090 = vmatpush1.msra.mxu0 %v4341_v18  ;;  %1161 = vmatpush1.msra.mxu1 %v5870_v7 }
 0x248   : > { %1091 = vmatprep.subr.mxu0 %v5890_v13  ;;  %1162 = vmatprep.subr.mxu1 %v5891_v5  ;;  %v886_v5 = vld [vmem:[#allocation2 + $0x30] sm:$0xff] }
 0x249   : > { %1092 = vmatpush1.msra.mxu0 %v5892_v17  ;;  %1163 = vmatpush1.msra.mxu1 %v5893_v11  ;;  %v887_v11 = vld [vmem:[#allocation2 + $0x48] sm:$0xff] }
 0x24a   : > { %1093 = vmatprep.subr.mxu0 %v5894_v8  ;;  %1164 = vmatprep.subr.mxu1 %v5895_v6 }
 0x24b   : > { %1094 = vmatpush1.msra.mxu0 %v5896_v15  ;;  %1165 = vmatpush1.msra.mxu1 %v5897_v14  ;;  %v5907_v14 = vld [vmem:[#allocation25_spill] sm:$0xff] }
 0x24c   : > { %1095 = vmatprep.subr.mxu0 %v5898_v3  ;;  %1166 = vmatprep.subr.mxu1 %v5899_v24  ;;  %v5908_v3 = vld [vmem:[#allocation26_spill] sm:$0xff]  ;;  %v885_v15 = vld [vmem:[#allocation2 + $0x68] sm:$0xff] }
 0x24d   : > { %1096 = vmatpush1.msra.mxu0 %v5900_v20  ;;  %1167 = vmatpush1.msra.mxu1 %v5901_v10  ;;  %v884_v24 = vld [vmem:[#allocation2 + $0x50] sm:$0xff] }
 0x24e   : > { %1097 = vmatprep.subr.mxu0 %v5902_v16  ;;  %1168 = vmatprep.subr.mxu1 %v5903_v2 }
 0x24f   : > { %1098 = vmatpush1.msra.mxu0 %v5904_v63  ;;  %1131 = vmatprep.mubr.f32.mxu0 %v5905_v4 }
 0x250   : > { %1169 = vmatpush1.msra.mxu1 %v5906_v9  ;;  %1202 = vmatprep.mubr.f32.mxu1 %v5905_v4 }
 0x251   : > { %1246 = vmatprep.subr.mxu0 %v5907_v14  ;;  %1317 = vmatprep.subr.mxu1 %v5908_v3 }
 0x2f0   : > { %v954_v20 = vpop.f32.mrf.mxu0  ;;  %v1025_v2 = vpop.f32.mrf.mxu1 }
 0x2f1   : > { %v1030_v10 = vadd.f32 %v954_v20, %v884_v24  ;;  %v1032_v14 = vadd.f32 %v1025_v2, %v886_v5  ;;  %v5914_v2 = vld [vmem:[#allocation20_spill] sm:$0xff] }
 0x2f2   : > { %v956_v6 = vpop.f32.mrf.mxu0  ;;  %v1027_v17 = vpop.f32.mrf.mxu1 }
 0x2f3   : > { %v3796_v16 = vmul.f32 -1.442695, %v1030_v10  ;;  %v1031_v8 = vadd.f32 %v956_v6, %v885_v15  ;;  %v1033_v9 = vadd.f32 %v1027_v17, %v887_v11 }
 0x2f5   : > { %3921 = vpow2.f32 %v3796_v16  ;;  %v3797_v63 = vmul.f32 -1.442695, %v1031_v8  ;;  %v3798_v4 = vmul.f32 -1.442695, %v1033_v9  ;;  %v5913_v16 = vld [vmem:[#allocation18_spill] sm:$0xff] }
 0x2f6   : > { %v5917_v9 = vld [vmem:[#allocation14_spill] sm:$0xff] }
 0x2f7   : > { %3923 = vpow2.f32 %v3797_v63  ;;  %v5915_v63 = vld [vmem:[#allocation15_spill] sm:$0xff] }
 0x2f8   : > { %3925 = vpow2.f32 %v3798_v4  ;;  %v5916_v4 = vld [vmem:[#allocation17_spill] sm:$0xff] }
 0x302   : > { %v3922_v13 = vpop.eup %3921 }
 0x303   : > { %v1037_v7 = vadd.f32 1.0, %v3922_v13 }
 0x304   : > { %v3924_v3 = vpop.eup %3923 }
 0x305   : > { %3927 = vrcp.f32 %v1037_v7  ;;  %v1043_v18 = vadd.f32 1.0, %v3924_v3  ;;  %v3926_v6 = vpop.eup %3925  ;;  %v5912_v3 = vld [vmem:[#allocation21_spill] sm:$0xff] }
 0x306   : > { %3929 = vtanh.f32 %v1032_v14  ;;  %v1050_v20 = vadd.f32 1.0, %v3926_v6  ;;  %v5911_v14 = vld [vmem:[#allocation19_spill] sm:$0xff]  ;;  %v5918_v6 = vld [vmem:[#allocation16_spill] sm:$0xff] }
 0x307   : > { %3931 = vrcp.f32 %v1043_v18  ;;  %v5909_v18 = vld [vmem:[#allocation22_spill] sm:$0xff] }
 0x308   : > { %3933 = vrcp.f32 %v1050_v20  ;;  %v5922_v20 = vld [vmem:[#allocation12_spill] sm:$0xff] }
 0x312   : > { %v3928_v15 = vpop.eup %3927 }
 0x313   : > { %v3930_v24 = vpop.eup %3929 }
 0x314   : > { %v3932_v8 = vpop.eup %3931  ;;  %v1054_v10 = vmul.f32 %v3930_v24, %v3928_v15  ;;  %v5919_v15 = vld [vmem:[#allocation11_spill] sm:$0xff]  ;;  %v5920_v24 = vld [vmem:[#allocation13_spill] sm:$0xff] }
 0x315   : > { %v1053_v17 = vmul.f32 %v3932_v8, %v4727_v12  ;;  %v3934_v13 = vpop.eup %3933  ;;  %v5910_v12 = vld [vmem:[#allocation23_spill] sm:$0xff]  ;;  %v5921_v8 = vld [vmem:[#allocation10_spill] sm:$0xff] }
 0x317   : > { %v4798_v11 = vadd.f32 %v1054_v10, %v1053_v17  ;;  %v5923_v10 = vld [vmem:[#allocation7_spill] sm:$0xff]  ;;  %v5924_v17 = vld [vmem:[#allocation9_spill] sm:$0xff] }
 0x319   : > { %3935 = vtanh.f32 %v4798_v11 }
 0x326   : > { %v3936_v5 = vpop.eup %3935 }
 0x327   : > { %v1057_v7 = vmul.f32 %v3936_v5, %v3934_v13  ;;  %v5925_v13 = vld [vmem:[#allocation6_spill] sm:$0xff]  ;;  %v5926_v5 = vmov 0.0  }
 0x329   : > { %3799 = vst [vmem:[%s4590_s28 + $0x8] sm:$0xff] %v1057_v7  ;;  %1132 = vmatmul.mubr.f32.vlgmr.msra.gmra.mxu0 %v1057_v7  ;;  %1203 = vmatmul.mubr.f32.vlgmr.msra.gmra.mxu1 %v1057_v7  ;;  %v5927_v7 = vld [vmem:[#allocation8_spill] sm:$0xff] }
 0x32a   : > { %1247 = vmatpush1.msra.mxu0 %v4473_v62  ;;  %1318 = vmatpush1.msra.mxu1 %v4479_v1 }
 0x32b   : > { %1248 = vmatprep.subr.mxu0 %v4464_v59  ;;  %1319 = vmatprep.subr.mxu1 %v4470_v61 }
 0x32c   : > { %1249 = vmatpush1.msra.mxu0 %v4461_v58  ;;  %1320 = vmatpush1.msra.mxu1 %v4467_v60 }
 0x32d   : > { %1250 = vmatprep.subr.mxu0 %v4452_v55  ;;  %1321 = vmatprep.subr.mxu1 %v4458_v57 }
 0x32e   : > { %1251 = vmatpush1.msra.mxu0 %v4449_v54  ;;  %1322 = vmatpush1.msra.mxu1 %v4455_v56 }
 0x32f   : > { %1252 = vmatprep.subr.mxu0 %v4440_v51  ;;  %1323 = vmatprep.subr.mxu1 %v4446_v53 }
 0x330   : > { %1253 = vmatpush1.msra.mxu0 %v4437_v50  ;;  %1324 = vmatpush1.msra.mxu1 %v4443_v52 }
 0x331   : > { %1254 = vmatprep.subr.mxu0 %v4428_v47  ;;  %1325 = vmatprep.subr.mxu1 %v4434_v49 }
 0x332   : > { %1255 = vmatpush1.msra.mxu0 %v4425_v46  ;;  %1326 = vmatpush1.msra.mxu1 %v4431_v48 }
 0x333   : > { %1256 = vmatprep.subr.mxu0 %v4416_v43  ;;  %1327 = vmatprep.subr.mxu1 %v4422_v45 }
 0x334   : > { %1257 = vmatpush1.msra.mxu0 %v4413_v42  ;;  %1328 = vmatpush1.msra.mxu1 %v4419_v44 }
 0x335   : > { %1258 = vmatprep.subr.mxu0 %v4404_v39  ;;  %1329 = vmatprep.subr.mxu1 %v4410_v41 }
 0x336   : > { %1259 = vmatpush1.msra.mxu0 %v4401_v38  ;;  %1330 = vmatpush1.msra.mxu1 %v4407_v40 }
 0x337   : > { %1260 = vmatprep.subr.mxu0 %v4392_v35  ;;  %1331 = vmatprep.subr.mxu1 %v4398_v37 }
 0x338   : > { %1261 = vmatpush1.msra.mxu0 %v4389_v34  ;;  %1332 = vmatpush1.msra.mxu1 %v4395_v36 }
 0x339   : > { %1262 = vmatprep.subr.mxu0 %v4380_v31  ;;  %1333 = vmatprep.subr.mxu1 %v4386_v33 }
 0x33a   : > { %1263 = vmatpush1.msra.mxu0 %v4377_v30  ;;  %1334 = vmatpush1.msra.mxu1 %v4383_v32 }
 0x33b   : > { %1264 = vmatprep.subr.mxu0 %v4368_v27  ;;  %1335 = vmatprep.subr.mxu1 %v4374_v29 }
 0x33c   : > { %1265 = vmatpush1.msra.mxu0 %v4365_v26  ;;  %1336 = vmatpush1.msra.mxu1 %v4371_v28 }
 0x33d   : > { %1266 = vmatprep.subr.mxu0 %v4356_v23  ;;  %1337 = vmatprep.subr.mxu1 %v4362_v25 }
 0x33e   : > { %1267 = vmatpush1.msra.mxu0 %v4353_v22  ;;  %1338 = vmatpush1.msra.mxu1 %v5889_v0 }
 0x33f   : > { %1268 = vmatprep.subr.mxu0 %v4344_v19  ;;  %1339 = vmatprep.subr.mxu1 %v4350_v21 }
 0x340   : > { %1269 = vmatpush1.msra.mxu0 %v5909_v18  ;;  %1340 = vmatpush1.msra.mxu1 %v5910_v12 }
 0x341   : > { %1270 = vmatprep.subr.mxu0 %v5911_v14  ;;  %1341 = vmatprep.subr.mxu1 %v5912_v3  ;;  %v1065_v3 = vld [vmem:[#allocation2 + $0xe8] sm:$0xff] }
 0x342   : > { %1271 = vmatpush1.msra.mxu0 %v5913_v16  ;;  %1342 = vmatpush1.msra.mxu1 %v5914_v2  ;;  %v1066_v2 = vld [vmem:[#allocation2 + $0xb8] sm:$0xff] }
 0x343   : > { %1272 = vmatprep.subr.mxu0 %v5915_v63  ;;  %1343 = vmatprep.subr.mxu1 %v5916_v4 }
 0x344   : > { %1273 = vmatpush1.msra.mxu0 %v5917_v9  ;;  %1344 = vmatpush1.msra.mxu1 %v5918_v6  ;;  %v5928_v6 = vld [vmem:[#allocation25_spill] sm:$0xff] }
 0x345   : > { %1274 = vmatprep.subr.mxu0 %v5919_v15  ;;  %1345 = vmatprep.subr.mxu1 %v5920_v24  ;;  %v5929_v15 = vld [vmem:[#allocation26_spill] sm:$0xff]  ;;  %v1063_v24 = vld [vmem:[#allocation2 + $0x80] sm:$0xff]  ;;  %v1064_v9 = vld [vmem:[#allocation2 + $0x88] sm:$0xff] }
 0x346   : > { %1275 = vmatpush1.msra.mxu0 %v5921_v8  ;;  %1346 = vmatpush1.msra.mxu1 %v5922_v20 }
 0x347   : > { %1276 = vmatprep.subr.mxu0 %v5923_v10  ;;  %1347 = vmatprep.subr.mxu1 %v5924_v17 }
 0x348   : > { %1277 = vmatpush1.msra.mxu0 %v5925_v13  ;;  %1310 = vmatprep.mubr.f32.mxu0 %v5926_v5 }
 0x349   : > { %1348 = vmatpush1.msra.mxu1 %v5927_v7  ;;  %1381 = vmatprep.mubr.f32.mxu1 %v5926_v5 }
 0x34a   : > { %1425 = vmatprep.subr.mxu0 %v5928_v6  ;;  %1496 = vmatprep.subr.mxu1 %v5929_v15 }
 0x3e9   : > { %v1133_v8 = vpop.f32.mrf.mxu0  ;;  %v1204_v17 = vpop.f32.mrf.mxu1 }
 0x3ea   : > { %v1209_v20 = vadd.f32 %v1133_v8, %v1063_v24  ;;  %v1211_v6 = vadd.f32 %v1204_v17, %v1065_v3  ;;  %v5935_v17 = vld [vmem:[#allocation20_spill] sm:$0xff] }
 0x3eb   : > { %v1135_v4 = vpop.f32.mrf.mxu0  ;;  %v1206_v16 = vpop.f32.mrf.mxu1 }
 0x3ec   : > { %v3800_v10 = vmul.f32 -1.442695, %v1209_v20  ;;  %v1210_v63 = vadd.f32 %v1135_v4, %v1064_v9  ;;  %v1212_v7 = vadd.f32 %v1206_v16, %v1066_v2 }
 0x3ee   : > { %3937 = vpow2.f32 %v3800_v10  ;;  %v3801_v13 = vmul.f32 -1.442695, %v1210_v63  ;;  %v3802_v5 = vmul.f32 -1.442695, %v1212_v7  ;;  %v5934_v10 = vld [vmem:[#allocation18_spill] sm:$0xff] }
 0x3ef   : > { %v5938_v7 = vld [vmem:[#allocation14_spill] sm:$0xff] }
 0x3f0   : > { %3939 = vpow2.f32 %v3801_v13  ;;  %v5936_v13 = vld [vmem:[#allocation15_spill] sm:$0xff] }
 0x3f1   : > { %3941 = vpow2.f32 %v3802_v5  ;;  %v5937_v5 = vld [vmem:[#allocation17_spill] sm:$0xff] }
 0x3fb   : > { %v3938_v14 = vpop.eup %3937 }
 0x3fc   : > { %v1216_v12 = vadd.f32 1.0, %v3938_v14 }
 0x3fd   : > { %v3940_v15 = vpop.eup %3939 }
 0x3fe   : > { %3943 = vrcp.f32 %v1216_v12  ;;  %v1222_v18 = vadd.f32 1.0, %v3940_v15  ;;  %v3942_v4 = vpop.eup %3941  ;;  %v5933_v15 = vld [vmem:[#allocation21_spill] sm:$0xff] }
 0x3ff   : > { %3945 = vtanh.f32 %v1211_v6  ;;  %v1229_v8 = vadd.f32 1.0, %v3942_v4  ;;  %v5932_v6 = vld [vmem:[#allocation19_spill] sm:$0xff]  ;;  %v5939_v4 = vld [vmem:[#allocation16_spill] sm:$0xff] }
 0x400   : > { %3947 = vrcp.f32 %v1222_v18  ;;  %v5931_v18 = vld [vmem:[#allocation23_spill] sm:$0xff] }
 0x401   : > { %3949 = vrcp.f32 %v1229_v8  ;;  %v5943_v8 = vld [vmem:[#allocation12_spill] sm:$0xff] }
 0x40b   : > { %v3944_v9 = vpop.eup %3943 }
 0x40c   : > { %v3946_v24 = vpop.eup %3945 }
 0x40d   : > { %v3948_v63 = vpop.eup %3947  ;;  %v1233_v20 = vmul.f32 %v3946_v24, %v3944_v9  ;;  %v5940_v9 = vld [vmem:[#allocation11_spill] sm:$0xff]  ;;  %v5941_v24 = vld [vmem:[#allocation13_spill] sm:$0xff] }
 0x40e   : > { %v1232_v16 = vmul.f32 %v3948_v63, %v4798_v11  ;;  %v3950_v14 = vpop.eup %3949  ;;  %v5930_v11 = vld [vmem:[#allocation22_spill] sm:$0xff] }
 0x40f   : > { %v5942_v63 = vld [vmem:[#allocation10_spill] sm:$0xff] }
 0x410   : > { %v4869_v2 = vadd.f32 %v1233_v20, %v1232_v16  ;;  %v5944_v20 = vld [vmem:[#allocation7_spill] sm:$0xff]  ;;  %v5945_v16 = vld [vmem:[#allocation9_spill] sm:$0xff] }
 0x412   : > { %3951 = vtanh.f32 %v4869_v2 }
 0x41f   : > { %v3952_v3 = vpop.eup %3951 }
 0x420   : > { %v1236_v12 = vmul.f32 %v3952_v3, %v3950_v14  ;;  %v5946_v14 = vld [vmem:[#allocation6_spill] sm:$0xff]  ;;  %v5947_v3 = vmov 0.0  }
 0x422   : > { %3803 = vst [vmem:[%s4590_s28 + $0x10] sm:$0xff] %v1236_v12  ;;  %1311 = vmatmul.mubr.f32.vlgmr.msra.gmra.mxu0 %v1236_v12  ;;  %1382 = vmatmul.mubr.f32.vlgmr.msra.gmra.mxu1 %v1236_v12  ;;  %v5948_v12 = vld [vmem:[#allocation8_spill] sm:$0xff] }
 0x423   : > { %1426 = vmatpush1.msra.mxu0 %v4473_v62  ;;  %1497 = vmatpush1.msra.mxu1 %v4479_v1 }
 0x424   : > { %1427 = vmatprep.subr.mxu0 %v4464_v59  ;;  %1498 = vmatprep.subr.mxu1 %v4470_v61 }
 0x425   : > { %1428 = vmatpush1.msra.mxu0 %v4461_v58  ;;  %1499 = vmatpush1.msra.mxu1 %v4467_v60 }
 0x426   : > { %1429 = vmatprep.subr.mxu0 %v4452_v55  ;;  %1500 = vmatprep.subr.mxu1 %v4458_v57 }
 0x427   : > { %1430 = vmatpush1.msra.mxu0 %v4449_v54  ;;  %1501 = vmatpush1.msra.mxu1 %v4455_v56 }
 0x428   : > { %1431 = vmatprep.subr.mxu0 %v4440_v51  ;;  %1502 = vmatprep.subr.mxu1 %v4446_v53 }
 0x429   : > { %1432 = vmatpush1.msra.mxu0 %v4437_v50  ;;  %1503 = vmatpush1.msra.mxu1 %v4443_v52 }
 0x42a   : > { %1433 = vmatprep.subr.mxu0 %v4428_v47  ;;  %1504 = vmatprep.subr.mxu1 %v4434_v49 }
 0x42b   : > { %1434 = vmatpush1.msra.mxu0 %v4425_v46  ;;  %1505 = vmatpush1.msra.mxu1 %v4431_v48 }
 0x42c   : > { %1435 = vmatprep.subr.mxu0 %v4416_v43  ;;  %1506 = vmatprep.subr.mxu1 %v4422_v45 }
 0x42d   : > { %1436 = vmatpush1.msra.mxu0 %v4413_v42  ;;  %1507 = vmatpush1.msra.mxu1 %v4419_v44 }
 0x42e   : > { %1437 = vmatprep.subr.mxu0 %v4404_v39  ;;  %1508 = vmatprep.subr.mxu1 %v4410_v41 }
 0x42f   : > { %1438 = vmatpush1.msra.mxu0 %v4401_v38  ;;  %1509 = vmatpush1.msra.mxu1 %v4407_v40 }
 0x430   : > { %1439 = vmatprep.subr.mxu0 %v4392_v35  ;;  %1510 = vmatprep.subr.mxu1 %v4398_v37 }
 0x431   : > { %1440 = vmatpush1.msra.mxu0 %v4389_v34  ;;  %1511 = vmatpush1.msra.mxu1 %v4395_v36 }
 0x432   : > { %1441 = vmatprep.subr.mxu0 %v4380_v31  ;;  %1512 = vmatprep.subr.mxu1 %v4386_v33 }
 0x433   : > { %1442 = vmatpush1.msra.mxu0 %v4377_v30  ;;  %1513 = vmatpush1.msra.mxu1 %v4383_v32 }
 0x434   : > { %1443 = vmatprep.subr.mxu0 %v4368_v27  ;;  %1514 = vmatprep.subr.mxu1 %v4374_v29 }
 0x435   : > { %1444 = vmatpush1.msra.mxu0 %v4365_v26  ;;  %1515 = vmatpush1.msra.mxu1 %v4371_v28 }
 0x436   : > { %1445 = vmatprep.subr.mxu0 %v4356_v23  ;;  %1516 = vmatprep.subr.mxu1 %v4362_v25 }
 0x437   : > { %1446 = vmatpush1.msra.mxu0 %v4353_v22  ;;  %1517 = vmatpush1.msra.mxu1 %v5889_v0 }
 0x438   : > { %1447 = vmatprep.subr.mxu0 %v4344_v19  ;;  %1518 = vmatprep.subr.mxu1 %v4350_v21 }
 0x439   : > { %1448 = vmatpush1.msra.mxu0 %v5930_v11  ;;  %1519 = vmatpush1.msra.mxu1 %v5931_v18 }
 0x43a   : > { %1449 = vmatprep.subr.mxu0 %v5932_v6  ;;  %1520 = vmatprep.subr.mxu1 %v5933_v15  ;;  %v1244_v15 = vld [vmem:[#allocation2 + $0x8] sm:$0xff] }
 0x43b   : > { %1450 = vmatpush1.msra.mxu0 %v5934_v10  ;;  %1521 = vmatpush1.msra.mxu1 %v5935_v17  ;;  %v1245_v17 = vld [vmem:[#allocation2 + $0x78] sm:$0xff] }
 0x43c   : > { %1451 = vmatprep.subr.mxu0 %v5936_v13  ;;  %1522 = vmatprep.subr.mxu1 %v5937_v5 }
 0x43d   : > { %1452 = vmatpush1.msra.mxu0 %v5938_v7  ;;  %1523 = vmatpush1.msra.mxu1 %v5939_v4  ;;  %v5949_v4 = vld [vmem:[#allocation25_spill] sm:$0xff]  ;;  %v1243_v7 = vld [vmem:[#allocation2 + $0xf0] sm:$0xff] }
 0x43e   : > { %1453 = vmatprep.subr.mxu0 %v5940_v9  ;;  %1524 = vmatprep.subr.mxu1 %v5941_v24  ;;  %v5950_v9 = vld [vmem:[#allocation26_spill] sm:$0xff]  ;;  %v1242_v24 = vld [vmem:[#allocation2 + $0x60] sm:$0xff] }
 0x43f   : > { %1454 = vmatpush1.msra.mxu0 %v5942_v63  ;;  %1525 = vmatpush1.msra.mxu1 %v5943_v8 }
 0x440   : > { %1455 = vmatprep.subr.mxu0 %v5944_v20  ;;  %1526 = vmatprep.subr.mxu1 %v5945_v16 }
 0x441   : > { %1456 = vmatpush1.msra.mxu0 %v5946_v14  ;;  %1489 = vmatprep.mubr.f32.mxu0 %v5947_v3 }
 0x442   : > { %1527 = vmatpush1.msra.mxu1 %v5948_v12  ;;  %1560 = vmatprep.mubr.f32.mxu1 %v5947_v3 }
 0x443   : > { %1604 = vmatprep.subr.mxu0 %v5949_v4  ;;  %1675 = vmatprep.subr.mxu1 %v5950_v9 }
 0x4e2   : > { %v1312_v63 = vpop.f32.mrf.mxu0  ;;  %v1383_v16 = vpop.f32.mrf.mxu1 }
 0x4e3   : > { %v1388_v8 = vadd.f32 %v1312_v63, %v1242_v24  ;;  %v1390_v4 = vadd.f32 %v1383_v16, %v1244_v15  ;;  %v5956_v16 = vld [vmem:[#allocation20_spill] sm:$0xff] }
 0x4e4   : > { %v1314_v5 = vpop.f32.mrf.mxu0  ;;  %v1385_v10 = vpop.f32.mrf.mxu1 }
 0x4e5   : > { %v3804_v20 = vmul.f32 -1.442695, %v1388_v8  ;;  %v1389_v13 = vadd.f32 %v1314_v5, %v1243_v7  ;;  %v1391_v12 = vadd.f32 %v1385_v10, %v1245_v17 }
 0x4e7   : > { %3953 = vpow2.f32 %v3804_v20  ;;  %v3805_v14 = vmul.f32 -1.442695, %v1389_v13  ;;  %v3806_v3 = vmul.f32 -1.442695, %v1391_v12  ;;  %v5955_v20 = vld [vmem:[#allocation18_spill] sm:$0xff] }
 0x4e8   : > { %v5959_v12 = vld [vmem:[#allocation14_spill] sm:$0xff] }
 0x4e9   : > { %3955 = vpow2.f32 %v3805_v14  ;;  %v5957_v14 = vld [vmem:[#allocation15_spill] sm:$0xff] }
 0x4ea   : > { %3957 = vpow2.f32 %v3806_v3  ;;  %v5958_v3 = vld [vmem:[#allocation17_spill] sm:$0xff] }
 0x4f4   : > { %v3954_v6 = vpop.eup %3953 }
 0x4f5   : > { %v1395_v18 = vadd.f32 1.0, %v3954_v6 }
 0x4f6   : > { %v3956_v9 = vpop.eup %3955 }
 0x4f7   : > { %3959 = vrcp.f32 %v1395_v18  ;;  %v1401_v11 = vadd.f32 1.0, %v3956_v9  ;;  %v3958_v5 = vpop.eup %3957  ;;  %v5954_v9 = vld [vmem:[#allocation21_spill] sm:$0xff] }
 0x4f8   : > { %3961 = vtanh.f32 %v1390_v4  ;;  %v1408_v63 = vadd.f32 1.0, %v3958_v5  ;;  %v5953_v4 = vld [vmem:[#allocation19_spill] sm:$0xff]  ;;  %v5960_v5 = vld [vmem:[#allocation16_spill] sm:$0xff] }
 0x4f9   : > { %3963 = vrcp.f32 %v1401_v11  ;;  %v5952_v11 = vld [vmem:[#allocation23_spill] sm:$0xff] }
 0x4fa   : > { %3965 = vrcp.f32 %v1408_v63  ;;  %v5964_v63 = vld [vmem:[#allocation12_spill] sm:$0xff] }
 0x504   : > { %v3960_v7 = vpop.eup %3959 }
 0x505   : > { %v3962_v24 = vpop.eup %3961 }
 0x506   : > { %v3964_v13 = vpop.eup %3963  ;;  %v1412_v8 = vmul.f32 %v3962_v24, %v3960_v7  ;;  %v5961_v7 = vld [vmem:[#allocation11_spill] sm:$0xff]  ;;  %v5962_v24 = vld [vmem:[#allocation13_spill] sm:$0xff] }
 0x507   : > { %v1411_v10 = vmul.f32 %v3964_v13, %v4869_v2  ;;  %v3966_v6 = vpop.eup %3965  ;;  %v5951_v2 = vld [vmem:[#allocation22_spill] sm:$0xff] }
 0x508   : > { %v5963_v13 = vld [vmem:[#allocation10_spill] sm:$0xff] }
 0x509   : > { %v4940_v17 = vadd.f32 %v1412_v8, %v1411_v10  ;;  %v5965_v8 = vld [vmem:[#allocation7_spill] sm:$0xff]  ;;  %v5966_v10 = vld [vmem:[#allocation9_spill] sm:$0xff] }
 0x50b   : > { %3967 = vtanh.f32 %v4940_v17 }
 0x518   : > { %v3968_v15 = vpop.eup %3967 }
 0x519   : > { %v1415_v18 = vmul.f32 %v3968_v15, %v3966_v6  ;;  %v5967_v6 = vld [vmem:[#allocation6_spill] sm:$0xff]  ;;  %v5968_v15 = vmov 0.0  }
 0x51b   : > { %3807 = vst [vmem:[%s4590_s28 + $0x18] sm:$0xff] %v1415_v18  ;;  %1490 = vmatmul.mubr.f32.vlgmr.msra.gmra.mxu0 %v1415_v18  ;;  %1561 = vmatmul.mubr.f32.vlgmr.msra.gmra.mxu1 %v1415_v18  ;;  %v5969_v18 = vld [vmem:[#allocation8_spill] sm:$0xff] }
 0x51c   : > { %1605 = vmatpush1.msra.mxu0 %v4473_v62  ;;  %1676 = vmatpush1.msra.mxu1 %v4479_v1 }
 0x51d   : > { %1606 = vmatprep.subr.mxu0 %v4464_v59  ;;  %1677 = vmatprep.subr.mxu1 %v4470_v61 }
 0x51e   : > { %1607 = vmatpush1.msra.mxu0 %v4461_v58  ;;  %1678 = vmatpush1.msra.mxu1 %v4467_v60 }
 0x51f   : > { %1608 = vmatprep.subr.mxu0 %v4452_v55  ;;  %1679 = vmatprep.subr.mxu1 %v4458_v57 }
 0x520   : > { %1609 = vmatpush1.msra.mxu0 %v4449_v54  ;;  %1680 = vmatpush1.msra.mxu1 %v4455_v56 }
 0x521   : > { %1610 = vmatprep.subr.mxu0 %v4440_v51  ;;  %1681 = vmatprep.subr.mxu1 %v4446_v53 }
 0x522   : > { %1611 = vmatpush1.msra.mxu0 %v4437_v50  ;;  %1682 = vmatpush1.msra.mxu1 %v4443_v52 }
 0x523   : > { %1612 = vmatprep.subr.mxu0 %v4428_v47  ;;  %1683 = vmatprep.subr.mxu1 %v4434_v49 }
 0x524   : > { %1613 = vmatpush1.msra.mxu0 %v4425_v46  ;;  %1684 = vmatpush1.msra.mxu1 %v4431_v48 }
 0x525   : > { %1614 = vmatprep.subr.mxu0 %v4416_v43  ;;  %1685 = vmatprep.subr.mxu1 %v4422_v45 }
 0x526   : > { %1615 = vmatpush1.msra.mxu0 %v4413_v42  ;;  %1686 = vmatpush1.msra.mxu1 %v4419_v44 }
 0x527   : > { %1616 = vmatprep.subr.mxu0 %v4404_v39  ;;  %1687 = vmatprep.subr.mxu1 %v4410_v41 }
 0x528   : > { %1617 = vmatpush1.msra.mxu0 %v4401_v38  ;;  %1688 = vmatpush1.msra.mxu1 %v4407_v40 }
 0x529   : > { %1618 = vmatprep.subr.mxu0 %v4392_v35  ;;  %1689 = vmatprep.subr.mxu1 %v4398_v37 }
 0x52a   : > { %1619 = vmatpush1.msra.mxu0 %v4389_v34  ;;  %1690 = vmatpush1.msra.mxu1 %v4395_v36 }
 0x52b   : > { %1620 = vmatprep.subr.mxu0 %v4380_v31  ;;  %1691 = vmatprep.subr.mxu1 %v4386_v33 }
 0x52c   : > { %1621 = vmatpush1.msra.mxu0 %v4377_v30  ;;  %1692 = vmatpush1.msra.mxu1 %v4383_v32 }
 0x52d   : > { %1622 = vmatprep.subr.mxu0 %v4368_v27  ;;  %1693 = vmatprep.subr.mxu1 %v4374_v29 }
 0x52e   : > { %1623 = vmatpush1.msra.mxu0 %v4365_v26  ;;  %1694 = vmatpush1.msra.mxu1 %v4371_v28 }
 0x52f   : > { %1624 = vmatprep.subr.mxu0 %v4356_v23  ;;  %1695 = vmatprep.subr.mxu1 %v4362_v25 }
 0x530   : > { %1625 = vmatpush1.msra.mxu0 %v4353_v22  ;;  %1696 = vmatpush1.msra.mxu1 %v5889_v0 }
 0x531   : > { %1626 = vmatprep.subr.mxu0 %v4344_v19  ;;  %1697 = vmatprep.subr.mxu1 %v4350_v21 }
 0x532   : > { %1627 = vmatpush1.msra.mxu0 %v5951_v2  ;;  %1698 = vmatpush1.msra.mxu1 %v5952_v11 }
 0x533   : > { %1628 = vmatprep.subr.mxu0 %v5953_v4  ;;  %1699 = vmatprep.subr.mxu1 %v5954_v9  ;;  %v1423_v9 = vld [vmem:[#allocation2 + $0x40] sm:$0xff] }
 0x534   : > { %1629 = vmatpush1.msra.mxu0 %v5955_v20  ;;  %1700 = vmatpush1.msra.mxu1 %v5956_v16  ;;  %v1424_v16 = vld [vmem:[#allocation2 + $0xc8] sm:$0xff] }
 0x535   : > { %1630 = vmatprep.subr.mxu0 %v5957_v14  ;;  %1701 = vmatprep.subr.mxu1 %v5958_v3 }
 0x536   : > { %1631 = vmatpush1.msra.mxu0 %v5959_v12  ;;  %1702 = vmatpush1.msra.mxu1 %v5960_v5  ;;  %v5970_v5 = vld [vmem:[#allocation25_spill] sm:$0xff]  ;;  %v1422_v12 = vld [vmem:[#allocation2 + $0x58] sm:$0xff] }
 0x537   : > { %1632 = vmatprep.subr.mxu0 %v5961_v7  ;;  %1703 = vmatprep.subr.mxu1 %v5962_v24  ;;  %v5971_v7 = vld [vmem:[#allocation26_spill] sm:$0xff]  ;;  %v1421_v24 = vld [vmem:[#allocation2 + $0x38] sm:$0xff] }
 0x538   : > { %1633 = vmatpush1.msra.mxu0 %v5963_v13  ;;  %1704 = vmatpush1.msra.mxu1 %v5964_v63 }
 0x539   : > { %1634 = vmatprep.subr.mxu0 %v5965_v8  ;;  %1705 = vmatprep.subr.mxu1 %v5966_v10 }
 0x53a   : > { %1635 = vmatpush1.msra.mxu0 %v5967_v6  ;;  %1668 = vmatprep.mubr.f32.mxu0 %v5968_v15 }
 0x53b   : > { %1706 = vmatpush1.msra.mxu1 %v5969_v18  ;;  %1739 = vmatprep.mubr.f32.mxu1 %v5968_v15 }
 0x53c   : > { %1783 = vmatprep.subr.mxu0 %v5970_v5  ;;  %1854 = vmatprep.subr.mxu1 %v5971_v7 }
 0x5db   : > { %v1491_v13 = vpop.f32.mrf.mxu0  ;;  %v1562_v10 = vpop.f32.mrf.mxu1 }
 0x5dc   : > { %v1567_v63 = vadd.f32 %v1491_v13, %v1421_v24  ;;  %v1569_v5 = vadd.f32 %v1562_v10, %v1423_v9  ;;  %v5977_v10 = vld [vmem:[#allocation20_spill] sm:$0xff] }
 0x5dd   : > { %v1493_v3 = vpop.f32.mrf.mxu0  ;;  %v1564_v20 = vpop.f32.mrf.mxu1 }
 0x5de   : > { %v3808_v8 = vmul.f32 -1.442695, %v1567_v63  ;;  %v1568_v14 = vadd.f32 %v1493_v3, %v1422_v12  ;;  %v1570_v18 = vadd.f32 %v1564_v20, %v1424_v16 }
 0x5e0   : > { %3969 = vpow2.f32 %v3808_v8  ;;  %v3809_v6 = vmul.f32 -1.442695, %v1568_v14  ;;  %v3810_v15 = vmul.f32 -1.442695, %v1570_v18  ;;  %v5976_v8 = vld [vmem:[#allocation18_spill] sm:$0xff] }
 0x5e1   : > { %v5980_v18 = vld [vmem:[#allocation14_spill] sm:$0xff] }
 0x5e2   : > { %3971 = vpow2.f32 %v3809_v6  ;;  %v5978_v6 = vld [vmem:[#allocation15_spill] sm:$0xff] }
 0x5e3   : > { %3973 = vpow2.f32 %v3810_v15  ;;  %v5979_v15 = vld [vmem:[#allocation17_spill] sm:$0xff] }
 0x5ed   : > { %v3970_v4 = vpop.eup %3969 }
 0x5ee   : > { %v1574_v11 = vadd.f32 1.0, %v3970_v4 }
 0x5ef   : > { %v3972_v7 = vpop.eup %3971 }
 0x5f0   : > { %3975 = vrcp.f32 %v1574_v11  ;;  %v1580_v2 = vadd.f32 1.0, %v3972_v7  ;;  %v3974_v3 = vpop.eup %3973  ;;  %v5975_v7 = vld [vmem:[#allocation21_spill] sm:$0xff] }
 0x5f1   : > { %3977 = vtanh.f32 %v1569_v5  ;;  %v1587_v13 = vadd.f32 1.0, %v3974_v3  ;;  %v5974_v5 = vld [vmem:[#allocation19_spill] sm:$0xff]  ;;  %v5981_v3 = vld [vmem:[#allocation16_spill] sm:$0xff] }
 0x5f2   : > { %3979 = vrcp.f32 %v1580_v2  ;;  %v5973_v2 = vld [vmem:[#allocation23_spill] sm:$0xff] }
 0x5f3   : > { %3981 = vrcp.f32 %v1587_v13  ;;  %v5985_v13 = vld [vmem:[#allocation12_spill] sm:$0xff] }
 0x5fd   : > { %v3976_v12 = vpop.eup %3975 }
 0x5fe   : > { %v3978_v24 = vpop.eup %3977 }
 0x5ff   : > { %v3980_v14 = vpop.eup %3979  ;;  %v1591_v63 = vmul.f32 %v3978_v24, %v3976_v12  ;;  %v5982_v12 = vld [vmem:[#allocation11_spill] sm:$0xff]  ;;  %v5983_v24 = vld [vmem:[#allocation13_spill] sm:$0xff] }
 0x600   : > { %v1590_v20 = vmul.f32 %v3980_v14, %v4940_v17  ;;  %v3982_v4 = vpop.eup %3981  ;;  %v5972_v17 = vld [vmem:[#allocation22_spill] sm:$0xff] }
 0x601   : > { %v5984_v14 = vld [vmem:[#allocation10_spill] sm:$0xff] }
 0x602   : > { %v5011_v16 = vadd.f32 %v1591_v63, %v1590_v20  ;;  %v5986_v63 = vld [vmem:[#allocation7_spill] sm:$0xff]  ;;  %v5987_v20 = vld [vmem:[#allocation9_spill] sm:$0xff] }
 0x604   : > { %3983 = vtanh.f32 %v5011_v16 }
 0x611   : > { %v3984_v9 = vpop.eup %3983 }
 0x612   : > { %v1594_v11 = vmul.f32 %v3984_v9, %v3982_v4  ;;  %v5988_v4 = vld [vmem:[#allocation6_spill] sm:$0xff]  ;;  %v5989_v9 = vmov 0.0  }
 0x614   : > { %3811 = vst [vmem:[%s4590_s28 + $0x20] sm:$0xff] %v1594_v11  ;;  %1669 = vmatmul.mubr.f32.vlgmr.msra.gmra.mxu0 %v1594_v11  ;;  %1740 = vmatmul.mubr.f32.vlgmr.msra.gmra.mxu1 %v1594_v11  ;;  %v5990_v11 = vld [vmem:[#allocation8_spill] sm:$0xff] }
 0x615   : > { %1784 = vmatpush1.msra.mxu0 %v4473_v62  ;;  %1855 = vmatpush1.msra.mxu1 %v4479_v1 }
 0x616   : > { %1785 = vmatprep.subr.mxu0 %v4464_v59  ;;  %1856 = vmatprep.subr.mxu1 %v4470_v61 }
 0x617   : > { %1786 = vmatpush1.msra.mxu0 %v4461_v58  ;;  %1857 = vmatpush1.msra.mxu1 %v4467_v60 }
 0x618   : > { %1787 = vmatprep.subr.mxu0 %v4452_v55  ;;  %1858 = vmatprep.subr.mxu1 %v4458_v57 }
 0x619   : > { %1788 = vmatpush1.msra.mxu0 %v4449_v54  ;;  %1859 = vmatpush1.msra.mxu1 %v4455_v56 }
 0x61a   : > { %1789 = vmatprep.subr.mxu0 %v4440_v51  ;;  %1860 = vmatprep.subr.mxu1 %v4446_v53 }
 0x61b   : > { %1790 = vmatpush1.msra.mxu0 %v4437_v50  ;;  %1861 = vmatpush1.msra.mxu1 %v4443_v52 }
 0x61c   : > { %1791 = vmatprep.subr.mxu0 %v4428_v47  ;;  %1862 = vmatprep.subr.mxu1 %v4434_v49 }
 0x61d   : > { %1792 = vmatpush1.msra.mxu0 %v4425_v46  ;;  %1863 = vmatpush1.msra.mxu1 %v4431_v48 }
 0x61e   : > { %1793 = vmatprep.subr.mxu0 %v4416_v43  ;;  %1864 = vmatprep.subr.mxu1 %v4422_v45 }
 0x61f   : > { %1794 = vmatpush1.msra.mxu0 %v4413_v42  ;;  %1865 = vmatpush1.msra.mxu1 %v4419_v44 }
 0x620   : > { %1795 = vmatprep.subr.mxu0 %v4404_v39  ;;  %1866 = vmatprep.subr.mxu1 %v4410_v41 }
 0x621   : > { %1796 = vmatpush1.msra.mxu0 %v4401_v38  ;;  %1867 = vmatpush1.msra.mxu1 %v4407_v40 }
 0x622   : > { %1797 = vmatprep.subr.mxu0 %v4392_v35  ;;  %1868 = vmatprep.subr.mxu1 %v4398_v37 }
 0x623   : > { %1798 = vmatpush1.msra.mxu0 %v4389_v34  ;;  %1869 = vmatpush1.msra.mxu1 %v4395_v36 }
 0x624   : > { %1799 = vmatprep.subr.mxu0 %v4380_v31  ;;  %1870 = vmatprep.subr.mxu1 %v4386_v33 }
 0x625   : > { %1800 = vmatpush1.msra.mxu0 %v4377_v30  ;;  %1871 = vmatpush1.msra.mxu1 %v4383_v32 }
 0x626   : > { %1801 = vmatprep.subr.mxu0 %v4368_v27  ;;  %1872 = vmatprep.subr.mxu1 %v4374_v29 }
 0x627   : > { %1802 = vmatpush1.msra.mxu0 %v4365_v26  ;;  %1873 = vmatpush1.msra.mxu1 %v4371_v28 }
 0x628   : > { %1803 = vmatprep.subr.mxu0 %v4356_v23  ;;  %1874 = vmatprep.subr.mxu1 %v4362_v25 }
 0x629   : > { %1804 = vmatpush1.msra.mxu0 %v4353_v22  ;;  %1875 = vmatpush1.msra.mxu1 %v5889_v0 }
 0x62a   : > { %1805 = vmatprep.subr.mxu0 %v4344_v19  ;;  %1876 = vmatprep.subr.mxu1 %v4350_v21 }
 0x62b   : > { %1806 = vmatpush1.msra.mxu0 %v5972_v17  ;;  %1877 = vmatpush1.msra.mxu1 %v5973_v2 }
 0x62c   : > { %1807 = vmatprep.subr.mxu0 %v5974_v5  ;;  %1878 = vmatprep.subr.mxu1 %v5975_v7  ;;  %v1602_v7 = vld [vmem:[#allocation2 + $0x70] sm:$0xff] }
 0x62d   : > { %1808 = vmatpush1.msra.mxu0 %v5976_v8  ;;  %1879 = vmatpush1.msra.mxu1 %v5977_v10  ;;  %v1603_v10 = vld [vmem:[#allocation2 + $0xc0] sm:$0xff] }
 0x62e   : > { %1809 = vmatprep.subr.mxu0 %v5978_v6  ;;  %1880 = vmatprep.subr.mxu1 %v5979_v15 }
 0x62f   : > { %1810 = vmatpush1.msra.mxu0 %v5980_v18  ;;  %1881 = vmatpush1.msra.mxu1 %v5981_v3  ;;  %v5991_v3 = vld [vmem:[#allocation25_spill] sm:$0xff]  ;;  %v1601_v18 = vld [vmem:[#allocation2 + $0x90] sm:$0xff] }
 0x630   : > { %1811 = vmatprep.subr.mxu0 %v5982_v12  ;;  %1882 = vmatprep.subr.mxu1 %v5983_v24  ;;  %v5992_v12 = vld [vmem:[#allocation26_spill] sm:$0xff]  ;;  %v1600_v24 = vld [vmem:[#allocation2 + $0xe0] sm:$0xff] }
 0x631   : > { %1812 = vmatpush1.msra.mxu0 %v5984_v14  ;;  %1883 = vmatpush1.msra.mxu1 %v5985_v13 }
 0x632   : > { %1813 = vmatprep.subr.mxu0 %v5986_v63  ;;  %1884 = vmatprep.subr.mxu1 %v5987_v20 }
 0x633   : > { %1814 = vmatpush1.msra.mxu0 %v5988_v4  ;;  %1847 = vmatprep.mubr.f32.mxu0 %v5989_v9 }
 0x634   : > { %1885 = vmatpush1.msra.mxu1 %v5990_v11  ;;  %1918 = vmatprep.mubr.f32.mxu1 %v5989_v9 }
 0x635   : > { %1962 = vmatprep.subr.mxu0 %v5991_v3  ;;  %2033 = vmatprep.subr.mxu1 %v5992_v12 }
 0x6d4   : > { %v1670_v14 = vpop.f32.mrf.mxu0  ;;  %v1741_v20 = vpop.f32.mrf.mxu1 }
 0x6d5   : > { %v1746_v13 = vadd.f32 %v1670_v14, %v1600_v24  ;;  %v1748_v3 = vadd.f32 %v1741_v20, %v1602_v7  ;;  %v5996_v20 = vld [vmem:[#allocation21_spill] sm:$0xff] }
 0x6d6   : > { %v1672_v15 = vpop.f32.mrf.mxu0  ;;  %v1743_v8 = vpop.f32.mrf.mxu1 }
 0x6d7   : > { %v3812_v63 = vmul.f32 -1.442695, %v1746_v13  ;;  %v1747_v6 = vadd.f32 %v1672_v15, %v1601_v18  ;;  %v1749_v11 = vadd.f32 %v1743_v8, %v1603_v10 }
 0x6d9   : > { %3985 = vpow2.f32 %v3812_v63  ;;  %v3813_v4 = vmul.f32 -1.442695, %v1747_v6  ;;  %v3814_v9 = vmul.f32 -1.442695, %v1749_v11  ;;  %v5995_v63 = vld [vmem:[#allocation19_spill] sm:$0xff] }
 0x6da   : > { %v5999_v11 = vld [vmem:[#allocation15_spill] sm:$0xff] }
 0x6db   : > { %3987 = vpow2.f32 %v3813_v4  ;;  %v5997_v4 = vld [vmem:[#allocation18_spill] sm:$0xff] }
 0x6dc   : > { %3989 = vpow2.f32 %v3814_v9  ;;  %v5998_v9 = vld [vmem:[#allocation20_spill] sm:$0xff] }
 0x6e6   : > { %v3986_v5 = vpop.eup %3985 }
 0x6e7   : > { %v1753_v2 = vadd.f32 1.0, %v3986_v5 }
 0x6e8   : > { %v3988_v12 = vpop.eup %3987 }
 0x6e9   : > { %3991 = vrcp.f32 %v1753_v2  ;;  %v1759_v17 = vadd.f32 1.0, %v3988_v12  ;;  %v3990_v15 = vpop.eup %3989  ;;  %v6002_v12 = vld [vmem:[#allocation16_spill] sm:$0xff] }
 0x6ea   : > { %3993 = vtanh.f32 %v1748_v3  ;;  %v1766_v14 = vadd.f32 1.0, %v3990_v15  ;;  %v6000_v3 = vld [vmem:[#allocation17_spill] sm:$0xff]  ;;  %v6003_v15 = vld [vmem:[#allocation11_spill] sm:$0xff] }
 0x6eb   : > { %3995 = vrcp.f32 %v1759_v17  ;;  %v5994_v17 = vld [vmem:[#allocation23_spill] sm:$0xff] }
 0x6ec   : > { %3997 = vrcp.f32 %v1766_v14  ;;  %v6007_v14 = vld [vmem:[#allocation7_spill] sm:$0xff] }
 0x6f6   : > { %v3992_v18 = vpop.eup %3991 }
 0x6f7   : > { %v3994_v24 = vpop.eup %3993 }
 0x6f8   : > { %v3996_v6 = vpop.eup %3995  ;;  %v1770_v13 = vmul.f32 %v3994_v24, %v3992_v18  ;;  %v6004_v18 = vld [vmem:[#allocation13_spill] sm:$0xff]  ;;  %v6005_v24 = vld [vmem:[#allocation10_spill] sm:$0xff] }
 0x6f9   : > { %v1769_v8 = vmul.f32 %v3996_v6, %v5011_v16  ;;  %v3998_v5 = vpop.eup %3997  ;;  %v5993_v16 = vld [vmem:[#allocation22_spill] sm:$0xff]  ;;  %v6006_v6 = vld [vmem:[#allocation12_spill] sm:$0xff] }
 0x6fb   : > { %v5082_v10 = vadd.f32 %v1770_v13, %v1769_v8  ;;  %v6008_v13 = vld [vmem:[#allocation9_spill] sm:$0xff]  ;;  %v6009_v8 = vld [vmem:[#allocation6_spill] sm:$0xff] }
 0x6fd   : > { %3999 = vtanh.f32 %v5082_v10 }
 0x70a   : > { %v4000_v7 = vpop.eup %3999 }
 0x70b   : > { %v1773_v2 = vmul.f32 %v4000_v7, %v3998_v5  ;;  %v6010_v5 = vmov 0.0   ;;  %v6011_v7 = vld [vmem:[#allocation8_spill] sm:$0xff] }
 0x70d   : > { %3815 = vst [vmem:[%s4590_s28 + $0x28] sm:$0xff] %v1773_v2  ;;  %1848 = vmatmul.mubr.f32.vlgmr.msra.gmra.mxu0 %v1773_v2  ;;  %1919 = vmatmul.mubr.f32.vlgmr.msra.gmra.mxu1 %v1773_v2  ;;  %v1779_v2 = vld [vmem:[#allocation2 + $0xa8] sm:$0xff] }
 0x70e   : > { %1963 = vmatpush1.msra.mxu0 %v4473_v62  ;;  %2034 = vmatpush1.msra.mxu1 %v4479_v1 }
 0x70f   : > { %1964 = vmatprep.subr.mxu0 %v4464_v59  ;;  %2035 = vmatprep.subr.mxu1 %v4470_v61 }
 0x710   : > { %1965 = vmatpush1.msra.mxu0 %v4461_v58  ;;  %2036 = vmatpush1.msra.mxu1 %v4467_v60 }
 0x711   : > { %1966 = vmatprep.subr.mxu0 %v4452_v55  ;;  %2037 = vmatprep.subr.mxu1 %v4458_v57 }
 0x712   : > { %1967 = vmatpush1.msra.mxu0 %v4449_v54  ;;  %2038 = vmatpush1.msra.mxu1 %v4455_v56 }
 0x713   : > { %1968 = vmatprep.subr.mxu0 %v4440_v51  ;;  %2039 = vmatprep.subr.mxu1 %v4446_v53 }
 0x714   : > { %1969 = vmatpush1.msra.mxu0 %v4437_v50  ;;  %2040 = vmatpush1.msra.mxu1 %v4443_v52 }
 0x715   : > { %1970 = vmatprep.subr.mxu0 %v4428_v47  ;;  %2041 = vmatprep.subr.mxu1 %v4434_v49 }
 0x716   : > { %1971 = vmatpush1.msra.mxu0 %v4425_v46  ;;  %2042 = vmatpush1.msra.mxu1 %v4431_v48 }
 0x717   : > { %1972 = vmatprep.subr.mxu0 %v4416_v43  ;;  %2043 = vmatprep.subr.mxu1 %v4422_v45 }
 0x718   : > { %1973 = vmatpush1.msra.mxu0 %v4413_v42  ;;  %2044 = vmatpush1.msra.mxu1 %v4419_v44 }
 0x719   : > { %1974 = vmatprep.subr.mxu0 %v4404_v39  ;;  %2045 = vmatprep.subr.mxu1 %v4410_v41 }
 0x71a   : > { %1975 = vmatpush1.msra.mxu0 %v4401_v38  ;;  %2046 = vmatpush1.msra.mxu1 %v4407_v40 }
 0x71b   : > { %1976 = vmatprep.subr.mxu0 %v4392_v35  ;;  %2047 = vmatprep.subr.mxu1 %v4398_v37 }
 0x71c   : > { %1977 = vmatpush1.msra.mxu0 %v4389_v34  ;;  %2048 = vmatpush1.msra.mxu1 %v4395_v36 }
 0x71d   : > { %1978 = vmatprep.subr.mxu0 %v4380_v31  ;;  %2049 = vmatprep.subr.mxu1 %v4386_v33 }
 0x71e   : > { %1979 = vmatpush1.msra.mxu0 %v4377_v30  ;;  %2050 = vmatpush1.msra.mxu1 %v4383_v32 }
 0x71f   : > { %1980 = vmatprep.subr.mxu0 %v4368_v27  ;;  %2051 = vmatprep.subr.mxu1 %v4374_v29 }
 0x720   : > { %1981 = vmatpush1.msra.mxu0 %v4365_v26  ;;  %2052 = vmatpush1.msra.mxu1 %v4371_v28 }
 0x721   : > { %1982 = vmatprep.subr.mxu0 %v4356_v23  ;;  %2053 = vmatprep.subr.mxu1 %v4362_v25 }
 0x722   : > { %1983 = vmatpush1.msra.mxu0 %v4353_v22  ;;  %2054 = vmatpush1.msra.mxu1 %v5889_v0  ;;  %v6001_v0 = vld [vmem:[#allocation14_spill] sm:$0xff] }
 0x723   : > { %1984 = vmatprep.subr.mxu0 %v4344_v19  ;;  %2055 = vmatprep.subr.mxu1 %v4350_v21 }
 0x724   : > { %1985 = vmatpush1.msra.mxu0 %v5993_v16  ;;  %2056 = vmatpush1.msra.mxu1 %v5994_v17  ;;  %v1780_v17 = vld [vmem:[#allocation2 + $0xd0] sm:$0xff] }
 0x725   : > { %1986 = vmatprep.subr.mxu0 %v5995_v63  ;;  %2057 = vmatprep.subr.mxu1 %v5996_v20 }
 0x726   : > { %1987 = vmatpush1.msra.mxu0 %v5997_v4  ;;  %2058 = vmatpush1.msra.mxu1 %v5998_v9 }
 0x727   : > { %1988 = vmatprep.subr.mxu0 %v5999_v11  ;;  %2059 = vmatprep.subr.mxu1 %v6000_v3 }
 0x728   : > { %1989 = vmatpush1.msra.mxu0 %v6001_v0  ;;  %2060 = vmatpush1.msra.mxu1 %v6002_v12  ;;  %v1782_v0 = vld [vmem:[#allocation2 + $0x28] sm:$0xff] }
 0x729   : > { %1990 = vmatprep.subr.mxu0 %v6003_v15  ;;  %2061 = vmatprep.subr.mxu1 %v6004_v18  ;;  %v1781_v18 = vld [vmem:[#allocation2 + $0x10] sm:$0xff] }
 0x72a   : > { %1991 = vmatpush1.msra.mxu0 %v6005_v24  ;;  %2062 = vmatpush1.msra.mxu1 %v6006_v6 }
 0x72b   : > { %1992 = vmatprep.subr.mxu0 %v6007_v14  ;;  %2063 = vmatprep.subr.mxu1 %v6008_v13 }
 0x72c   : > { %1993 = vmatpush1.msra.mxu0 %v6009_v8  ;;  %2026 = vmatprep.mubr.f32.mxu0 %v6010_v5 }
 0x72d   : > { %2064 = vmatpush1.msra.mxu1 %v6011_v7  ;;  %2097 = vmatprep.mubr.f32.mxu1 %v6010_v5 }
 0x7cd   : > { %v1849_v16 = vpop.f32.mrf.mxu0  ;;  %v1920_v11 = vpop.f32.mrf.mxu1 }
 0x7ce   : > { %v1925_v63 = vadd.f32 %v1849_v16, %v1779_v2  ;;  %v1927_v14 = vadd.f32 %v1920_v11, %v1781_v18  ;;  %v1959_v18 = vld [vmem:[#allocation2 + $0xf8] sm:$0xff] }
 0x7cf   : > { %v1851_v20 = vpop.f32.mrf.mxu0  ;;  %v1922_v12 = vpop.f32.mrf.mxu1 }
 0x7d0   : > { %v3816_v4 = vmul.f32 -1.442695, %v1925_v63  ;;  %v1926_v9 = vadd.f32 %v1851_v20, %v1780_v17  ;;  %v1928_v15 = vadd.f32 %v1922_v12, %v1782_v0  ;;  %v1958_v12 = vld [vmem:[#allocation2 + $0xa0] sm:$0xff] }
 0x7d2   : > { %4001 = vpow2.f32 %v3816_v4  ;;  %v3817_v3 = vmul.f32 -1.442695, %v1926_v9  ;;  %v3818_v24 = vmul.f32 -1.442695, %v1928_v15 }
 0x7d4   : > { %4003 = vpow2.f32 %v3817_v3 }
 0x7d5   : > { %4005 = vpow2.f32 %v3818_v24 }
 0x7df   : > { %v4002_v6 = vpop.eup %4001 }
 0x7e0   : > { %v1932_v13 = vadd.f32 1.0, %v4002_v6 }
 0x7e1   : > { %v4004_v8 = vpop.eup %4003 }
 0x7e2   : > { %4007 = vrcp.f32 %v1932_v13  ;;  %v1938_v5 = vadd.f32 1.0, %v4004_v8  ;;  %v4006_v7 = vpop.eup %4005 }
 0x7e3   : > { %4009 = vtanh.f32 %v1927_v14  ;;  %v1945_v63 = vadd.f32 1.0, %v4006_v7 }
 0x7e4   : > { %4011 = vrcp.f32 %v1938_v5 }
 0x7e5   : > { %4013 = vrcp.f32 %v1945_v63 }
 0x7ef   : > { %v4008_v2 = vpop.eup %4007 }
 0x7f0   : > { %v4010_v16 = vpop.eup %4009 }
 0x7f1   : > { %v4012_v17 = vpop.eup %4011  ;;  %v1949_v20 = vmul.f32 %v4010_v16, %v4008_v2  ;;  %v1960_v16 = vld [vmem:[#allocation2 + $0x20] sm:$0xff] }
 0x7f2   : > { %v1948_v4 = vmul.f32 %v4012_v17, %v5082_v10  ;;  %v4014_v11 = vpop.eup %4013  ;;  %v1961_v10 = vld [vmem:[#allocation2 + $0x98] sm:$0xff] }
 0x7f4   : > { %v1950_v9 = vadd.f32 %v1949_v20, %v1948_v4 }
 0x7f6   : > { %4015 = vtanh.f32 %v1950_v9 }
 0x803   : > { %v4016_v3 = vpop.eup %4015 }
 0x804   : > { %v1952_v0 = vmul.f32 %v4016_v3, %v4014_v11 }
 0x806   : > { %3819 = vst [vmem:[%s4590_s28 + $0x30] sm:$0xff] %v1952_v0  ;;  %2027 = vmatmul.mubr.f32.vlgmr.msra.gmra.mxu0 %v1952_v0  ;;  %2098 = vmatmul.mubr.f32.vlgmr.msra.gmra.mxu1 %v1952_v0 }
 0x8c6   : > { %v2028_v15 = vpop.f32.mrf.mxu0  ;;  %v2099_v8 = vpop.f32.mrf.mxu1 }
 0x8c7   : > { %v2104_v24 = vadd.f32 %v2028_v15, %v1958_v12  ;;  %v2106_v20 = vadd.f32 %v2099_v8, %v1960_v16 }
 0x8c8   : > { %v2030_v6 = vpop.f32.mrf.mxu0  ;;  %v2101_v7 = vpop.f32.mrf.mxu1 }
 0x8c9   : > { %v3820_v14 = vmul.f32 -1.442695, %v2104_v24  ;;  %v2105_v13 = vadd.f32 %v2030_v6, %v1959_v18  ;;  %v2107_v2 = vadd.f32 %v2101_v7, %v1961_v10 }
 0x8cb   : > { %4017 = vpow2.f32 %v3820_v14  ;;  %v3821_v5 = vmul.f32 -1.442695, %v2105_v13  ;;  %v3822_v17 = vmul.f32 -1.442695, %v2107_v2 }
 0x8cd   : > { %4019 = vpow2.f32 %v3821_v5 }
 0x8ce   : > { %4021 = vpow2.f32 %v3822_v17 }
 0x8d8   : > { %v4018_v63 = vpop.eup %4017 }
 0x8d9   : > { %v2111_v4 = vadd.f32 1.0, %v4018_v63 }
 0x8da   : > { %v4020_v11 = vpop.eup %4019 }
 0x8db   : > { %4023 = vrcp.f32 %v2111_v4  ;;  %v2117_v3 = vadd.f32 1.0, %v4020_v11  ;;  %v4022_v0 = vpop.eup %4021 }
 0x8dc   : > { %4025 = vtanh.f32 %v2106_v20  ;;  %v2124_v24 = vadd.f32 1.0, %v4022_v0 }
 0x8dd   : > { %4027 = vrcp.f32 %v2117_v3 }
 0x8de   : > { %4029 = vrcp.f32 %v2124_v24 }
 0x8e8   : > { %v4024_v12 = vpop.eup %4023 }
 0x8e9   : > { %v4026_v15 = vpop.eup %4025 }
 0x8ea   : > { %v4028_v18 = vpop.eup %4027  ;;  %v2128_v6 = vmul.f32 %v4026_v15, %v4024_v12 }
 0x8eb   : > { %v2127_v14 = vmul.f32 %v4028_v18, %v1950_v9  ;;  %v4030_v8 = vpop.eup %4029 }
 0x8ed   : > { %v2129_v13 = vadd.f32 %v2128_v6, %v2127_v14 }
 0x8ef   : > { %4031 = vtanh.f32 %v2129_v13  ;;  %2135 = vst [vmem:[#allocation4] sm:$0xff] %v2129_v13 }
 0x8fc   : > { %v4032_v5 = vpop.eup %4031 }
 0x8fd   : > { %v2131_v10 = vmul.f32 %v4032_v5, %v4030_v8 }
 0x8ff   : > { %3823 = vst [vmem:[%s4590_s28 + $0x38] sm:$0xff] %v2131_v10  ;;  %2134 = vst [vmem:[#allocation3] sm:$0xff] %v2131_v10 }
 0x900 PF: > { %p3824_p10 = scmp.ne.s32.totalorder %s4191_s17, 1 }
 0x902   : > { %2139 = sbr.rel (%p3824_p10) target bundleno = 4337 (0x10f1), region = 48 }
 0x907   : > { %v6012_v7 = vld [vmem:[#allocation25_spill] sm:$0xff]  ;;  %v6013_v2 = vld [vmem:[#allocation26_spill] sm:$0xff]  ;;  %v5819_v9 = vmov 0.0   ;;  %v6014_v16 = vld [vmem:[#allocation24_spill] sm:$0xff] }
 0x908   : > { %2149 = vmatprep.subr.mxu0 %v6012_v7  ;;  %2220 = vmatprep.subr.mxu1 %v6013_v2  ;;  %v6015_v17 = vld [vmem:[#allocation22_spill] sm:$0xff]  ;;  %v6016_v63 = vld [vmem:[#allocation19_spill] sm:$0xff]  ;;  %v6019_v11 = vld [vmem:[#allocation21_spill] sm:$0xff] }
 0x909   : > { %2150 = vmatpush1.msra.mxu0 %v4473_v62  ;;  %2221 = vmatpush1.msra.mxu1 %v4479_v1  ;;  %v6017_v20 = vld [vmem:[#allocation23_spill] sm:$0xff]  ;;  %v6018_v4 = vld [vmem:[#allocation18_spill] sm:$0xff]  ;;  %v6021_v0 = vld [vmem:[#allocation20_spill] sm:$0xff] }
 0x90a   : > { %2151 = vmatprep.subr.mxu0 %v4464_v59  ;;  %2222 = vmatprep.subr.mxu1 %v4470_v61  ;;  %v6020_v3 = vld [vmem:[#allocation15_spill] sm:$0xff]  ;;  %v6022_v12 = vld [vmem:[#allocation14_spill] sm:$0xff]  ;;  %v6023_v15 = vld [vmem:[#allocation17_spill] sm:$0xff] }
 0x90b   : > { %2152 = vmatpush1.msra.mxu0 %v4461_v58  ;;  %2223 = vmatpush1.msra.mxu1 %v4467_v60  ;;  %v6024_v18 = vld [vmem:[#allocation11_spill] sm:$0xff]  ;;  %v6025_v24 = vld [vmem:[#allocation16_spill] sm:$0xff]  ;;  %v6026_v6 = vld [vmem:[#allocation10_spill] sm:$0xff] }
 0x90c   : > { %2153 = vmatprep.subr.mxu0 %v4452_v55  ;;  %2224 = vmatprep.subr.mxu1 %v4458_v57  ;;  %v2140_v14 = vld [vmem:[#allocation3] sm:$0xff]  ;;  %v6027_v13 = vld [vmem:[#allocation13_spill] sm:$0xff]  ;;  %v6028_v8 = vld [vmem:[#allocation7_spill] sm:$0xff] }
 0x90d   : > { %2154 = vmatpush1.msra.mxu0 %v4449_v54  ;;  %2225 = vmatpush1.msra.mxu1 %v4455_v56  ;;  %v6029_v5 = vld [vmem:[#allocation12_spill] sm:$0xff]  ;;  %v6030_v10 = vld [vmem:[#allocation6_spill] sm:$0xff] }
 0x90e   : > { %2155 = vmatprep.subr.mxu0 %v4440_v51  ;;  %2226 = vmatprep.subr.mxu1 %v4446_v53 }
 0x90f   : > { %2156 = vmatpush1.msra.mxu0 %v4437_v50  ;;  %2227 = vmatpush1.msra.mxu1 %v4443_v52 }
 0x910   : > { %2157 = vmatprep.subr.mxu0 %v4428_v47  ;;  %2228 = vmatprep.subr.mxu1 %v4434_v49 }
 0x911   : > { %2158 = vmatpush1.msra.mxu0 %v4425_v46  ;;  %2229 = vmatpush1.msra.mxu1 %v4431_v48 }
 0x912   : > { %2159 = vmatprep.subr.mxu0 %v4416_v43  ;;  %2230 = vmatprep.subr.mxu1 %v4422_v45 }
 0x913   : > { %2160 = vmatpush1.msra.mxu0 %v4413_v42  ;;  %2231 = vmatpush1.msra.mxu1 %v4419_v44 }
 0x914   : > { %2161 = vmatprep.subr.mxu0 %v4404_v39  ;;  %2232 = vmatprep.subr.mxu1 %v4410_v41 }
 0x915   : > { %2162 = vmatpush1.msra.mxu0 %v4401_v38  ;;  %2233 = vmatpush1.msra.mxu1 %v4407_v40 }
 0x916   : > { %2163 = vmatprep.subr.mxu0 %v4392_v35  ;;  %2234 = vmatprep.subr.mxu1 %v4398_v37 }
 0x917   : > { %2164 = vmatpush1.msra.mxu0 %v4389_v34  ;;  %2213 = vmatprep.mubr.f32.mxu0 %v5819_v9  ;;  %v6031_v9 = vld [vmem:[#allocation9_spill] sm:$0xff] }
 0x918   : > { %2165 = vmatprep.subr.mxu0 %v4380_v31  ;;  %2235 = vmatpush1.msra.mxu1 %v4395_v36 }
 0x919   : > { %2166 = vmatpush1.msra.mxu0 %v4377_v30  ;;  %2236 = vmatprep.subr.mxu1 %v4386_v33 }
 0x91a   : > { %2167 = vmatprep.subr.mxu0 %v4368_v27  ;;  %2237 = vmatpush1.msra.mxu1 %v4383_v32 }
 0x91b   : > { %2168 = vmatpush1.msra.mxu0 %v4365_v26  ;;  %2238 = vmatprep.subr.mxu1 %v4374_v29 }
 0x91c   : > { %2169 = vmatprep.subr.mxu0 %v4356_v23  ;;  %2239 = vmatpush1.msra.mxu1 %v4371_v28 }
 0x91d   : > { %2170 = vmatpush1.msra.mxu0 %v4353_v22  ;;  %2240 = vmatprep.subr.mxu1 %v4362_v25 }
 0x91e   : > { %2171 = vmatprep.subr.mxu0 %v4344_v19  ;;  %2241 = vmatpush1.msra.mxu1 %v6014_v16 }
 0x91f   : > { %2172 = vmatpush1.msra.mxu0 %v6015_v17  ;;  %2242 = vmatprep.subr.mxu1 %v4350_v21 }
 0x920   : > { %2173 = vmatprep.subr.mxu0 %v6016_v63  ;;  %2243 = vmatpush1.msra.mxu1 %v6017_v20 }
 0x921   : > { %2174 = vmatpush1.msra.mxu0 %v6018_v4  ;;  %2244 = vmatprep.subr.mxu1 %v6019_v11 }
 0x922   : > { %2175 = vmatprep.subr.mxu0 %v6020_v3  ;;  %2245 = vmatpush1.msra.mxu1 %v6021_v0 }
 0x923   : > { %2176 = vmatpush1.msra.mxu0 %v6022_v12  ;;  %2246 = vmatprep.subr.mxu1 %v6023_v15  ;;  %v6032_v12 = vld [vmem:[#allocation8_spill] sm:$0xff]  ;;  %v6033_v15 = vmov 0.0  }
 0x924   : > { %2177 = vmatprep.subr.mxu0 %v6024_v18  ;;  %2247 = vmatpush1.msra.mxu1 %v6025_v24 }
 0x925   : > { %2178 = vmatpush1.msra.mxu0 %v6026_v6  ;;  %2248 = vmatprep.subr.mxu1 %v6027_v13 }
 0x926   : > { %2179 = vmatprep.subr.mxu0 %v6028_v8  ;;  %2249 = vmatpush1.msra.mxu1 %v6029_v5 }
 0x927   : > { %2180 = vmatpush1.msra.mxu0 %v6030_v10  ;;  %2250 = vmatprep.subr.mxu1 %v6031_v9 }
 0x928   : > { %2214 = vmatmul.mubr.f32.vlgmr.msra.gmra.mxu0 %v2140_v14  ;;  %2251 = vmatpush1.msra.mxu1 %v6032_v12 }
 0x929   : > { %2284 = vmatprep.mubr.f32.mxu1 %v6033_v15  ;;  %2328 = vmatprep.subr.mxu0 %v6012_v7 }
 0x92a   : > { %2285 = vmatmul.mubr.f32.vlgmr.msra.gmra.mxu1 %v2140_v14  ;;  %2399 = vmatprep.subr.mxu1 %v6013_v2  ;;  %v6034_v14 = vld [vmem:[#allocation17_spill] sm:$0xff] }
 0x92b   : > { %2329 = vmatpush1.msra.mxu0 %v4473_v62  ;;  %2400 = vmatpush1.msra.mxu1 %v4479_v1 }
 0x92c   : > { %2330 = vmatprep.subr.mxu0 %v4464_v59  ;;  %2401 = vmatprep.subr.mxu1 %v4470_v61 }
 0x92d   : > { %2331 = vmatpush1.msra.mxu0 %v4461_v58  ;;  %2402 = vmatpush1.msra.mxu1 %v4467_v60 }
 0x92e   : > { %2332 = vmatprep.subr.mxu0 %v4452_v55  ;;  %2403 = vmatprep.subr.mxu1 %v4458_v57 }
 0x92f   : > { %2333 = vmatpush1.msra.mxu0 %v4449_v54  ;;  %2404 = vmatpush1.msra.mxu1 %v4455_v56 }
 0x930   : > { %2334 = vmatprep.subr.mxu0 %v4440_v51  ;;  %2405 = vmatprep.subr.mxu1 %v4446_v53 }
 0x931   : > { %2335 = vmatpush1.msra.mxu0 %v4437_v50  ;;  %2406 = vmatpush1.msra.mxu1 %v4443_v52 }
 0x932   : > { %2336 = vmatprep.subr.mxu0 %v4428_v47  ;;  %2407 = vmatprep.subr.mxu1 %v4434_v49 }
 0x933   : > { %2337 = vmatpush1.msra.mxu0 %v4425_v46  ;;  %2408 = vmatpush1.msra.mxu1 %v4431_v48 }
 0x934   : > { %2338 = vmatprep.subr.mxu0 %v4416_v43  ;;  %2409 = vmatprep.subr.mxu1 %v4422_v45 }
 0x935   : > { %2339 = vmatpush1.msra.mxu0 %v4413_v42  ;;  %2410 = vmatpush1.msra.mxu1 %v4419_v44 }
 0x936   : > { %2340 = vmatprep.subr.mxu0 %v4404_v39  ;;  %2411 = vmatprep.subr.mxu1 %v4410_v41 }
 0x937   : > { %2341 = vmatpush1.msra.mxu0 %v4401_v38  ;;  %2412 = vmatpush1.msra.mxu1 %v4407_v40 }
 0x938   : > { %2342 = vmatprep.subr.mxu0 %v4392_v35  ;;  %2413 = vmatprep.subr.mxu1 %v4398_v37 }
 0x939   : > { %2343 = vmatpush1.msra.mxu0 %v4389_v34  ;;  %2414 = vmatpush1.msra.mxu1 %v4395_v36 }
 0x93a   : > { %2344 = vmatprep.subr.mxu0 %v4380_v31  ;;  %2415 = vmatprep.subr.mxu1 %v4386_v33 }
 0x93b   : > { %2345 = vmatpush1.msra.mxu0 %v4377_v30  ;;  %2416 = vmatpush1.msra.mxu1 %v4383_v32 }
 0x93c   : > { %2346 = vmatprep.subr.mxu0 %v4368_v27  ;;  %2417 = vmatprep.subr.mxu1 %v4374_v29 }
 0x93d   : > { %2347 = vmatpush1.msra.mxu0 %v4365_v26  ;;  %2418 = vmatpush1.msra.mxu1 %v4371_v28 }
 0x93e   : > { %2348 = vmatprep.subr.mxu0 %v4356_v23  ;;  %2419 = vmatprep.subr.mxu1 %v4362_v25 }
 0x93f   : > { %2349 = vmatpush1.msra.mxu0 %v4353_v22  ;;  %2420 = vmatpush1.msra.mxu1 %v6014_v16  ;;  %v6035_v16 = vld [vmem:[#allocation14_spill] sm:$0xff] }
 0x940   : > { %2350 = vmatprep.subr.mxu0 %v4344_v19  ;;  %2421 = vmatprep.subr.mxu1 %v4350_v21 }
 0x941   : > { %2351 = vmatpush1.msra.mxu0 %v6015_v17  ;;  %2422 = vmatpush1.msra.mxu1 %v6017_v20 }
 0x942   : > { %2352 = vmatprep.subr.mxu0 %v6016_v63  ;;  %2423 = vmatprep.subr.mxu1 %v6019_v11 }
 0x943   : > { %2353 = vmatpush1.msra.mxu0 %v6018_v4  ;;  %2424 = vmatpush1.msra.mxu1 %v6021_v0 }
 0x944   : > { %2354 = vmatprep.subr.mxu0 %v6020_v3  ;;  %2425 = vmatprep.subr.mxu1 %v6034_v14  ;;  %v2148_v14 = vld [vmem:[#allocation2 + $0x98] sm:$0xff] }
 0x945   : > { %2355 = vmatpush1.msra.mxu0 %v6035_v16  ;;  %2426 = vmatpush1.msra.mxu1 %v6025_v24 }
 0x946   : > { %2356 = vmatprep.subr.mxu0 %v6024_v18  ;;  %2427 = vmatprep.subr.mxu1 %v6027_v13  ;;  %v2145_v13 = vld [vmem:[#allocation2 + $0xa0] sm:$0xff]  ;;  %v2146_v18 = vld [vmem:[#allocation2 + $0xf8] sm:$0xff] }
 0x947   : > { %2357 = vmatpush1.msra.mxu0 %v6026_v6  ;;  %2428 = vmatpush1.msra.mxu1 %v6029_v5 }
 0x948   : > { %2358 = vmatprep.subr.mxu0 %v6028_v8  ;;  %2429 = vmatprep.subr.mxu1 %v6031_v9 }
 0x949   : > { %2359 = vmatpush1.msra.mxu0 %v6030_v10  ;;  %2392 = vmatprep.mubr.f32.mxu0 %v6033_v15 }
 0x94a   : > { %2430 = vmatpush1.msra.mxu1 %v6032_v12  ;;  %2463 = vmatprep.mubr.f32.mxu1 %v6033_v15  ;;  %v2147_v12 = vld [vmem:[#allocation2 + $0x20] sm:$0xff] }
 0x94b   : > { %2507 = vmatprep.subr.mxu0 %v6012_v7  ;;  %2578 = vmatprep.subr.mxu1 %v6013_v2 }
 0x9e8   : > { %v2215_v6 = vpop.f32.mrf.mxu0 }
 0x9e9   : > { %v2291_v5 = vadd.f32 %v2215_v6, %v2145_v13  ;;  %v2141_v13 = vld [vmem:[#allocation4] sm:$0xff] }
 0x9ea   : > { %v2217_v24 = vpop.f32.mrf.mxu0  ;;  %v2286_v10 = vpop.f32.mrf.mxu1 }
 0x9eb   : > { %v3825_v8 = vmul.f32 -1.442695, %v2291_v5  ;;  %v2292_v16 = vadd.f32 %v2217_v24, %v2146_v18  ;;  %v2293_v15 = vadd.f32 %v2286_v10, %v2147_v12  ;;  %v6039_v12 = vld [vmem:[#allocation18_spill] sm:$0xff]  ;;  %v6041_v10 = vld [vmem:[#allocation15_spill] sm:$0xff] }
 0x9ec   : > { %v2288_v3 = vpop.f32.mrf.mxu1 }
 0x9ed   : > { %4033 = vpow2.f32 %v3825_v8  ;;  %v3826_v9 = vmul.f32 -1.442695, %v2292_v16  ;;  %v2294_v0 = vadd.f32 %v2288_v3, %v2148_v14  ;;  %v6042_v14 = vld [vmem:[#allocation17_spill] sm:$0xff] }
 0x9ef   : > { %4035 = vpow2.f32 %v3826_v9  ;;  %v3827_v4 = vmul.f32 -1.442695, %v2294_v0 }
 0x9f0   : > { %4037 = vtanh.f32 %v2293_v15  ;;  %v6040_v15 = vld [vmem:[#allocation20_spill] sm:$0xff] }
 0x9f1   : > { %4039 = vpow2.f32 %v3827_v4 }
 0x9fa   : > { %v4034_v7 = vpop.eup %4033 }
 0x9fb   : > { %v2298_v11 = vadd.f32 1.0, %v4034_v7 }
 0x9fc   : > { %v4036_v2 = vpop.eup %4035 }
 0x9fd   : > { %4041 = vrcp.f32 %v2298_v11  ;;  %v2304_v6 = vadd.f32 1.0, %v4036_v2  ;;  %v4038_v18 = vpop.eup %4037  ;;  %v6036_v2 = vld [vmem:[#allocation24_spill] sm:$0xff]  ;;  %v6038_v11 = vld [vmem:[#allocation21_spill] sm:$0xff] }
 0x9fe   : > { %v4040_v24 = vpop.eup %4039 }
 0x9ff   : > { %4043 = vrcp.f32 %v2304_v6  ;;  %v2311_v8 = vadd.f32 1.0, %v4040_v24  ;;  %v6043_v6 = vld [vmem:[#allocation14_spill] sm:$0xff]  ;;  %v6045_v24 = vld [vmem:[#allocation11_spill] sm:$0xff] }
 0xa01   : > { %4045 = vrcp.f32 %v2311_v8  ;;  %v6049_v8 = vld [vmem:[#allocation7_spill] sm:$0xff] }
 0xa0a   : > { %v4042_v16 = vpop.eup %4041 }
 0xa0b   : > { %v2315_v63 = vmul.f32 %v4042_v16, %v4038_v18  ;;  %v6044_v18 = vld [vmem:[#allocation16_spill] sm:$0xff]  ;;  %v6046_v16 = vld [vmem:[#allocation13_spill] sm:$0xff] }
 0xa0c   : > { %v4044_v9 = vpop.eup %4043 }
 0xa0d   : > { %v2314_v5 = vmul.f32 %v4044_v9, %v2141_v13  ;;  %v6047_v13 = vld [vmem:[#allocation10_spill] sm:$0xff]  ;;  %v6048_v9 = vld [vmem:[#allocation12_spill] sm:$0xff] }
 0xa0e   : > { %v4046_v7 = vpop.eup %4045 }
 0xa0f   : > { %v5288_v3 = vadd.f32 %v2315_v63, %v2314_v5  ;;  %v6037_v63 = vld [vmem:[#allocation19_spill] sm:$0xff]  ;;  %v6050_v5 = vld [vmem:[#allocation9_spill] sm:$0xff] }
 0xa11   : > { %4047 = vtanh.f32 %v5288_v3 }
 0xa1e   : > { %v4048_v0 = vpop.eup %4047 }
 0xa1f   : > { %v2318_v4 = vmul.f32 %v4048_v0, %v4046_v7  ;;  %v6051_v7 = vld [vmem:[#allocation6_spill] sm:$0xff]  ;;  %v6052_v0 = vmov 0.0  }
 0xa21   : > { %3828 = vst [vmem:[%s4590_s28 + $0x38] sm:$0xff] %v2318_v4  ;;  %2393 = vmatmul.mubr.f32.vlgmr.msra.gmra.mxu0 %v2318_v4  ;;  %2464 = vmatmul.mubr.f32.vlgmr.msra.gmra.mxu1 %v2318_v4  ;;  %v6053_v4 = vld [vmem:[#allocation8_spill] sm:$0xff] }
 0xa22   : > { %2508 = vmatpush1.msra.mxu0 %v4473_v62  ;;  %2579 = vmatpush1.msra.mxu1 %v4479_v1 }
 0xa23   : > { %2509 = vmatprep.subr.mxu0 %v4464_v59  ;;  %2580 = vmatprep.subr.mxu1 %v4470_v61 }
 0xa24   : > { %2510 = vmatpush1.msra.mxu0 %v4461_v58  ;;  %2581 = vmatpush1.msra.mxu1 %v4467_v60 }
 0xa25   : > { %2511 = vmatprep.subr.mxu0 %v4452_v55  ;;  %2582 = vmatprep.subr.mxu1 %v4458_v57 }
 0xa26   : > { %2512 = vmatpush1.msra.mxu0 %v4449_v54  ;;  %2583 = vmatpush1.msra.mxu1 %v4455_v56 }
 0xa27   : > { %2513 = vmatprep.subr.mxu0 %v4440_v51  ;;  %2584 = vmatprep.subr.mxu1 %v4446_v53 }
 0xa28   : > { %2514 = vmatpush1.msra.mxu0 %v4437_v50  ;;  %2585 = vmatpush1.msra.mxu1 %v4443_v52 }
 0xa29   : > { %2515 = vmatprep.subr.mxu0 %v4428_v47  ;;  %2586 = vmatprep.subr.mxu1 %v4434_v49 }
 0xa2a   : > { %2516 = vmatpush1.msra.mxu0 %v4425_v46  ;;  %2587 = vmatpush1.msra.mxu1 %v4431_v48 }
 0xa2b   : > { %2517 = vmatprep.subr.mxu0 %v4416_v43  ;;  %2588 = vmatprep.subr.mxu1 %v4422_v45 }
 0xa2c   : > { %2518 = vmatpush1.msra.mxu0 %v4413_v42  ;;  %2589 = vmatpush1.msra.mxu1 %v4419_v44 }
 0xa2d   : > { %2519 = vmatprep.subr.mxu0 %v4404_v39  ;;  %2590 = vmatprep.subr.mxu1 %v4410_v41 }
 0xa2e   : > { %2520 = vmatpush1.msra.mxu0 %v4401_v38  ;;  %2591 = vmatpush1.msra.mxu1 %v4407_v40 }
 0xa2f   : > { %2521 = vmatprep.subr.mxu0 %v4392_v35  ;;  %2592 = vmatprep.subr.mxu1 %v4398_v37 }
 0xa30   : > { %2522 = vmatpush1.msra.mxu0 %v4389_v34  ;;  %2593 = vmatpush1.msra.mxu1 %v4395_v36 }
 0xa31   : > { %2523 = vmatprep.subr.mxu0 %v4380_v31  ;;  %2594 = vmatprep.subr.mxu1 %v4386_v33 }
 0xa32   : > { %2524 = vmatpush1.msra.mxu0 %v4377_v30  ;;  %2595 = vmatpush1.msra.mxu1 %v4383_v32 }
 0xa33   : > { %2525 = vmatprep.subr.mxu0 %v4368_v27  ;;  %2596 = vmatprep.subr.mxu1 %v4374_v29 }
 0xa34   : > { %2526 = vmatpush1.msra.mxu0 %v4365_v26  ;;  %2597 = vmatpush1.msra.mxu1 %v4371_v28 }
 0xa35   : > { %2527 = vmatprep.subr.mxu0 %v4356_v23  ;;  %2598 = vmatprep.subr.mxu1 %v4362_v25 }
 0xa36   : > { %2528 = vmatpush1.msra.mxu0 %v4353_v22  ;;  %2599 = vmatpush1.msra.mxu1 %v6036_v2 }
 0xa37   : > { %2529 = vmatprep.subr.mxu0 %v4344_v19  ;;  %2600 = vmatprep.subr.mxu1 %v4350_v21 }
 0xa38   : > { %2530 = vmatpush1.msra.mxu0 %v6015_v17  ;;  %2601 = vmatpush1.msra.mxu1 %v6017_v20 }
 0xa39   : > { %2531 = vmatprep.subr.mxu0 %v6037_v63  ;;  %2602 = vmatprep.subr.mxu1 %v6038_v11  ;;  %v2326_v11 = vld [vmem:[#allocation2 + $0x10] sm:$0xff] }
 0xa3a   : > { %2532 = vmatpush1.msra.mxu0 %v6039_v12  ;;  %2603 = vmatpush1.msra.mxu1 %v6040_v15  ;;  %v2327_v15 = vld [vmem:[#allocation2 + $0x28] sm:$0xff] }
 0xa3b   : > { %2533 = vmatprep.subr.mxu0 %v6041_v10  ;;  %2604 = vmatprep.subr.mxu1 %v6042_v14 }
 0xa3c   : > { %2534 = vmatpush1.msra.mxu0 %v6043_v6  ;;  %2605 = vmatpush1.msra.mxu1 %v6044_v18  ;;  %v6054_v18 = vld [vmem:[#allocation25_spill] sm:$0xff]  ;;  %v2325_v6 = vld [vmem:[#allocation2 + $0xd0] sm:$0xff] }
 0xa3d   : > { %2535 = vmatprep.subr.mxu0 %v6045_v24  ;;  %2606 = vmatprep.subr.mxu1 %v6046_v16  ;;  %v6055_v24 = vld [vmem:[#allocation26_spill] sm:$0xff]  ;;  %v2324_v16 = vld [vmem:[#allocation2 + $0xa8] sm:$0xff] }
 0xa3e   : > { %2536 = vmatpush1.msra.mxu0 %v6047_v13  ;;  %2607 = vmatpush1.msra.mxu1 %v6048_v9 }
 0xa3f   : > { %2537 = vmatprep.subr.mxu0 %v6049_v8  ;;  %2608 = vmatprep.subr.mxu1 %v6050_v5 }
 0xa40   : > { %2538 = vmatpush1.msra.mxu0 %v6051_v7  ;;  %2571 = vmatprep.mubr.f32.mxu0 %v6052_v0 }
 0xa41   : > { %2609 = vmatpush1.msra.mxu1 %v6053_v4  ;;  %2642 = vmatprep.mubr.f32.mxu1 %v6052_v0 }
 0xa42   : > { %2686 = vmatprep.subr.mxu0 %v6054_v18  ;;  %2757 = vmatprep.subr.mxu1 %v6055_v24 }
 0xae1   : > { %v2394_v13 = vpop.f32.mrf.mxu0  ;;  %v2465_v5 = vpop.f32.mrf.mxu1 }
 0xae2   : > { %v2470_v9 = vadd.f32 %v2394_v13, %v2324_v16  ;;  %v2472_v18 = vadd.f32 %v2465_v5, %v2326_v11  ;;  %v6061_v5 = vld [vmem:[#allocation20_spill] sm:$0xff] }
 0xae3   : > { %v2396_v14 = vpop.f32.mrf.mxu0  ;;  %v2467_v12 = vpop.f32.mrf.mxu1 }
 0xae4   : > { %v3829_v8 = vmul.f32 -1.442695, %v2470_v9  ;;  %v2471_v10 = vadd.f32 %v2396_v14, %v2325_v6  ;;  %v2473_v4 = vadd.f32 %v2467_v12, %v2327_v15 }
 0xae6   : > { %4049 = vpow2.f32 %v3829_v8  ;;  %v3830_v7 = vmul.f32 -1.442695, %v2471_v10  ;;  %v3831_v0 = vmul.f32 -1.442695, %v2473_v4  ;;  %v6060_v8 = vld [vmem:[#allocation18_spill] sm:$0xff] }
 0xae7   : > { %v6064_v4 = vld [vmem:[#allocation14_spill] sm:$0xff] }
 0xae8   : > { %4051 = vpow2.f32 %v3830_v7  ;;  %v6062_v7 = vld [vmem:[#allocation15_spill] sm:$0xff] }
 0xae9   : > { %4053 = vpow2.f32 %v3831_v0  ;;  %v6063_v0 = vld [vmem:[#allocation17_spill] sm:$0xff] }
 0xaf3   : > { %v4050_v63 = vpop.eup %4049 }
 0xaf4   : > { %v2477_v20 = vadd.f32 1.0, %v4050_v63 }
 0xaf5   : > { %v4052_v24 = vpop.eup %4051 }
 0xaf6   : > { %4055 = vrcp.f32 %v2477_v20  ;;  %v2483_v17 = vadd.f32 1.0, %v4052_v24  ;;  %v4054_v14 = vpop.eup %4053  ;;  %v6059_v24 = vld [vmem:[#allocation21_spill] sm:$0xff] }
 0xaf7   : > { %4057 = vtanh.f32 %v2472_v18  ;;  %v2490_v13 = vadd.f32 1.0, %v4054_v14  ;;  %v6058_v18 = vld [vmem:[#allocation19_spill] sm:$0xff]  ;;  %v6065_v14 = vld [vmem:[#allocation16_spill] sm:$0xff] }
 0xaf8   : > { %4059 = vrcp.f32 %v2483_v17  ;;  %v6056_v17 = vld [vmem:[#allocation22_spill] sm:$0xff] }
 0xaf9   : > { %4061 = vrcp.f32 %v2490_v13  ;;  %v6069_v13 = vld [vmem:[#allocation12_spill] sm:$0xff] }
 0xb03   : > { %v4056_v6 = vpop.eup %4055 }
 0xb04   : > { %v4058_v16 = vpop.eup %4057 }
 0xb05   : > { %v4060_v10 = vpop.eup %4059  ;;  %v2494_v9 = vmul.f32 %v4058_v16, %v4056_v6  ;;  %v6066_v6 = vld [vmem:[#allocation11_spill] sm:$0xff]  ;;  %v6067_v16 = vld [vmem:[#allocation13_spill] sm:$0xff] }
 0xb06   : > { %v2493_v12 = vmul.f32 %v4060_v10, %v5288_v3  ;;  %v4062_v63 = vpop.eup %4061  ;;  %v6057_v3 = vld [vmem:[#allocation23_spill] sm:$0xff]  ;;  %v6068_v10 = vld [vmem:[#allocation10_spill] sm:$0xff] }
 0xb08   : > { %v5359_v15 = vadd.f32 %v2494_v9, %v2493_v12  ;;  %v6070_v9 = vld [vmem:[#allocation7_spill] sm:$0xff]  ;;  %v6071_v12 = vld [vmem:[#allocation9_spill] sm:$0xff] }
 0xb0a   : > { %4063 = vtanh.f32 %v5359_v15 }
 0xb17   : > { %v4064_v11 = vpop.eup %4063 }
 0xb18   : > { %v2497_v20 = vmul.f32 %v4064_v11, %v4062_v63  ;;  %v6072_v63 = vld [vmem:[#allocation6_spill] sm:$0xff]  ;;  %v6073_v11 = vmov 0.0  }
 0xb1a   : > { %3832 = vst [vmem:[%s4590_s28 + $0x30] sm:$0xff] %v2497_v20  ;;  %2572 = vmatmul.mubr.f32.vlgmr.msra.gmra.mxu0 %v2497_v20  ;;  %2643 = vmatmul.mubr.f32.vlgmr.msra.gmra.mxu1 %v2497_v20  ;;  %v6074_v20 = vld [vmem:[#allocation8_spill] sm:$0xff] }
 0xb1b   : > { %2687 = vmatpush1.msra.mxu0 %v4473_v62  ;;  %2758 = vmatpush1.msra.mxu1 %v4479_v1 }
 0xb1c   : > { %2688 = vmatprep.subr.mxu0 %v4464_v59  ;;  %2759 = vmatprep.subr.mxu1 %v4470_v61 }
 0xb1d   : > { %2689 = vmatpush1.msra.mxu0 %v4461_v58  ;;  %2760 = vmatpush1.msra.mxu1 %v4467_v60 }
 0xb1e   : > { %2690 = vmatprep.subr.mxu0 %v4452_v55  ;;  %2761 = vmatprep.subr.mxu1 %v4458_v57 }
 0xb1f   : > { %2691 = vmatpush1.msra.mxu0 %v4449_v54  ;;  %2762 = vmatpush1.msra.mxu1 %v4455_v56 }
 0xb20   : > { %2692 = vmatprep.subr.mxu0 %v4440_v51  ;;  %2763 = vmatprep.subr.mxu1 %v4446_v53 }
 0xb21   : > { %2693 = vmatpush1.msra.mxu0 %v4437_v50  ;;  %2764 = vmatpush1.msra.mxu1 %v4443_v52 }
 0xb22   : > { %2694 = vmatprep.subr.mxu0 %v4428_v47  ;;  %2765 = vmatprep.subr.mxu1 %v4434_v49 }
 0xb23   : > { %2695 = vmatpush1.msra.mxu0 %v4425_v46  ;;  %2766 = vmatpush1.msra.mxu1 %v4431_v48 }
 0xb24   : > { %2696 = vmatprep.subr.mxu0 %v4416_v43  ;;  %2767 = vmatprep.subr.mxu1 %v4422_v45 }
 0xb25   : > { %2697 = vmatpush1.msra.mxu0 %v4413_v42  ;;  %2768 = vmatpush1.msra.mxu1 %v4419_v44 }
 0xb26   : > { %2698 = vmatprep.subr.mxu0 %v4404_v39  ;;  %2769 = vmatprep.subr.mxu1 %v4410_v41 }
 0xb27   : > { %2699 = vmatpush1.msra.mxu0 %v4401_v38  ;;  %2770 = vmatpush1.msra.mxu1 %v4407_v40 }
 0xb28   : > { %2700 = vmatprep.subr.mxu0 %v4392_v35  ;;  %2771 = vmatprep.subr.mxu1 %v4398_v37 }
 0xb29   : > { %2701 = vmatpush1.msra.mxu0 %v4389_v34  ;;  %2772 = vmatpush1.msra.mxu1 %v4395_v36 }
 0xb2a   : > { %2702 = vmatprep.subr.mxu0 %v4380_v31  ;;  %2773 = vmatprep.subr.mxu1 %v4386_v33 }
 0xb2b   : > { %2703 = vmatpush1.msra.mxu0 %v4377_v30  ;;  %2774 = vmatpush1.msra.mxu1 %v4383_v32 }
 0xb2c   : > { %2704 = vmatprep.subr.mxu0 %v4368_v27  ;;  %2775 = vmatprep.subr.mxu1 %v4374_v29 }
 0xb2d   : > { %2705 = vmatpush1.msra.mxu0 %v4365_v26  ;;  %2776 = vmatpush1.msra.mxu1 %v4371_v28 }
 0xb2e   : > { %2706 = vmatprep.subr.mxu0 %v4356_v23  ;;  %2777 = vmatprep.subr.mxu1 %v4362_v25 }
 0xb2f   : > { %2707 = vmatpush1.msra.mxu0 %v4353_v22  ;;  %2778 = vmatpush1.msra.mxu1 %v6036_v2 }
 0xb30   : > { %2708 = vmatprep.subr.mxu0 %v4344_v19  ;;  %2779 = vmatprep.subr.mxu1 %v4350_v21 }
 0xb31   : > { %2709 = vmatpush1.msra.mxu0 %v6056_v17  ;;  %2780 = vmatpush1.msra.mxu1 %v6057_v3 }
 0xb32   : > { %2710 = vmatprep.subr.mxu0 %v6058_v18  ;;  %2781 = vmatprep.subr.mxu1 %v6059_v24  ;;  %v2505_v24 = vld [vmem:[#allocation2 + $0x70] sm:$0xff] }
 0xb33   : > { %2711 = vmatpush1.msra.mxu0 %v6060_v8  ;;  %2782 = vmatpush1.msra.mxu1 %v6061_v5  ;;  %v2506_v5 = vld [vmem:[#allocation2 + $0xc0] sm:$0xff] }
 0xb34   : > { %2712 = vmatprep.subr.mxu0 %v6062_v7  ;;  %2783 = vmatprep.subr.mxu1 %v6063_v0 }
 0xb35   : > { %2713 = vmatpush1.msra.mxu0 %v6064_v4  ;;  %2784 = vmatpush1.msra.mxu1 %v6065_v14  ;;  %v6075_v14 = vld [vmem:[#allocation25_spill] sm:$0xff]  ;;  %v2504_v4 = vld [vmem:[#allocation2 + $0x90] sm:$0xff] }
 0xb36   : > { %2714 = vmatprep.subr.mxu0 %v6066_v6  ;;  %2785 = vmatprep.subr.mxu1 %v6067_v16  ;;  %v6076_v6 = vld [vmem:[#allocation26_spill] sm:$0xff]  ;;  %v2503_v16 = vld [vmem:[#allocation2 + $0xe0] sm:$0xff] }
 0xb37   : > { %2715 = vmatpush1.msra.mxu0 %v6068_v10  ;;  %2786 = vmatpush1.msra.mxu1 %v6069_v13 }
 0xb38   : > { %2716 = vmatprep.subr.mxu0 %v6070_v9  ;;  %2787 = vmatprep.subr.mxu1 %v6071_v12 }
 0xb39   : > { %2717 = vmatpush1.msra.mxu0 %v6072_v63  ;;  %2750 = vmatprep.mubr.f32.mxu0 %v6073_v11 }
 0xb3a   : > { %2788 = vmatpush1.msra.mxu1 %v6074_v20  ;;  %2821 = vmatprep.mubr.f32.mxu1 %v6073_v11 }
 0xb3b   : > { %2865 = vmatprep.subr.mxu0 %v6075_v14  ;;  %2936 = vmatprep.subr.mxu1 %v6076_v6 }
 0xbda   : > { %v2573_v10 = vpop.f32.mrf.mxu0  ;;  %v2644_v12 = vpop.f32.mrf.mxu1 }
 0xbdb   : > { %v2649_v13 = vadd.f32 %v2573_v10, %v2503_v16  ;;  %v2651_v14 = vadd.f32 %v2644_v12, %v2505_v24  ;;  %v6082_v12 = vld [vmem:[#allocation20_spill] sm:$0xff] }
 0xbdc   : > { %v2575_v0 = vpop.f32.mrf.mxu0  ;;  %v2646_v8 = vpop.f32.mrf.mxu1 }
 0xbdd   : > { %v3833_v9 = vmul.f32 -1.442695, %v2649_v13  ;;  %v2650_v7 = vadd.f32 %v2575_v0, %v2504_v4  ;;  %v2652_v20 = vadd.f32 %v2646_v8, %v2506_v5 }
 0xbdf   : > { %4065 = vpow2.f32 %v3833_v9  ;;  %v3834_v63 = vmul.f32 -1.442695, %v2650_v7  ;;  %v3835_v11 = vmul.f32 -1.442695, %v2652_v20  ;;  %v6081_v9 = vld [vmem:[#allocation18_spill] sm:$0xff] }
 0xbe0   : > { %v6085_v20 = vld [vmem:[#allocation14_spill] sm:$0xff] }
 0xbe1   : > { %4067 = vpow2.f32 %v3834_v63  ;;  %v6083_v63 = vld [vmem:[#allocation15_spill] sm:$0xff] }
 0xbe2   : > { %4069 = vpow2.f32 %v3835_v11  ;;  %v6084_v11 = vld [vmem:[#allocation17_spill] sm:$0xff] }
 0xbec   : > { %v4066_v18 = vpop.eup %4065 }
 0xbed   : > { %v2656_v3 = vadd.f32 1.0, %v4066_v18 }
 0xbee   : > { %v4068_v6 = vpop.eup %4067 }
 0xbef   : > { %4071 = vrcp.f32 %v2656_v3  ;;  %v2662_v17 = vadd.f32 1.0, %v4068_v6  ;;  %v4070_v0 = vpop.eup %4069  ;;  %v6080_v6 = vld [vmem:[#allocation21_spill] sm:$0xff] }
 0xbf0   : > { %4073 = vtanh.f32 %v2651_v14  ;;  %v2669_v10 = vadd.f32 1.0, %v4070_v0  ;;  %v6079_v14 = vld [vmem:[#allocation19_spill] sm:$0xff]  ;;  %v6086_v0 = vld [vmem:[#allocation16_spill] sm:$0xff] }
 0xbf1   : > { %4075 = vrcp.f32 %v2662_v17  ;;  %v6078_v17 = vld [vmem:[#allocation23_spill] sm:$0xff] }
 0xbf2   : > { %4077 = vrcp.f32 %v2669_v10  ;;  %v6090_v10 = vld [vmem:[#allocation12_spill] sm:$0xff] }
 0xbfc   : > { %v4072_v4 = vpop.eup %4071 }
 0xbfd   : > { %v4074_v16 = vpop.eup %4073 }
 0xbfe   : > { %v4076_v7 = vpop.eup %4075  ;;  %v2673_v13 = vmul.f32 %v4074_v16, %v4072_v4  ;;  %v6087_v4 = vld [vmem:[#allocation11_spill] sm:$0xff]  ;;  %v6088_v16 = vld [vmem:[#allocation13_spill] sm:$0xff] }
 0xbff   : > { %v2672_v8 = vmul.f32 %v4076_v7, %v5359_v15  ;;  %v4078_v18 = vpop.eup %4077  ;;  %v6077_v15 = vld [vmem:[#allocation22_spill] sm:$0xff] }
 0xc00   : > { %v6089_v7 = vld [vmem:[#allocation10_spill] sm:$0xff] }
 0xc01   : > { %v5430_v5 = vadd.f32 %v2673_v13, %v2672_v8  ;;  %v6091_v13 = vld [vmem:[#allocation7_spill] sm:$0xff]  ;;  %v6092_v8 = vld [vmem:[#allocation9_spill] sm:$0xff] }
 0xc03   : > { %4079 = vtanh.f32 %v5430_v5 }
 0xc10   : > { %v4080_v24 = vpop.eup %4079 }
 0xc11   : > { %v2676_v3 = vmul.f32 %v4080_v24, %v4078_v18  ;;  %v6093_v18 = vld [vmem:[#allocation6_spill] sm:$0xff]  ;;  %v6094_v24 = vmov 0.0  }
 0xc13   : > { %3836 = vst [vmem:[%s4590_s28 + $0x28] sm:$0xff] %v2676_v3  ;;  %2751 = vmatmul.mubr.f32.vlgmr.msra.gmra.mxu0 %v2676_v3  ;;  %2822 = vmatmul.mubr.f32.vlgmr.msra.gmra.mxu1 %v2676_v3  ;;  %v6095_v3 = vld [vmem:[#allocation8_spill] sm:$0xff] }
 0xc14   : > { %2866 = vmatpush1.msra.mxu0 %v4473_v62  ;;  %2937 = vmatpush1.msra.mxu1 %v4479_v1 }
 0xc15   : > { %2867 = vmatprep.subr.mxu0 %v4464_v59  ;;  %2938 = vmatprep.subr.mxu1 %v4470_v61 }
 0xc16   : > { %2868 = vmatpush1.msra.mxu0 %v4461_v58  ;;  %2939 = vmatpush1.msra.mxu1 %v4467_v60 }
 0xc17   : > { %2869 = vmatprep.subr.mxu0 %v4452_v55  ;;  %2940 = vmatprep.subr.mxu1 %v4458_v57 }
 0xc18   : > { %2870 = vmatpush1.msra.mxu0 %v4449_v54  ;;  %2941 = vmatpush1.msra.mxu1 %v4455_v56 }
 0xc19   : > { %2871 = vmatprep.subr.mxu0 %v4440_v51  ;;  %2942 = vmatprep.subr.mxu1 %v4446_v53 }
 0xc1a   : > { %2872 = vmatpush1.msra.mxu0 %v4437_v50  ;;  %2943 = vmatpush1.msra.mxu1 %v4443_v52 }
 0xc1b   : > { %2873 = vmatprep.subr.mxu0 %v4428_v47  ;;  %2944 = vmatprep.subr.mxu1 %v4434_v49 }
 0xc1c   : > { %2874 = vmatpush1.msra.mxu0 %v4425_v46  ;;  %2945 = vmatpush1.msra.mxu1 %v4431_v48 }
 0xc1d   : > { %2875 = vmatprep.subr.mxu0 %v4416_v43  ;;  %2946 = vmatprep.subr.mxu1 %v4422_v45 }
 0xc1e   : > { %2876 = vmatpush1.msra.mxu0 %v4413_v42  ;;  %2947 = vmatpush1.msra.mxu1 %v4419_v44 }
 0xc1f   : > { %2877 = vmatprep.subr.mxu0 %v4404_v39  ;;  %2948 = vmatprep.subr.mxu1 %v4410_v41 }
 0xc20   : > { %2878 = vmatpush1.msra.mxu0 %v4401_v38  ;;  %2949 = vmatpush1.msra.mxu1 %v4407_v40 }
 0xc21   : > { %2879 = vmatprep.subr.mxu0 %v4392_v35  ;;  %2950 = vmatprep.subr.mxu1 %v4398_v37 }
 0xc22   : > { %2880 = vmatpush1.msra.mxu0 %v4389_v34  ;;  %2951 = vmatpush1.msra.mxu1 %v4395_v36 }
 0xc23   : > { %2881 = vmatprep.subr.mxu0 %v4380_v31  ;;  %2952 = vmatprep.subr.mxu1 %v4386_v33 }
 0xc24   : > { %2882 = vmatpush1.msra.mxu0 %v4377_v30  ;;  %2953 = vmatpush1.msra.mxu1 %v4383_v32 }
 0xc25   : > { %2883 = vmatprep.subr.mxu0 %v4368_v27  ;;  %2954 = vmatprep.subr.mxu1 %v4374_v29 }
 0xc26   : > { %2884 = vmatpush1.msra.mxu0 %v4365_v26  ;;  %2955 = vmatpush1.msra.mxu1 %v4371_v28 }
 0xc27   : > { %2885 = vmatprep.subr.mxu0 %v4356_v23  ;;  %2956 = vmatprep.subr.mxu1 %v4362_v25 }
 0xc28   : > { %2886 = vmatpush1.msra.mxu0 %v4353_v22  ;;  %2957 = vmatpush1.msra.mxu1 %v6036_v2 }
 0xc29   : > { %2887 = vmatprep.subr.mxu0 %v4344_v19  ;;  %2958 = vmatprep.subr.mxu1 %v4350_v21 }
 0xc2a   : > { %2888 = vmatpush1.msra.mxu0 %v6077_v15  ;;  %2959 = vmatpush1.msra.mxu1 %v6078_v17 }
 0xc2b   : > { %2889 = vmatprep.subr.mxu0 %v6079_v14  ;;  %2960 = vmatprep.subr.mxu1 %v6080_v6  ;;  %v2684_v6 = vld [vmem:[#allocation2 + $0x40] sm:$0xff] }
 0xc2c   : > { %2890 = vmatpush1.msra.mxu0 %v6081_v9  ;;  %2961 = vmatpush1.msra.mxu1 %v6082_v12  ;;  %v2685_v12 = vld [vmem:[#allocation2 + $0xc8] sm:$0xff] }
 0xc2d   : > { %2891 = vmatprep.subr.mxu0 %v6083_v63  ;;  %2962 = vmatprep.subr.mxu1 %v6084_v11 }
 0xc2e   : > { %2892 = vmatpush1.msra.mxu0 %v6085_v20  ;;  %2963 = vmatpush1.msra.mxu1 %v6086_v0  ;;  %v6096_v0 = vld [vmem:[#allocation25_spill] sm:$0xff]  ;;  %v2683_v20 = vld [vmem:[#allocation2 + $0x58] sm:$0xff] }
 0xc2f   : > { %2893 = vmatprep.subr.mxu0 %v6087_v4  ;;  %2964 = vmatprep.subr.mxu1 %v6088_v16  ;;  %v6097_v4 = vld [vmem:[#allocation26_spill] sm:$0xff]  ;;  %v2682_v16 = vld [vmem:[#allocation2 + $0x38] sm:$0xff] }
 0xc30   : > { %2894 = vmatpush1.msra.mxu0 %v6089_v7  ;;  %2965 = vmatpush1.msra.mxu1 %v6090_v10 }
 0xc31   : > { %2895 = vmatprep.subr.mxu0 %v6091_v13  ;;  %2966 = vmatprep.subr.mxu1 %v6092_v8 }
 0xc32   : > { %2896 = vmatpush1.msra.mxu0 %v6093_v18  ;;  %2929 = vmatprep.mubr.f32.mxu0 %v6094_v24 }
 0xc33   : > { %2967 = vmatpush1.msra.mxu1 %v6095_v3  ;;  %3000 = vmatprep.mubr.f32.mxu1 %v6094_v24 }
 0xc34   : > { %3044 = vmatprep.subr.mxu0 %v6096_v0  ;;  %3115 = vmatprep.subr.mxu1 %v6097_v4 }
 0xcd3   : > { %v2752_v7 = vpop.f32.mrf.mxu0  ;;  %v2823_v8 = vpop.f32.mrf.mxu1 }
 0xcd4   : > { %v2828_v10 = vadd.f32 %v2752_v7, %v2682_v16  ;;  %v2830_v0 = vadd.f32 %v2823_v8, %v2684_v6  ;;  %v6103_v8 = vld [vmem:[#allocation20_spill] sm:$0xff] }
 0xcd5   : > { %v2754_v11 = vpop.f32.mrf.mxu0  ;;  %v2825_v9 = vpop.f32.mrf.mxu1 }
 0xcd6   : > { %v3837_v13 = vmul.f32 -1.442695, %v2828_v10  ;;  %v2829_v63 = vadd.f32 %v2754_v11, %v2683_v20  ;;  %v2831_v3 = vadd.f32 %v2825_v9, %v2685_v12 }
 0xcd8   : > { %4081 = vpow2.f32 %v3837_v13  ;;  %v3838_v18 = vmul.f32 -1.442695, %v2829_v63  ;;  %v3839_v24 = vmul.f32 -1.442695, %v2831_v3  ;;  %v6102_v13 = vld [vmem:[#allocation18_spill] sm:$0xff] }
 0xcd9   : > { %v6106_v3 = vld [vmem:[#allocation14_spill] sm:$0xff] }
 0xcda   : > { %4083 = vpow2.f32 %v3838_v18  ;;  %v6104_v18 = vld [vmem:[#allocation15_spill] sm:$0xff] }
 0xcdb   : > { %4085 = vpow2.f32 %v3839_v24  ;;  %v6105_v24 = vld [vmem:[#allocation17_spill] sm:$0xff] }
 0xce5   : > { %v4082_v14 = vpop.eup %4081 }
 0xce6   : > { %v2835_v17 = vadd.f32 1.0, %v4082_v14 }
 0xce7   : > { %v4084_v4 = vpop.eup %4083 }
 0xce8   : > { %4087 = vrcp.f32 %v2835_v17  ;;  %v2841_v15 = vadd.f32 1.0, %v4084_v4  ;;  %v4086_v11 = vpop.eup %4085  ;;  %v6101_v4 = vld [vmem:[#allocation21_spill] sm:$0xff] }
 0xce9   : > { %4089 = vtanh.f32 %v2830_v0  ;;  %v2848_v7 = vadd.f32 1.0, %v4086_v11  ;;  %v6100_v0 = vld [vmem:[#allocation19_spill] sm:$0xff]  ;;  %v6107_v11 = vld [vmem:[#allocation16_spill] sm:$0xff] }
 0xcea   : > { %4091 = vrcp.f32 %v2841_v15  ;;  %v6099_v15 = vld [vmem:[#allocation23_spill] sm:$0xff] }
 0xceb   : > { %4093 = vrcp.f32 %v2848_v7  ;;  %v6111_v7 = vld [vmem:[#allocation12_spill] sm:$0xff] }
 0xcf5   : > { %v4088_v20 = vpop.eup %4087 }
 0xcf6   : > { %v4090_v16 = vpop.eup %4089 }
 0xcf7   : > { %v4092_v63 = vpop.eup %4091  ;;  %v2852_v10 = vmul.f32 %v4090_v16, %v4088_v20  ;;  %v6108_v20 = vld [vmem:[#allocation11_spill] sm:$0xff]  ;;  %v6109_v16 = vld [vmem:[#allocation13_spill] sm:$0xff] }
 0xcf8   : > { %v2851_v9 = vmul.f32 %v4092_v63, %v5430_v5  ;;  %v4094_v14 = vpop.eup %4093  ;;  %v6098_v5 = vld [vmem:[#allocation22_spill] sm:$0xff] }
 0xcf9   : > { %v6110_v63 = vld [vmem:[#allocation10_spill] sm:$0xff] }
 0xcfa   : > { %v5501_v12 = vadd.f32 %v2852_v10, %v2851_v9  ;;  %v6112_v10 = vld [vmem:[#allocation7_spill] sm:$0xff]  ;;  %v6113_v9 = vld [vmem:[#allocation9_spill] sm:$0xff] }
 0xcfc   : > { %4095 = vtanh.f32 %v5501_v12 }
 0xd09   : > { %v4096_v6 = vpop.eup %4095 }
 0xd0a   : > { %v2855_v17 = vmul.f32 %v4096_v6, %v4094_v14  ;;  %v6114_v14 = vld [vmem:[#allocation6_spill] sm:$0xff]  ;;  %v6115_v6 = vmov 0.0  }
 0xd0c   : > { %3840 = vst [vmem:[%s4590_s28 + $0x20] sm:$0xff] %v2855_v17  ;;  %2930 = vmatmul.mubr.f32.vlgmr.msra.gmra.mxu0 %v2855_v17  ;;  %3001 = vmatmul.mubr.f32.vlgmr.msra.gmra.mxu1 %v2855_v17  ;;  %v6116_v17 = vld [vmem:[#allocation8_spill] sm:$0xff] }
 0xd0d   : > { %3045 = vmatpush1.msra.mxu0 %v4473_v62  ;;  %3116 = vmatpush1.msra.mxu1 %v4479_v1 }
 0xd0e   : > { %3046 = vmatprep.subr.mxu0 %v4464_v59  ;;  %3117 = vmatprep.subr.mxu1 %v4470_v61 }
 0xd0f   : > { %3047 = vmatpush1.msra.mxu0 %v4461_v58  ;;  %3118 = vmatpush1.msra.mxu1 %v4467_v60 }
 0xd10   : > { %3048 = vmatprep.subr.mxu0 %v4452_v55  ;;  %3119 = vmatprep.subr.mxu1 %v4458_v57 }
 0xd11   : > { %3049 = vmatpush1.msra.mxu0 %v4449_v54  ;;  %3120 = vmatpush1.msra.mxu1 %v4455_v56 }
 0xd12   : > { %3050 = vmatprep.subr.mxu0 %v4440_v51  ;;  %3121 = vmatprep.subr.mxu1 %v4446_v53 }
 0xd13   : > { %3051 = vmatpush1.msra.mxu0 %v4437_v50  ;;  %3122 = vmatpush1.msra.mxu1 %v4443_v52 }
 0xd14   : > { %3052 = vmatprep.subr.mxu0 %v4428_v47  ;;  %3123 = vmatprep.subr.mxu1 %v4434_v49 }
 0xd15   : > { %3053 = vmatpush1.msra.mxu0 %v4425_v46  ;;  %3124 = vmatpush1.msra.mxu1 %v4431_v48 }
 0xd16   : > { %3054 = vmatprep.subr.mxu0 %v4416_v43  ;;  %3125 = vmatprep.subr.mxu1 %v4422_v45 }
 0xd17   : > { %3055 = vmatpush1.msra.mxu0 %v4413_v42  ;;  %3126 = vmatpush1.msra.mxu1 %v4419_v44 }
 0xd18   : > { %3056 = vmatprep.subr.mxu0 %v4404_v39  ;;  %3127 = vmatprep.subr.mxu1 %v4410_v41 }
 0xd19   : > { %3057 = vmatpush1.msra.mxu0 %v4401_v38  ;;  %3128 = vmatpush1.msra.mxu1 %v4407_v40 }
 0xd1a   : > { %3058 = vmatprep.subr.mxu0 %v4392_v35  ;;  %3129 = vmatprep.subr.mxu1 %v4398_v37 }
 0xd1b   : > { %3059 = vmatpush1.msra.mxu0 %v4389_v34  ;;  %3130 = vmatpush1.msra.mxu1 %v4395_v36 }
 0xd1c   : > { %3060 = vmatprep.subr.mxu0 %v4380_v31  ;;  %3131 = vmatprep.subr.mxu1 %v4386_v33 }
 0xd1d   : > { %3061 = vmatpush1.msra.mxu0 %v4377_v30  ;;  %3132 = vmatpush1.msra.mxu1 %v4383_v32 }
 0xd1e   : > { %3062 = vmatprep.subr.mxu0 %v4368_v27  ;;  %3133 = vmatprep.subr.mxu1 %v4374_v29 }
 0xd1f   : > { %3063 = vmatpush1.msra.mxu0 %v4365_v26  ;;  %3134 = vmatpush1.msra.mxu1 %v4371_v28 }
 0xd20   : > { %3064 = vmatprep.subr.mxu0 %v4356_v23  ;;  %3135 = vmatprep.subr.mxu1 %v4362_v25 }
 0xd21   : > { %3065 = vmatpush1.msra.mxu0 %v4353_v22  ;;  %3136 = vmatpush1.msra.mxu1 %v6036_v2 }
 0xd22   : > { %3066 = vmatprep.subr.mxu0 %v4344_v19  ;;  %3137 = vmatprep.subr.mxu1 %v4350_v21 }
 0xd23   : > { %3067 = vmatpush1.msra.mxu0 %v6098_v5  ;;  %3138 = vmatpush1.msra.mxu1 %v6099_v15 }
 0xd24   : > { %3068 = vmatprep.subr.mxu0 %v6100_v0  ;;  %3139 = vmatprep.subr.mxu1 %v6101_v4  ;;  %v2863_v4 = vld [vmem:[#allocation2 + $0x8] sm:$0xff] }
 0xd25   : > { %3069 = vmatpush1.msra.mxu0 %v6102_v13  ;;  %3140 = vmatpush1.msra.mxu1 %v6103_v8  ;;  %v2864_v8 = vld [vmem:[#allocation2 + $0x78] sm:$0xff] }
 0xd26   : > { %3070 = vmatprep.subr.mxu0 %v6104_v18  ;;  %3141 = vmatprep.subr.mxu1 %v6105_v24 }
 0xd27   : > { %3071 = vmatpush1.msra.mxu0 %v6106_v3  ;;  %3142 = vmatpush1.msra.mxu1 %v6107_v11  ;;  %v6117_v11 = vld [vmem:[#allocation25_spill] sm:$0xff]  ;;  %v2862_v3 = vld [vmem:[#allocation2 + $0xf0] sm:$0xff] }
 0xd28   : > { %3072 = vmatprep.subr.mxu0 %v6108_v20  ;;  %3143 = vmatprep.subr.mxu1 %v6109_v16  ;;  %v6118_v20 = vld [vmem:[#allocation26_spill] sm:$0xff]  ;;  %v2861_v16 = vld [vmem:[#allocation2 + $0x60] sm:$0xff] }
 0xd29   : > { %3073 = vmatpush1.msra.mxu0 %v6110_v63  ;;  %3144 = vmatpush1.msra.mxu1 %v6111_v7 }
 0xd2a   : > { %3074 = vmatprep.subr.mxu0 %v6112_v10  ;;  %3145 = vmatprep.subr.mxu1 %v6113_v9 }
 0xd2b   : > { %3075 = vmatpush1.msra.mxu0 %v6114_v14  ;;  %3108 = vmatprep.mubr.f32.mxu0 %v6115_v6 }
 0xd2c   : > { %3146 = vmatpush1.msra.mxu1 %v6116_v17  ;;  %3179 = vmatprep.mubr.f32.mxu1 %v6115_v6 }
 0xd2d   : > { %3223 = vmatprep.subr.mxu0 %v6117_v11  ;;  %3294 = vmatprep.subr.mxu1 %v6118_v20 }
 0xdcc   : > { %v2931_v63 = vpop.f32.mrf.mxu0  ;;  %v3002_v9 = vpop.f32.mrf.mxu1 }
 0xdcd   : > { %v3007_v7 = vadd.f32 %v2931_v63, %v2861_v16  ;;  %v3009_v11 = vadd.f32 %v3002_v9, %v2863_v4  ;;  %v6124_v9 = vld [vmem:[#allocation20_spill] sm:$0xff] }
 0xdce   : > { %v2933_v24 = vpop.f32.mrf.mxu0  ;;  %v3004_v13 = vpop.f32.mrf.mxu1 }
 0xdcf   : > { %v3841_v10 = vmul.f32 -1.442695, %v3007_v7  ;;  %v3008_v18 = vadd.f32 %v2933_v24, %v2862_v3  ;;  %v3010_v17 = vadd.f32 %v3004_v13, %v2864_v8 }
 0xdd1   : > { %4097 = vpow2.f32 %v3841_v10  ;;  %v3842_v14 = vmul.f32 -1.442695, %v3008_v18  ;;  %v3843_v6 = vmul.f32 -1.442695, %v3010_v17  ;;  %v6123_v10 = vld [vmem:[#allocation18_spill] sm:$0xff] }
 0xdd2   : > { %v6127_v17 = vld [vmem:[#allocation14_spill] sm:$0xff] }
 0xdd3   : > { %4099 = vpow2.f32 %v3842_v14  ;;  %v6125_v14 = vld [vmem:[#allocation15_spill] sm:$0xff] }
 0xdd4   : > { %4101 = vpow2.f32 %v3843_v6  ;;  %v6126_v6 = vld [vmem:[#allocation17_spill] sm:$0xff] }
 0xdde   : > { %v4098_v0 = vpop.eup %4097 }
 0xddf   : > { %v3014_v15 = vadd.f32 1.0, %v4098_v0 }
 0xde0   : > { %v4100_v20 = vpop.eup %4099 }
 0xde1   : > { %4103 = vrcp.f32 %v3014_v15  ;;  %v3020_v5 = vadd.f32 1.0, %v4100_v20  ;;  %v4102_v24 = vpop.eup %4101  ;;  %v6122_v20 = vld [vmem:[#allocation21_spill] sm:$0xff] }
 0xde2   : > { %4105 = vtanh.f32 %v3009_v11  ;;  %v3027_v63 = vadd.f32 1.0, %v4102_v24  ;;  %v6121_v11 = vld [vmem:[#allocation19_spill] sm:$0xff]  ;;  %v6128_v24 = vld [vmem:[#allocation16_spill] sm:$0xff] }
 0xde3   : > { %4107 = vrcp.f32 %v3020_v5  ;;  %v6120_v5 = vld [vmem:[#allocation23_spill] sm:$0xff] }
 0xde4   : > { %4109 = vrcp.f32 %v3027_v63  ;;  %v6132_v63 = vld [vmem:[#allocation12_spill] sm:$0xff] }
 0xdee   : > { %v4104_v3 = vpop.eup %4103 }
 0xdef   : > { %v4106_v16 = vpop.eup %4105 }
 0xdf0   : > { %v4108_v18 = vpop.eup %4107  ;;  %v3031_v7 = vmul.f32 %v4106_v16, %v4104_v3  ;;  %v6129_v3 = vld [vmem:[#allocation11_spill] sm:$0xff]  ;;  %v6130_v16 = vld [vmem:[#allocation13_spill] sm:$0xff] }
 0xdf1   : > { %v3030_v13 = vmul.f32 %v4108_v18, %v5501_v12  ;;  %v4110_v0 = vpop.eup %4109  ;;  %v6119_v12 = vld [vmem:[#allocation22_spill] sm:$0xff] }
 0xdf2   : > { %v6131_v18 = vld [vmem:[#allocation10_spill] sm:$0xff] }
 0xdf3   : > { %v5572_v8 = vadd.f32 %v3031_v7, %v3030_v13  ;;  %v6133_v7 = vld [vmem:[#allocation7_spill] sm:$0xff]  ;;  %v6134_v13 = vld [vmem:[#allocation9_spill] sm:$0xff] }
 0xdf5   : > { %4111 = vtanh.f32 %v5572_v8 }
 0xe02   : > { %v4112_v4 = vpop.eup %4111 }
 0xe03   : > { %v3034_v15 = vmul.f32 %v4112_v4, %v4110_v0  ;;  %v6135_v0 = vld [vmem:[#allocation6_spill] sm:$0xff]  ;;  %v6136_v4 = vmov 0.0  }
 0xe05   : > { %3844 = vst [vmem:[%s4590_s28 + $0x18] sm:$0xff] %v3034_v15  ;;  %3109 = vmatmul.mubr.f32.vlgmr.msra.gmra.mxu0 %v3034_v15  ;;  %3180 = vmatmul.mubr.f32.vlgmr.msra.gmra.mxu1 %v3034_v15  ;;  %v6137_v15 = vld [vmem:[#allocation8_spill] sm:$0xff] }
 0xe06   : > { %3224 = vmatpush1.msra.mxu0 %v4473_v62  ;;  %3295 = vmatpush1.msra.mxu1 %v4479_v1 }
 0xe07   : > { %3225 = vmatprep.subr.mxu0 %v4464_v59  ;;  %3296 = vmatprep.subr.mxu1 %v4470_v61 }
 0xe08   : > { %3226 = vmatpush1.msra.mxu0 %v4461_v58  ;;  %3297 = vmatpush1.msra.mxu1 %v4467_v60 }
 0xe09   : > { %3227 = vmatprep.subr.mxu0 %v4452_v55  ;;  %3298 = vmatprep.subr.mxu1 %v4458_v57 }
 0xe0a   : > { %3228 = vmatpush1.msra.mxu0 %v4449_v54  ;;  %3299 = vmatpush1.msra.mxu1 %v4455_v56 }
 0xe0b   : > { %3229 = vmatprep.subr.mxu0 %v4440_v51  ;;  %3300 = vmatprep.subr.mxu1 %v4446_v53 }
 0xe0c   : > { %3230 = vmatpush1.msra.mxu0 %v4437_v50  ;;  %3301 = vmatpush1.msra.mxu1 %v4443_v52 }
 0xe0d   : > { %3231 = vmatprep.subr.mxu0 %v4428_v47  ;;  %3302 = vmatprep.subr.mxu1 %v4434_v49 }
 0xe0e   : > { %3232 = vmatpush1.msra.mxu0 %v4425_v46  ;;  %3303 = vmatpush1.msra.mxu1 %v4431_v48 }
 0xe0f   : > { %3233 = vmatprep.subr.mxu0 %v4416_v43  ;;  %3304 = vmatprep.subr.mxu1 %v4422_v45 }
 0xe10   : > { %3234 = vmatpush1.msra.mxu0 %v4413_v42  ;;  %3305 = vmatpush1.msra.mxu1 %v4419_v44 }
 0xe11   : > { %3235 = vmatprep.subr.mxu0 %v4404_v39  ;;  %3306 = vmatprep.subr.mxu1 %v4410_v41 }
 0xe12   : > { %3236 = vmatpush1.msra.mxu0 %v4401_v38  ;;  %3307 = vmatpush1.msra.mxu1 %v4407_v40 }
 0xe13   : > { %3237 = vmatprep.subr.mxu0 %v4392_v35  ;;  %3308 = vmatprep.subr.mxu1 %v4398_v37 }
 0xe14   : > { %3238 = vmatpush1.msra.mxu0 %v4389_v34  ;;  %3309 = vmatpush1.msra.mxu1 %v4395_v36 }
 0xe15   : > { %3239 = vmatprep.subr.mxu0 %v4380_v31  ;;  %3310 = vmatprep.subr.mxu1 %v4386_v33 }
 0xe16   : > { %3240 = vmatpush1.msra.mxu0 %v4377_v30  ;;  %3311 = vmatpush1.msra.mxu1 %v4383_v32 }
 0xe17   : > { %3241 = vmatprep.subr.mxu0 %v4368_v27  ;;  %3312 = vmatprep.subr.mxu1 %v4374_v29 }
 0xe18   : > { %3242 = vmatpush1.msra.mxu0 %v4365_v26  ;;  %3313 = vmatpush1.msra.mxu1 %v4371_v28 }
 0xe19   : > { %3243 = vmatprep.subr.mxu0 %v4356_v23  ;;  %3314 = vmatprep.subr.mxu1 %v4362_v25 }
 0xe1a   : > { %3244 = vmatpush1.msra.mxu0 %v4353_v22  ;;  %3315 = vmatpush1.msra.mxu1 %v6036_v2 }
 0xe1b   : > { %3245 = vmatprep.subr.mxu0 %v4344_v19  ;;  %3316 = vmatprep.subr.mxu1 %v4350_v21 }
 0xe1c   : > { %3246 = vmatpush1.msra.mxu0 %v6119_v12  ;;  %3317 = vmatpush1.msra.mxu1 %v6120_v5 }
 0xe1d   : > { %3247 = vmatprep.subr.mxu0 %v6121_v11  ;;  %3318 = vmatprep.subr.mxu1 %v6122_v20  ;;  %v3042_v20 = vld [vmem:[#allocation2 + $0xe8] sm:$0xff] }
 0xe1e   : > { %3248 = vmatpush1.msra.mxu0 %v6123_v10  ;;  %3319 = vmatpush1.msra.mxu1 %v6124_v9  ;;  %v3043_v9 = vld [vmem:[#allocation2 + $0xb8] sm:$0xff] }
 0xe1f   : > { %3249 = vmatprep.subr.mxu0 %v6125_v14  ;;  %3320 = vmatprep.subr.mxu1 %v6126_v6 }
 0xe20   : > { %3250 = vmatpush1.msra.mxu0 %v6127_v17  ;;  %3321 = vmatpush1.msra.mxu1 %v6128_v24  ;;  %v6138_v24 = vld [vmem:[#allocation25_spill] sm:$0xff] }
 0xe21   : > { %3251 = vmatprep.subr.mxu0 %v6129_v3  ;;  %3322 = vmatprep.subr.mxu1 %v6130_v16  ;;  %v6139_v3 = vld [vmem:[#allocation26_spill] sm:$0xff]  ;;  %v3040_v16 = vld [vmem:[#allocation2 + $0x80] sm:$0xff]  ;;  %v3041_v17 = vld [vmem:[#allocation2 + $0x88] sm:$0xff] }
 0xe22   : > { %3252 = vmatpush1.msra.mxu0 %v6131_v18  ;;  %3323 = vmatpush1.msra.mxu1 %v6132_v63 }
 0xe23   : > { %3253 = vmatprep.subr.mxu0 %v6133_v7  ;;  %3324 = vmatprep.subr.mxu1 %v6134_v13 }
 0xe24   : > { %3254 = vmatpush1.msra.mxu0 %v6135_v0  ;;  %3287 = vmatprep.mubr.f32.mxu0 %v6136_v4 }
 0xe25   : > { %3325 = vmatpush1.msra.mxu1 %v6137_v15  ;;  %3358 = vmatprep.mubr.f32.mxu1 %v6136_v4 }
 0xe26   : > { %3402 = vmatprep.subr.mxu0 %v6138_v24  ;;  %3473 = vmatprep.subr.mxu1 %v6139_v3 }
 0xec5   : > { %v3110_v18 = vpop.f32.mrf.mxu0  ;;  %v3181_v13 = vpop.f32.mrf.mxu1 }
 0xec6   : > { %v3186_v63 = vadd.f32 %v3110_v18, %v3040_v16  ;;  %v3188_v24 = vadd.f32 %v3181_v13, %v3042_v20 }
 0xec7   : > { %v3112_v6 = vpop.f32.mrf.mxu0  ;;  %v3183_v10 = vpop.f32.mrf.mxu1 }
 0xec8   : > { %v3845_v7 = vmul.f32 -1.442695, %v3186_v63  ;;  %v3187_v14 = vadd.f32 %v3112_v6, %v3041_v17  ;;  %v3189_v15 = vadd.f32 %v3183_v10, %v3043_v9 }
 0xeca   : > { %4113 = vpow2.f32 %v3845_v7  ;;  %v3846_v0 = vmul.f32 -1.442695, %v3187_v14  ;;  %v3847_v4 = vmul.f32 -1.442695, %v3189_v15 }
 0xecc   : > { %4115 = vpow2.f32 %v3846_v0 }
 0xecd   : > { %4117 = vpow2.f32 %v3847_v4  ;;  %v3398_v4 = vld [vmem:[#allocation2 + $0xb0] sm:$0xff] }
 0xed7   : > { %v4114_v11 = vpop.eup %4113 }
 0xed8   : > { %v3193_v5 = vadd.f32 1.0, %v4114_v11 }
 0xed9   : > { %v4116_v3 = vpop.eup %4115 }
 0xeda   : > { %4119 = vrcp.f32 %v3193_v5  ;;  %v3199_v12 = vadd.f32 1.0, %v4116_v3  ;;  %v4118_v6 = vpop.eup %4117 }
 0xedb   : > { %4121 = vtanh.f32 %v3188_v24  ;;  %v3206_v18 = vadd.f32 1.0, %v4118_v6  ;;  %v3399_v24 = vld [vmem:[#allocation2] sm:$0xff] }
 0xedc   : > { %4123 = vrcp.f32 %v3199_v12 }
 0xedd   : > { %4125 = vrcp.f32 %v3206_v18 }
 0xee7   : > { %v4120_v17 = vpop.eup %4119 }
 0xee8   : > { %v4122_v16 = vpop.eup %4121 }
 0xee9   : > { %v4124_v14 = vpop.eup %4123  ;;  %v3210_v63 = vmul.f32 %v4122_v16, %v4120_v17 }
 0xeea   : > { %v3209_v10 = vmul.f32 %v4124_v14, %v5572_v8  ;;  %v4126_v11 = vpop.eup %4125 }
 0xeec   : > { %v5643_v9 = vadd.f32 %v3210_v63, %v3209_v10  ;;  %v3401_v63 = vld [vmem:[#allocation2 + $0x18] sm:$0xff] }
 0xeee   : > { %4127 = vtanh.f32 %v5643_v9 }
 0xefb   : > { %v4128_v20 = vpop.eup %4127 }
 0xefc   : > { %v3213_v5 = vmul.f32 %v4128_v20, %v4126_v11  ;;  %v3400_v11 = vld [vmem:[#allocation2 + $0xd8] sm:$0xff] }
 0xefe   : > { %3848 = vst [vmem:[%s4590_s28 + $0x10] sm:$0xff] %v3213_v5  ;;  %3288 = vmatmul.mubr.f32.vlgmr.msra.gmra.mxu0 %v3213_v5  ;;  %3359 = vmatmul.mubr.f32.vlgmr.msra.gmra.mxu1 %v3213_v5 }
 0xeff   : > { %3403 = vmatpush1.msra.mxu0 %v4473_v62  ;;  %3474 = vmatpush1.msra.mxu1 %v4479_v1 }
 0xf00   : > { %3404 = vmatprep.subr.mxu0 %v4464_v59  ;;  %3475 = vmatprep.subr.mxu1 %v4470_v61 }
 0xf01   : > { %3405 = vmatpush1.msra.mxu0 %v4461_v58  ;;  %3476 = vmatpush1.msra.mxu1 %v4467_v60 }
 0xf02   : > { %3406 = vmatprep.subr.mxu0 %v4452_v55  ;;  %3477 = vmatprep.subr.mxu1 %v4458_v57 }
 0xf03   : > { %3407 = vmatpush1.msra.mxu0 %v4449_v54  ;;  %3478 = vmatpush1.msra.mxu1 %v4455_v56 }
 0xf04   : > { %3408 = vmatprep.subr.mxu0 %v4440_v51  ;;  %3479 = vmatprep.subr.mxu1 %v4446_v53 }
 0xf05   : > { %3409 = vmatpush1.msra.mxu0 %v4437_v50  ;;  %3480 = vmatpush1.msra.mxu1 %v4443_v52  ;;  %v3221_v52 = vld [vmem:[#allocation2 + $0x30] sm:$0xff] }
 0xf06   : > { %3410 = vmatprep.subr.mxu0 %v4428_v47  ;;  %3481 = vmatprep.subr.mxu1 %v4434_v49  ;;  %v3222_v49 = vld [vmem:[#allocation2 + $0x48] sm:$0xff] }
 0xf07   : > { %3411 = vmatpush1.msra.mxu0 %v4425_v46  ;;  %3482 = vmatpush1.msra.mxu1 %v4431_v48 }
 0xf08   : > { %3412 = vmatprep.subr.mxu0 %v4416_v43  ;;  %3483 = vmatprep.subr.mxu1 %v4422_v45 }
 0xf09   : > { %3413 = vmatpush1.msra.mxu0 %v4413_v42  ;;  %3484 = vmatpush1.msra.mxu1 %v4419_v44  ;;  %v3220_v42 = vld [vmem:[#allocation2 + $0x68] sm:$0xff] }
 0xf0a   : > { %3414 = vmatprep.subr.mxu0 %v4404_v39  ;;  %3485 = vmatprep.subr.mxu1 %v4410_v41  ;;  %v6158_v39 = vld [vmem:[#allocation8_spill] sm:$0xff] }
 0xf0b   : > { %3415 = vmatpush1.msra.mxu0 %v4401_v38  ;;  %3486 = vmatpush1.msra.mxu1 %v4407_v40  ;;  %v6157_v38 = vmov 0.0   ;;  %v3219_v40 = vld [vmem:[#allocation2 + $0x50] sm:$0xff] }
 0xf0c   : > { %3416 = vmatprep.subr.mxu0 %v4392_v35  ;;  %3487 = vmatprep.subr.mxu1 %v4398_v37  ;;  %v6154_v35 = vld [vmem:[#allocation7_spill] sm:$0xff]  ;;  %v6156_v37 = vld [vmem:[#allocation6_spill] sm:$0xff] }
 0xf0d   : > { %3417 = vmatpush1.msra.mxu0 %v4389_v34  ;;  %3488 = vmatpush1.msra.mxu1 %v4395_v36  ;;  %v6153_v34 = vld [vmem:[#allocation12_spill] sm:$0xff]  ;;  %v6155_v36 = vld [vmem:[#allocation9_spill] sm:$0xff] }
 0xf0e   : > { %3418 = vmatprep.subr.mxu0 %v4380_v31  ;;  %3489 = vmatprep.subr.mxu1 %v4386_v33  ;;  %v6148_v31 = vld [vmem:[#allocation14_spill] sm:$0xff] }
 0xf0f   : > { %3419 = vmatpush1.msra.mxu0 %v4377_v30  ;;  %3490 = vmatpush1.msra.mxu1 %v4383_v32  ;;  %v6140_v30 = vld [vmem:[#allocation22_spill] sm:$0xff]  ;;  %v6151_v32 = vld [vmem:[#allocation13_spill] sm:$0xff] }
 0xf10   : > { %3420 = vmatprep.subr.mxu0 %v4368_v27  ;;  %3491 = vmatprep.subr.mxu1 %v4374_v29  ;;  %v6141_v27 = vld [vmem:[#allocation23_spill] sm:$0xff]  ;;  %v6152_v33 = vld [vmem:[#allocation10_spill] sm:$0xff] }
 0xf11   : > { %3421 = vmatpush1.msra.mxu0 %v4365_v26  ;;  %3492 = vmatpush1.msra.mxu1 %v4371_v28  ;;  %v6142_v29 = vld [vmem:[#allocation19_spill] sm:$0xff]  ;;  %v6143_v26 = vld [vmem:[#allocation21_spill] sm:$0xff]  ;;  %v6144_v28 = vld [vmem:[#allocation18_spill] sm:$0xff] }
 0xf12   : > { %3422 = vmatprep.subr.mxu0 %v4356_v23  ;;  %3493 = vmatprep.subr.mxu1 %v4362_v25  ;;  %v6145_v23 = vld [vmem:[#allocation20_spill] sm:$0xff]  ;;  %v6146_v25 = vld [vmem:[#allocation15_spill] sm:$0xff] }
 0xf13   : > { %3423 = vmatpush1.msra.mxu0 %v4353_v22  ;;  %3494 = vmatpush1.msra.mxu1 %v6036_v2  ;;  %v6147_v22 = vld [vmem:[#allocation17_spill] sm:$0xff] }
 0xf14   : > { %3424 = vmatprep.subr.mxu0 %v4344_v19  ;;  %3495 = vmatprep.subr.mxu1 %v4350_v21  ;;  %v6149_v19 = vld [vmem:[#allocation16_spill] sm:$0xff]  ;;  %v6150_v21 = vld [vmem:[#allocation11_spill] sm:$0xff] }
 0xf15   : > { %3425 = vmatpush1.msra.mxu0 %v6140_v30  ;;  %3496 = vmatpush1.msra.mxu1 %v6141_v27 }
 0xf16   : > { %3426 = vmatprep.subr.mxu0 %v6142_v29  ;;  %3497 = vmatprep.subr.mxu1 %v6143_v26 }
 0xf17   : > { %3427 = vmatpush1.msra.mxu0 %v6144_v28  ;;  %3498 = vmatpush1.msra.mxu1 %v6145_v23 }
 0xf18   : > { %3428 = vmatprep.subr.mxu0 %v6146_v25  ;;  %3499 = vmatprep.subr.mxu1 %v6147_v22 }
 0xf19   : > { %3429 = vmatpush1.msra.mxu0 %v6148_v31  ;;  %3500 = vmatpush1.msra.mxu1 %v6149_v19 }
 0xf1a   : > { %3430 = vmatprep.subr.mxu0 %v6150_v21  ;;  %3501 = vmatprep.subr.mxu1 %v6151_v32 }
 0xf1b   : > { %3431 = vmatpush1.msra.mxu0 %v6152_v33  ;;  %3502 = vmatpush1.msra.mxu1 %v6153_v34 }
 0xf1c   : > { %3432 = vmatprep.subr.mxu0 %v6154_v35  ;;  %3503 = vmatprep.subr.mxu1 %v6155_v36 }
 0xf1d   : > { %3433 = vmatpush1.msra.mxu0 %v6156_v37  ;;  %3466 = vmatprep.mubr.f32.mxu0 %v6157_v38 }
 0xf1e   : > { %3504 = vmatpush1.msra.mxu1 %v6158_v39  ;;  %3537 = vmatprep.mubr.f32.mxu1 %v6157_v38 }
 0xfbe   : > { %v3289_v41 = vpop.f32.mrf.mxu0  ;;  %v3360_v47 = vpop.f32.mrf.mxu1 }
 0xfbf   : > { %v3365_v43 = vadd.f32 %v3289_v41, %v3219_v40  ;;  %v3367_v55 = vadd.f32 %v3360_v47, %v3221_v52 }
 0xfc0   : > { %v3291_v44 = vpop.f32.mrf.mxu0  ;;  %v3362_v50 = vpop.f32.mrf.mxu1 }
 0xfc1   : > { %v3849_v45 = vmul.f32 -1.442695, %v3365_v43  ;;  %v3366_v46 = vadd.f32 %v3291_v44, %v3220_v42  ;;  %v3368_v51 = vadd.f32 %v3362_v50, %v3222_v49 }
 0xfc3   : > { %4129 = vpow2.f32 %v3849_v45  ;;  %v3850_v48 = vmul.f32 -1.442695, %v3366_v46  ;;  %v3851_v53 = vmul.f32 -1.442695, %v3368_v51 }
 0xfc5   : > { %4131 = vpow2.f32 %v3850_v48 }
 0xfc6   : > { %4133 = vpow2.f32 %v3851_v53 }
 0xfd0   : > { %v4130_v54 = vpop.eup %4129 }
 0xfd1   : > { %v3372_v56 = vadd.f32 1.0, %v4130_v54 }
 0xfd2   : > { %v4132_v57 = vpop.eup %4131 }
 0xfd3   : > { %4135 = vrcp.f32 %v3372_v56  ;;  %v3378_v58 = vadd.f32 1.0, %v4132_v57  ;;  %v4134_v59 = vpop.eup %4133 }
 0xfd4   : > { %4137 = vtanh.f32 %v3367_v55  ;;  %v3385_v1 = vadd.f32 1.0, %v4134_v59 }
 0xfd5   : > { %4139 = vrcp.f32 %v3378_v58 }
 0xfd6   : > { %4141 = vrcp.f32 %v3385_v1 }
 0xfe0   : > { %v4136_v60 = vpop.eup %4135 }
 0xfe1   : > { %v4138_v61 = vpop.eup %4137 }
 0xfe2   : > { %v4140_v62 = vpop.eup %4139  ;;  %v3389_v2 = vmul.f32 %v4138_v61, %v4136_v60 }
 0xfe3   : > { %v3388_v8 = vmul.f32 %v4140_v62, %v5643_v9  ;;  %v4142_v7 = vpop.eup %4141 }
 0xfe5   : > { %v3390_v12 = vadd.f32 %v3389_v2, %v3388_v8 }
 0xfe7   : > { %4143 = vtanh.f32 %v3390_v12 }
 0xff4   : > { %v4144_v13 = vpop.eup %4143 }
 0xff5   : > { %v3392_v0 = vmul.f32 %v4144_v13, %v4142_v7 }
 0xff7   : > { %3852 = vst [vmem:[%s4590_s28 + $0x8] sm:$0xff] %v3392_v0  ;;  %3467 = vmatmul.mubr.f32.vlgmr.msra.gmra.mxu0 %v3392_v0  ;;  %3538 = vmatmul.mubr.f32.vlgmr.msra.gmra.mxu1 %v3392_v0 }
0x10b7   : > { %v3468_v15 = vpop.f32.mrf.mxu0  ;;  %v3539_v14 = vpop.f32.mrf.mxu1 }
0x10b8   : > { %v3544_v3 = vadd.f32 %v3468_v15, %v3398_v4  ;;  %v3546_v30 = vadd.f32 %v3539_v14, %v3400_v11 }
0x10b9   : > { %v3470_v6 = vpop.f32.mrf.mxu0  ;;  %v3541_v10 = vpop.f32.mrf.mxu1 }
0x10ba   : > { %v3853_v17 = vmul.f32 -1.442695, %v3544_v3  ;;  %v3545_v16 = vadd.f32 %v3470_v6, %v3399_v24  ;;  %v3547_v9 = vadd.f32 %v3541_v10, %v3401_v63 }
0x10bc   : > { %4145 = vpow2.f32 %v3853_v17  ;;  %v3854_v18 = vmul.f32 -1.442695, %v3545_v16  ;;  %v3855_v20 = vmul.f32 -1.442695, %v3547_v9 }
0x10be   : > { %4147 = vpow2.f32 %v3854_v18 }
0x10bf   : > { %4149 = vpow2.f32 %v3855_v20 }
0x10c9   : > { %v4146_v5 = vpop.eup %4145 }
0x10ca   : > { %v3551_v27 = vadd.f32 1.0, %v4146_v5 }
0x10cb   : > { %v4148_v29 = vpop.eup %4147 }
0x10cc   : > { %4151 = vrcp.f32 %v3551_v27  ;;  %v3557_v26 = vadd.f32 1.0, %v4148_v29  ;;  %v4150_v28 = vpop.eup %4149 }
0x10cd   : > { %4153 = vtanh.f32 %v3546_v30  ;;  %v3564_v31 = vadd.f32 1.0, %v4150_v28 }
0x10ce   : > { %4155 = vrcp.f32 %v3557_v26 }
0x10cf   : > { %4157 = vrcp.f32 %v3564_v31 }
0x10d9   : > { %v4152_v23 = vpop.eup %4151 }
0x10da   : > { %v4154_v25 = vpop.eup %4153 }
0x10db   : > { %v4156_v22 = vpop.eup %4155  ;;  %v3568_v19 = vmul.f32 %v4154_v25, %v4152_v23 }
0x10dc   : > { %v3567_v21 = vmul.f32 %v4156_v22, %v3390_v12  ;;  %v4158_v33 = vpop.eup %4157 }
0x10de   : > { %v3569_v32 = vadd.f32 %v3568_v19, %v3567_v21 }
0x10e0   : > { %4159 = vtanh.f32 %v3569_v32  ;;  %3574 = vst [vmem:[#allocation4] sm:$0xff] %v3569_v32 }
0x10ed   : > { %v4160_v34 = vpop.eup %4159 }
0x10ee   : > { %v3571_v35 = vmul.f32 %v4160_v34, %v4158_v33 }
0x10f0   : > { %3572 = vst [vmem:[%s4590_s28] sm:$0xff] %v3571_v35  ;;  %3573 = vst [vmem:[#allocation3] sm:$0xff] %v3571_v35 }
0x10f1 PF: > { %3581 = sbr.rel (!%p4258_p3) target bundleno = 4345 (0x10f9), region = 52  ;;  %s3857_s27 = sshll.u32 (%p4258_p3), %s4191_s17, 3  ;;  %v3635_v37 = vld [vmem:[%s4590_s28 + $0x8] sm:$0xff] (%p4258_p3)  ;;  %v3637_v38 = vld [vmem:[%s4590_s28 + $0x10] sm:$0xff] (%p4258_p3)  ;;  %v3639_v39 = vld [vmem:[%s4590_s28 + $0x18] sm:$0xff] (%p4258_p3) }
0x10f2   : > { %s3590_s20 = scalar_lea.vmem (%p4258_p3), %s5747_s4, %s3857_s27  ;;  %v3641_v40 = vld [vmem:[%s4590_s28 + $0x20] sm:$0xff] (%p4258_p3)  ;;  %v3643_v41 = vld [vmem:[%s4590_s28 + $0x28] sm:$0xff] (%p4258_p3)  ;;  %v3645_v42 = vld [vmem:[%s4590_s28 + $0x30] sm:$0xff] (%p4258_p3) }
0x10f3   : > { %3636 = vst [vmem:[%s3590_s20 + $0x10] sm:$0xff] (%p4258_p3), %v3635_v37  ;;  %3638 = vst [vmem:[%s3590_s20 + $0x20] sm:$0xff] (%p4258_p3), %v3637_v38  ;;  %v3647_v43 = vld [vmem:[%s4590_s28 + $0x38] sm:$0xff] (%p4258_p3) }
0x10f4   : > { %3640 = vst [vmem:[%s3590_s20 + $0x30] sm:$0xff] (%p4258_p3), %v3639_v39  ;;  %3642 = vst [vmem:[%s3590_s20 + $0x40] sm:$0xff] (%p4258_p3), %v3641_v40 }
0x10f5   : > { %3644 = vst [vmem:[%s3590_s20 + $0x50] sm:$0xff] (%p4258_p3), %v3643_v41  ;;  %3646 = vst [vmem:[%s3590_s20 + $0x60] sm:$0xff] (%p4258_p3), %v3645_v42 }
0x10f6   : > { %3648 = vst [vmem:[%s3590_s20 + $0x70] sm:$0xff] %v3647_v43 }
0x10f7   : > { %v3633_v36 = vld [vmem:[%s4590_s28] sm:$0xff] }
0x10f8   : > { %3634 = vst [vmem:[%s3590_s20] sm:$0xff] %v3633_v36 }
0x10f9 PF: > { %s14_s19 = sadd.s32 1, %s4199_s19   ;;  %s6159_s15 = smov %s4187_s16 }
0x10fa   : > { %p11_p11 = scmp.ge.s32.totalorder %s14_s19, 4   ;;  %s6160_s16 = smov %s4267_s25 }
0x10fb   : > { %s6161_s17 = smov %s4195_s18  ;;  %s6162_s18 = smov %s6164_s21 }
0x10fc   :  { %13 = sbr.rel (!%p11_p11) target bundleno = 3 (0x3), region = 155 }

// kernel: bilstm_forward.3
= control target key start
LH: loop header
LB: loop body
LE: loop exit
PB: predicated region body
PF: predicated region fallthrough
CT: control target
= control target key end

     0   :  { %s4319_s15 = smov 0   ;;  %s4321_s16 = smov 0   ;;  %s5943_s0 = inlined_call_operand.vmem [shape: f32[64,256], index: 0, kind: input, shape index: {}]   ;;  %s5944_s1 = inlined_call_operand.vmem [shape: f32[2,256,512], index: 1, kind: input, shape index: {}]   ;;  %s5945_s2 = inlined_call_operand.vmem [shape: f32[2,128,512], index: 2, kind: input, shape index: {}]   ;;  %s5946_s3 = inlined_call_operand.vmem [shape: f32[2,1,512], index: 3, kind: input, shape index: {}]   ;;  %s5947_s4 = inlined_call_operand.vmem [shape: f32[64,256], index: 4, kind: output, shape index: {}]  }
   0x1   :  { %s4323_s17 = smov 0   ;;  %s4325_s18 = smov 0  }
   0x2   :  { %s4327_s19 = smov 0  }
   0x3 LB: > { %s3870_s20 = sadd.s32 4294967295, %s4289_s19   ;;  %s26_s21 = sadd.s32 1, %s4285_s18  ;;  %s4289_s19 = sphi %s4327_s19, %s14_s19   ;;  %s4285_s18 = sphi %s4325_s18, %s6359_s18   ;;  %s4281_s17 = sphi %s4323_s17, %s6358_s17   ;;  %s4277_s16 = sphi %s4321_s16, %s6357_s16   ;;  %s4273_s15 = sphi %s4319_s15, %s6356_s15  }
   0x4   : > { %p28_p0 = scmp.ge.s32.totalorder %s26_s21, 2  ;;  %s155_s22 = sadd.s32 1, %s4277_s16 }
   0x5   : > { %p165_p1 = scmp.ne.s32.totalorder %s4277_s16, %s4273_s15  ;;  %p166_p2 = scmp.eq.s32.totalorder %s3870_s20, 1 }
   0x6   : > { %s6361_s21 = smov (%p28_p0, %s26_s21), 0  ;;  %p3875_p4 = scmp.ge.s32.totalorder %s4289_s19, 1 }
   0x7   : > { %p4348_p3 = por %p166_p2, %p165_p1  ;;  %s151_s24 = ssub.s32 %s4285_s18, %s6361_s21 }
   0x8   : > { %p231_p5 = scmp.lt.s32.totalorder %s4289_s19, 3  ;;  %p153_p6 = scmp.eq.s32.totalorder %s151_s24, 0 }
   0xa   : > { %p232_p7 = pnand %p3875_p4, %p231_p5 }
   0xb   : > { %s4357_s25 = scalar_select %p153_p6, %s4277_s16, %s155_s22  }
   0xc   : > { %235 = sbr.rel (%p232_p7) target bundleno = 4405 (0x1135), region = 36 }
  0x11   : > { %s272_s26 = sand.u32 1, %s4273_s15   ;;  %p290_p8 = scmp.lt.s32.totalorder %s4281_s17, 1  ;;  %v316_v0 = vld [vmem:[%s5943_s0 + $0x8] sm:$0xff]  ;;  %v4291_v1 = vmov 0.0  }
  0x12   : > { %s4363_s29 = sshll.u32 %s272_s26, 6  ;;  %313 = vst [vmem:[#allocation3] sm:$0xff] %v4291_v1  ;;  %314 = vst [vmem:[#allocation4] sm:$0xff] %v4291_v1  ;;  %545 = vmatprep.mubr.f32.mxu0 %v316_v0  ;;  %658 = vmatprep.mubr.f32.mxu1 %v316_v0  ;;  %p3882_p9 = scmp.ne.s32.totalorder %s4281_s17, 0 }
  0x13   : > { %s4366_s30 = scalar_select %p290_p8, %s4281_s17, 1 }
  0x15   : > { %s3950_s5 = sshll.u32 %s4366_s30, 10  ;;  %s3951_s6 = sshll.u32 %s4366_s30, 9 }
  0x16   : > { %s4373_s9 = scalar_lea.vmem %s5944_s1, %s3950_s5  ;;  %s4378_s12 = scalar_lea.vmem %s5945_s2, %s3951_s6 }
  0x17   : > { %v392_v2 = vld [vmem:[%s4373_s9 + $0x1e8] sm:$0xff]  ;;  %v4382_v3 = vld [vmem:[%s4378_s12] sm:$0xff]  ;;  %v4388_v5 = vld [vmem:[%s4378_s12 + $0x10] sm:$0xff] }
  0x18   : > { %6045 = vst [vmem:[#allocation6_spill] sm:$0xff] %v4382_v3  ;;  %v4385_v4 = vld [vmem:[%s4378_s12 + $0x8] sm:$0xff]  ;;  %481 = vmatprep.subr.mxu0 %v392_v2  ;;  %6047 = vst [vmem:[#allocation8_spill] sm:$0xff] %v4388_v5  ;;  %v4391_v6 = vld [vmem:[%s4378_s12 + $0x18] sm:$0xff] }
  0x19   : > { %6046 = vst [vmem:[#allocation7_spill] sm:$0xff] %v4385_v4  ;;  %6048 = vst [vmem:[#allocation9_spill] sm:$0xff] %v4391_v6  ;;  %v4394_v7 = vld [vmem:[%s4378_s12 + $0x20] sm:$0xff]  ;;  %v4397_v8 = vld [vmem:[%s4378_s12 + $0x28] sm:$0xff] }
  0x1a   : > { %6049 = vst [vmem:[#allocation10_spill] sm:$0xff] %v4394_v7  ;;  %6050 = vst [vmem:[#allocation11_spill] sm:$0xff] %v4397_v8  ;;  %v4400_v9 = vld [vmem:[%s4378_s12 + $0x30] sm:$0xff]  ;;  %v4403_v10 = vld [vmem:[%s4378_s12 + $0x38] sm:$0xff] }
  0x1b   : > { %6051 = vst [vmem:[#allocation12_spill] sm:$0xff] %v4400_v9  ;;  %6052 = vst [vmem:[#allocation13_spill] sm:$0xff] %v4403_v10  ;;  %v4406_v11 = vld [vmem:[%s4378_s12 + $0x40] sm:$0xff]  ;;  %v4409_v12 = vld [vmem:[%s4378_s12 + $0x48] sm:$0xff] }
  0x1c   : > { %6053 = vst [vmem:[#allocation14_spill] sm:$0xff] %v4406_v11  ;;  %6054 = vst [vmem:[#allocation15_spill] sm:$0xff] %v4409_v12  ;;  %v4412_v13 = vld [vmem:[%s4378_s12 + $0x50] sm:$0xff]  ;;  %v4415_v14 = vld [vmem:[%s4378_s12 + $0x58] sm:$0xff] }
  0x1d   : > { %6055 = vst [vmem:[#allocation16_spill] sm:$0xff] %v4412_v13  ;;  %6056 = vst [vmem:[#allocation17_spill] sm:$0xff] %v4415_v14  ;;  %v4418_v15 = vld [vmem:[%s4378_s12 + $0x60] sm:$0xff]  ;;  %v4421_v16 = vld [vmem:[%s4378_s12 + $0x68] sm:$0xff] }
  0x1e   : > { %6057 = vst [vmem:[#allocation18_spill] sm:$0xff] %v4418_v15  ;;  %6058 = vst [vmem:[#allocation19_spill] sm:$0xff] %v4421_v16  ;;  %v4424_v17 = vld [vmem:[%s4378_s12 + $0x70] sm:$0xff]  ;;  %v4427_v18 = vld [vmem:[%s4378_s12 + $0x78] sm:$0xff] }
  0x1f   : > { %6059 = vst [vmem:[#allocation20_spill] sm:$0xff] %v4424_v17  ;;  %6060 = vst [vmem:[#allocation21_spill] sm:$0xff] %v4427_v18  ;;  %v4430_v19 = vld [vmem:[%s4378_s12 + $0x80] sm:$0xff]  ;;  %v4433_v20 = vld [vmem:[%s4378_s12 + $0x88] sm:$0xff] }
  0x20   : > { %6061 = vst [vmem:[#allocation22_spill] sm:$0xff] %v4430_v19  ;;  %v4436_v21 = vld [vmem:[%s4378_s12 + $0x90] sm:$0xff]  ;;  %v4439_v22 = vld [vmem:[%s4378_s12 + $0x98] sm:$0xff]  ;;  %v4442_v23 = vld [vmem:[%s4378_s12 + $0xa0] sm:$0xff] }
  0x21   : > { %6062 = vst [vmem:[#allocation23_spill] sm:$0xff] %v4436_v21  ;;  %v4445_v24 = vld [vmem:[%s4378_s12 + $0xa8] sm:$0xff]  ;;  %v4448_v25 = vld [vmem:[%s4378_s12 + $0xb0] sm:$0xff]  ;;  %v4451_v26 = vld [vmem:[%s4378_s12 + $0xb8] sm:$0xff] }
  0x22   : > { %6063 = vst [vmem:[#allocation24_spill] sm:$0xff] %v4448_v25  ;;  %v4454_v27 = vld [vmem:[%s4378_s12 + $0xc0] sm:$0xff]  ;;  %v4457_v28 = vld [vmem:[%s4378_s12 + $0xc8] sm:$0xff]  ;;  %v4460_v29 = vld [vmem:[%s4378_s12 + $0xd0] sm:$0xff] }
  0x23   : > { %v4463_v30 = vld [vmem:[%s4378_s12 + $0xd8] sm:$0xff]  ;;  %v4466_v31 = vld [vmem:[%s4378_s12 + $0xe0] sm:$0xff]  ;;  %v4469_v32 = vld [vmem:[%s4378_s12 + $0xe8] sm:$0xff] }
  0x24   : > { %v4472_v33 = vld [vmem:[%s4378_s12 + $0xf0] sm:$0xff]  ;;  %v4475_v34 = vld [vmem:[%s4378_s12 + $0xf8] sm:$0xff]  ;;  %v4478_v35 = vld [vmem:[%s4378_s12 + $0x100] sm:$0xff] }
  0x25   : > { %v4481_v36 = vld [vmem:[%s4378_s12 + $0x108] sm:$0xff]  ;;  %v4484_v37 = vld [vmem:[%s4378_s12 + $0x110] sm:$0xff]  ;;  %v4487_v38 = vld [vmem:[%s4378_s12 + $0x118] sm:$0xff] }
  0x26   : > { %v4490_v39 = vld [vmem:[%s4378_s12 + $0x120] sm:$0xff]  ;;  %v4493_v40 = vld [vmem:[%s4378_s12 + $0x128] sm:$0xff]  ;;  %v4496_v41 = vld [vmem:[%s4378_s12 + $0x130] sm:$0xff] }
  0x27   : > { %v4499_v42 = vld [vmem:[%s4378_s12 + $0x138] sm:$0xff]  ;;  %v4502_v43 = vld [vmem:[%s4378_s12 + $0x140] sm:$0xff]  ;;  %v4505_v44 = vld [vmem:[%s4378_s12 + $0x148] sm:$0xff] }
  0x28   : > { %v4508_v45 = vld [vmem:[%s4378_s12 + $0x150] sm:$0xff]  ;;  %v4511_v46 = vld [vmem:[%s4378_s12 + $0x158] sm:$0xff]  ;;  %v4514_v47 = vld [vmem:[%s4378_s12 + $0x160] sm:$0xff] }
  0x29   : > { %v4517_v48 = vld [vmem:[%s4378_s12 + $0x168] sm:$0xff]  ;;  %v4520_v49 = vld [vmem:[%s4378_s12 + $0x170] sm:$0xff]  ;;  %v4523_v50 = vld [vmem:[%s4378_s12 + $0x178] sm:$0xff] }
  0x2a   : > { %v4526_v51 = vld [vmem:[%s4378_s12 + $0x180] sm:$0xff]  ;;  %v4529_v52 = vld [vmem:[%s4378_s12 + $0x188] sm:$0xff]  ;;  %v4532_v53 = vld [vmem:[%s4378_s12 + $0x190] sm:$0xff] }
  0x2b   : > { %v4535_v54 = vld [vmem:[%s4378_s12 + $0x198] sm:$0xff]  ;;  %v4538_v55 = vld [vmem:[%s4378_s12 + $0x1a0] sm:$0xff]  ;;  %v4541_v56 = vld [vmem:[%s4378_s12 + $0x1a8] sm:$0xff] }
  0x2c   : > { %v4544_v57 = vld [vmem:[%s4378_s12 + $0x1b0] sm:$0xff]  ;;  %v4547_v58 = vld [vmem:[%s4378_s12 + $0x1b8] sm:$0xff]  ;;  %v4550_v59 = vld [vmem:[%s4378_s12 + $0x1c0] sm:$0xff] }
  0x2d   : > { %v4553_v60 = vld [vmem:[%s4378_s12 + $0x1c8] sm:$0xff]  ;;  %v4556_v61 = vld [vmem:[%s4378_s12 + $0x1d0] sm:$0xff]  ;;  %v4559_v62 = vld [vmem:[%s4378_s12 + $0x1d8] sm:$0xff] }
  0x2e   : > { %v4562_v63 = vld [vmem:[%s4378_s12 + $0x1e0] sm:$0xff]  ;;  %v4565_v0 = vld [vmem:[%s4378_s12 + $0x1e8] sm:$0xff]  ;;  %v4568_v1 = vld [vmem:[%s4378_s12 + $0x1f0] sm:$0xff] }
  0x2f   : > { %6064 = vst [vmem:[#allocation25_spill] sm:$0xff] %v4565_v0  ;;  %v4571_v2 = vld [vmem:[%s4378_s12 + $0x1f8] sm:$0xff]  ;;  %v391_v6 = vld [vmem:[%s4373_s9 + $0x1e0] sm:$0xff]  ;;  %v393_v3 = vld [vmem:[%s4373_s9 + $0x1f0] sm:$0xff] }
  0x30   : > { %6065 = vst [vmem:[#allocation26_spill] sm:$0xff] %v4571_v2  ;;  %v394_v5 = vld [vmem:[%s4373_s9 + $0x1f8] sm:$0xff]  ;;  %v388_v9 = vld [vmem:[%s4373_s9 + $0x1c8] sm:$0xff]  ;;  %482 = vmatpush1.msra.mxu0 %v391_v6  ;;  %v387_v10 = vld [vmem:[%s4373_s9 + $0x1c0] sm:$0xff] }
  0x31   : > { %594 = vmatprep.subr.mxu1 %v394_v5  ;;  %v390_v4 = vld [vmem:[%s4373_s9 + $0x1d8] sm:$0xff]  ;;  %v389_v7 = vld [vmem:[%s4373_s9 + $0x1d0] sm:$0xff]  ;;  %483 = vmatprep.subr.mxu0 %v388_v9  ;;  %v384_v13 = vld [vmem:[%s4373_s9 + $0x1a8] sm:$0xff] }
  0x32   : > { %595 = vmatpush1.msra.mxu1 %v393_v3  ;;  %v386_v8 = vld [vmem:[%s4373_s9 + $0x1b8] sm:$0xff]  ;;  %v383_v5 = vld [vmem:[%s4373_s9 + $0x1a0] sm:$0xff]  ;;  %484 = vmatpush1.msra.mxu0 %v387_v10  ;;  %v385_v14 = vld [vmem:[%s4373_s9 + $0x1b0] sm:$0xff] }
  0x33   : > { %596 = vmatprep.subr.mxu1 %v390_v4  ;;  %v380_v11 = vld [vmem:[%s4373_s9 + $0x188] sm:$0xff]  ;;  %v382_v3 = vld [vmem:[%s4373_s9 + $0x198] sm:$0xff]  ;;  %485 = vmatprep.subr.mxu0 %v384_v13  ;;  %v379_v6 = vld [vmem:[%s4373_s9 + $0x180] sm:$0xff] }
  0x34   : > { %597 = vmatpush1.msra.mxu1 %v389_v7  ;;  %v381_v9 = vld [vmem:[%s4373_s9 + $0x190] sm:$0xff]  ;;  %486 = vmatpush1.msra.mxu0 %v383_v5  ;;  %v376_v4 = vld [vmem:[%s4373_s9 + $0x168] sm:$0xff]  ;;  %v378_v17 = vld [vmem:[%s4373_s9 + $0x178] sm:$0xff] }
  0x35   : > { %598 = vmatprep.subr.mxu1 %v386_v8  ;;  %487 = vmatprep.subr.mxu0 %v380_v11  ;;  %v375_v7 = vld [vmem:[%s4373_s9 + $0x160] sm:$0xff]  ;;  %v377_v10 = vld [vmem:[%s4373_s9 + $0x170] sm:$0xff]  ;;  %v372_v13 = vld [vmem:[%s4373_s9 + $0x148] sm:$0xff] }
  0x36   : > { %599 = vmatpush1.msra.mxu1 %v385_v14  ;;  %488 = vmatpush1.msra.mxu0 %v379_v6  ;;  %v374_v8 = vld [vmem:[%s4373_s9 + $0x158] sm:$0xff]  ;;  %v371_v5 = vld [vmem:[%s4373_s9 + $0x140] sm:$0xff]  ;;  %v373_v14 = vld [vmem:[%s4373_s9 + $0x150] sm:$0xff] }
  0x37   : > { %600 = vmatprep.subr.mxu1 %v382_v3  ;;  %489 = vmatprep.subr.mxu0 %v376_v4  ;;  %v368_v11 = vld [vmem:[%s4373_s9 + $0x128] sm:$0xff]  ;;  %v370_v3 = vld [vmem:[%s4373_s9 + $0x138] sm:$0xff]  ;;  %v367_v6 = vld [vmem:[%s4373_s9 + $0x120] sm:$0xff] }
  0x38   : > { %601 = vmatpush1.msra.mxu1 %v381_v9  ;;  %490 = vmatpush1.msra.mxu0 %v375_v7  ;;  %v369_v9 = vld [vmem:[%s4373_s9 + $0x130] sm:$0xff]  ;;  %v364_v4 = vld [vmem:[%s4373_s9 + $0x108] sm:$0xff]  ;;  %v363_v7 = vld [vmem:[%s4373_s9 + $0x100] sm:$0xff] }
  0x39   : > { %602 = vmatprep.subr.mxu1 %v378_v17  ;;  %491 = vmatprep.subr.mxu0 %v372_v13  ;;  %v366_v17 = vld [vmem:[%s4373_s9 + $0x118] sm:$0xff]  ;;  %v360_v13 = vld [vmem:[%s4373_s9 + $0xe8] sm:$0xff]  ;;  %v399_v12 = vld [vmem:[%s4373_s9 + $0x220] sm:$0xff] }
  0x3a   : > { %603 = vmatpush1.msra.mxu1 %v377_v10  ;;  %492 = vmatpush1.msra.mxu0 %v371_v5  ;;  %v365_v10 = vld [vmem:[%s4373_s9 + $0x110] sm:$0xff]  ;;  %v359_v5 = vld [vmem:[%s4373_s9 + $0xe0] sm:$0xff] }
  0x3b   : > { %604 = vmatprep.subr.mxu1 %v374_v8  ;;  %493 = vmatprep.subr.mxu0 %v368_v11  ;;  %v362_v8 = vld [vmem:[%s4373_s9 + $0xf8] sm:$0xff]  ;;  %v356_v11 = vld [vmem:[%s4373_s9 + $0xc8] sm:$0xff]  ;;  %v401_v18 = vld [vmem:[%s4373_s9 + $0x230] sm:$0xff] }
  0x3c   : > { %605 = vmatpush1.msra.mxu1 %v373_v14  ;;  %494 = vmatpush1.msra.mxu0 %v367_v6  ;;  %v361_v14 = vld [vmem:[%s4373_s9 + $0xf0] sm:$0xff]  ;;  %v355_v6 = vld [vmem:[%s4373_s9 + $0xc0] sm:$0xff] }
  0x3d   : > { %606 = vmatprep.subr.mxu1 %v370_v3  ;;  %495 = vmatprep.subr.mxu0 %v364_v4  ;;  %v358_v3 = vld [vmem:[%s4373_s9 + $0xd8] sm:$0xff]  ;;  %v352_v4 = vld [vmem:[%s4373_s9 + $0xa8] sm:$0xff] }
  0x3e   : > { %607 = vmatpush1.msra.mxu1 %v369_v9  ;;  %496 = vmatpush1.msra.mxu0 %v363_v7  ;;  %v357_v9 = vld [vmem:[%s4373_s9 + $0xd0] sm:$0xff]  ;;  %v351_v7 = vld [vmem:[%s4373_s9 + $0xa0] sm:$0xff] }
  0x3f   : > { %608 = vmatprep.subr.mxu1 %v366_v17  ;;  %497 = vmatprep.subr.mxu0 %v360_v13  ;;  %v354_v17 = vld [vmem:[%s4373_s9 + $0xb8] sm:$0xff]  ;;  %v348_v13 = vld [vmem:[%s4373_s9 + $0x88] sm:$0xff] }
  0x40   : > { %609 = vmatpush1.msra.mxu1 %v365_v10  ;;  %498 = vmatpush1.msra.mxu0 %v359_v5  ;;  %v353_v10 = vld [vmem:[%s4373_s9 + $0xb0] sm:$0xff]  ;;  %v347_v5 = vld [vmem:[%s4373_s9 + $0x80] sm:$0xff] }
  0x41   : > { %610 = vmatprep.subr.mxu1 %v362_v8  ;;  %499 = vmatprep.subr.mxu0 %v356_v11  ;;  %v350_v8 = vld [vmem:[%s4373_s9 + $0x98] sm:$0xff]  ;;  %v344_v11 = vld [vmem:[%s4373_s9 + $0x68] sm:$0xff] }
  0x42   : > { %611 = vmatpush1.msra.mxu1 %v361_v14  ;;  %500 = vmatpush1.msra.mxu0 %v355_v6  ;;  %v349_v14 = vld [vmem:[%s4373_s9 + $0x90] sm:$0xff]  ;;  %v343_v6 = vld [vmem:[%s4373_s9 + $0x60] sm:$0xff] }
  0x43   : > { %612 = vmatprep.subr.mxu1 %v358_v3  ;;  %501 = vmatprep.subr.mxu0 %v352_v4  ;;  %v346_v3 = vld [vmem:[%s4373_s9 + $0x78] sm:$0xff]  ;;  %v340_v4 = vld [vmem:[%s4373_s9 + $0x48] sm:$0xff] }
  0x44   : > { %613 = vmatpush1.msra.mxu1 %v357_v9  ;;  %502 = vmatpush1.msra.mxu0 %v351_v7  ;;  %v345_v9 = vld [vmem:[%s4373_s9 + $0x70] sm:$0xff]  ;;  %v339_v7 = vld [vmem:[%s4373_s9 + $0x40] sm:$0xff] }
  0x45   : > { %614 = vmatprep.subr.mxu1 %v354_v17  ;;  %503 = vmatprep.subr.mxu0 %v348_v13  ;;  %v342_v17 = vld [vmem:[%s4373_s9 + $0x58] sm:$0xff]  ;;  %v336_v13 = vld [vmem:[%s4373_s9 + $0x28] sm:$0xff] }
  0x46   : > { %615 = vmatpush1.msra.mxu1 %v353_v10  ;;  %504 = vmatpush1.msra.mxu0 %v347_v5  ;;  %v341_v10 = vld [vmem:[%s4373_s9 + $0x50] sm:$0xff]  ;;  %v335_v5 = vld [vmem:[%s4373_s9 + $0x20] sm:$0xff] }
  0x47   : > { %616 = vmatprep.subr.mxu1 %v350_v8  ;;  %505 = vmatprep.subr.mxu0 %v344_v11  ;;  %v338_v8 = vld [vmem:[%s4373_s9 + $0x38] sm:$0xff]  ;;  %v332_v11 = vld [vmem:[%s4373_s9 + $0x8] sm:$0xff] }
  0x48   : > { %617 = vmatpush1.msra.mxu1 %v349_v14  ;;  %506 = vmatpush1.msra.mxu0 %v343_v6  ;;  %v337_v14 = vld [vmem:[%s4373_s9 + $0x30] sm:$0xff]  ;;  %v331_v6 = vld [vmem:[%s4373_s9] sm:$0xff] }
  0x49   : > { %618 = vmatprep.subr.mxu1 %v346_v3  ;;  %507 = vmatprep.subr.mxu0 %v340_v4  ;;  %v334_v3 = vld [vmem:[%s4373_s9 + $0x18] sm:$0xff]  ;;  %v456_v4 = vld [vmem:[%s4373_s9 + $0x3e8] sm:$0xff] }
  0x4a   : > { %619 = vmatpush1.msra.mxu1 %v345_v9  ;;  %508 = vmatpush1.msra.mxu0 %v339_v7  ;;  %v333_v9 = vld [vmem:[%s4373_s9 + $0x10] sm:$0xff]  ;;  %v455_v7 = vld [vmem:[%s4373_s9 + $0x3e0] sm:$0xff] }
  0x4b   : > { %620 = vmatprep.subr.mxu1 %v342_v17  ;;  %509 = vmatprep.subr.mxu0 %v336_v13  ;;  %v458_v17 = vld [vmem:[%s4373_s9 + $0x3f8] sm:$0xff]  ;;  %v452_v13 = vld [vmem:[%s4373_s9 + $0x3c8] sm:$0xff] }
  0x4c   : > { %621 = vmatpush1.msra.mxu1 %v341_v10  ;;  %510 = vmatpush1.msra.mxu0 %v335_v5  ;;  %v457_v10 = vld [vmem:[%s4373_s9 + $0x3f0] sm:$0xff]  ;;  %v451_v5 = vld [vmem:[%s4373_s9 + $0x3c0] sm:$0xff] }
  0x4d   : > { %622 = vmatprep.subr.mxu1 %v338_v8  ;;  %511 = vmatprep.subr.mxu0 %v332_v11  ;;  %v454_v8 = vld [vmem:[%s4373_s9 + $0x3d8] sm:$0xff]  ;;  %v448_v11 = vld [vmem:[%s4373_s9 + $0x3a8] sm:$0xff] }
  0x4e   : > { %623 = vmatpush1.msra.mxu1 %v337_v14  ;;  %512 = vmatpush1.msra.mxu0 %v331_v6  ;;  %v453_v14 = vld [vmem:[%s4373_s9 + $0x3d0] sm:$0xff]  ;;  %v447_v6 = vld [vmem:[%s4373_s9 + $0x3a0] sm:$0xff] }
  0x4f   : > { %624 = vmatprep.subr.mxu1 %v334_v3  ;;  %513 = vmatprep.subr.mxu0 %v456_v4  ;;  %v450_v3 = vld [vmem:[%s4373_s9 + $0x3b8] sm:$0xff]  ;;  %v444_v4 = vld [vmem:[%s4373_s9 + $0x388] sm:$0xff] }
  0x50   : > { %625 = vmatpush1.msra.mxu1 %v333_v9  ;;  %514 = vmatpush2.msra.mxu0 %v455_v7  ;;  %v449_v9 = vld [vmem:[%s4373_s9 + $0x3b0] sm:$0xff]  ;;  %v443_v7 = vld [vmem:[%s4373_s9 + $0x380] sm:$0xff] }
  0x51   : > { %626 = vmatprep.subr.mxu1 %v458_v17  ;;  %515 = vmatprep.subr.mxu0 %v452_v13  ;;  %v446_v17 = vld [vmem:[%s4373_s9 + $0x398] sm:$0xff]  ;;  %v440_v13 = vld [vmem:[%s4373_s9 + $0x368] sm:$0xff] }
  0x52   : > { %627 = vmatpush2.msra.mxu1 %v457_v10  ;;  %516 = vmatpush2.msra.mxu0 %v451_v5  ;;  %v445_v10 = vld [vmem:[%s4373_s9 + $0x390] sm:$0xff]  ;;  %v439_v5 = vld [vmem:[%s4373_s9 + $0x360] sm:$0xff] }
  0x53   : > { %628 = vmatprep.subr.mxu1 %v454_v8  ;;  %517 = vmatprep.subr.mxu0 %v448_v11  ;;  %v442_v8 = vld [vmem:[%s4373_s9 + $0x378] sm:$0xff]  ;;  %v436_v11 = vld [vmem:[%s4373_s9 + $0x348] sm:$0xff] }
  0x54   : > { %629 = vmatpush2.msra.mxu1 %v453_v14  ;;  %518 = vmatpush2.msra.mxu0 %v447_v6  ;;  %v441_v14 = vld [vmem:[%s4373_s9 + $0x370] sm:$0xff]  ;;  %v435_v6 = vld [vmem:[%s4373_s9 + $0x340] sm:$0xff] }
  0x55   : > { %630 = vmatprep.subr.mxu1 %v450_v3  ;;  %519 = vmatprep.subr.mxu0 %v444_v4  ;;  %v438_v3 = vld [vmem:[%s4373_s9 + $0x358] sm:$0xff]  ;;  %v432_v4 = vld [vmem:[%s4373_s9 + $0x328] sm:$0xff] }
  0x56   : > { %631 = vmatpush2.msra.mxu1 %v449_v9  ;;  %520 = vmatpush2.msra.mxu0 %v443_v7  ;;  %v437_v9 = vld [vmem:[%s4373_s9 + $0x350] sm:$0xff]  ;;  %v431_v7 = vld [vmem:[%s4373_s9 + $0x320] sm:$0xff] }
  0x57   : > { %632 = vmatprep.subr.mxu1 %v446_v17  ;;  %521 = vmatprep.subr.mxu0 %v440_v13  ;;  %v434_v17 = vld [vmem:[%s4373_s9 + $0x338] sm:$0xff]  ;;  %v428_v13 = vld [vmem:[%s4373_s9 + $0x308] sm:$0xff] }
  0x58   : > { %633 = vmatpush2.msra.mxu1 %v445_v10  ;;  %522 = vmatpush2.msra.mxu0 %v439_v5  ;;  %v433_v10 = vld [vmem:[%s4373_s9 + $0x330] sm:$0xff]  ;;  %v427_v5 = vld [vmem:[%s4373_s9 + $0x300] sm:$0xff] }
  0x59   : > { %634 = vmatprep.subr.mxu1 %v442_v8  ;;  %523 = vmatprep.subr.mxu0 %v436_v11  ;;  %v430_v8 = vld [vmem:[%s4373_s9 + $0x318] sm:$0xff]  ;;  %v424_v11 = vld [vmem:[%s4373_s9 + $0x2e8] sm:$0xff] }
  0x5a   : > { %635 = vmatpush2.msra.mxu1 %v441_v14  ;;  %524 = vmatpush2.msra.mxu0 %v435_v6  ;;  %v429_v14 = vld [vmem:[%s4373_s9 + $0x310] sm:$0xff]  ;;  %v423_v6 = vld [vmem:[%s4373_s9 + $0x2e0] sm:$0xff] }
  0x5b   : > { %636 = vmatprep.subr.mxu1 %v438_v3  ;;  %525 = vmatprep.subr.mxu0 %v432_v4  ;;  %v426_v3 = vld [vmem:[%s4373_s9 + $0x2f8] sm:$0xff]  ;;  %v420_v4 = vld [vmem:[%s4373_s9 + $0x2c8] sm:$0xff] }
  0x5c   : > { %637 = vmatpush2.msra.mxu1 %v437_v9  ;;  %526 = vmatpush2.msra.mxu0 %v431_v7  ;;  %v425_v9 = vld [vmem:[%s4373_s9 + $0x2f0] sm:$0xff]  ;;  %v419_v7 = vld [vmem:[%s4373_s9 + $0x2c0] sm:$0xff] }
  0x5d   : > { %638 = vmatprep.subr.mxu1 %v434_v17  ;;  %527 = vmatprep.subr.mxu0 %v428_v13  ;;  %v422_v17 = vld [vmem:[%s4373_s9 + $0x2d8] sm:$0xff]  ;;  %v416_v13 = vld [vmem:[%s4373_s9 + $0x2a8] sm:$0xff] }
  0x5e   : > { %639 = vmatpush2.msra.mxu1 %v433_v10  ;;  %528 = vmatpush2.msra.mxu0 %v427_v5  ;;  %v421_v10 = vld [vmem:[%s4373_s9 + $0x2d0] sm:$0xff]  ;;  %v415_v5 = vld [vmem:[%s4373_s9 + $0x2a0] sm:$0xff] }
  0x5f   : > { %640 = vmatprep.subr.mxu1 %v430_v8  ;;  %529 = vmatprep.subr.mxu0 %v424_v11  ;;  %v418_v8 = vld [vmem:[%s4373_s9 + $0x2b8] sm:$0xff]  ;;  %v412_v11 = vld [vmem:[%s4373_s9 + $0x288] sm:$0xff] }
  0x60   : > { %641 = vmatpush2.msra.mxu1 %v429_v14  ;;  %530 = vmatpush2.msra.mxu0 %v423_v6  ;;  %v417_v14 = vld [vmem:[%s4373_s9 + $0x2b0] sm:$0xff]  ;;  %v411_v6 = vld [vmem:[%s4373_s9 + $0x280] sm:$0xff] }
  0x61   : > { %642 = vmatprep.subr.mxu1 %v426_v3  ;;  %531 = vmatprep.subr.mxu0 %v420_v4  ;;  %v414_v3 = vld [vmem:[%s4373_s9 + $0x298] sm:$0xff]  ;;  %v408_v4 = vld [vmem:[%s4373_s9 + $0x268] sm:$0xff] }
  0x62   : > { %643 = vmatpush2.msra.mxu1 %v425_v9  ;;  %532 = vmatpush2.msra.mxu0 %v419_v7  ;;  %v413_v9 = vld [vmem:[%s4373_s9 + $0x290] sm:$0xff]  ;;  %v407_v7 = vld [vmem:[%s4373_s9 + $0x260] sm:$0xff] }
  0x63   : > { %644 = vmatprep.subr.mxu1 %v422_v17  ;;  %533 = vmatprep.subr.mxu0 %v416_v13  ;;  %v410_v17 = vld [vmem:[%s4373_s9 + $0x278] sm:$0xff]  ;;  %v404_v13 = vld [vmem:[%s4373_s9 + $0x248] sm:$0xff] }
  0x64   : > { %645 = vmatpush2.msra.mxu1 %v421_v10  ;;  %534 = vmatpush2.msra.mxu0 %v415_v5  ;;  %v409_v10 = vld [vmem:[%s4373_s9 + $0x270] sm:$0xff]  ;;  %v403_v5 = vld [vmem:[%s4373_s9 + $0x240] sm:$0xff] }
  0x65   : > { %646 = vmatprep.subr.mxu1 %v418_v8  ;;  %535 = vmatprep.subr.mxu0 %v412_v11  ;;  %v406_v8 = vld [vmem:[%s4373_s9 + $0x258] sm:$0xff]  ;;  %v400_v11 = vld [vmem:[%s4373_s9 + $0x228] sm:$0xff] }
  0x66   : > { %647 = vmatpush2.msra.mxu1 %v417_v14  ;;  %536 = vmatpush2.msra.mxu0 %v411_v6  ;;  %v405_v14 = vld [vmem:[%s4373_s9 + $0x250] sm:$0xff]  ;;  %v396_v6 = vld [vmem:[%s4373_s9 + $0x208] sm:$0xff] }
  0x67   : > { %648 = vmatprep.subr.mxu1 %v414_v3  ;;  %537 = vmatprep.subr.mxu0 %v408_v4  ;;  %v402_v3 = vld [vmem:[%s4373_s9 + $0x238] sm:$0xff]  ;;  %v395_v4 = vld [vmem:[%s4373_s9 + $0x200] sm:$0xff] }
  0x68   : > { %649 = vmatpush2.msra.mxu1 %v413_v9  ;;  %538 = vmatpush2.msra.mxu0 %v407_v7  ;;  %v398_v9 = vld [vmem:[%s4373_s9 + $0x218] sm:$0xff]  ;;  %v315_v7 = vld [vmem:[%s5943_s0] sm:$0xff] }
  0x69   : > { %650 = vmatprep.subr.mxu1 %v410_v17  ;;  %539 = vmatprep.subr.mxu0 %v404_v13  ;;  %v397_v17 = vld [vmem:[%s4373_s9 + $0x210] sm:$0xff]  ;;  %v319_v13 = vld [vmem:[%s5943_s0 + $0x20] sm:$0xff]  ;;  %s3881_s9 = sshll.u32 %s4366_s30, 2  ;;  %s4790_s30 = scalar_lea.vmem [#allocation5], %s4363_s29 }
  0x6a   : > { %651 = vmatpush2.msra.mxu1 %v409_v10  ;;  %540 = vmatpush2.msra.mxu0 %v403_v5  ;;  %v318_v10 = vld [vmem:[%s5943_s0 + $0x18] sm:$0xff]  ;;  %v321_v5 = vld [vmem:[%s5943_s0 + $0x30] sm:$0xff]  ;;  %s303_s12 = scalar_lea.vmem %s5946_s3, %s3881_s9 }
  0x6b   : > { %652 = vmatprep.subr.mxu1 %v406_v8  ;;  %541 = vmatprep.subr.mxu0 %v400_v11  ;;  %v322_v8 = vld [vmem:[%s5943_s0 + $0x38] sm:$0xff]  ;;  %v323_v11 = vld [vmem:[%s5943_s0 + $0x40] sm:$0xff] }
  0x6c   : > { %653 = vmatpush2.msra.mxu1 %v405_v14  ;;  %542 = vmatpush2.msra.mxu0 %v399_v12  ;;  %v317_v12 = vld [vmem:[%s5943_s0 + $0x10] sm:$0xff]  ;;  %v324_v14 = vld [vmem:[%s5943_s0 + $0x48] sm:$0xff] }
  0x6d   : > { %654 = vmatprep.subr.mxu1 %v402_v3  ;;  %543 = vmatprep.subr.mxu0 %v396_v6  ;;  %v326_v3 = vld [vmem:[%s5943_s0 + $0x58] sm:$0xff]  ;;  %v325_v6 = vld [vmem:[%s5943_s0 + $0x50] sm:$0xff] }
  0x6e   : > { %655 = vmatpush2.msra.mxu1 %v401_v18  ;;  %544 = vmatpush2.msra.mxu0 %v395_v4  ;;  %v320_v18 = vld [vmem:[%s5943_s0 + $0x28] sm:$0xff]  ;;  %v327_v4 = vld [vmem:[%s5943_s0 + $0x60] sm:$0xff] }
  0x6f   : > { %656 = vmatprep.subr.mxu1 %v398_v9  ;;  %546 = vmatmul.mubr.f32.vlgmr.msra.gmra.mxu0 %v315_v7  ;;  %v328_v9 = vld [vmem:[%s5943_s0 + $0x68] sm:$0xff] }
  0x70   : > { %657 = vmatpush2.msra.mxu1 %v397_v17  ;;  %551 = vmatprep.mubr.f32.mxu0 %v318_v10  ;;  %v330_v17 = vld [vmem:[%s5943_s0 + $0x78] sm:$0xff] }
  0x71   : > { %659 = vmatmul.mubr.f32.vlgmr.msra.gmra.mxu1 %v315_v7  ;;  %v329_v7 = vld [vmem:[%s5943_s0 + $0x70] sm:$0xff] }
  0x72   : > { %664 = vmatprep.mubr.f32.mxu1 %v318_v10  ;;  %v461_v10 = vlaneseq }
  0x73   : > { %552 = vmatmul.mubr.f32.gmra.mxu0 %v317_v12 }
  0x74   : > { %557 = vmatprep.mubr.f32.mxu0 %v320_v18 }
  0x75   : > { %665 = vmatmul.mubr.f32.gmra.mxu1 %v317_v12  ;;  %v462_v12 = vshrl.u32 %v461_v10, 7 }
  0x76   : > { %670 = vmatprep.mubr.f32.mxu1 %v320_v18 }
  0x77   : > { %558 = vmatmul.mubr.f32.gmra.mxu0 %v319_v13  ;;  %v463_v18 = vsub.s32 0, %v462_v12 }
  0x78   : > { %563 = vmatprep.mubr.f32.mxu0 %v322_v8 }
  0x79   : > { %671 = vmatmul.mubr.f32.gmra.mxu1 %v319_v13  ;;  %v471_v13 = vsub.s32 2, %v462_v12 }
  0x7a   : > { %676 = vmatprep.mubr.f32.mxu1 %v322_v8  ;;  %v459_v8 = vld [vmem:[%s303_s12] sm:$0xf] }
  0x7b   : > { %564 = vmatmul.mubr.f32.gmra.mxu0 %v321_v5 }
  0x7c   : > { %569 = vmatprep.mubr.f32.mxu0 %v324_v14 }
  0x7d   : > { %677 = vmatmul.mubr.f32.gmra.mxu1 %v321_v5  ;;  %v467_v5 = vsub.s32 1, %v462_v12 }
  0x7e   : > { %682 = vmatprep.mubr.f32.mxu1 %v324_v14  ;;  %v475_v14 = vsub.s32 3, %v462_v12 }
  0x7f   : > { %570 = vmatmul.mubr.f32.gmra.mxu0 %v323_v11 }
  0x80   : > { %575 = vmatprep.mubr.f32.mxu0 %v326_v3 }
  0x81   : > { %683 = vmatmul.mubr.f32.gmra.mxu1 %v323_v11  ;;  %v4749_v11 = vrot.slane %v459_v8, %v463_v18 }
  0x82   : > { %688 = vmatprep.mubr.f32.mxu1 %v326_v3  ;;  %v4751_v3 = vrot.slane %v459_v8, %v471_v13 }
  0x83   : > { %576 = vmatmul.mubr.f32.gmra.mxu0 %v325_v6 }
  0x84   : > { %581 = vmatprep.mubr.f32.mxu0 %v328_v9 }
  0x85   : > { %689 = vmatmul.mubr.f32.gmra.mxu1 %v325_v6  ;;  %v4753_v6 = vrot.slane %v459_v8, %v467_v5 }
  0x86   : > { %694 = vmatprep.mubr.f32.mxu1 %v328_v9  ;;  %v4755_v9 = vrot.slane %v459_v8, %v475_v14 }
  0x87   : > { %582 = vmatmul.mubr.f32.gmra.mxu0 %v327_v4 }
  0x88   : > { %587 = vmatprep.mubr.f32.mxu0 %v330_v17 }
  0x89   : > { %695 = vmatmul.mubr.f32.gmra.mxu1 %v327_v4 }
  0x8a   : > { %700 = vmatprep.mubr.f32.mxu1 %v330_v17 }
  0x8b   : > { %588 = vmatmul.mubr.f32.gmra.mxu0 %v329_v7 }
  0x8d   : > { %701 = vmatmul.mubr.f32.gmra.mxu1 %v329_v7 }
 0x12f   : > { %v547_v4 = vpop.f32.mrf.mxu0 }
 0x130   : > { %v548_v7 = vadd.f32 %v547_v4, %v4749_v11 }
 0x131   : > { %v660_v17 = vpop.f32.mrf.mxu1  ;;  %v549_v15 = vpop.f32.mrf.mxu0 }
 0x132   : > { %v661_v10 = vadd.f32 %v660_v17, %v4751_v3  ;;  %707 = vst [vmem:[#allocation2 + $0xb0] sm:$0xff] %v548_v7  ;;  %v550_v12 = vadd.f32 %v549_v15, %v4753_v6 }
 0x133   : > { %v662_v21 = vpop.f32.mrf.mxu1  ;;  %v553_v13 = vpop.f32.mrf.mxu0 }
 0x134   : > { %709 = vst [vmem:[#allocation2 + $0xd8] sm:$0xff] %v661_v10  ;;  %v663_v18 = vadd.f32 %v662_v21, %v4755_v9  ;;  %708 = vst [vmem:[#allocation2] sm:$0xff] %v550_v12  ;;  %v554_v8 = vadd.f32 %v553_v13, %v4749_v11 }
 0x135   : > { %v666_v16 = vpop.f32.mrf.mxu1  ;;  %v555_v14 = vpop.f32.mrf.mxu0 }
 0x136   : > { %710 = vst [vmem:[#allocation2 + $0x18] sm:$0xff] %v663_v18  ;;  %v667_v5 = vadd.f32 %v666_v16, %v4751_v3  ;;  %711 = vst [vmem:[#allocation2 + $0x50] sm:$0xff] %v554_v8  ;;  %v556_v17 = vadd.f32 %v555_v14, %v4753_v6 }
 0x137   : > { %v668_v4 = vpop.f32.mrf.mxu1  ;;  %v559_v10 = vpop.f32.mrf.mxu0 }
 0x138   : > { %713 = vst [vmem:[#allocation2 + $0x30] sm:$0xff] %v667_v5  ;;  %v669_v7 = vadd.f32 %v668_v4, %v4755_v9  ;;  %712 = vst [vmem:[#allocation2 + $0x68] sm:$0xff] %v556_v17  ;;  %v560_v21 = vadd.f32 %v559_v10, %v4749_v11 }
 0x139   : > { %v672_v15 = vpop.f32.mrf.mxu1  ;;  %v561_v18 = vpop.f32.mrf.mxu0 }
 0x13a   : > { %714 = vst [vmem:[#allocation2 + $0x48] sm:$0xff] %v669_v7  ;;  %v673_v12 = vadd.f32 %v672_v15, %v4751_v3  ;;  %715 = vst [vmem:[#allocation2 + $0x80] sm:$0xff] %v560_v21  ;;  %v562_v16 = vadd.f32 %v561_v18, %v4753_v6 }
 0x13b   : > { %v674_v13 = vpop.f32.mrf.mxu1  ;;  %v565_v5 = vpop.f32.mrf.mxu0 }
 0x13c   : > { %717 = vst [vmem:[#allocation2 + $0xe8] sm:$0xff] %v673_v12  ;;  %v675_v8 = vadd.f32 %v674_v13, %v4755_v9  ;;  %716 = vst [vmem:[#allocation2 + $0x88] sm:$0xff] %v562_v16  ;;  %v566_v4 = vadd.f32 %v565_v5, %v4749_v11 }
 0x13d   : > { %v678_v14 = vpop.f32.mrf.mxu1  ;;  %v567_v7 = vpop.f32.mrf.mxu0 }
 0x13e   : > { %718 = vst [vmem:[#allocation2 + $0xb8] sm:$0xff] %v675_v8  ;;  %v679_v17 = vadd.f32 %v678_v14, %v4751_v3  ;;  %719 = vst [vmem:[#allocation2 + $0x60] sm:$0xff] %v566_v4  ;;  %v568_v15 = vadd.f32 %v567_v7, %v4753_v6 }
 0x13f   : > { %v680_v10 = vpop.f32.mrf.mxu1  ;;  %v571_v12 = vpop.f32.mrf.mxu0 }
 0x140   : > { %721 = vst [vmem:[#allocation2 + $0x8] sm:$0xff] %v679_v17  ;;  %v681_v21 = vadd.f32 %v680_v10, %v4755_v9  ;;  %720 = vst [vmem:[#allocation2 + $0xf0] sm:$0xff] %v568_v15  ;;  %v572_v13 = vadd.f32 %v571_v12, %v4749_v11 }
 0x141   : > { %v684_v18 = vpop.f32.mrf.mxu1  ;;  %v573_v8 = vpop.f32.mrf.mxu0 }
 0x142   : > { %722 = vst [vmem:[#allocation2 + $0x78] sm:$0xff] %v681_v21  ;;  %v685_v16 = vadd.f32 %v684_v18, %v4751_v3  ;;  %723 = vst [vmem:[#allocation2 + $0x38] sm:$0xff] %v572_v13  ;;  %v574_v14 = vadd.f32 %v573_v8, %v4753_v6 }
 0x143   : > { %v686_v5 = vpop.f32.mrf.mxu1  ;;  %v577_v17 = vpop.f32.mrf.mxu0 }
 0x144   : > { %725 = vst [vmem:[#allocation2 + $0x40] sm:$0xff] %v685_v16  ;;  %v687_v4 = vadd.f32 %v686_v5, %v4755_v9  ;;  %724 = vst [vmem:[#allocation2 + $0x58] sm:$0xff] %v574_v14  ;;  %v578_v10 = vadd.f32 %v577_v17, %v4749_v11 }
 0x145   : > { %v690_v7 = vpop.f32.mrf.mxu1  ;;  %v579_v21 = vpop.f32.mrf.mxu0 }
 0x146   : > { %726 = vst [vmem:[#allocation2 + $0xc8] sm:$0xff] %v687_v4  ;;  %v691_v15 = vadd.f32 %v690_v7, %v4751_v3  ;;  %727 = vst [vmem:[#allocation2 + $0xe0] sm:$0xff] %v578_v10  ;;  %v580_v18 = vadd.f32 %v579_v21, %v4753_v6 }
 0x147   : > { %v692_v12 = vpop.f32.mrf.mxu1  ;;  %v583_v16 = vpop.f32.mrf.mxu0 }
 0x148   : > { %729 = vst [vmem:[#allocation2 + $0x70] sm:$0xff] %v691_v15  ;;  %v693_v13 = vadd.f32 %v692_v12, %v4755_v9  ;;  %728 = vst [vmem:[#allocation2 + $0x90] sm:$0xff] %v580_v18  ;;  %v584_v5 = vadd.f32 %v583_v16, %v4749_v11 }
 0x149   : > { %v696_v8 = vpop.f32.mrf.mxu1  ;;  %v585_v4 = vpop.f32.mrf.mxu0 }
 0x14a   : > { %730 = vst [vmem:[#allocation2 + $0xc0] sm:$0xff] %v693_v13  ;;  %v697_v14 = vadd.f32 %v696_v8, %v4751_v3  ;;  %731 = vst [vmem:[#allocation2 + $0xa8] sm:$0xff] %v584_v5  ;;  %v586_v7 = vadd.f32 %v585_v4, %v4753_v6 }
 0x14b   : > { %v698_v17 = vpop.f32.mrf.mxu1  ;;  %v589_v15 = vpop.f32.mrf.mxu0 }
 0x14c   : > { %733 = vst [vmem:[#allocation2 + $0x10] sm:$0xff] %v697_v14  ;;  %v699_v10 = vadd.f32 %v698_v17, %v4755_v9  ;;  %732 = vst [vmem:[#allocation2 + $0xd0] sm:$0xff] %v586_v7  ;;  %v590_v12 = vadd.f32 %v589_v15, %v4749_v11 }
 0x14d   : > { %v702_v21 = vpop.f32.mrf.mxu1  ;;  %v591_v13 = vpop.f32.mrf.mxu0 }
 0x14e   : > { %734 = vst [vmem:[#allocation2 + $0x28] sm:$0xff] %v699_v10  ;;  %v703_v18 = vadd.f32 %v702_v21, %v4751_v3  ;;  %735 = vst [vmem:[#allocation2 + $0xa0] sm:$0xff] %v590_v12  ;;  %v592_v8 = vadd.f32 %v591_v13, %v4753_v6  ;;  %806 = sbr.rel (%p3882_p9) target bundleno = 2364 (0x93c), region = 44 }
 0x14f   : > { %v704_v16 = vpop.f32.mrf.mxu1 }
 0x150   : > { %737 = vst [vmem:[#allocation2 + $0x20] sm:$0xff] %v703_v18  ;;  %v705_v5 = vadd.f32 %v704_v16, %v4755_v9  ;;  %736 = vst [vmem:[#allocation2 + $0xf8] sm:$0xff] %v592_v8 }
 0x152   : > { %738 = vst [vmem:[#allocation2 + $0x98] sm:$0xff] %v705_v5 }
 0x153   : > { %816 = vmatprep.subr.mxu0 %v4565_v0  ;;  %887 = vmatprep.subr.mxu1 %v4571_v2  ;;  %v5982_v11 = vmov 0.0   ;;  %v6066_v3 = vld [vmem:[#allocation19_spill] sm:$0xff]  ;;  %v6068_v9 = vld [vmem:[#allocation18_spill] sm:$0xff]  ;;  %v6069_v14 = vld [vmem:[#allocation21_spill] sm:$0xff] }
 0x154   : > { %817 = vmatpush1.msra.mxu0 %v4562_v63  ;;  %888 = vmatpush1.msra.mxu1 %v4568_v1  ;;  %v6067_v6 = vld [vmem:[#allocation23_spill] sm:$0xff]  ;;  %v6071_v17 = vld [vmem:[#allocation20_spill] sm:$0xff]  ;;  %v6072_v7 = vld [vmem:[#allocation14_spill] sm:$0xff] }
 0x155   : > { %818 = vmatprep.subr.mxu0 %v4553_v60  ;;  %889 = vmatprep.subr.mxu1 %v4559_v62  ;;  %v6070_v4 = vld [vmem:[#allocation15_spill] sm:$0xff]  ;;  %v6073_v10 = vld [vmem:[#allocation17_spill] sm:$0xff]  ;;  %v6075_v21 = vld [vmem:[#allocation16_spill] sm:$0xff] }
 0x156   : > { %819 = vmatpush1.msra.mxu0 %v4550_v59  ;;  %890 = vmatpush1.msra.mxu1 %v4556_v61  ;;  %v6074_v15 = vld [vmem:[#allocation11_spill] sm:$0xff]  ;;  %v6076_v12 = vld [vmem:[#allocation10_spill] sm:$0xff]  ;;  %v807_v18 = vld [vmem:[#allocation3] sm:$0xff] }
 0x157   : > { %820 = vmatprep.subr.mxu0 %v4541_v56  ;;  %891 = vmatprep.subr.mxu1 %v4547_v58  ;;  %v6077_v13 = vld [vmem:[#allocation13_spill] sm:$0xff]  ;;  %v6078_v16 = vld [vmem:[#allocation7_spill] sm:$0xff]  ;;  %v6079_v8 = vld [vmem:[#allocation12_spill] sm:$0xff] }
 0x158   : > { %821 = vmatpush1.msra.mxu0 %v4538_v55  ;;  %892 = vmatpush1.msra.mxu1 %v4544_v57  ;;  %v6080_v5 = vld [vmem:[#allocation6_spill] sm:$0xff] }
 0x159   : > { %822 = vmatprep.subr.mxu0 %v4529_v52  ;;  %893 = vmatprep.subr.mxu1 %v4535_v54 }
 0x15a   : > { %823 = vmatpush1.msra.mxu0 %v4526_v51  ;;  %894 = vmatpush1.msra.mxu1 %v4532_v53 }
 0x15b   : > { %824 = vmatprep.subr.mxu0 %v4517_v48  ;;  %895 = vmatprep.subr.mxu1 %v4523_v50 }
 0x15c   : > { %825 = vmatpush1.msra.mxu0 %v4514_v47  ;;  %896 = vmatpush1.msra.mxu1 %v4520_v49 }
 0x15d   : > { %826 = vmatprep.subr.mxu0 %v4505_v44  ;;  %897 = vmatprep.subr.mxu1 %v4511_v46 }
 0x15e   : > { %827 = vmatpush1.msra.mxu0 %v4502_v43  ;;  %898 = vmatpush1.msra.mxu1 %v4508_v45 }
 0x15f   : > { %828 = vmatprep.subr.mxu0 %v4493_v40  ;;  %899 = vmatprep.subr.mxu1 %v4499_v42 }
 0x160   : > { %829 = vmatpush1.msra.mxu0 %v4490_v39  ;;  %900 = vmatpush1.msra.mxu1 %v4496_v41 }
 0x161   : > { %830 = vmatprep.subr.mxu0 %v4481_v36  ;;  %901 = vmatprep.subr.mxu1 %v4487_v38 }
 0x162   : > { %831 = vmatpush1.msra.mxu0 %v4478_v35  ;;  %880 = vmatprep.mubr.f32.mxu0 %v5982_v11  ;;  %v6081_v11 = vld [vmem:[#allocation9_spill] sm:$0xff] }
 0x163   : > { %832 = vmatprep.subr.mxu0 %v4469_v32  ;;  %902 = vmatpush1.msra.mxu1 %v4484_v37 }
 0x164   : > { %833 = vmatpush1.msra.mxu0 %v4466_v31  ;;  %903 = vmatprep.subr.mxu1 %v4475_v34 }
 0x165   : > { %834 = vmatprep.subr.mxu0 %v4457_v28  ;;  %904 = vmatpush1.msra.mxu1 %v4472_v33 }
 0x166   : > { %835 = vmatpush1.msra.mxu0 %v4454_v27  ;;  %905 = vmatprep.subr.mxu1 %v4463_v30 }
 0x167   : > { %836 = vmatprep.subr.mxu0 %v4445_v24  ;;  %906 = vmatpush1.msra.mxu1 %v4460_v29 }
 0x168   : > { %837 = vmatpush1.msra.mxu0 %v4442_v23  ;;  %907 = vmatprep.subr.mxu1 %v4451_v26 }
 0x169   : > { %838 = vmatprep.subr.mxu0 %v4433_v20  ;;  %908 = vmatpush1.msra.mxu1 %v4448_v25 }
 0x16a   : > { %839 = vmatpush1.msra.mxu0 %v4430_v19  ;;  %909 = vmatprep.subr.mxu1 %v4439_v22 }
 0x16b   : > { %840 = vmatprep.subr.mxu0 %v6066_v3  ;;  %910 = vmatpush1.msra.mxu1 %v6067_v6 }
 0x16c   : > { %841 = vmatpush1.msra.mxu0 %v6068_v9  ;;  %911 = vmatprep.subr.mxu1 %v6069_v14 }
 0x16d   : > { %842 = vmatprep.subr.mxu0 %v6070_v4  ;;  %912 = vmatpush1.msra.mxu1 %v6071_v17 }
 0x16e   : > { %843 = vmatpush1.msra.mxu0 %v6072_v7  ;;  %913 = vmatprep.subr.mxu1 %v6073_v10  ;;  %v6082_v7 = vld [vmem:[#allocation8_spill] sm:$0xff]  ;;  %v6083_v10 = vmov 0.0  }
 0x16f   : > { %844 = vmatprep.subr.mxu0 %v6074_v15  ;;  %914 = vmatpush1.msra.mxu1 %v6075_v21 }
 0x170   : > { %845 = vmatpush1.msra.mxu0 %v6076_v12  ;;  %915 = vmatprep.subr.mxu1 %v6077_v13 }
 0x171   : > { %846 = vmatprep.subr.mxu0 %v6078_v16  ;;  %916 = vmatpush1.msra.mxu1 %v6079_v8 }
 0x172   : > { %847 = vmatpush1.msra.mxu0 %v6080_v5  ;;  %917 = vmatprep.subr.mxu1 %v6081_v11 }
 0x173   : > { %881 = vmatmul.mubr.f32.vlgmr.msra.gmra.mxu0 %v807_v18  ;;  %918 = vmatpush1.msra.mxu1 %v6082_v7 }
 0x174   : > { %951 = vmatprep.mubr.f32.mxu1 %v6083_v10  ;;  %994 = vmatprep.subr.mxu0 %v4565_v0 }
 0x175   : > { %952 = vmatmul.mubr.f32.vlgmr.msra.gmra.mxu1 %v807_v18  ;;  %1065 = vmatprep.subr.mxu1 %v4571_v2  ;;  %v6084_v18 = vld [vmem:[#allocation17_spill] sm:$0xff] }
 0x176   : > { %995 = vmatpush1.msra.mxu0 %v4562_v63  ;;  %1066 = vmatpush1.msra.mxu1 %v4568_v1 }
 0x177   : > { %996 = vmatprep.subr.mxu0 %v4553_v60  ;;  %1067 = vmatprep.subr.mxu1 %v4559_v62 }
 0x178   : > { %997 = vmatpush1.msra.mxu0 %v4550_v59  ;;  %1068 = vmatpush1.msra.mxu1 %v4556_v61 }
 0x179   : > { %998 = vmatprep.subr.mxu0 %v4541_v56  ;;  %1069 = vmatprep.subr.mxu1 %v4547_v58 }
 0x17a   : > { %999 = vmatpush1.msra.mxu0 %v4538_v55  ;;  %1070 = vmatpush1.msra.mxu1 %v4544_v57 }
 0x17b   : > { %1000 = vmatprep.subr.mxu0 %v4529_v52  ;;  %1071 = vmatprep.subr.mxu1 %v4535_v54 }
 0x17c   : > { %1001 = vmatpush1.msra.mxu0 %v4526_v51  ;;  %1072 = vmatpush1.msra.mxu1 %v4532_v53 }
 0x17d   : > { %1002 = vmatprep.subr.mxu0 %v4517_v48  ;;  %1073 = vmatprep.subr.mxu1 %v4523_v50 }
 0x17e   : > { %1003 = vmatpush1.msra.mxu0 %v4514_v47  ;;  %1074 = vmatpush1.msra.mxu1 %v4520_v49 }
 0x17f   : > { %1004 = vmatprep.subr.mxu0 %v4505_v44  ;;  %1075 = vmatprep.subr.mxu1 %v4511_v46 }
 0x180   : > { %1005 = vmatpush1.msra.mxu0 %v4502_v43  ;;  %1076 = vmatpush1.msra.mxu1 %v4508_v45 }
 0x181   : > { %1006 = vmatprep.subr.mxu0 %v4493_v40  ;;  %1077 = vmatprep.subr.mxu1 %v4499_v42 }
 0x182   : > { %1007 = vmatpush1.msra.mxu0 %v4490_v39  ;;  %1078 = vmatpush1.msra.mxu1 %v4496_v41 }
 0x183   : > { %1008 = vmatprep.subr.mxu0 %v4481_v36  ;;  %1079 = vmatprep.subr.mxu1 %v4487_v38 }
 0x184   : > { %1009 = vmatpush1.msra.mxu0 %v4478_v35  ;;  %1080 = vmatpush1.msra.mxu1 %v4484_v37 }
 0x185   : > { %1010 = vmatprep.subr.mxu0 %v4469_v32  ;;  %1081 = vmatprep.subr.mxu1 %v4475_v34 }
 0x186   : > { %1011 = vmatpush1.msra.mxu0 %v4466_v31  ;;  %1082 = vmatpush1.msra.mxu1 %v4472_v33 }
 0x187   : > { %1012 = vmatprep.subr.mxu0 %v4457_v28  ;;  %1083 = vmatprep.subr.mxu1 %v4463_v30 }
 0x188   : > { %1013 = vmatpush1.msra.mxu0 %v4454_v27  ;;  %1084 = vmatpush1.msra.mxu1 %v4460_v29 }
 0x189   : > { %1014 = vmatprep.subr.mxu0 %v4445_v24  ;;  %1085 = vmatprep.subr.mxu1 %v4451_v26 }
 0x18a   : > { %1015 = vmatpush1.msra.mxu0 %v4442_v23  ;;  %1086 = vmatpush1.msra.mxu1 %v4448_v25  ;;  %v6085_v25 = vld [vmem:[#allocation14_spill] sm:$0xff] }
 0x18b   : > { %1016 = vmatprep.subr.mxu0 %v4433_v20  ;;  %1087 = vmatprep.subr.mxu1 %v4439_v22 }
 0x18c   : > { %1017 = vmatpush1.msra.mxu0 %v4430_v19  ;;  %1088 = vmatpush1.msra.mxu1 %v6067_v6 }
 0x18d   : > { %1018 = vmatprep.subr.mxu0 %v6066_v3  ;;  %1089 = vmatprep.subr.mxu1 %v6069_v14 }
 0x18e   : > { %1019 = vmatpush1.msra.mxu0 %v6068_v9  ;;  %1090 = vmatpush1.msra.mxu1 %v6071_v17 }
 0x18f   : > { %1020 = vmatprep.subr.mxu0 %v6070_v4  ;;  %1091 = vmatprep.subr.mxu1 %v6084_v18  ;;  %v815_v18 = vld [vmem:[#allocation2 + $0x18] sm:$0xff] }
 0x190   : > { %1021 = vmatpush1.msra.mxu0 %v6085_v25  ;;  %1092 = vmatpush1.msra.mxu1 %v6075_v21 }
 0x191   : > { %1022 = vmatprep.subr.mxu0 %v6074_v15  ;;  %1093 = vmatprep.subr.mxu1 %v6077_v13  ;;  %v812_v13 = vld [vmem:[#allocation2 + $0xb0] sm:$0xff]  ;;  %v813_v15 = vld [vmem:[#allocation2] sm:$0xff] }
 0x192   : > { %1023 = vmatpush1.msra.mxu0 %v6076_v12  ;;  %1094 = vmatpush1.msra.mxu1 %v6079_v8 }
 0x193   : > { %1024 = vmatprep.subr.mxu0 %v6078_v16  ;;  %1095 = vmatprep.subr.mxu1 %v6081_v11 }
 0x194   : > { %1025 = vmatpush1.msra.mxu0 %v6080_v5  ;;  %1058 = vmatprep.mubr.f32.mxu0 %v6083_v10 }
 0x195   : > { %1096 = vmatpush1.msra.mxu1 %v6082_v7  ;;  %1129 = vmatprep.mubr.f32.mxu1 %v6083_v10  ;;  %v814_v7 = vld [vmem:[#allocation2 + $0xd8] sm:$0xff] }
 0x196   : > { %1173 = vmatprep.subr.mxu0 %v4565_v0  ;;  %1244 = vmatprep.subr.mxu1 %v4571_v2 }
 0x233   : > { %v882_v12 = vpop.f32.mrf.mxu0 }
 0x234   : > { %v958_v8 = vadd.f32 %v882_v12, %v812_v13  ;;  %v808_v13 = vld [vmem:[#allocation4] sm:$0xff] }
 0x235   : > { %v884_v21 = vpop.f32.mrf.mxu0  ;;  %v953_v5 = vpop.f32.mrf.mxu1 }
 0x236   : > { %v3883_v16 = vmul.f32 -1.442695, %v958_v8  ;;  %v959_v25 = vadd.f32 %v884_v21, %v813_v15  ;;  %v960_v10 = vadd.f32 %v953_v5, %v814_v7  ;;  %v6089_v7 = vld [vmem:[#allocation18_spill] sm:$0xff]  ;;  %v6091_v5 = vld [vmem:[#allocation15_spill] sm:$0xff] }
 0x237   : > { %v955_v4 = vpop.f32.mrf.mxu1 }
 0x238   : > { %3995 = vpow2.f32 %v3883_v16  ;;  %v3884_v11 = vmul.f32 -1.442695, %v959_v25  ;;  %v961_v17 = vadd.f32 %v955_v4, %v815_v18  ;;  %v6092_v18 = vld [vmem:[#allocation17_spill] sm:$0xff] }
 0x23a   : > { %3997 = vpow2.f32 %v3884_v11  ;;  %v3885_v9 = vmul.f32 -1.442695, %v961_v17 }
 0x23b   : > { %3999 = vtanh.f32 %v960_v10  ;;  %v6090_v10 = vld [vmem:[#allocation20_spill] sm:$0xff] }
 0x23c   : > { %4001 = vpow2.f32 %v3885_v9 }
 0x245   : > { %v3996_v0 = vpop.eup %3995 }
 0x246   : > { %v965_v14 = vadd.f32 1.0, %v3996_v0 }
 0x247   : > { %v3998_v2 = vpop.eup %3997 }
 0x248   : > { %4003 = vrcp.f32 %v965_v14  ;;  %v971_v12 = vadd.f32 1.0, %v3998_v2  ;;  %v4000_v15 = vpop.eup %3999  ;;  %v6086_v2 = vld [vmem:[#allocation24_spill] sm:$0xff]  ;;  %v6088_v14 = vld [vmem:[#allocation21_spill] sm:$0xff] }
 0x249   : > { %v4002_v21 = vpop.eup %4001 }
 0x24a   : > { %4005 = vrcp.f32 %v971_v12  ;;  %v978_v16 = vadd.f32 1.0, %v4002_v21  ;;  %v6093_v12 = vld [vmem:[#allocation14_spill] sm:$0xff]  ;;  %v6095_v21 = vld [vmem:[#allocation11_spill] sm:$0xff] }
 0x24c   : > { %4007 = vrcp.f32 %v978_v16  ;;  %v6099_v16 = vld [vmem:[#allocation7_spill] sm:$0xff] }
 0x255   : > { %v4004_v25 = vpop.eup %4003 }
 0x256   : > { %v982_v3 = vmul.f32 %v4004_v25, %v4000_v15  ;;  %v6094_v15 = vld [vmem:[#allocation16_spill] sm:$0xff]  ;;  %v6096_v25 = vld [vmem:[#allocation13_spill] sm:$0xff] }
 0x257   : > { %v4006_v11 = vpop.eup %4005 }
 0x258   : > { %v981_v8 = vmul.f32 %v4006_v11, %v808_v13  ;;  %v6097_v13 = vld [vmem:[#allocation10_spill] sm:$0xff]  ;;  %v6098_v11 = vld [vmem:[#allocation12_spill] sm:$0xff] }
 0x259   : > { %v4008_v0 = vpop.eup %4007 }
 0x25a   : > { %v4927_v4 = vadd.f32 %v982_v3, %v981_v8  ;;  %v6087_v3 = vld [vmem:[#allocation19_spill] sm:$0xff]  ;;  %v6100_v8 = vld [vmem:[#allocation9_spill] sm:$0xff] }
 0x25c   : > { %4009 = vtanh.f32 %v4927_v4 }
 0x269   : > { %v4010_v17 = vpop.eup %4009 }
 0x26a   : > { %v985_v9 = vmul.f32 %v4010_v17, %v4008_v0  ;;  %v6101_v0 = vld [vmem:[#allocation6_spill] sm:$0xff]  ;;  %v6102_v17 = vmov 0.0  }
 0x26c   : > { %986 = vst [vmem:[%s4790_s30] sm:$0xff] %v985_v9  ;;  %1059 = vmatmul.mubr.f32.vlgmr.msra.gmra.mxu0 %v985_v9  ;;  %1130 = vmatmul.mubr.f32.vlgmr.msra.gmra.mxu1 %v985_v9  ;;  %v6103_v9 = vld [vmem:[#allocation8_spill] sm:$0xff] }
 0x26d   : > { %1174 = vmatpush1.msra.mxu0 %v4562_v63  ;;  %1245 = vmatpush1.msra.mxu1 %v4568_v1 }
 0x26e   : > { %1175 = vmatprep.subr.mxu0 %v4553_v60  ;;  %1246 = vmatprep.subr.mxu1 %v4559_v62 }
 0x26f   : > { %1176 = vmatpush1.msra.mxu0 %v4550_v59  ;;  %1247 = vmatpush1.msra.mxu1 %v4556_v61 }
 0x270   : > { %1177 = vmatprep.subr.mxu0 %v4541_v56  ;;  %1248 = vmatprep.subr.mxu1 %v4547_v58 }
 0x271   : > { %1178 = vmatpush1.msra.mxu0 %v4538_v55  ;;  %1249 = vmatpush1.msra.mxu1 %v4544_v57 }
 0x272   : > { %1179 = vmatprep.subr.mxu0 %v4529_v52  ;;  %1250 = vmatprep.subr.mxu1 %v4535_v54 }
 0x273   : > { %1180 = vmatpush1.msra.mxu0 %v4526_v51  ;;  %1251 = vmatpush1.msra.mxu1 %v4532_v53 }
 0x274   : > { %1181 = vmatprep.subr.mxu0 %v4517_v48  ;;  %1252 = vmatprep.subr.mxu1 %v4523_v50 }
 0x275   : > { %1182 = vmatpush1.msra.mxu0 %v4514_v47  ;;  %1253 = vmatpush1.msra.mxu1 %v4520_v49 }
 0x276   : > { %1183 = vmatprep.subr.mxu0 %v4505_v44  ;;  %1254 = vmatprep.subr.mxu1 %v4511_v46 }
 0x277   : > { %1184 = vmatpush1.msra.mxu0 %v4502_v43  ;;  %1255 = vmatpush1.msra.mxu1 %v4508_v45 }
 0x278   : > { %1185 = vmatprep.subr.mxu0 %v4493_v40  ;;  %1256 = vmatprep.subr.mxu1 %v4499_v42 }
 0x279   : > { %1186 = vmatpush1.msra.mxu0 %v4490_v39  ;;  %1257 = vmatpush1.msra.mxu1 %v4496_v41 }
 0x27a   : > { %1187 = vmatprep.subr.mxu0 %v4481_v36  ;;  %1258 = vmatprep.subr.mxu1 %v4487_v38 }
 0x27b   : > { %1188 = vmatpush1.msra.mxu0 %v4478_v35  ;;  %1259 = vmatpush1.msra.mxu1 %v4484_v37 }
 0x27c   : > { %1189 = vmatprep.subr.mxu0 %v4469_v32  ;;  %1260 = vmatprep.subr.mxu1 %v4475_v34 }
 0x27d   : > { %1190 = vmatpush1.msra.mxu0 %v4466_v31  ;;  %1261 = vmatpush1.msra.mxu1 %v4472_v33 }
 0x27e   : > { %1191 = vmatprep.subr.mxu0 %v4457_v28  ;;  %1262 = vmatprep.subr.mxu1 %v4463_v30 }
 0x27f   : > { %1192 = vmatpush1.msra.mxu0 %v4454_v27  ;;  %1263 = vmatpush1.msra.mxu1 %v4460_v29 }
 0x280   : > { %1193 = vmatprep.subr.mxu0 %v4445_v24  ;;  %1264 = vmatprep.subr.mxu1 %v4451_v26 }
 0x281   : > { %1194 = vmatpush1.msra.mxu0 %v4442_v23  ;;  %1265 = vmatpush1.msra.mxu1 %v6086_v2 }
 0x282   : > { %1195 = vmatprep.subr.mxu0 %v4433_v20  ;;  %1266 = vmatprep.subr.mxu1 %v4439_v22 }
 0x283   : > { %1196 = vmatpush1.msra.mxu0 %v4430_v19  ;;  %1267 = vmatpush1.msra.mxu1 %v6067_v6 }
 0x284   : > { %1197 = vmatprep.subr.mxu0 %v6087_v3  ;;  %1268 = vmatprep.subr.mxu1 %v6088_v14  ;;  %v992_v14 = vld [vmem:[#allocation2 + $0x30] sm:$0xff] }
 0x285   : > { %1198 = vmatpush1.msra.mxu0 %v6089_v7  ;;  %1269 = vmatpush1.msra.mxu1 %v6090_v10  ;;  %v993_v10 = vld [vmem:[#allocation2 + $0x48] sm:$0xff] }
 0x286   : > { %1199 = vmatprep.subr.mxu0 %v6091_v5  ;;  %1270 = vmatprep.subr.mxu1 %v6092_v18 }
 0x287   : > { %1200 = vmatpush1.msra.mxu0 %v6093_v12  ;;  %1271 = vmatpush1.msra.mxu1 %v6094_v15  ;;  %v6104_v15 = vld [vmem:[#allocation25_spill] sm:$0xff] }
 0x288   : > { %1201 = vmatprep.subr.mxu0 %v6095_v21  ;;  %1272 = vmatprep.subr.mxu1 %v6096_v25  ;;  %v6105_v21 = vld [vmem:[#allocation26_spill] sm:$0xff]  ;;  %v991_v12 = vld [vmem:[#allocation2 + $0x68] sm:$0xff] }
 0x289   : > { %1202 = vmatpush1.msra.mxu0 %v6097_v13  ;;  %1273 = vmatpush1.msra.mxu1 %v6098_v11  ;;  %v990_v25 = vld [vmem:[#allocation2 + $0x50] sm:$0xff] }
 0x28a   : > { %1203 = vmatprep.subr.mxu0 %v6099_v16  ;;  %1274 = vmatprep.subr.mxu1 %v6100_v8 }
 0x28b   : > { %1204 = vmatpush1.msra.mxu0 %v6101_v0  ;;  %1237 = vmatprep.mubr.f32.mxu0 %v6102_v17 }
 0x28c   : > { %1275 = vmatpush1.msra.mxu1 %v6103_v9  ;;  %1308 = vmatprep.mubr.f32.mxu1 %v6102_v17 }
 0x28d   : > { %1352 = vmatprep.subr.mxu0 %v6104_v15  ;;  %1423 = vmatprep.subr.mxu1 %v6105_v21 }
 0x32c   : > { %v1060_v13 = vpop.f32.mrf.mxu0  ;;  %v1131_v8 = vpop.f32.mrf.mxu1 }
 0x32d   : > { %v1136_v11 = vadd.f32 %v1060_v13, %v990_v25  ;;  %v1138_v15 = vadd.f32 %v1131_v8, %v992_v14  ;;  %v6111_v8 = vld [vmem:[#allocation20_spill] sm:$0xff] }
 0x32e   : > { %v1062_v18 = vpop.f32.mrf.mxu0  ;;  %v1133_v7 = vpop.f32.mrf.mxu1 }
 0x32f   : > { %v3886_v16 = vmul.f32 -1.442695, %v1136_v11  ;;  %v1137_v5 = vadd.f32 %v1062_v18, %v991_v12  ;;  %v1139_v9 = vadd.f32 %v1133_v7, %v993_v10 }
 0x331   : > { %4011 = vpow2.f32 %v3886_v16  ;;  %v3887_v0 = vmul.f32 -1.442695, %v1137_v5  ;;  %v3888_v17 = vmul.f32 -1.442695, %v1139_v9  ;;  %v6110_v16 = vld [vmem:[#allocation18_spill] sm:$0xff] }
 0x332   : > { %v6114_v9 = vld [vmem:[#allocation14_spill] sm:$0xff] }
 0x333   : > { %4013 = vpow2.f32 %v3887_v0  ;;  %v6112_v0 = vld [vmem:[#allocation15_spill] sm:$0xff] }
 0x334   : > { %4015 = vpow2.f32 %v3888_v17  ;;  %v6113_v17 = vld [vmem:[#allocation17_spill] sm:$0xff] }
 0x33e   : > { %v4012_v3 = vpop.eup %4011 }
 0x33f   : > { %v1143_v6 = vadd.f32 1.0, %v4012_v3 }
 0x340   : > { %v4014_v21 = vpop.eup %4013 }
 0x341   : > { %4017 = vrcp.f32 %v1143_v6  ;;  %v1149_v19 = vadd.f32 1.0, %v4014_v21  ;;  %v4016_v18 = vpop.eup %4015  ;;  %v6109_v21 = vld [vmem:[#allocation21_spill] sm:$0xff] }
 0x342   : > { %4019 = vtanh.f32 %v1138_v15  ;;  %v1156_v13 = vadd.f32 1.0, %v4016_v18  ;;  %v6108_v15 = vld [vmem:[#allocation19_spill] sm:$0xff]  ;;  %v6115_v18 = vld [vmem:[#allocation16_spill] sm:$0xff] }
 0x343   : > { %4021 = vrcp.f32 %v1149_v19  ;;  %v6106_v19 = vld [vmem:[#allocation22_spill] sm:$0xff] }
 0x344   : > { %4023 = vrcp.f32 %v1156_v13  ;;  %v6119_v13 = vld [vmem:[#allocation12_spill] sm:$0xff] }
 0x34e   : > { %v4018_v12 = vpop.eup %4017 }
 0x34f   : > { %v4020_v25 = vpop.eup %4019 }
 0x350   : > { %v4022_v5 = vpop.eup %4021  ;;  %v1160_v11 = vmul.f32 %v4020_v25, %v4018_v12  ;;  %v6116_v12 = vld [vmem:[#allocation11_spill] sm:$0xff]  ;;  %v6117_v25 = vld [vmem:[#allocation13_spill] sm:$0xff] }
 0x351   : > { %v1159_v7 = vmul.f32 %v4022_v5, %v4927_v4  ;;  %v4024_v3 = vpop.eup %4023  ;;  %v6107_v4 = vld [vmem:[#allocation23_spill] sm:$0xff]  ;;  %v6118_v5 = vld [vmem:[#allocation10_spill] sm:$0xff] }
 0x353   : > { %v4998_v10 = vadd.f32 %v1160_v11, %v1159_v7  ;;  %v6120_v11 = vld [vmem:[#allocation7_spill] sm:$0xff]  ;;  %v6121_v7 = vld [vmem:[#allocation9_spill] sm:$0xff] }
 0x355   : > { %4025 = vtanh.f32 %v4998_v10 }
 0x362   : > { %v4026_v14 = vpop.eup %4025 }
 0x363   : > { %v1163_v6 = vmul.f32 %v4026_v14, %v4024_v3  ;;  %v6122_v3 = vld [vmem:[#allocation6_spill] sm:$0xff]  ;;  %v6123_v14 = vmov 0.0  }
 0x365   : > { %3889 = vst [vmem:[%s4790_s30 + $0x8] sm:$0xff] %v1163_v6  ;;  %1238 = vmatmul.mubr.f32.vlgmr.msra.gmra.mxu0 %v1163_v6  ;;  %1309 = vmatmul.mubr.f32.vlgmr.msra.gmra.mxu1 %v1163_v6  ;;  %v6124_v6 = vld [vmem:[#allocation8_spill] sm:$0xff] }
 0x366   : > { %1353 = vmatpush1.msra.mxu0 %v4562_v63  ;;  %1424 = vmatpush1.msra.mxu1 %v4568_v1 }
 0x367   : > { %1354 = vmatprep.subr.mxu0 %v4553_v60  ;;  %1425 = vmatprep.subr.mxu1 %v4559_v62 }
 0x368   : > { %1355 = vmatpush1.msra.mxu0 %v4550_v59  ;;  %1426 = vmatpush1.msra.mxu1 %v4556_v61 }
 0x369   : > { %1356 = vmatprep.subr.mxu0 %v4541_v56  ;;  %1427 = vmatprep.subr.mxu1 %v4547_v58 }
 0x36a   : > { %1357 = vmatpush1.msra.mxu0 %v4538_v55  ;;  %1428 = vmatpush1.msra.mxu1 %v4544_v57 }
 0x36b   : > { %1358 = vmatprep.subr.mxu0 %v4529_v52  ;;  %1429 = vmatprep.subr.mxu1 %v4535_v54 }
 0x36c   : > { %1359 = vmatpush1.msra.mxu0 %v4526_v51  ;;  %1430 = vmatpush1.msra.mxu1 %v4532_v53 }
 0x36d   : > { %1360 = vmatprep.subr.mxu0 %v4517_v48  ;;  %1431 = vmatprep.subr.mxu1 %v4523_v50 }
 0x36e   : > { %1361 = vmatpush1.msra.mxu0 %v4514_v47  ;;  %1432 = vmatpush1.msra.mxu1 %v4520_v49 }
 0x36f   : > { %1362 = vmatprep.subr.mxu0 %v4505_v44  ;;  %1433 = vmatprep.subr.mxu1 %v4511_v46 }
 0x370   : > { %1363 = vmatpush1.msra.mxu0 %v4502_v43  ;;  %1434 = vmatpush1.msra.mxu1 %v4508_v45 }
 0x371   : > { %1364 = vmatprep.subr.mxu0 %v4493_v40  ;;  %1435 = vmatprep.subr.mxu1 %v4499_v42 }
 0x372   : > { %1365 = vmatpush1.msra.mxu0 %v4490_v39  ;;  %1436 = vmatpush1.msra.mxu1 %v4496_v41 }
 0x373   : > { %1366 = vmatprep.subr.mxu0 %v4481_v36  ;;  %1437 = vmatprep.subr.mxu1 %v4487_v38 }
 0x374   : > { %1367 = vmatpush1.msra.mxu0 %v4478_v35  ;;  %1438 = vmatpush1.msra.mxu1 %v4484_v37 }
 0x375   : > { %1368 = vmatprep.subr.mxu0 %v4469_v32  ;;  %1439 = vmatprep.subr.mxu1 %v4475_v34 }
 0x376   : > { %1369 = vmatpush1.msra.mxu0 %v4466_v31  ;;  %1440 = vmatpush1.msra.mxu1 %v4472_v33 }
 0x377   : > { %1370 = vmatprep.subr.mxu0 %v4457_v28  ;;  %1441 = vmatprep.subr.mxu1 %v4463_v30 }
 0x378   : > { %1371 = vmatpush1.msra.mxu0 %v4454_v27  ;;  %1442 = vmatpush1.msra.mxu1 %v4460_v29 }
 0x379   : > { %1372 = vmatprep.subr.mxu0 %v4445_v24  ;;  %1443 = vmatprep.subr.mxu1 %v4451_v26 }
 0x37a   : > { %1373 = vmatpush1.msra.mxu0 %v4442_v23  ;;  %1444 = vmatpush1.msra.mxu1 %v6086_v2 }
 0x37b   : > { %1374 = vmatprep.subr.mxu0 %v4433_v20  ;;  %1445 = vmatprep.subr.mxu1 %v4439_v22 }
 0x37c   : > { %1375 = vmatpush1.msra.mxu0 %v6106_v19  ;;  %1446 = vmatpush1.msra.mxu1 %v6107_v4 }
 0x37d   : > { %1376 = vmatprep.subr.mxu0 %v6108_v15  ;;  %1447 = vmatprep.subr.mxu1 %v6109_v21  ;;  %v1171_v21 = vld [vmem:[#allocation2 + $0xe8] sm:$0xff] }
 0x37e   : > { %1377 = vmatpush1.msra.mxu0 %v6110_v16  ;;  %1448 = vmatpush1.msra.mxu1 %v6111_v8  ;;  %v1172_v8 = vld [vmem:[#allocation2 + $0xb8] sm:$0xff] }
 0x37f   : > { %1378 = vmatprep.subr.mxu0 %v6112_v0  ;;  %1449 = vmatprep.subr.mxu1 %v6113_v17 }
 0x380   : > { %1379 = vmatpush1.msra.mxu0 %v6114_v9  ;;  %1450 = vmatpush1.msra.mxu1 %v6115_v18  ;;  %v6125_v18 = vld [vmem:[#allocation25_spill] sm:$0xff] }
 0x381   : > { %1380 = vmatprep.subr.mxu0 %v6116_v12  ;;  %1451 = vmatprep.subr.mxu1 %v6117_v25  ;;  %v6126_v12 = vld [vmem:[#allocation26_spill] sm:$0xff]  ;;  %v1169_v25 = vld [vmem:[#allocation2 + $0x80] sm:$0xff]  ;;  %v1170_v9 = vld [vmem:[#allocation2 + $0x88] sm:$0xff] }
 0x382   : > { %1381 = vmatpush1.msra.mxu0 %v6118_v5  ;;  %1452 = vmatpush1.msra.mxu1 %v6119_v13 }
 0x383   : > { %1382 = vmatprep.subr.mxu0 %v6120_v11  ;;  %1453 = vmatprep.subr.mxu1 %v6121_v7 }
 0x384   : > { %1383 = vmatpush1.msra.mxu0 %v6122_v3  ;;  %1416 = vmatprep.mubr.f32.mxu0 %v6123_v14 }
 0x385   : > { %1454 = vmatpush1.msra.mxu1 %v6124_v6  ;;  %1487 = vmatprep.mubr.f32.mxu1 %v6123_v14 }
 0x386   : > { %1531 = vmatprep.subr.mxu0 %v6125_v18  ;;  %1602 = vmatprep.subr.mxu1 %v6126_v12 }
 0x425   : > { %v1239_v5 = vpop.f32.mrf.mxu0  ;;  %v1310_v7 = vpop.f32.mrf.mxu1 }
 0x426   : > { %v1315_v13 = vadd.f32 %v1239_v5, %v1169_v25  ;;  %v1317_v18 = vadd.f32 %v1310_v7, %v1171_v21  ;;  %v6132_v7 = vld [vmem:[#allocation20_spill] sm:$0xff] }
 0x427   : > { %v1241_v17 = vpop.f32.mrf.mxu0  ;;  %v1312_v16 = vpop.f32.mrf.mxu1 }
 0x428   : > { %v3890_v11 = vmul.f32 -1.442695, %v1315_v13  ;;  %v1316_v0 = vadd.f32 %v1241_v17, %v1170_v9  ;;  %v1318_v6 = vadd.f32 %v1312_v16, %v1172_v8 }
 0x42a   : > { %4027 = vpow2.f32 %v3890_v11  ;;  %v3891_v3 = vmul.f32 -1.442695, %v1316_v0  ;;  %v3892_v14 = vmul.f32 -1.442695, %v1318_v6  ;;  %v6131_v11 = vld [vmem:[#allocation18_spill] sm:$0xff] }
 0x42b   : > { %v6135_v6 = vld [vmem:[#allocation14_spill] sm:$0xff] }
 0x42c   : > { %4029 = vpow2.f32 %v3891_v3  ;;  %v6133_v3 = vld [vmem:[#allocation15_spill] sm:$0xff] }
 0x42d   : > { %4031 = vpow2.f32 %v3892_v14  ;;  %v6134_v14 = vld [vmem:[#allocation17_spill] sm:$0xff] }
 0x437   : > { %v4028_v15 = vpop.eup %4027 }
 0x438   : > { %v1322_v4 = vadd.f32 1.0, %v4028_v15 }
 0x439   : > { %v4030_v12 = vpop.eup %4029 }
 0x43a   : > { %4033 = vrcp.f32 %v1322_v4  ;;  %v1328_v19 = vadd.f32 1.0, %v4030_v12  ;;  %v4032_v17 = vpop.eup %4031  ;;  %v6130_v12 = vld [vmem:[#allocation21_spill] sm:$0xff] }
 0x43b   : > { %4035 = vtanh.f32 %v1317_v18  ;;  %v1335_v5 = vadd.f32 1.0, %v4032_v17  ;;  %v6129_v18 = vld [vmem:[#allocation19_spill] sm:$0xff]  ;;  %v6136_v17 = vld [vmem:[#allocation16_spill] sm:$0xff] }
 0x43c   : > { %4037 = vrcp.f32 %v1328_v19  ;;  %v6128_v19 = vld [vmem:[#allocation23_spill] sm:$0xff] }
 0x43d   : > { %4039 = vrcp.f32 %v1335_v5  ;;  %v6140_v5 = vld [vmem:[#allocation12_spill] sm:$0xff] }
 0x447   : > { %v4034_v9 = vpop.eup %4033 }
 0x448   : > { %v4036_v25 = vpop.eup %4035 }
 0x449   : > { %v4038_v0 = vpop.eup %4037  ;;  %v1339_v13 = vmul.f32 %v4036_v25, %v4034_v9  ;;  %v6137_v9 = vld [vmem:[#allocation11_spill] sm:$0xff]  ;;  %v6138_v25 = vld [vmem:[#allocation13_spill] sm:$0xff] }
 0x44a   : > { %v1338_v16 = vmul.f32 %v4038_v0, %v4998_v10  ;;  %v4040_v15 = vpop.eup %4039  ;;  %v6127_v10 = vld [vmem:[#allocation22_spill] sm:$0xff] }
 0x44b   : > { %v6139_v0 = vld [vmem:[#allocation10_spill] sm:$0xff] }
 0x44c   : > { %v5069_v8 = vadd.f32 %v1339_v13, %v1338_v16  ;;  %v6141_v13 = vld [vmem:[#allocation7_spill] sm:$0xff]  ;;  %v6142_v16 = vld [vmem:[#allocation9_spill] sm:$0xff] }
 0x44e   : > { %4041 = vtanh.f32 %v5069_v8 }
 0x45b   : > { %v4042_v21 = vpop.eup %4041 }
 0x45c   : > { %v1342_v4 = vmul.f32 %v4042_v21, %v4040_v15  ;;  %v6143_v15 = vld [vmem:[#allocation6_spill] sm:$0xff]  ;;  %v6144_v21 = vmov 0.0  }
 0x45e   : > { %3893 = vst [vmem:[%s4790_s30 + $0x10] sm:$0xff] %v1342_v4  ;;  %1417 = vmatmul.mubr.f32.vlgmr.msra.gmra.mxu0 %v1342_v4  ;;  %1488 = vmatmul.mubr.f32.vlgmr.msra.gmra.mxu1 %v1342_v4  ;;  %v6145_v4 = vld [vmem:[#allocation8_spill] sm:$0xff] }
 0x45f   : > { %1532 = vmatpush1.msra.mxu0 %v4562_v63  ;;  %1603 = vmatpush1.msra.mxu1 %v4568_v1 }
 0x460   : > { %1533 = vmatprep.subr.mxu0 %v4553_v60  ;;  %1604 = vmatprep.subr.mxu1 %v4559_v62 }
 0x461   : > { %1534 = vmatpush1.msra.mxu0 %v4550_v59  ;;  %1605 = vmatpush1.msra.mxu1 %v4556_v61 }
 0x462   : > { %1535 = vmatprep.subr.mxu0 %v4541_v56  ;;  %1606 = vmatprep.subr.mxu1 %v4547_v58 }
 0x463   : > { %1536 = vmatpush1.msra.mxu0 %v4538_v55  ;;  %1607 = vmatpush1.msra.mxu1 %v4544_v57 }
 0x464   : > { %1537 = vmatprep.subr.mxu0 %v4529_v52  ;;  %1608 = vmatprep.subr.mxu1 %v4535_v54 }
 0x465   : > { %1538 = vmatpush1.msra.mxu0 %v4526_v51  ;;  %1609 = vmatpush1.msra.mxu1 %v4532_v53 }
 0x466   : > { %1539 = vmatprep.subr.mxu0 %v4517_v48  ;;  %1610 = vmatprep.subr.mxu1 %v4523_v50 }
 0x467   : > { %1540 = vmatpush1.msra.mxu0 %v4514_v47  ;;  %1611 = vmatpush1.msra.mxu1 %v4520_v49 }
 0x468   : > { %1541 = vmatprep.subr.mxu0 %v4505_v44  ;;  %1612 = vmatprep.subr.mxu1 %v4511_v46 }
 0x469   : > { %1542 = vmatpush1.msra.mxu0 %v4502_v43  ;;  %1613 = vmatpush1.msra.mxu1 %v4508_v45 }
 0x46a   : > { %1543 = vmatprep.subr.mxu0 %v4493_v40  ;;  %1614 = vmatprep.subr.mxu1 %v4499_v42 }
 0x46b   : > { %1544 = vmatpush1.msra.mxu0 %v4490_v39  ;;  %1615 = vmatpush1.msra.mxu1 %v4496_v41 }
 0x46c   : > { %1545 = vmatprep.subr.mxu0 %v4481_v36  ;;  %1616 = vmatprep.subr.mxu1 %v4487_v38 }
 0x46d   : > { %1546 = vmatpush1.msra.mxu0 %v4478_v35  ;;  %1617 = vmatpush1.msra.mxu1 %v4484_v37 }
 0x46e   : > { %1547 = vmatprep.subr.mxu0 %v4469_v32  ;;  %1618 = vmatprep.subr.mxu1 %v4475_v34 }
 0x46f   : > { %1548 = vmatpush1.msra.mxu0 %v4466_v31  ;;  %1619 = vmatpush1.msra.mxu1 %v4472_v33 }
 0x470   : > { %1549 = vmatprep.subr.mxu0 %v4457_v28  ;;  %1620 = vmatprep.subr.mxu1 %v4463_v30 }
 0x471   : > { %1550 = vmatpush1.msra.mxu0 %v4454_v27  ;;  %1621 = vmatpush1.msra.mxu1 %v4460_v29 }
 0x472   : > { %1551 = vmatprep.subr.mxu0 %v4445_v24  ;;  %1622 = vmatprep.subr.mxu1 %v4451_v26 }
 0x473   : > { %1552 = vmatpush1.msra.mxu0 %v4442_v23  ;;  %1623 = vmatpush1.msra.mxu1 %v6086_v2 }
 0x474   : > { %1553 = vmatprep.subr.mxu0 %v4433_v20  ;;  %1624 = vmatprep.subr.mxu1 %v4439_v22 }
 0x475   : > { %1554 = vmatpush1.msra.mxu0 %v6127_v10  ;;  %1625 = vmatpush1.msra.mxu1 %v6128_v19 }
 0x476   : > { %1555 = vmatprep.subr.mxu0 %v6129_v18  ;;  %1626 = vmatprep.subr.mxu1 %v6130_v12  ;;  %v1350_v12 = vld [vmem:[#allocation2 + $0x8] sm:$0xff] }
 0x477   : > { %1556 = vmatpush1.msra.mxu0 %v6131_v11  ;;  %1627 = vmatpush1.msra.mxu1 %v6132_v7  ;;  %v1351_v7 = vld [vmem:[#allocation2 + $0x78] sm:$0xff] }
 0x478   : > { %1557 = vmatprep.subr.mxu0 %v6133_v3  ;;  %1628 = vmatprep.subr.mxu1 %v6134_v14 }
 0x479   : > { %1558 = vmatpush1.msra.mxu0 %v6135_v6  ;;  %1629 = vmatpush1.msra.mxu1 %v6136_v17  ;;  %v6146_v17 = vld [vmem:[#allocation25_spill] sm:$0xff]  ;;  %v1349_v6 = vld [vmem:[#allocation2 + $0xf0] sm:$0xff] }
 0x47a   : > { %1559 = vmatprep.subr.mxu0 %v6137_v9  ;;  %1630 = vmatprep.subr.mxu1 %v6138_v25  ;;  %v6147_v9 = vld [vmem:[#allocation26_spill] sm:$0xff]  ;;  %v1348_v25 = vld [vmem:[#allocation2 + $0x60] sm:$0xff] }
 0x47b   : > { %1560 = vmatpush1.msra.mxu0 %v6139_v0  ;;  %1631 = vmatpush1.msra.mxu1 %v6140_v5 }
 0x47c   : > { %1561 = vmatprep.subr.mxu0 %v6141_v13  ;;  %1632 = vmatprep.subr.mxu1 %v6142_v16 }
 0x47d   : > { %1562 = vmatpush1.msra.mxu0 %v6143_v15  ;;  %1595 = vmatprep.mubr.f32.mxu0 %v6144_v21 }
 0x47e   : > { %1633 = vmatpush1.msra.mxu1 %v6145_v4  ;;  %1666 = vmatprep.mubr.f32.mxu1 %v6144_v21 }
 0x47f   : > { %1710 = vmatprep.subr.mxu0 %v6146_v17  ;;  %1781 = vmatprep.subr.mxu1 %v6147_v9 }
 0x51e   : > { %v1418_v0 = vpop.f32.mrf.mxu0  ;;  %v1489_v16 = vpop.f32.mrf.mxu1 }
 0x51f   : > { %v1494_v5 = vadd.f32 %v1418_v0, %v1348_v25  ;;  %v1496_v17 = vadd.f32 %v1489_v16, %v1350_v12  ;;  %v6153_v16 = vld [vmem:[#allocation20_spill] sm:$0xff] }
 0x520   : > { %v1420_v14 = vpop.f32.mrf.mxu0  ;;  %v1491_v11 = vpop.f32.mrf.mxu1 }
 0x521   : > { %v3894_v13 = vmul.f32 -1.442695, %v1494_v5  ;;  %v1495_v3 = vadd.f32 %v1420_v14, %v1349_v6  ;;  %v1497_v4 = vadd.f32 %v1491_v11, %v1351_v7 }
 0x523   : > { %4043 = vpow2.f32 %v3894_v13  ;;  %v3895_v15 = vmul.f32 -1.442695, %v1495_v3  ;;  %v3896_v21 = vmul.f32 -1.442695, %v1497_v4  ;;  %v6152_v13 = vld [vmem:[#allocation18_spill] sm:$0xff] }
 0x524   : > { %v6156_v4 = vld [vmem:[#allocation14_spill] sm:$0xff] }
 0x525   : > { %4045 = vpow2.f32 %v3895_v15  ;;  %v6154_v15 = vld [vmem:[#allocation15_spill] sm:$0xff] }
 0x526   : > { %4047 = vpow2.f32 %v3896_v21  ;;  %v6155_v21 = vld [vmem:[#allocation17_spill] sm:$0xff] }
 0x530   : > { %v4044_v18 = vpop.eup %4043 }
 0x531   : > { %v1501_v19 = vadd.f32 1.0, %v4044_v18 }
 0x532   : > { %v4046_v9 = vpop.eup %4045 }
 0x533   : > { %4049 = vrcp.f32 %v1501_v19  ;;  %v1507_v10 = vadd.f32 1.0, %v4046_v9  ;;  %v4048_v14 = vpop.eup %4047  ;;  %v6151_v9 = vld [vmem:[#allocation21_spill] sm:$0xff] }
 0x534   : > { %4051 = vtanh.f32 %v1496_v17  ;;  %v1514_v0 = vadd.f32 1.0, %v4048_v14  ;;  %v6150_v17 = vld [vmem:[#allocation19_spill] sm:$0xff]  ;;  %v6157_v14 = vld [vmem:[#allocation16_spill] sm:$0xff] }
 0x535   : > { %4053 = vrcp.f32 %v1507_v10  ;;  %v6149_v10 = vld [vmem:[#allocation23_spill] sm:$0xff] }
 0x536   : > { %4055 = vrcp.f32 %v1514_v0  ;;  %v6161_v0 = vld [vmem:[#allocation12_spill] sm:$0xff] }
 0x540   : > { %v4050_v6 = vpop.eup %4049 }
 0x541   : > { %v4052_v25 = vpop.eup %4051 }
 0x542   : > { %v4054_v3 = vpop.eup %4053  ;;  %v1518_v5 = vmul.f32 %v4052_v25, %v4050_v6  ;;  %v6158_v6 = vld [vmem:[#allocation11_spill] sm:$0xff]  ;;  %v6159_v25 = vld [vmem:[#allocation13_spill] sm:$0xff] }
 0x543   : > { %v1517_v11 = vmul.f32 %v4054_v3, %v5069_v8  ;;  %v4056_v18 = vpop.eup %4055  ;;  %v6148_v8 = vld [vmem:[#allocation22_spill] sm:$0xff] }
 0x544   : > { %v6160_v3 = vld [vmem:[#allocation10_spill] sm:$0xff] }
 0x545   : > { %v5140_v7 = vadd.f32 %v1518_v5, %v1517_v11  ;;  %v6162_v5 = vld [vmem:[#allocation7_spill] sm:$0xff]  ;;  %v6163_v11 = vld [vmem:[#allocation9_spill] sm:$0xff] }
 0x547   : > { %4057 = vtanh.f32 %v5140_v7 }
 0x554   : > { %v4058_v12 = vpop.eup %4057 }
 0x555   : > { %v1521_v19 = vmul.f32 %v4058_v12, %v4056_v18  ;;  %v6164_v18 = vld [vmem:[#allocation6_spill] sm:$0xff]  ;;  %v6165_v12 = vmov 0.0  }
 0x557   : > { %3897 = vst [vmem:[%s4790_s30 + $0x18] sm:$0xff] %v1521_v19  ;;  %1596 = vmatmul.mubr.f32.vlgmr.msra.gmra.mxu0 %v1521_v19  ;;  %1667 = vmatmul.mubr.f32.vlgmr.msra.gmra.mxu1 %v1521_v19  ;;  %v6166_v19 = vld [vmem:[#allocation8_spill] sm:$0xff] }
 0x558   : > { %1711 = vmatpush1.msra.mxu0 %v4562_v63  ;;  %1782 = vmatpush1.msra.mxu1 %v4568_v1 }
 0x559   : > { %1712 = vmatprep.subr.mxu0 %v4553_v60  ;;  %1783 = vmatprep.subr.mxu1 %v4559_v62 }
 0x55a   : > { %1713 = vmatpush1.msra.mxu0 %v4550_v59  ;;  %1784 = vmatpush1.msra.mxu1 %v4556_v61 }
 0x55b   : > { %1714 = vmatprep.subr.mxu0 %v4541_v56  ;;  %1785 = vmatprep.subr.mxu1 %v4547_v58 }
 0x55c   : > { %1715 = vmatpush1.msra.mxu0 %v4538_v55  ;;  %1786 = vmatpush1.msra.mxu1 %v4544_v57 }
 0x55d   : > { %1716 = vmatprep.subr.mxu0 %v4529_v52  ;;  %1787 = vmatprep.subr.mxu1 %v4535_v54 }
 0x55e   : > { %1717 = vmatpush1.msra.mxu0 %v4526_v51  ;;  %1788 = vmatpush1.msra.mxu1 %v4532_v53 }
 0x55f   : > { %1718 = vmatprep.subr.mxu0 %v4517_v48  ;;  %1789 = vmatprep.subr.mxu1 %v4523_v50 }
 0x560   : > { %1719 = vmatpush1.msra.mxu0 %v4514_v47  ;;  %1790 = vmatpush1.msra.mxu1 %v4520_v49 }
 0x561   : > { %1720 = vmatprep.subr.mxu0 %v4505_v44  ;;  %1791 = vmatprep.subr.mxu1 %v4511_v46 }
 0x562   : > { %1721 = vmatpush1.msra.mxu0 %v4502_v43  ;;  %1792 = vmatpush1.msra.mxu1 %v4508_v45 }
 0x563   : > { %1722 = vmatprep.subr.mxu0 %v4493_v40  ;;  %1793 = vmatprep.subr.mxu1 %v4499_v42 }
 0x564   : > { %1723 = vmatpush1.msra.mxu0 %v4490_v39  ;;  %1794 = vmatpush1.msra.mxu1 %v4496_v41 }
 0x565   : > { %1724 = vmatprep.subr.mxu0 %v4481_v36  ;;  %1795 = vmatprep.subr.mxu1 %v4487_v38 }
 0x566   : > { %1725 = vmatpush1.msra.mxu0 %v4478_v35  ;;  %1796 = vmatpush1.msra.mxu1 %v4484_v37 }
 0x567   : > { %1726 = vmatprep.subr.mxu0 %v4469_v32  ;;  %1797 = vmatprep.subr.mxu1 %v4475_v34 }
 0x568   : > { %1727 = vmatpush1.msra.mxu0 %v4466_v31  ;;  %1798 = vmatpush1.msra.mxu1 %v4472_v33 }
 0x569   : > { %1728 = vmatprep.subr.mxu0 %v4457_v28  ;;  %1799 = vmatprep.subr.mxu1 %v4463_v30 }
 0x56a   : > { %1729 = vmatpush1.msra.mxu0 %v4454_v27  ;;  %1800 = vmatpush1.msra.mxu1 %v4460_v29 }
 0x56b   : > { %1730 = vmatprep.subr.mxu0 %v4445_v24  ;;  %1801 = vmatprep.subr.mxu1 %v4451_v26 }
 0x56c   : > { %1731 = vmatpush1.msra.mxu0 %v4442_v23  ;;  %1802 = vmatpush1.msra.mxu1 %v6086_v2 }
 0x56d   : > { %1732 = vmatprep.subr.mxu0 %v4433_v20  ;;  %1803 = vmatprep.subr.mxu1 %v4439_v22 }
 0x56e   : > { %1733 = vmatpush1.msra.mxu0 %v6148_v8  ;;  %1804 = vmatpush1.msra.mxu1 %v6149_v10 }
 0x56f   : > { %1734 = vmatprep.subr.mxu0 %v6150_v17  ;;  %1805 = vmatprep.subr.mxu1 %v6151_v9  ;;  %v1529_v9 = vld [vmem:[#allocation2 + $0x40] sm:$0xff] }
 0x570   : > { %1735 = vmatpush1.msra.mxu0 %v6152_v13  ;;  %1806 = vmatpush1.msra.mxu1 %v6153_v16  ;;  %v1530_v16 = vld [vmem:[#allocation2 + $0xc8] sm:$0xff] }
 0x571   : > { %1736 = vmatprep.subr.mxu0 %v6154_v15  ;;  %1807 = vmatprep.subr.mxu1 %v6155_v21 }
 0x572   : > { %1737 = vmatpush1.msra.mxu0 %v6156_v4  ;;  %1808 = vmatpush1.msra.mxu1 %v6157_v14  ;;  %v6167_v14 = vld [vmem:[#allocation25_spill] sm:$0xff]  ;;  %v1528_v4 = vld [vmem:[#allocation2 + $0x58] sm:$0xff] }
 0x573   : > { %1738 = vmatprep.subr.mxu0 %v6158_v6  ;;  %1809 = vmatprep.subr.mxu1 %v6159_v25  ;;  %v6168_v6 = vld [vmem:[#allocation26_spill] sm:$0xff]  ;;  %v1527_v25 = vld [vmem:[#allocation2 + $0x38] sm:$0xff] }
 0x574   : > { %1739 = vmatpush1.msra.mxu0 %v6160_v3  ;;  %1810 = vmatpush1.msra.mxu1 %v6161_v0 }
 0x575   : > { %1740 = vmatprep.subr.mxu0 %v6162_v5  ;;  %1811 = vmatprep.subr.mxu1 %v6163_v11 }
 0x576   : > { %1741 = vmatpush1.msra.mxu0 %v6164_v18  ;;  %1774 = vmatprep.mubr.f32.mxu0 %v6165_v12 }
 0x577   : > { %1812 = vmatpush1.msra.mxu1 %v6166_v19  ;;  %1845 = vmatprep.mubr.f32.mxu1 %v6165_v12 }
 0x578   : > { %1889 = vmatprep.subr.mxu0 %v6167_v14  ;;  %1960 = vmatprep.subr.mxu1 %v6168_v6 }
 0x617   : > { %v1597_v3 = vpop.f32.mrf.mxu0  ;;  %v1668_v11 = vpop.f32.mrf.mxu1 }
 0x618   : > { %v1673_v0 = vadd.f32 %v1597_v3, %v1527_v25  ;;  %v1675_v14 = vadd.f32 %v1668_v11, %v1529_v9  ;;  %v6174_v11 = vld [vmem:[#allocation20_spill] sm:$0xff] }
 0x619   : > { %v1599_v21 = vpop.f32.mrf.mxu0  ;;  %v1670_v13 = vpop.f32.mrf.mxu1 }
 0x61a   : > { %v3898_v5 = vmul.f32 -1.442695, %v1673_v0  ;;  %v1674_v15 = vadd.f32 %v1599_v21, %v1528_v4  ;;  %v1676_v19 = vadd.f32 %v1670_v13, %v1530_v16 }
 0x61c   : > { %4059 = vpow2.f32 %v3898_v5  ;;  %v3899_v18 = vmul.f32 -1.442695, %v1674_v15  ;;  %v3900_v12 = vmul.f32 -1.442695, %v1676_v19  ;;  %v6173_v5 = vld [vmem:[#allocation18_spill] sm:$0xff] }
 0x61d   : > { %v6177_v19 = vld [vmem:[#allocation14_spill] sm:$0xff] }
 0x61e   : > { %4061 = vpow2.f32 %v3899_v18  ;;  %v6175_v18 = vld [vmem:[#allocation15_spill] sm:$0xff] }
 0x61f   : > { %4063 = vpow2.f32 %v3900_v12  ;;  %v6176_v12 = vld [vmem:[#allocation17_spill] sm:$0xff] }
 0x629   : > { %v4060_v17 = vpop.eup %4059 }
 0x62a   : > { %v1680_v10 = vadd.f32 1.0, %v4060_v17 }
 0x62b   : > { %v4062_v6 = vpop.eup %4061 }
 0x62c   : > { %4065 = vrcp.f32 %v1680_v10  ;;  %v1686_v8 = vadd.f32 1.0, %v4062_v6  ;;  %v4064_v21 = vpop.eup %4063  ;;  %v6172_v6 = vld [vmem:[#allocation21_spill] sm:$0xff] }
 0x62d   : > { %4067 = vtanh.f32 %v1675_v14  ;;  %v1693_v3 = vadd.f32 1.0, %v4064_v21  ;;  %v6171_v14 = vld [vmem:[#allocation19_spill] sm:$0xff]  ;;  %v6178_v21 = vld [vmem:[#allocation16_spill] sm:$0xff] }
 0x62e   : > { %4069 = vrcp.f32 %v1686_v8  ;;  %v6170_v8 = vld [vmem:[#allocation23_spill] sm:$0xff] }
 0x62f   : > { %4071 = vrcp.f32 %v1693_v3  ;;  %v6182_v3 = vld [vmem:[#allocation12_spill] sm:$0xff] }
 0x639   : > { %v4066_v4 = vpop.eup %4065 }
 0x63a   : > { %v4068_v25 = vpop.eup %4067 }
 0x63b   : > { %v4070_v15 = vpop.eup %4069  ;;  %v1697_v0 = vmul.f32 %v4068_v25, %v4066_v4  ;;  %v6179_v4 = vld [vmem:[#allocation11_spill] sm:$0xff]  ;;  %v6180_v25 = vld [vmem:[#allocation13_spill] sm:$0xff] }
 0x63c   : > { %v1696_v13 = vmul.f32 %v4070_v15, %v5140_v7  ;;  %v4072_v17 = vpop.eup %4071  ;;  %v6169_v7 = vld [vmem:[#allocation22_spill] sm:$0xff] }
 0x63d   : > { %v6181_v15 = vld [vmem:[#allocation10_spill] sm:$0xff] }
 0x63e   : > { %v5211_v16 = vadd.f32 %v1697_v0, %v1696_v13  ;;  %v6183_v0 = vld [vmem:[#allocation7_spill] sm:$0xff]  ;;  %v6184_v13 = vld [vmem:[#allocation9_spill] sm:$0xff] }
 0x640   : > { %4073 = vtanh.f32 %v5211_v16 }
 0x64d   : > { %v4074_v9 = vpop.eup %4073 }
 0x64e   : > { %v1700_v10 = vmul.f32 %v4074_v9, %v4072_v17  ;;  %v6185_v17 = vld [vmem:[#allocation6_spill] sm:$0xff]  ;;  %v6186_v9 = vmov 0.0  }
 0x650   : > { %3901 = vst [vmem:[%s4790_s30 + $0x20] sm:$0xff] %v1700_v10  ;;  %1775 = vmatmul.mubr.f32.vlgmr.msra.gmra.mxu0 %v1700_v10  ;;  %1846 = vmatmul.mubr.f32.vlgmr.msra.gmra.mxu1 %v1700_v10  ;;  %v6187_v10 = vld [vmem:[#allocation8_spill] sm:$0xff] }
 0x651   : > { %1890 = vmatpush1.msra.mxu0 %v4562_v63  ;;  %1961 = vmatpush1.msra.mxu1 %v4568_v1 }
 0x652   : > { %1891 = vmatprep.subr.mxu0 %v4553_v60  ;;  %1962 = vmatprep.subr.mxu1 %v4559_v62 }
 0x653   : > { %1892 = vmatpush1.msra.mxu0 %v4550_v59  ;;  %1963 = vmatpush1.msra.mxu1 %v4556_v61 }
 0x654   : > { %1893 = vmatprep.subr.mxu0 %v4541_v56  ;;  %1964 = vmatprep.subr.mxu1 %v4547_v58 }
 0x655   : > { %1894 = vmatpush1.msra.mxu0 %v4538_v55  ;;  %1965 = vmatpush1.msra.mxu1 %v4544_v57 }
 0x656   : > { %1895 = vmatprep.subr.mxu0 %v4529_v52  ;;  %1966 = vmatprep.subr.mxu1 %v4535_v54 }
 0x657   : > { %1896 = vmatpush1.msra.mxu0 %v4526_v51  ;;  %1967 = vmatpush1.msra.mxu1 %v4532_v53 }
 0x658   : > { %1897 = vmatprep.subr.mxu0 %v4517_v48  ;;  %1968 = vmatprep.subr.mxu1 %v4523_v50 }
 0x659   : > { %1898 = vmatpush1.msra.mxu0 %v4514_v47  ;;  %1969 = vmatpush1.msra.mxu1 %v4520_v49 }
 0x65a   : > { %1899 = vmatprep.subr.mxu0 %v4505_v44  ;;  %1970 = vmatprep.subr.mxu1 %v4511_v46 }
 0x65b   : > { %1900 = vmatpush1.msra.mxu0 %v4502_v43  ;;  %1971 = vmatpush1.msra.mxu1 %v4508_v45 }
 0x65c   : > { %1901 = vmatprep.subr.mxu0 %v4493_v40  ;;  %1972 = vmatprep.subr.mxu1 %v4499_v42 }
 0x65d   : > { %1902 = vmatpush1.msra.mxu0 %v4490_v39  ;;  %1973 = vmatpush1.msra.mxu1 %v4496_v41 }
 0x65e   : > { %1903 = vmatprep.subr.mxu0 %v4481_v36  ;;  %1974 = vmatprep.subr.mxu1 %v4487_v38 }
 0x65f   : > { %1904 = vmatpush1.msra.mxu0 %v4478_v35  ;;  %1975 = vmatpush1.msra.mxu1 %v4484_v37 }
 0x660   : > { %1905 = vmatprep.subr.mxu0 %v4469_v32  ;;  %1976 = vmatprep.subr.mxu1 %v4475_v34 }
 0x661   : > { %1906 = vmatpush1.msra.mxu0 %v4466_v31  ;;  %1977 = vmatpush1.msra.mxu1 %v4472_v33 }
 0x662   : > { %1907 = vmatprep.subr.mxu0 %v4457_v28  ;;  %1978 = vmatprep.subr.mxu1 %v4463_v30 }
 0x663   : > { %1908 = vmatpush1.msra.mxu0 %v4454_v27  ;;  %1979 = vmatpush1.msra.mxu1 %v4460_v29 }
 0x664   : > { %1909 = vmatprep.subr.mxu0 %v4445_v24  ;;  %1980 = vmatprep.subr.mxu1 %v4451_v26 }
 0x665   : > { %1910 = vmatpush1.msra.mxu0 %v4442_v23  ;;  %1981 = vmatpush1.msra.mxu1 %v6086_v2 }
 0x666   : > { %1911 = vmatprep.subr.mxu0 %v4433_v20  ;;  %1982 = vmatprep.subr.mxu1 %v4439_v22 }
 0x667   : > { %1912 = vmatpush1.msra.mxu0 %v6169_v7  ;;  %1983 = vmatpush1.msra.mxu1 %v6170_v8 }
 0x668   : > { %1913 = vmatprep.subr.mxu0 %v6171_v14  ;;  %1984 = vmatprep.subr.mxu1 %v6172_v6  ;;  %v1708_v6 = vld [vmem:[#allocation2 + $0x70] sm:$0xff] }
 0x669   : > { %1914 = vmatpush1.msra.mxu0 %v6173_v5  ;;  %1985 = vmatpush1.msra.mxu1 %v6174_v11  ;;  %v1709_v11 = vld [vmem:[#allocation2 + $0xc0] sm:$0xff] }
 0x66a   : > { %1915 = vmatprep.subr.mxu0 %v6175_v18  ;;  %1986 = vmatprep.subr.mxu1 %v6176_v12 }
 0x66b   : > { %1916 = vmatpush1.msra.mxu0 %v6177_v19  ;;  %1987 = vmatpush1.msra.mxu1 %v6178_v21  ;;  %v6188_v21 = vld [vmem:[#allocation25_spill] sm:$0xff]  ;;  %v1707_v19 = vld [vmem:[#allocation2 + $0x90] sm:$0xff] }
 0x66c   : > { %1917 = vmatprep.subr.mxu0 %v6179_v4  ;;  %1988 = vmatprep.subr.mxu1 %v6180_v25  ;;  %v6189_v4 = vld [vmem:[#allocation26_spill] sm:$0xff]  ;;  %v1706_v25 = vld [vmem:[#allocation2 + $0xe0] sm:$0xff] }
 0x66d   : > { %1918 = vmatpush1.msra.mxu0 %v6181_v15  ;;  %1989 = vmatpush1.msra.mxu1 %v6182_v3 }
 0x66e   : > { %1919 = vmatprep.subr.mxu0 %v6183_v0  ;;  %1990 = vmatprep.subr.mxu1 %v6184_v13 }
 0x66f   : > { %1920 = vmatpush1.msra.mxu0 %v6185_v17  ;;  %1953 = vmatprep.mubr.f32.mxu0 %v6186_v9 }
 0x670   : > { %1991 = vmatpush1.msra.mxu1 %v6187_v10  ;;  %2024 = vmatprep.mubr.f32.mxu1 %v6186_v9 }
 0x671   : > { %2068 = vmatprep.subr.mxu0 %v6188_v21  ;;  %2139 = vmatprep.subr.mxu1 %v6189_v4 }
 0x710   : > { %v1776_v15 = vpop.f32.mrf.mxu0  ;;  %v1847_v13 = vpop.f32.mrf.mxu1 }
 0x711   : > { %v1852_v3 = vadd.f32 %v1776_v15, %v1706_v25  ;;  %v1854_v21 = vadd.f32 %v1847_v13, %v1708_v6  ;;  %v6193_v13 = vld [vmem:[#allocation21_spill] sm:$0xff] }
 0x712   : > { %v1778_v12 = vpop.f32.mrf.mxu0  ;;  %v1849_v5 = vpop.f32.mrf.mxu1 }
 0x713   : > { %v3902_v0 = vmul.f32 -1.442695, %v1852_v3  ;;  %v1853_v18 = vadd.f32 %v1778_v12, %v1707_v19  ;;  %v1855_v10 = vadd.f32 %v1849_v5, %v1709_v11 }
 0x715   : > { %4075 = vpow2.f32 %v3902_v0  ;;  %v3903_v17 = vmul.f32 -1.442695, %v1853_v18  ;;  %v3904_v9 = vmul.f32 -1.442695, %v1855_v10  ;;  %v6192_v0 = vld [vmem:[#allocation19_spill] sm:$0xff] }
 0x716   : > { %v6196_v10 = vld [vmem:[#allocation15_spill] sm:$0xff] }
 0x717   : > { %4077 = vpow2.f32 %v3903_v17  ;;  %v6194_v17 = vld [vmem:[#allocation18_spill] sm:$0xff] }
 0x718   : > { %4079 = vpow2.f32 %v3904_v9  ;;  %v6195_v9 = vld [vmem:[#allocation20_spill] sm:$0xff] }
 0x722   : > { %v4076_v14 = vpop.eup %4075 }
 0x723   : > { %v1859_v8 = vadd.f32 1.0, %v4076_v14 }
 0x724   : > { %v4078_v4 = vpop.eup %4077 }
 0x725   : > { %4081 = vrcp.f32 %v1859_v8  ;;  %v1865_v7 = vadd.f32 1.0, %v4078_v4  ;;  %v4080_v12 = vpop.eup %4079  ;;  %v6199_v4 = vld [vmem:[#allocation16_spill] sm:$0xff] }
 0x726   : > { %4083 = vtanh.f32 %v1854_v21  ;;  %v1872_v15 = vadd.f32 1.0, %v4080_v12  ;;  %v6197_v21 = vld [vmem:[#allocation17_spill] sm:$0xff]  ;;  %v6200_v12 = vld [vmem:[#allocation11_spill] sm:$0xff] }
 0x727   : > { %4085 = vrcp.f32 %v1865_v7  ;;  %v6191_v7 = vld [vmem:[#allocation23_spill] sm:$0xff] }
 0x728   : > { %4087 = vrcp.f32 %v1872_v15  ;;  %v6204_v15 = vld [vmem:[#allocation7_spill] sm:$0xff] }
 0x732   : > { %v4082_v19 = vpop.eup %4081 }
 0x733   : > { %v4084_v25 = vpop.eup %4083 }
 0x734   : > { %v4086_v18 = vpop.eup %4085  ;;  %v1876_v3 = vmul.f32 %v4084_v25, %v4082_v19  ;;  %v6201_v19 = vld [vmem:[#allocation13_spill] sm:$0xff]  ;;  %v6202_v25 = vld [vmem:[#allocation10_spill] sm:$0xff] }
 0x735   : > { %v1875_v5 = vmul.f32 %v4086_v18, %v5211_v16  ;;  %v4088_v14 = vpop.eup %4087  ;;  %v6190_v16 = vld [vmem:[#allocation22_spill] sm:$0xff]  ;;  %v6203_v18 = vld [vmem:[#allocation12_spill] sm:$0xff] }
 0x737   : > { %v5282_v11 = vadd.f32 %v1876_v3, %v1875_v5  ;;  %v6205_v3 = vld [vmem:[#allocation9_spill] sm:$0xff]  ;;  %v6206_v5 = vld [vmem:[#allocation6_spill] sm:$0xff] }
 0x739   : > { %4089 = vtanh.f32 %v5282_v11 }
 0x746   : > { %v4090_v6 = vpop.eup %4089 }
 0x747   : > { %v1879_v8 = vmul.f32 %v4090_v6, %v4088_v14  ;;  %v6207_v14 = vmov 0.0   ;;  %v6208_v6 = vld [vmem:[#allocation8_spill] sm:$0xff] }
 0x749   : > { %3905 = vst [vmem:[%s4790_s30 + $0x28] sm:$0xff] %v1879_v8  ;;  %1954 = vmatmul.mubr.f32.vlgmr.msra.gmra.mxu0 %v1879_v8  ;;  %2025 = vmatmul.mubr.f32.vlgmr.msra.gmra.mxu1 %v1879_v8  ;;  %v1885_v8 = vld [vmem:[#allocation2 + $0xa8] sm:$0xff] }
 0x74a   : > { %2069 = vmatpush1.msra.mxu0 %v4562_v63  ;;  %2140 = vmatpush1.msra.mxu1 %v4568_v1 }
 0x74b   : > { %2070 = vmatprep.subr.mxu0 %v4553_v60  ;;  %2141 = vmatprep.subr.mxu1 %v4559_v62 }
 0x74c   : > { %2071 = vmatpush1.msra.mxu0 %v4550_v59  ;;  %2142 = vmatpush1.msra.mxu1 %v4556_v61 }
 0x74d   : > { %2072 = vmatprep.subr.mxu0 %v4541_v56  ;;  %2143 = vmatprep.subr.mxu1 %v4547_v58 }
 0x74e   : > { %2073 = vmatpush1.msra.mxu0 %v4538_v55  ;;  %2144 = vmatpush1.msra.mxu1 %v4544_v57 }
 0x74f   : > { %2074 = vmatprep.subr.mxu0 %v4529_v52  ;;  %2145 = vmatprep.subr.mxu1 %v4535_v54 }
 0x750   : > { %2075 = vmatpush1.msra.mxu0 %v4526_v51  ;;  %2146 = vmatpush1.msra.mxu1 %v4532_v53 }
 0x751   : > { %2076 = vmatprep.subr.mxu0 %v4517_v48  ;;  %2147 = vmatprep.subr.mxu1 %v4523_v50 }
 0x752   : > { %2077 = vmatpush1.msra.mxu0 %v4514_v47  ;;  %2148 = vmatpush1.msra.mxu1 %v4520_v49 }
 0x753   : > { %2078 = vmatprep.subr.mxu0 %v4505_v44  ;;  %2149 = vmatprep.subr.mxu1 %v4511_v46 }
 0x754   : > { %2079 = vmatpush1.msra.mxu0 %v4502_v43  ;;  %2150 = vmatpush1.msra.mxu1 %v4508_v45 }
 0x755   : > { %2080 = vmatprep.subr.mxu0 %v4493_v40  ;;  %2151 = vmatprep.subr.mxu1 %v4499_v42 }
 0x756   : > { %2081 = vmatpush1.msra.mxu0 %v4490_v39  ;;  %2152 = vmatpush1.msra.mxu1 %v4496_v41 }
 0x757   : > { %2082 = vmatprep.subr.mxu0 %v4481_v36  ;;  %2153 = vmatprep.subr.mxu1 %v4487_v38 }
 0x758   : > { %2083 = vmatpush1.msra.mxu0 %v4478_v35  ;;  %2154 = vmatpush1.msra.mxu1 %v4484_v37 }
 0x759   : > { %2084 = vmatprep.subr.mxu0 %v4469_v32  ;;  %2155 = vmatprep.subr.mxu1 %v4475_v34 }
 0x75a   : > { %2085 = vmatpush1.msra.mxu0 %v4466_v31  ;;  %2156 = vmatpush1.msra.mxu1 %v4472_v33 }
 0x75b   : > { %2086 = vmatprep.subr.mxu0 %v4457_v28  ;;  %2157 = vmatprep.subr.mxu1 %v4463_v30 }
 0x75c   : > { %2087 = vmatpush1.msra.mxu0 %v4454_v27  ;;  %2158 = vmatpush1.msra.mxu1 %v4460_v29 }
 0x75d   : > { %2088 = vmatprep.subr.mxu0 %v4445_v24  ;;  %2159 = vmatprep.subr.mxu1 %v4451_v26 }
 0x75e   : > { %2089 = vmatpush1.msra.mxu0 %v4442_v23  ;;  %2160 = vmatpush1.msra.mxu1 %v6086_v2  ;;  %v6198_v2 = vld [vmem:[#allocation14_spill] sm:$0xff] }
 0x75f   : > { %2090 = vmatprep.subr.mxu0 %v4433_v20  ;;  %2161 = vmatprep.subr.mxu1 %v4439_v22 }
 0x760   : > { %2091 = vmatpush1.msra.mxu0 %v6190_v16  ;;  %2162 = vmatpush1.msra.mxu1 %v6191_v7  ;;  %v1886_v7 = vld [vmem:[#allocation2 + $0xd0] sm:$0xff] }
 0x761   : > { %2092 = vmatprep.subr.mxu0 %v6192_v0  ;;  %2163 = vmatprep.subr.mxu1 %v6193_v13 }
 0x762   : > { %2093 = vmatpush1.msra.mxu0 %v6194_v17  ;;  %2164 = vmatpush1.msra.mxu1 %v6195_v9 }
 0x763   : > { %2094 = vmatprep.subr.mxu0 %v6196_v10  ;;  %2165 = vmatprep.subr.mxu1 %v6197_v21 }
 0x764   : > { %2095 = vmatpush1.msra.mxu0 %v6198_v2  ;;  %2166 = vmatpush1.msra.mxu1 %v6199_v4  ;;  %v1888_v2 = vld [vmem:[#allocation2 + $0x28] sm:$0xff] }
 0x765   : > { %2096 = vmatprep.subr.mxu0 %v6200_v12  ;;  %2167 = vmatprep.subr.mxu1 %v6201_v19  ;;  %v1887_v19 = vld [vmem:[#allocation2 + $0x10] sm:$0xff] }
 0x766   : > { %2097 = vmatpush1.msra.mxu0 %v6202_v25  ;;  %2168 = vmatpush1.msra.mxu1 %v6203_v18 }
 0x767   : > { %2098 = vmatprep.subr.mxu0 %v6204_v15  ;;  %2169 = vmatprep.subr.mxu1 %v6205_v3 }
 0x768   : > { %2099 = vmatpush1.msra.mxu0 %v6206_v5  ;;  %2132 = vmatprep.mubr.f32.mxu0 %v6207_v14 }
 0x769   : > { %2170 = vmatpush1.msra.mxu1 %v6208_v6  ;;  %2203 = vmatprep.mubr.f32.mxu1 %v6207_v14 }
 0x809   : > { %v1955_v16 = vpop.f32.mrf.mxu0  ;;  %v2026_v10 = vpop.f32.mrf.mxu1 }
 0x80a   : > { %v2031_v0 = vadd.f32 %v1955_v16, %v1885_v8  ;;  %v2033_v15 = vadd.f32 %v2026_v10, %v1887_v19  ;;  %v2065_v19 = vld [vmem:[#allocation2 + $0xf8] sm:$0xff] }
 0x80b   : > { %v1957_v13 = vpop.f32.mrf.mxu0  ;;  %v2028_v4 = vpop.f32.mrf.mxu1 }
 0x80c   : > { %v3906_v17 = vmul.f32 -1.442695, %v2031_v0  ;;  %v2032_v9 = vadd.f32 %v1957_v13, %v1886_v7  ;;  %v2034_v12 = vadd.f32 %v2028_v4, %v1888_v2  ;;  %v2064_v4 = vld [vmem:[#allocation2 + $0xa0] sm:$0xff] }
 0x80e   : > { %4091 = vpow2.f32 %v3906_v17  ;;  %v3907_v21 = vmul.f32 -1.442695, %v2032_v9  ;;  %v3908_v25 = vmul.f32 -1.442695, %v2034_v12 }
 0x810   : > { %4093 = vpow2.f32 %v3907_v21 }
 0x811   : > { %4095 = vpow2.f32 %v3908_v25 }
 0x81b   : > { %v4092_v18 = vpop.eup %4091 }
 0x81c   : > { %v2038_v3 = vadd.f32 1.0, %v4092_v18 }
 0x81d   : > { %v4094_v5 = vpop.eup %4093 }
 0x81e   : > { %4097 = vrcp.f32 %v2038_v3  ;;  %v2044_v14 = vadd.f32 1.0, %v4094_v5  ;;  %v4096_v6 = vpop.eup %4095 }
 0x81f   : > { %4099 = vtanh.f32 %v2033_v15  ;;  %v2051_v0 = vadd.f32 1.0, %v4096_v6 }
 0x820   : > { %4101 = vrcp.f32 %v2044_v14 }
 0x821   : > { %4103 = vrcp.f32 %v2051_v0 }
 0x82b   : > { %v4098_v8 = vpop.eup %4097 }
 0x82c   : > { %v4100_v16 = vpop.eup %4099 }
 0x82d   : > { %v4102_v7 = vpop.eup %4101  ;;  %v2055_v13 = vmul.f32 %v4100_v16, %v4098_v8  ;;  %v2066_v16 = vld [vmem:[#allocation2 + $0x20] sm:$0xff] }
 0x82e   : > { %v2054_v17 = vmul.f32 %v4102_v7, %v5282_v11  ;;  %v4104_v10 = vpop.eup %4103  ;;  %v2067_v11 = vld [vmem:[#allocation2 + $0x98] sm:$0xff] }
 0x830   : > { %v2056_v9 = vadd.f32 %v2055_v13, %v2054_v17 }
 0x832   : > { %4105 = vtanh.f32 %v2056_v9 }
 0x83f   : > { %v4106_v21 = vpop.eup %4105 }
 0x840   : > { %v2058_v2 = vmul.f32 %v4106_v21, %v4104_v10 }
 0x842   : > { %3909 = vst [vmem:[%s4790_s30 + $0x30] sm:$0xff] %v2058_v2  ;;  %2133 = vmatmul.mubr.f32.vlgmr.msra.gmra.mxu0 %v2058_v2  ;;  %2204 = vmatmul.mubr.f32.vlgmr.msra.gmra.mxu1 %v2058_v2 }
 0x902   : > { %v2134_v12 = vpop.f32.mrf.mxu0  ;;  %v2205_v5 = vpop.f32.mrf.mxu1 }
 0x903   : > { %v2210_v25 = vadd.f32 %v2134_v12, %v2064_v4  ;;  %v2212_v13 = vadd.f32 %v2205_v5, %v2066_v16 }
 0x904   : > { %v2136_v18 = vpop.f32.mrf.mxu0  ;;  %v2207_v6 = vpop.f32.mrf.mxu1 }
 0x905   : > { %v3910_v15 = vmul.f32 -1.442695, %v2210_v25  ;;  %v2211_v3 = vadd.f32 %v2136_v18, %v2065_v19  ;;  %v2213_v8 = vadd.f32 %v2207_v6, %v2067_v11 }
 0x907   : > { %4107 = vpow2.f32 %v3910_v15  ;;  %v3911_v14 = vmul.f32 -1.442695, %v2211_v3  ;;  %v3912_v7 = vmul.f32 -1.442695, %v2213_v8 }
 0x909   : > { %4109 = vpow2.f32 %v3911_v14 }
 0x90a   : > { %4111 = vpow2.f32 %v3912_v7 }
 0x914   : > { %v4108_v0 = vpop.eup %4107 }
 0x915   : > { %v2217_v17 = vadd.f32 1.0, %v4108_v0 }
 0x916   : > { %v4110_v10 = vpop.eup %4109 }
 0x917   : > { %4113 = vrcp.f32 %v2217_v17  ;;  %v2223_v21 = vadd.f32 1.0, %v4110_v10  ;;  %v4112_v2 = vpop.eup %4111 }
 0x918   : > { %4115 = vtanh.f32 %v2212_v13  ;;  %v2230_v25 = vadd.f32 1.0, %v4112_v2 }
 0x919   : > { %4117 = vrcp.f32 %v2223_v21 }
 0x91a   : > { %4119 = vrcp.f32 %v2230_v25 }
 0x924   : > { %v4114_v4 = vpop.eup %4113 }
 0x925   : > { %v4116_v12 = vpop.eup %4115 }
 0x926   : > { %v4118_v19 = vpop.eup %4117  ;;  %v2234_v18 = vmul.f32 %v4116_v12, %v4114_v4 }
 0x927   : > { %v2233_v15 = vmul.f32 %v4118_v19, %v2056_v9  ;;  %v4120_v5 = vpop.eup %4119 }
 0x929   : > { %v2235_v3 = vadd.f32 %v2234_v18, %v2233_v15 }
 0x92b   : > { %4121 = vtanh.f32 %v2235_v3  ;;  %2241 = vst [vmem:[#allocation4] sm:$0xff] %v2235_v3 }
 0x938   : > { %v4122_v14 = vpop.eup %4121 }
 0x939   : > { %v2237_v11 = vmul.f32 %v4122_v14, %v4120_v5 }
 0x93b   : > { %3913 = vst [vmem:[%s4790_s30 + $0x38] sm:$0xff] %v2237_v11  ;;  %2240 = vst [vmem:[#allocation3] sm:$0xff] %v2237_v11 }
 0x93c PF: > { %p3914_p10 = scmp.ne.s32.totalorder %s4281_s17, 1 }
 0x93e   : > { %2245 = sbr.rel (%p3914_p10) target bundleno = 4397 (0x112d), region = 48 }
 0x943   : > { %v6209_v6 = vld [vmem:[#allocation25_spill] sm:$0xff]  ;;  %v6210_v8 = vld [vmem:[#allocation26_spill] sm:$0xff]  ;;  %v6017_v9 = vmov 0.0   ;;  %v6211_v16 = vld [vmem:[#allocation24_spill] sm:$0xff] }
 0x944   : > { %2255 = vmatprep.subr.mxu0 %v6209_v6  ;;  %2326 = vmatprep.subr.mxu1 %v6210_v8  ;;  %v6212_v7 = vld [vmem:[#allocation22_spill] sm:$0xff]  ;;  %v6213_v0 = vld [vmem:[#allocation19_spill] sm:$0xff]  ;;  %v6216_v10 = vld [vmem:[#allocation21_spill] sm:$0xff] }
 0x945   : > { %2256 = vmatpush1.msra.mxu0 %v4562_v63  ;;  %2327 = vmatpush1.msra.mxu1 %v4568_v1  ;;  %v6214_v13 = vld [vmem:[#allocation23_spill] sm:$0xff]  ;;  %v6215_v17 = vld [vmem:[#allocation18_spill] sm:$0xff]  ;;  %v6218_v2 = vld [vmem:[#allocation20_spill] sm:$0xff] }
 0x946   : > { %2257 = vmatprep.subr.mxu0 %v4553_v60  ;;  %2328 = vmatprep.subr.mxu1 %v4559_v62  ;;  %v6217_v21 = vld [vmem:[#allocation15_spill] sm:$0xff]  ;;  %v6219_v4 = vld [vmem:[#allocation14_spill] sm:$0xff]  ;;  %v6220_v12 = vld [vmem:[#allocation17_spill] sm:$0xff] }
 0x947   : > { %2258 = vmatpush1.msra.mxu0 %v4550_v59  ;;  %2329 = vmatpush1.msra.mxu1 %v4556_v61  ;;  %v6221_v19 = vld [vmem:[#allocation11_spill] sm:$0xff]  ;;  %v6222_v25 = vld [vmem:[#allocation16_spill] sm:$0xff]  ;;  %v6223_v18 = vld [vmem:[#allocation10_spill] sm:$0xff] }
 0x948   : > { %2259 = vmatprep.subr.mxu0 %v4541_v56  ;;  %2330 = vmatprep.subr.mxu1 %v4547_v58  ;;  %v2246_v15 = vld [vmem:[#allocation3] sm:$0xff]  ;;  %v6224_v3 = vld [vmem:[#allocation13_spill] sm:$0xff]  ;;  %v6225_v5 = vld [vmem:[#allocation7_spill] sm:$0xff] }
 0x949   : > { %2260 = vmatpush1.msra.mxu0 %v4538_v55  ;;  %2331 = vmatpush1.msra.mxu1 %v4544_v57  ;;  %v6226_v14 = vld [vmem:[#allocation12_spill] sm:$0xff]  ;;  %v6227_v11 = vld [vmem:[#allocation6_spill] sm:$0xff] }
 0x94a   : > { %2261 = vmatprep.subr.mxu0 %v4529_v52  ;;  %2332 = vmatprep.subr.mxu1 %v4535_v54 }
 0x94b   : > { %2262 = vmatpush1.msra.mxu0 %v4526_v51  ;;  %2333 = vmatpush1.msra.mxu1 %v4532_v53 }
 0x94c   : > { %2263 = vmatprep.subr.mxu0 %v4517_v48  ;;  %2334 = vmatprep.subr.mxu1 %v4523_v50 }
 0x94d   : > { %2264 = vmatpush1.msra.mxu0 %v4514_v47  ;;  %2335 = vmatpush1.msra.mxu1 %v4520_v49 }
 0x94e   : > { %2265 = vmatprep.subr.mxu0 %v4505_v44  ;;  %2336 = vmatprep.subr.mxu1 %v4511_v46 }
 0x94f   : > { %2266 = vmatpush1.msra.mxu0 %v4502_v43  ;;  %2337 = vmatpush1.msra.mxu1 %v4508_v45 }
 0x950   : > { %2267 = vmatprep.subr.mxu0 %v4493_v40  ;;  %2338 = vmatprep.subr.mxu1 %v4499_v42 }
 0x951   : > { %2268 = vmatpush1.msra.mxu0 %v4490_v39  ;;  %2339 = vmatpush1.msra.mxu1 %v4496_v41 }
 0x952   : > { %2269 = vmatprep.subr.mxu0 %v4481_v36  ;;  %2340 = vmatprep.subr.mxu1 %v4487_v38 }
 0x953   : > { %2270 = vmatpush1.msra.mxu0 %v4478_v35  ;;  %2319 = vmatprep.mubr.f32.mxu0 %v6017_v9  ;;  %v6228_v9 = vld [vmem:[#allocation9_spill] sm:$0xff] }
 0x954   : > { %2271 = vmatprep.subr.mxu0 %v4469_v32  ;;  %2341 = vmatpush1.msra.mxu1 %v4484_v37 }
 0x955   : > { %2272 = vmatpush1.msra.mxu0 %v4466_v31  ;;  %2342 = vmatprep.subr.mxu1 %v4475_v34 }
 0x956   : > { %2273 = vmatprep.subr.mxu0 %v4457_v28  ;;  %2343 = vmatpush1.msra.mxu1 %v4472_v33 }
 0x957   : > { %2274 = vmatpush1.msra.mxu0 %v4454_v27  ;;  %2344 = vmatprep.subr.mxu1 %v4463_v30 }
 0x958   : > { %2275 = vmatprep.subr.mxu0 %v4445_v24  ;;  %2345 = vmatpush1.msra.mxu1 %v4460_v29 }
 0x959   : > { %2276 = vmatpush1.msra.mxu0 %v4442_v23  ;;  %2346 = vmatprep.subr.mxu1 %v4451_v26 }
 0x95a   : > { %2277 = vmatprep.subr.mxu0 %v4433_v20  ;;  %2347 = vmatpush1.msra.mxu1 %v6211_v16 }
 0x95b   : > { %2278 = vmatpush1.msra.mxu0 %v6212_v7  ;;  %2348 = vmatprep.subr.mxu1 %v4439_v22 }
 0x95c   : > { %2279 = vmatprep.subr.mxu0 %v6213_v0  ;;  %2349 = vmatpush1.msra.mxu1 %v6214_v13 }
 0x95d   : > { %2280 = vmatpush1.msra.mxu0 %v6215_v17  ;;  %2350 = vmatprep.subr.mxu1 %v6216_v10 }
 0x95e   : > { %2281 = vmatprep.subr.mxu0 %v6217_v21  ;;  %2351 = vmatpush1.msra.mxu1 %v6218_v2 }
 0x95f   : > { %2282 = vmatpush1.msra.mxu0 %v6219_v4  ;;  %2352 = vmatprep.subr.mxu1 %v6220_v12  ;;  %v6229_v4 = vld [vmem:[#allocation8_spill] sm:$0xff]  ;;  %v6230_v12 = vmov 0.0  }
 0x960   : > { %2283 = vmatprep.subr.mxu0 %v6221_v19  ;;  %2353 = vmatpush1.msra.mxu1 %v6222_v25 }
 0x961   : > { %2284 = vmatpush1.msra.mxu0 %v6223_v18  ;;  %2354 = vmatprep.subr.mxu1 %v6224_v3 }
 0x962   : > { %2285 = vmatprep.subr.mxu0 %v6225_v5  ;;  %2355 = vmatpush1.msra.mxu1 %v6226_v14 }
 0x963   : > { %2286 = vmatpush1.msra.mxu0 %v6227_v11  ;;  %2356 = vmatprep.subr.mxu1 %v6228_v9 }
 0x964   : > { %2320 = vmatmul.mubr.f32.vlgmr.msra.gmra.mxu0 %v2246_v15  ;;  %2357 = vmatpush1.msra.mxu1 %v6229_v4 }
 0x965   : > { %2390 = vmatprep.mubr.f32.mxu1 %v6230_v12  ;;  %2434 = vmatprep.subr.mxu0 %v6209_v6 }
 0x966   : > { %2391 = vmatmul.mubr.f32.vlgmr.msra.gmra.mxu1 %v2246_v15  ;;  %2505 = vmatprep.subr.mxu1 %v6210_v8  ;;  %v6231_v15 = vld [vmem:[#allocation17_spill] sm:$0xff] }
 0x967   : > { %2435 = vmatpush1.msra.mxu0 %v4562_v63  ;;  %2506 = vmatpush1.msra.mxu1 %v4568_v1 }
 0x968   : > { %2436 = vmatprep.subr.mxu0 %v4553_v60  ;;  %2507 = vmatprep.subr.mxu1 %v4559_v62 }
 0x969   : > { %2437 = vmatpush1.msra.mxu0 %v4550_v59  ;;  %2508 = vmatpush1.msra.mxu1 %v4556_v61 }
 0x96a   : > { %2438 = vmatprep.subr.mxu0 %v4541_v56  ;;  %2509 = vmatprep.subr.mxu1 %v4547_v58 }
 0x96b   : > { %2439 = vmatpush1.msra.mxu0 %v4538_v55  ;;  %2510 = vmatpush1.msra.mxu1 %v4544_v57 }
 0x96c   : > { %2440 = vmatprep.subr.mxu0 %v4529_v52  ;;  %2511 = vmatprep.subr.mxu1 %v4535_v54 }
 0x96d   : > { %2441 = vmatpush1.msra.mxu0 %v4526_v51  ;;  %2512 = vmatpush1.msra.mxu1 %v4532_v53 }
 0x96e   : > { %2442 = vmatprep.subr.mxu0 %v4517_v48  ;;  %2513 = vmatprep.subr.mxu1 %v4523_v50 }
 0x96f   : > { %2443 = vmatpush1.msra.mxu0 %v4514_v47  ;;  %2514 = vmatpush1.msra.mxu1 %v4520_v49 }
 0x970   : > { %2444 = vmatprep.subr.mxu0 %v4505_v44  ;;  %2515 = vmatprep.subr.mxu1 %v4511_v46 }
 0x971   : > { %2445 = vmatpush1.msra.mxu0 %v4502_v43  ;;  %2516 = vmatpush1.msra.mxu1 %v4508_v45 }
 0x972   : > { %2446 = vmatprep.subr.mxu0 %v4493_v40  ;;  %2517 = vmatprep.subr.mxu1 %v4499_v42 }
 0x973   : > { %2447 = vmatpush1.msra.mxu0 %v4490_v39  ;;  %2518 = vmatpush1.msra.mxu1 %v4496_v41 }
 0x974   : > { %2448 = vmatprep.subr.mxu0 %v4481_v36  ;;  %2519 = vmatprep.subr.mxu1 %v4487_v38 }
 0x975   : > { %2449 = vmatpush1.msra.mxu0 %v4478_v35  ;;  %2520 = vmatpush1.msra.mxu1 %v4484_v37 }
 0x976   : > { %2450 = vmatprep.subr.mxu0 %v4469_v32  ;;  %2521 = vmatprep.subr.mxu1 %v4475_v34 }
 0x977   : > { %2451 = vmatpush1.msra.mxu0 %v4466_v31  ;;  %2522 = vmatpush1.msra.mxu1 %v4472_v33 }
 0x978   : > { %2452 = vmatprep.subr.mxu0 %v4457_v28  ;;  %2523 = vmatprep.subr.mxu1 %v4463_v30 }
 0x979   : > { %2453 = vmatpush1.msra.mxu0 %v4454_v27  ;;  %2524 = vmatpush1.msra.mxu1 %v4460_v29 }
 0x97a   : > { %2454 = vmatprep.subr.mxu0 %v4445_v24  ;;  %2525 = vmatprep.subr.mxu1 %v4451_v26 }
 0x97b   : > { %2455 = vmatpush1.msra.mxu0 %v4442_v23  ;;  %2526 = vmatpush1.msra.mxu1 %v6211_v16  ;;  %v6232_v16 = vld [vmem:[#allocation14_spill] sm:$0xff] }
 0x97c   : > { %2456 = vmatprep.subr.mxu0 %v4433_v20  ;;  %2527 = vmatprep.subr.mxu1 %v4439_v22 }
 0x97d   : > { %2457 = vmatpush1.msra.mxu0 %v6212_v7  ;;  %2528 = vmatpush1.msra.mxu1 %v6214_v13 }
 0x97e   : > { %2458 = vmatprep.subr.mxu0 %v6213_v0  ;;  %2529 = vmatprep.subr.mxu1 %v6216_v10 }
 0x97f   : > { %2459 = vmatpush1.msra.mxu0 %v6215_v17  ;;  %2530 = vmatpush1.msra.mxu1 %v6218_v2 }
 0x980   : > { %2460 = vmatprep.subr.mxu0 %v6217_v21  ;;  %2531 = vmatprep.subr.mxu1 %v6231_v15  ;;  %v2254_v15 = vld [vmem:[#allocation2 + $0x98] sm:$0xff] }
 0x981   : > { %2461 = vmatpush1.msra.mxu0 %v6232_v16  ;;  %2532 = vmatpush1.msra.mxu1 %v6222_v25 }
 0x982   : > { %2462 = vmatprep.subr.mxu0 %v6221_v19  ;;  %2533 = vmatprep.subr.mxu1 %v6224_v3  ;;  %v2251_v3 = vld [vmem:[#allocation2 + $0xa0] sm:$0xff]  ;;  %v2252_v19 = vld [vmem:[#allocation2 + $0xf8] sm:$0xff] }
 0x983   : > { %2463 = vmatpush1.msra.mxu0 %v6223_v18  ;;  %2534 = vmatpush1.msra.mxu1 %v6226_v14 }
 0x984   : > { %2464 = vmatprep.subr.mxu0 %v6225_v5  ;;  %2535 = vmatprep.subr.mxu1 %v6228_v9 }
 0x985   : > { %2465 = vmatpush1.msra.mxu0 %v6227_v11  ;;  %2498 = vmatprep.mubr.f32.mxu0 %v6230_v12 }
 0x986   : > { %2536 = vmatpush1.msra.mxu1 %v6229_v4  ;;  %2569 = vmatprep.mubr.f32.mxu1 %v6230_v12  ;;  %v2253_v4 = vld [vmem:[#allocation2 + $0x20] sm:$0xff] }
 0x987   : > { %2613 = vmatprep.subr.mxu0 %v6209_v6  ;;  %2684 = vmatprep.subr.mxu1 %v6210_v8 }
 0xa24   : > { %v2321_v18 = vpop.f32.mrf.mxu0 }
 0xa25   : > { %v2397_v14 = vadd.f32 %v2321_v18, %v2251_v3  ;;  %v2247_v3 = vld [vmem:[#allocation4] sm:$0xff] }
 0xa26   : > { %v2323_v25 = vpop.f32.mrf.mxu0  ;;  %v2392_v11 = vpop.f32.mrf.mxu1 }
 0xa27   : > { %v3915_v5 = vmul.f32 -1.442695, %v2397_v14  ;;  %v2398_v16 = vadd.f32 %v2323_v25, %v2252_v19  ;;  %v2399_v12 = vadd.f32 %v2392_v11, %v2253_v4  ;;  %v6236_v4 = vld [vmem:[#allocation18_spill] sm:$0xff]  ;;  %v6238_v11 = vld [vmem:[#allocation15_spill] sm:$0xff] }
 0xa28   : > { %v2394_v21 = vpop.f32.mrf.mxu1 }
 0xa29   : > { %4123 = vpow2.f32 %v3915_v5  ;;  %v3916_v9 = vmul.f32 -1.442695, %v2398_v16  ;;  %v2400_v2 = vadd.f32 %v2394_v21, %v2254_v15  ;;  %v6239_v15 = vld [vmem:[#allocation17_spill] sm:$0xff] }
 0xa2b   : > { %4125 = vpow2.f32 %v3916_v9  ;;  %v3917_v17 = vmul.f32 -1.442695, %v2400_v2 }
 0xa2c   : > { %4127 = vtanh.f32 %v2399_v12  ;;  %v6237_v12 = vld [vmem:[#allocation20_spill] sm:$0xff] }
 0xa2d   : > { %4129 = vpow2.f32 %v3917_v17 }
 0xa36   : > { %v4124_v6 = vpop.eup %4123 }
 0xa37   : > { %v2404_v10 = vadd.f32 1.0, %v4124_v6 }
 0xa38   : > { %v4126_v8 = vpop.eup %4125 }
 0xa39   : > { %4131 = vrcp.f32 %v2404_v10  ;;  %v2410_v18 = vadd.f32 1.0, %v4126_v8  ;;  %v4128_v19 = vpop.eup %4127  ;;  %v6233_v8 = vld [vmem:[#allocation24_spill] sm:$0xff]  ;;  %v6235_v10 = vld [vmem:[#allocation21_spill] sm:$0xff] }
 0xa3a   : > { %v4130_v25 = vpop.eup %4129 }
 0xa3b   : > { %4133 = vrcp.f32 %v2410_v18  ;;  %v2417_v5 = vadd.f32 1.0, %v4130_v25  ;;  %v6240_v18 = vld [vmem:[#allocation14_spill] sm:$0xff]  ;;  %v6242_v25 = vld [vmem:[#allocation11_spill] sm:$0xff] }
 0xa3d   : > { %4135 = vrcp.f32 %v2417_v5  ;;  %v6246_v5 = vld [vmem:[#allocation7_spill] sm:$0xff] }
 0xa46   : > { %v4132_v16 = vpop.eup %4131 }
 0xa47   : > { %v2421_v0 = vmul.f32 %v4132_v16, %v4128_v19  ;;  %v6241_v19 = vld [vmem:[#allocation16_spill] sm:$0xff]  ;;  %v6243_v16 = vld [vmem:[#allocation13_spill] sm:$0xff] }
 0xa48   : > { %v4134_v9 = vpop.eup %4133 }
 0xa49   : > { %v2420_v14 = vmul.f32 %v4134_v9, %v2247_v3  ;;  %v6244_v3 = vld [vmem:[#allocation10_spill] sm:$0xff]  ;;  %v6245_v9 = vld [vmem:[#allocation12_spill] sm:$0xff] }
 0xa4a   : > { %v4136_v6 = vpop.eup %4135 }
 0xa4b   : > { %v5488_v21 = vadd.f32 %v2421_v0, %v2420_v14  ;;  %v6234_v0 = vld [vmem:[#allocation19_spill] sm:$0xff]  ;;  %v6247_v14 = vld [vmem:[#allocation9_spill] sm:$0xff] }
 0xa4d   : > { %4137 = vtanh.f32 %v5488_v21 }
 0xa5a   : > { %v4138_v2 = vpop.eup %4137 }
 0xa5b   : > { %v2424_v17 = vmul.f32 %v4138_v2, %v4136_v6  ;;  %v6248_v6 = vld [vmem:[#allocation6_spill] sm:$0xff]  ;;  %v6249_v2 = vmov 0.0  }
 0xa5d   : > { %3918 = vst [vmem:[%s4790_s30 + $0x38] sm:$0xff] %v2424_v17  ;;  %2499 = vmatmul.mubr.f32.vlgmr.msra.gmra.mxu0 %v2424_v17  ;;  %2570 = vmatmul.mubr.f32.vlgmr.msra.gmra.mxu1 %v2424_v17  ;;  %v6250_v17 = vld [vmem:[#allocation8_spill] sm:$0xff] }
 0xa5e   : > { %2614 = vmatpush1.msra.mxu0 %v4562_v63  ;;  %2685 = vmatpush1.msra.mxu1 %v4568_v1 }
 0xa5f   : > { %2615 = vmatprep.subr.mxu0 %v4553_v60  ;;  %2686 = vmatprep.subr.mxu1 %v4559_v62 }
 0xa60   : > { %2616 = vmatpush1.msra.mxu0 %v4550_v59  ;;  %2687 = vmatpush1.msra.mxu1 %v4556_v61 }
 0xa61   : > { %2617 = vmatprep.subr.mxu0 %v4541_v56  ;;  %2688 = vmatprep.subr.mxu1 %v4547_v58 }
 0xa62   : > { %2618 = vmatpush1.msra.mxu0 %v4538_v55  ;;  %2689 = vmatpush1.msra.mxu1 %v4544_v57 }
 0xa63   : > { %2619 = vmatprep.subr.mxu0 %v4529_v52  ;;  %2690 = vmatprep.subr.mxu1 %v4535_v54 }
 0xa64   : > { %2620 = vmatpush1.msra.mxu0 %v4526_v51  ;;  %2691 = vmatpush1.msra.mxu1 %v4532_v53 }
 0xa65   : > { %2621 = vmatprep.subr.mxu0 %v4517_v48  ;;  %2692 = vmatprep.subr.mxu1 %v4523_v50 }
 0xa66   : > { %2622 = vmatpush1.msra.mxu0 %v4514_v47  ;;  %2693 = vmatpush1.msra.mxu1 %v4520_v49 }
 0xa67   : > { %2623 = vmatprep.subr.mxu0 %v4505_v44  ;;  %2694 = vmatprep.subr.mxu1 %v4511_v46 }
 0xa68   : > { %2624 = vmatpush1.msra.mxu0 %v4502_v43  ;;  %2695 = vmatpush1.msra.mxu1 %v4508_v45 }
 0xa69   : > { %2625 = vmatprep.subr.mxu0 %v4493_v40  ;;  %2696 = vmatprep.subr.mxu1 %v4499_v42 }
 0xa6a   : > { %2626 = vmatpush1.msra.mxu0 %v4490_v39  ;;  %2697 = vmatpush1.msra.mxu1 %v4496_v41 }
 0xa6b   : > { %2627 = vmatprep.subr.mxu0 %v4481_v36  ;;  %2698 = vmatprep.subr.mxu1 %v4487_v38 }
 0xa6c   : > { %2628 = vmatpush1.msra.mxu0 %v4478_v35  ;;  %2699 = vmatpush1.msra.mxu1 %v4484_v37 }
 0xa6d   : > { %2629 = vmatprep.subr.mxu0 %v4469_v32  ;;  %2700 = vmatprep.subr.mxu1 %v4475_v34 }
 0xa6e   : > { %2630 = vmatpush1.msra.mxu0 %v4466_v31  ;;  %2701 = vmatpush1.msra.mxu1 %v4472_v33 }
 0xa6f   : > { %2631 = vmatprep.subr.mxu0 %v4457_v28  ;;  %2702 = vmatprep.subr.mxu1 %v4463_v30 }
 0xa70   : > { %2632 = vmatpush1.msra.mxu0 %v4454_v27  ;;  %2703 = vmatpush1.msra.mxu1 %v4460_v29 }
 0xa71   : > { %2633 = vmatprep.subr.mxu0 %v4445_v24  ;;  %2704 = vmatprep.subr.mxu1 %v4451_v26 }
 0xa72   : > { %2634 = vmatpush1.msra.mxu0 %v4442_v23  ;;  %2705 = vmatpush1.msra.mxu1 %v6233_v8 }
 0xa73   : > { %2635 = vmatprep.subr.mxu0 %v4433_v20  ;;  %2706 = vmatprep.subr.mxu1 %v4439_v22 }
 0xa74   : > { %2636 = vmatpush1.msra.mxu0 %v6212_v7  ;;  %2707 = vmatpush1.msra.mxu1 %v6214_v13 }
 0xa75   : > { %2637 = vmatprep.subr.mxu0 %v6234_v0  ;;  %2708 = vmatprep.subr.mxu1 %v6235_v10  ;;  %v2432_v10 = vld [vmem:[#allocation2 + $0x10] sm:$0xff] }
 0xa76   : > { %2638 = vmatpush1.msra.mxu0 %v6236_v4  ;;  %2709 = vmatpush1.msra.mxu1 %v6237_v12  ;;  %v2433_v12 = vld [vmem:[#allocation2 + $0x28] sm:$0xff] }
 0xa77   : > { %2639 = vmatprep.subr.mxu0 %v6238_v11  ;;  %2710 = vmatprep.subr.mxu1 %v6239_v15 }
 0xa78   : > { %2640 = vmatpush1.msra.mxu0 %v6240_v18  ;;  %2711 = vmatpush1.msra.mxu1 %v6241_v19  ;;  %v6251_v19 = vld [vmem:[#allocation25_spill] sm:$0xff]  ;;  %v2431_v18 = vld [vmem:[#allocation2 + $0xd0] sm:$0xff] }
 0xa79   : > { %2641 = vmatprep.subr.mxu0 %v6242_v25  ;;  %2712 = vmatprep.subr.mxu1 %v6243_v16  ;;  %v6252_v25 = vld [vmem:[#allocation26_spill] sm:$0xff]  ;;  %v2430_v16 = vld [vmem:[#allocation2 + $0xa8] sm:$0xff] }
 0xa7a   : > { %2642 = vmatpush1.msra.mxu0 %v6244_v3  ;;  %2713 = vmatpush1.msra.mxu1 %v6245_v9 }
 0xa7b   : > { %2643 = vmatprep.subr.mxu0 %v6246_v5  ;;  %2714 = vmatprep.subr.mxu1 %v6247_v14 }
 0xa7c   : > { %2644 = vmatpush1.msra.mxu0 %v6248_v6  ;;  %2677 = vmatprep.mubr.f32.mxu0 %v6249_v2 }
 0xa7d   : > { %2715 = vmatpush1.msra.mxu1 %v6250_v17  ;;  %2748 = vmatprep.mubr.f32.mxu1 %v6249_v2 }
 0xa7e   : > { %2792 = vmatprep.subr.mxu0 %v6251_v19  ;;  %2863 = vmatprep.subr.mxu1 %v6252_v25 }
 0xb1d   : > { %v2500_v3 = vpop.f32.mrf.mxu0  ;;  %v2571_v14 = vpop.f32.mrf.mxu1 }
 0xb1e   : > { %v2576_v9 = vadd.f32 %v2500_v3, %v2430_v16  ;;  %v2578_v19 = vadd.f32 %v2571_v14, %v2432_v10  ;;  %v6258_v14 = vld [vmem:[#allocation20_spill] sm:$0xff] }
 0xb1f   : > { %v2502_v15 = vpop.f32.mrf.mxu0  ;;  %v2573_v4 = vpop.f32.mrf.mxu1 }
 0xb20   : > { %v3919_v5 = vmul.f32 -1.442695, %v2576_v9  ;;  %v2577_v11 = vadd.f32 %v2502_v15, %v2431_v18  ;;  %v2579_v17 = vadd.f32 %v2573_v4, %v2433_v12 }
 0xb22   : > { %4139 = vpow2.f32 %v3919_v5  ;;  %v3920_v6 = vmul.f32 -1.442695, %v2577_v11  ;;  %v3921_v2 = vmul.f32 -1.442695, %v2579_v17  ;;  %v6257_v5 = vld [vmem:[#allocation18_spill] sm:$0xff] }
 0xb23   : > { %v6261_v17 = vld [vmem:[#allocation14_spill] sm:$0xff] }
 0xb24   : > { %4141 = vpow2.f32 %v3920_v6  ;;  %v6259_v6 = vld [vmem:[#allocation15_spill] sm:$0xff] }
 0xb25   : > { %4143 = vpow2.f32 %v3921_v2  ;;  %v6260_v2 = vld [vmem:[#allocation17_spill] sm:$0xff] }
 0xb2f   : > { %v4140_v0 = vpop.eup %4139 }
 0xb30   : > { %v2583_v13 = vadd.f32 1.0, %v4140_v0 }
 0xb31   : > { %v4142_v25 = vpop.eup %4141 }
 0xb32   : > { %4145 = vrcp.f32 %v2583_v13  ;;  %v2589_v7 = vadd.f32 1.0, %v4142_v25  ;;  %v4144_v15 = vpop.eup %4143  ;;  %v6256_v25 = vld [vmem:[#allocation21_spill] sm:$0xff] }
 0xb33   : > { %4147 = vtanh.f32 %v2578_v19  ;;  %v2596_v3 = vadd.f32 1.0, %v4144_v15  ;;  %v6255_v19 = vld [vmem:[#allocation19_spill] sm:$0xff]  ;;  %v6262_v15 = vld [vmem:[#allocation16_spill] sm:$0xff] }
 0xb34   : > { %4149 = vrcp.f32 %v2589_v7  ;;  %v6253_v7 = vld [vmem:[#allocation22_spill] sm:$0xff] }
 0xb35   : > { %4151 = vrcp.f32 %v2596_v3  ;;  %v6266_v3 = vld [vmem:[#allocation12_spill] sm:$0xff] }
 0xb3f   : > { %v4146_v18 = vpop.eup %4145 }
 0xb40   : > { %v4148_v16 = vpop.eup %4147 }
 0xb41   : > { %v4150_v11 = vpop.eup %4149  ;;  %v2600_v9 = vmul.f32 %v4148_v16, %v4146_v18  ;;  %v6263_v18 = vld [vmem:[#allocation11_spill] sm:$0xff]  ;;  %v6264_v16 = vld [vmem:[#allocation13_spill] sm:$0xff] }
 0xb42   : > { %v2599_v4 = vmul.f32 %v4150_v11, %v5488_v21  ;;  %v4152_v0 = vpop.eup %4151  ;;  %v6254_v21 = vld [vmem:[#allocation23_spill] sm:$0xff]  ;;  %v6265_v11 = vld [vmem:[#allocation10_spill] sm:$0xff] }
 0xb44   : > { %v5559_v12 = vadd.f32 %v2600_v9, %v2599_v4  ;;  %v6267_v9 = vld [vmem:[#allocation7_spill] sm:$0xff]  ;;  %v6268_v4 = vld [vmem:[#allocation9_spill] sm:$0xff] }
 0xb46   : > { %4153 = vtanh.f32 %v5559_v12 }
 0xb53   : > { %v4154_v10 = vpop.eup %4153 }
 0xb54   : > { %v2603_v13 = vmul.f32 %v4154_v10, %v4152_v0  ;;  %v6269_v0 = vld [vmem:[#allocation6_spill] sm:$0xff]  ;;  %v6270_v10 = vmov 0.0  }
 0xb56   : > { %3922 = vst [vmem:[%s4790_s30 + $0x30] sm:$0xff] %v2603_v13  ;;  %2678 = vmatmul.mubr.f32.vlgmr.msra.gmra.mxu0 %v2603_v13  ;;  %2749 = vmatmul.mubr.f32.vlgmr.msra.gmra.mxu1 %v2603_v13  ;;  %v6271_v13 = vld [vmem:[#allocation8_spill] sm:$0xff] }
 0xb57   : > { %2793 = vmatpush1.msra.mxu0 %v4562_v63  ;;  %2864 = vmatpush1.msra.mxu1 %v4568_v1 }
 0xb58   : > { %2794 = vmatprep.subr.mxu0 %v4553_v60  ;;  %2865 = vmatprep.subr.mxu1 %v4559_v62 }
 0xb59   : > { %2795 = vmatpush1.msra.mxu0 %v4550_v59  ;;  %2866 = vmatpush1.msra.mxu1 %v4556_v61 }
 0xb5a   : > { %2796 = vmatprep.subr.mxu0 %v4541_v56  ;;  %2867 = vmatprep.subr.mxu1 %v4547_v58 }
 0xb5b   : > { %2797 = vmatpush1.msra.mxu0 %v4538_v55  ;;  %2868 = vmatpush1.msra.mxu1 %v4544_v57 }
 0xb5c   : > { %2798 = vmatprep.subr.mxu0 %v4529_v52  ;;  %2869 = vmatprep.subr.mxu1 %v4535_v54 }
 0xb5d   : > { %2799 = vmatpush1.msra.mxu0 %v4526_v51  ;;  %2870 = vmatpush1.msra.mxu1 %v4532_v53 }
 0xb5e   : > { %2800 = vmatprep.subr.mxu0 %v4517_v48  ;;  %2871 = vmatprep.subr.mxu1 %v4523_v50 }
 0xb5f   : > { %2801 = vmatpush1.msra.mxu0 %v4514_v47  ;;  %2872 = vmatpush1.msra.mxu1 %v4520_v49 }
 0xb60   : > { %2802 = vmatprep.subr.mxu0 %v4505_v44  ;;  %2873 = vmatprep.subr.mxu1 %v4511_v46 }
 0xb61   : > { %2803 = vmatpush1.msra.mxu0 %v4502_v43  ;;  %2874 = vmatpush1.msra.mxu1 %v4508_v45 }
 0xb62   : > { %2804 = vmatprep.subr.mxu0 %v4493_v40  ;;  %2875 = vmatprep.subr.mxu1 %v4499_v42 }
 0xb63   : > { %2805 = vmatpush1.msra.mxu0 %v4490_v39  ;;  %2876 = vmatpush1.msra.mxu1 %v4496_v41 }
 0xb64   : > { %2806 = vmatprep.subr.mxu0 %v4481_v36  ;;  %2877 = vmatprep.subr.mxu1 %v4487_v38 }
 0xb65   : > { %2807 = vmatpush1.msra.mxu0 %v4478_v35  ;;  %2878 = vmatpush1.msra.mxu1 %v4484_v37 }
 0xb66   : > { %2808 = vmatprep.subr.mxu0 %v4469_v32  ;;  %2879 = vmatprep.subr.mxu1 %v4475_v34 }
 0xb67   : > { %2809 = vmatpush1.msra.mxu0 %v4466_v31  ;;  %2880 = vmatpush1.msra.mxu1 %v4472_v33 }
 0xb68   : > { %2810 = vmatprep.subr.mxu0 %v4457_v28  ;;  %2881 = vmatprep.subr.mxu1 %v4463_v30 }
 0xb69   : > { %2811 = vmatpush1.msra.mxu0 %v4454_v27  ;;  %2882 = vmatpush1.msra.mxu1 %v4460_v29 }
 0xb6a   : > { %2812 = vmatprep.subr.mxu0 %v4445_v24  ;;  %2883 = vmatprep.subr.mxu1 %v4451_v26 }
 0xb6b   : > { %2813 = vmatpush1.msra.mxu0 %v4442_v23  ;;  %2884 = vmatpush1.msra.mxu1 %v6233_v8 }
 0xb6c   : > { %2814 = vmatprep.subr.mxu0 %v4433_v20  ;;  %2885 = vmatprep.subr.mxu1 %v4439_v22 }
 0xb6d   : > { %2815 = vmatpush1.msra.mxu0 %v6253_v7  ;;  %2886 = vmatpush1.msra.mxu1 %v6254_v21 }
 0xb6e   : > { %2816 = vmatprep.subr.mxu0 %v6255_v19  ;;  %2887 = vmatprep.subr.mxu1 %v6256_v25  ;;  %v2611_v25 = vld [vmem:[#allocation2 + $0x70] sm:$0xff] }
 0xb6f   : > { %2817 = vmatpush1.msra.mxu0 %v6257_v5  ;;  %2888 = vmatpush1.msra.mxu1 %v6258_v14  ;;  %v2612_v14 = vld [vmem:[#allocation2 + $0xc0] sm:$0xff] }
 0xb70   : > { %2818 = vmatprep.subr.mxu0 %v6259_v6  ;;  %2889 = vmatprep.subr.mxu1 %v6260_v2 }
 0xb71   : > { %2819 = vmatpush1.msra.mxu0 %v6261_v17  ;;  %2890 = vmatpush1.msra.mxu1 %v6262_v15  ;;  %v6272_v15 = vld [vmem:[#allocation25_spill] sm:$0xff]  ;;  %v2610_v17 = vld [vmem:[#allocation2 + $0x90] sm:$0xff] }
 0xb72   : > { %2820 = vmatprep.subr.mxu0 %v6263_v18  ;;  %2891 = vmatprep.subr.mxu1 %v6264_v16  ;;  %v6273_v18 = vld [vmem:[#allocation26_spill] sm:$0xff]  ;;  %v2609_v16 = vld [vmem:[#allocation2 + $0xe0] sm:$0xff] }
 0xb73   : > { %2821 = vmatpush1.msra.mxu0 %v6265_v11  ;;  %2892 = vmatpush1.msra.mxu1 %v6266_v3 }
 0xb74   : > { %2822 = vmatprep.subr.mxu0 %v6267_v9  ;;  %2893 = vmatprep.subr.mxu1 %v6268_v4 }
 0xb75   : > { %2823 = vmatpush1.msra.mxu0 %v6269_v0  ;;  %2856 = vmatprep.mubr.f32.mxu0 %v6270_v10 }
 0xb76   : > { %2894 = vmatpush1.msra.mxu1 %v6271_v13  ;;  %2927 = vmatprep.mubr.f32.mxu1 %v6270_v10 }
 0xb77   : > { %2971 = vmatprep.subr.mxu0 %v6272_v15  ;;  %3042 = vmatprep.subr.mxu1 %v6273_v18 }
 0xc16   : > { %v2679_v11 = vpop.f32.mrf.mxu0  ;;  %v2750_v4 = vpop.f32.mrf.mxu1 }
 0xc17   : > { %v2755_v3 = vadd.f32 %v2679_v11, %v2609_v16  ;;  %v2757_v15 = vadd.f32 %v2750_v4, %v2611_v25  ;;  %v6279_v4 = vld [vmem:[#allocation20_spill] sm:$0xff] }
 0xc18   : > { %v2681_v2 = vpop.f32.mrf.mxu0  ;;  %v2752_v5 = vpop.f32.mrf.mxu1 }
 0xc19   : > { %v3923_v9 = vmul.f32 -1.442695, %v2755_v3  ;;  %v2756_v6 = vadd.f32 %v2681_v2, %v2610_v17  ;;  %v2758_v13 = vadd.f32 %v2752_v5, %v2612_v14 }
 0xc1b   : > { %4155 = vpow2.f32 %v3923_v9  ;;  %v3924_v0 = vmul.f32 -1.442695, %v2756_v6  ;;  %v3925_v10 = vmul.f32 -1.442695, %v2758_v13  ;;  %v6278_v9 = vld [vmem:[#allocation18_spill] sm:$0xff] }
 0xc1c   : > { %v6282_v13 = vld [vmem:[#allocation14_spill] sm:$0xff] }
 0xc1d   : > { %4157 = vpow2.f32 %v3924_v0  ;;  %v6280_v0 = vld [vmem:[#allocation15_spill] sm:$0xff] }
 0xc1e   : > { %4159 = vpow2.f32 %v3925_v10  ;;  %v6281_v10 = vld [vmem:[#allocation17_spill] sm:$0xff] }
 0xc28   : > { %v4156_v19 = vpop.eup %4155 }
 0xc29   : > { %v2762_v21 = vadd.f32 1.0, %v4156_v19 }
 0xc2a   : > { %v4158_v18 = vpop.eup %4157 }
 0xc2b   : > { %4161 = vrcp.f32 %v2762_v21  ;;  %v2768_v7 = vadd.f32 1.0, %v4158_v18  ;;  %v4160_v2 = vpop.eup %4159  ;;  %v6277_v18 = vld [vmem:[#allocation21_spill] sm:$0xff] }
 0xc2c   : > { %4163 = vtanh.f32 %v2757_v15  ;;  %v2775_v11 = vadd.f32 1.0, %v4160_v2  ;;  %v6276_v15 = vld [vmem:[#allocation19_spill] sm:$0xff]  ;;  %v6283_v2 = vld [vmem:[#allocation16_spill] sm:$0xff] }
 0xc2d   : > { %4165 = vrcp.f32 %v2768_v7  ;;  %v6275_v7 = vld [vmem:[#allocation23_spill] sm:$0xff] }
 0xc2e   : > { %4167 = vrcp.f32 %v2775_v11  ;;  %v6287_v11 = vld [vmem:[#allocation12_spill] sm:$0xff] }
 0xc38   : > { %v4162_v17 = vpop.eup %4161 }
 0xc39   : > { %v4164_v16 = vpop.eup %4163 }
 0xc3a   : > { %v4166_v6 = vpop.eup %4165  ;;  %v2779_v3 = vmul.f32 %v4164_v16, %v4162_v17  ;;  %v6284_v17 = vld [vmem:[#allocation11_spill] sm:$0xff]  ;;  %v6285_v16 = vld [vmem:[#allocation13_spill] sm:$0xff] }
 0xc3b   : > { %v2778_v5 = vmul.f32 %v4166_v6, %v5559_v12  ;;  %v4168_v19 = vpop.eup %4167  ;;  %v6274_v12 = vld [vmem:[#allocation22_spill] sm:$0xff] }
 0xc3c   : > { %v6286_v6 = vld [vmem:[#allocation10_spill] sm:$0xff] }
 0xc3d   : > { %v5630_v14 = vadd.f32 %v2779_v3, %v2778_v5  ;;  %v6288_v3 = vld [vmem:[#allocation7_spill] sm:$0xff]  ;;  %v6289_v5 = vld [vmem:[#allocation9_spill] sm:$0xff] }
 0xc3f   : > { %4169 = vtanh.f32 %v5630_v14 }
 0xc4c   : > { %v4170_v25 = vpop.eup %4169 }
 0xc4d   : > { %v2782_v21 = vmul.f32 %v4170_v25, %v4168_v19  ;;  %v6290_v19 = vld [vmem:[#allocation6_spill] sm:$0xff]  ;;  %v6291_v25 = vmov 0.0  }
 0xc4f   : > { %3926 = vst [vmem:[%s4790_s30 + $0x28] sm:$0xff] %v2782_v21  ;;  %2857 = vmatmul.mubr.f32.vlgmr.msra.gmra.mxu0 %v2782_v21  ;;  %2928 = vmatmul.mubr.f32.vlgmr.msra.gmra.mxu1 %v2782_v21  ;;  %v6292_v21 = vld [vmem:[#allocation8_spill] sm:$0xff] }
 0xc50   : > { %2972 = vmatpush1.msra.mxu0 %v4562_v63  ;;  %3043 = vmatpush1.msra.mxu1 %v4568_v1 }
 0xc51   : > { %2973 = vmatprep.subr.mxu0 %v4553_v60  ;;  %3044 = vmatprep.subr.mxu1 %v4559_v62 }
 0xc52   : > { %2974 = vmatpush1.msra.mxu0 %v4550_v59  ;;  %3045 = vmatpush1.msra.mxu1 %v4556_v61 }
 0xc53   : > { %2975 = vmatprep.subr.mxu0 %v4541_v56  ;;  %3046 = vmatprep.subr.mxu1 %v4547_v58 }
 0xc54   : > { %2976 = vmatpush1.msra.mxu0 %v4538_v55  ;;  %3047 = vmatpush1.msra.mxu1 %v4544_v57 }
 0xc55   : > { %2977 = vmatprep.subr.mxu0 %v4529_v52  ;;  %3048 = vmatprep.subr.mxu1 %v4535_v54 }
 0xc56   : > { %2978 = vmatpush1.msra.mxu0 %v4526_v51  ;;  %3049 = vmatpush1.msra.mxu1 %v4532_v53 }
 0xc57   : > { %2979 = vmatprep.subr.mxu0 %v4517_v48  ;;  %3050 = vmatprep.subr.mxu1 %v4523_v50 }
 0xc58   : > { %2980 = vmatpush1.msra.mxu0 %v4514_v47  ;;  %3051 = vmatpush1.msra.mxu1 %v4520_v49 }
 0xc59   : > { %2981 = vmatprep.subr.mxu0 %v4505_v44  ;;  %3052 = vmatprep.subr.mxu1 %v4511_v46 }
 0xc5a   : > { %2982 = vmatpush1.msra.mxu0 %v4502_v43  ;;  %3053 = vmatpush1.msra.mxu1 %v4508_v45 }
 0xc5b   : > { %2983 = vmatprep.subr.mxu0 %v4493_v40  ;;  %3054 = vmatprep.subr.mxu1 %v4499_v42 }
 0xc5c   : > { %2984 = vmatpush1.msra.mxu0 %v4490_v39  ;;  %3055 = vmatpush1.msra.mxu1 %v4496_v41 }
 0xc5d   : > { %2985 = vmatprep.subr.mxu0 %v4481_v36  ;;  %3056 = vmatprep.subr.mxu1 %v4487_v38 }
 0xc5e   : > { %2986 = vmatpush1.msra.mxu0 %v4478_v35  ;;  %3057 = vmatpush1.msra.mxu1 %v4484_v37 }
 0xc5f   : > { %2987 = vmatprep.subr.mxu0 %v4469_v32  ;;  %3058 = vmatprep.subr.mxu1 %v4475_v34 }
 0xc60   : > { %2988 = vmatpush1.msra.mxu0 %v4466_v31  ;;  %3059 = vmatpush1.msra.mxu1 %v4472_v33 }
 0xc61   : > { %2989 = vmatprep.subr.mxu0 %v4457_v28  ;;  %3060 = vmatprep.subr.mxu1 %v4463_v30 }
 0xc62   : > { %2990 = vmatpush1.msra.mxu0 %v4454_v27  ;;  %3061 = vmatpush1.msra.mxu1 %v4460_v29 }
 0xc63   : > { %2991 = vmatprep.subr.mxu0 %v4445_v24  ;;  %3062 = vmatprep.subr.mxu1 %v4451_v26 }
 0xc64   : > { %2992 = vmatpush1.msra.mxu0 %v4442_v23  ;;  %3063 = vmatpush1.msra.mxu1 %v6233_v8 }
 0xc65   : > { %2993 = vmatprep.subr.mxu0 %v4433_v20  ;;  %3064 = vmatprep.subr.mxu1 %v4439_v22 }
 0xc66   : > { %2994 = vmatpush1.msra.mxu0 %v6274_v12  ;;  %3065 = vmatpush1.msra.mxu1 %v6275_v7 }
 0xc67   : > { %2995 = vmatprep.subr.mxu0 %v6276_v15  ;;  %3066 = vmatprep.subr.mxu1 %v6277_v18  ;;  %v2790_v18 = vld [vmem:[#allocation2 + $0x40] sm:$0xff] }
 0xc68   : > { %2996 = vmatpush1.msra.mxu0 %v6278_v9  ;;  %3067 = vmatpush1.msra.mxu1 %v6279_v4  ;;  %v2791_v4 = vld [vmem:[#allocation2 + $0xc8] sm:$0xff] }
 0xc69   : > { %2997 = vmatprep.subr.mxu0 %v6280_v0  ;;  %3068 = vmatprep.subr.mxu1 %v6281_v10 }
 0xc6a   : > { %2998 = vmatpush1.msra.mxu0 %v6282_v13  ;;  %3069 = vmatpush1.msra.mxu1 %v6283_v2  ;;  %v6293_v2 = vld [vmem:[#allocation25_spill] sm:$0xff]  ;;  %v2789_v13 = vld [vmem:[#allocation2 + $0x58] sm:$0xff] }
 0xc6b   : > { %2999 = vmatprep.subr.mxu0 %v6284_v17  ;;  %3070 = vmatprep.subr.mxu1 %v6285_v16  ;;  %v6294_v17 = vld [vmem:[#allocation26_spill] sm:$0xff]  ;;  %v2788_v16 = vld [vmem:[#allocation2 + $0x38] sm:$0xff] }
 0xc6c   : > { %3000 = vmatpush1.msra.mxu0 %v6286_v6  ;;  %3071 = vmatpush1.msra.mxu1 %v6287_v11 }
 0xc6d   : > { %3001 = vmatprep.subr.mxu0 %v6288_v3  ;;  %3072 = vmatprep.subr.mxu1 %v6289_v5 }
 0xc6e   : > { %3002 = vmatpush1.msra.mxu0 %v6290_v19  ;;  %3035 = vmatprep.mubr.f32.mxu0 %v6291_v25 }
 0xc6f   : > { %3073 = vmatpush1.msra.mxu1 %v6292_v21  ;;  %3106 = vmatprep.mubr.f32.mxu1 %v6291_v25 }
 0xc70   : > { %3150 = vmatprep.subr.mxu0 %v6293_v2  ;;  %3221 = vmatprep.subr.mxu1 %v6294_v17 }
 0xd0f   : > { %v2858_v6 = vpop.f32.mrf.mxu0  ;;  %v2929_v5 = vpop.f32.mrf.mxu1 }
 0xd10   : > { %v2934_v11 = vadd.f32 %v2858_v6, %v2788_v16  ;;  %v2936_v2 = vadd.f32 %v2929_v5, %v2790_v18  ;;  %v6300_v5 = vld [vmem:[#allocation20_spill] sm:$0xff] }
 0xd11   : > { %v2860_v10 = vpop.f32.mrf.mxu0  ;;  %v2931_v9 = vpop.f32.mrf.mxu1 }
 0xd12   : > { %v3927_v3 = vmul.f32 -1.442695, %v2934_v11  ;;  %v2935_v0 = vadd.f32 %v2860_v10, %v2789_v13  ;;  %v2937_v21 = vadd.f32 %v2931_v9, %v2791_v4 }
 0xd14   : > { %4171 = vpow2.f32 %v3927_v3  ;;  %v3928_v19 = vmul.f32 -1.442695, %v2935_v0  ;;  %v3929_v25 = vmul.f32 -1.442695, %v2937_v21  ;;  %v6299_v3 = vld [vmem:[#allocation18_spill] sm:$0xff] }
 0xd15   : > { %v6303_v21 = vld [vmem:[#allocation14_spill] sm:$0xff] }
 0xd16   : > { %4173 = vpow2.f32 %v3928_v19  ;;  %v6301_v19 = vld [vmem:[#allocation15_spill] sm:$0xff] }
 0xd17   : > { %4175 = vpow2.f32 %v3929_v25  ;;  %v6302_v25 = vld [vmem:[#allocation17_spill] sm:$0xff] }
 0xd21   : > { %v4172_v15 = vpop.eup %4171 }
 0xd22   : > { %v2941_v7 = vadd.f32 1.0, %v4172_v15 }
 0xd23   : > { %v4174_v17 = vpop.eup %4173 }
 0xd24   : > { %4177 = vrcp.f32 %v2941_v7  ;;  %v2947_v12 = vadd.f32 1.0, %v4174_v17  ;;  %v4176_v10 = vpop.eup %4175  ;;  %v6298_v17 = vld [vmem:[#allocation21_spill] sm:$0xff] }
 0xd25   : > { %4179 = vtanh.f32 %v2936_v2  ;;  %v2954_v6 = vadd.f32 1.0, %v4176_v10  ;;  %v6297_v2 = vld [vmem:[#allocation19_spill] sm:$0xff]  ;;  %v6304_v10 = vld [vmem:[#allocation16_spill] sm:$0xff] }
 0xd26   : > { %4181 = vrcp.f32 %v2947_v12  ;;  %v6296_v12 = vld [vmem:[#allocation23_spill] sm:$0xff] }
 0xd27   : > { %4183 = vrcp.f32 %v2954_v6  ;;  %v6308_v6 = vld [vmem:[#allocation12_spill] sm:$0xff] }
 0xd31   : > { %v4178_v13 = vpop.eup %4177 }
 0xd32   : > { %v4180_v16 = vpop.eup %4179 }
 0xd33   : > { %v4182_v0 = vpop.eup %4181  ;;  %v2958_v11 = vmul.f32 %v4180_v16, %v4178_v13  ;;  %v6305_v13 = vld [vmem:[#allocation11_spill] sm:$0xff]  ;;  %v6306_v16 = vld [vmem:[#allocation13_spill] sm:$0xff] }
 0xd34   : > { %v2957_v9 = vmul.f32 %v4182_v0, %v5630_v14  ;;  %v4184_v15 = vpop.eup %4183  ;;  %v6295_v14 = vld [vmem:[#allocation22_spill] sm:$0xff] }
 0xd35   : > { %v6307_v0 = vld [vmem:[#allocation10_spill] sm:$0xff] }
 0xd36   : > { %v5701_v4 = vadd.f32 %v2958_v11, %v2957_v9  ;;  %v6309_v11 = vld [vmem:[#allocation7_spill] sm:$0xff]  ;;  %v6310_v9 = vld [vmem:[#allocation9_spill] sm:$0xff] }
 0xd38   : > { %4185 = vtanh.f32 %v5701_v4 }
 0xd45   : > { %v4186_v18 = vpop.eup %4185 }
 0xd46   : > { %v2961_v7 = vmul.f32 %v4186_v18, %v4184_v15  ;;  %v6311_v15 = vld [vmem:[#allocation6_spill] sm:$0xff]  ;;  %v6312_v18 = vmov 0.0  }
 0xd48   : > { %3930 = vst [vmem:[%s4790_s30 + $0x20] sm:$0xff] %v2961_v7  ;;  %3036 = vmatmul.mubr.f32.vlgmr.msra.gmra.mxu0 %v2961_v7  ;;  %3107 = vmatmul.mubr.f32.vlgmr.msra.gmra.mxu1 %v2961_v7  ;;  %v6313_v7 = vld [vmem:[#allocation8_spill] sm:$0xff] }
 0xd49   : > { %3151 = vmatpush1.msra.mxu0 %v4562_v63  ;;  %3222 = vmatpush1.msra.mxu1 %v4568_v1 }
 0xd4a   : > { %3152 = vmatprep.subr.mxu0 %v4553_v60  ;;  %3223 = vmatprep.subr.mxu1 %v4559_v62 }
 0xd4b   : > { %3153 = vmatpush1.msra.mxu0 %v4550_v59  ;;  %3224 = vmatpush1.msra.mxu1 %v4556_v61 }
 0xd4c   : > { %3154 = vmatprep.subr.mxu0 %v4541_v56  ;;  %3225 = vmatprep.subr.mxu1 %v4547_v58 }
 0xd4d   : > { %3155 = vmatpush1.msra.mxu0 %v4538_v55  ;;  %3226 = vmatpush1.msra.mxu1 %v4544_v57 }
 0xd4e   : > { %3156 = vmatprep.subr.mxu0 %v4529_v52  ;;  %3227 = vmatprep.subr.mxu1 %v4535_v54 }
 0xd4f   : > { %3157 = vmatpush1.msra.mxu0 %v4526_v51  ;;  %3228 = vmatpush1.msra.mxu1 %v4532_v53 }
 0xd50   : > { %3158 = vmatprep.subr.mxu0 %v4517_v48  ;;  %3229 = vmatprep.subr.mxu1 %v4523_v50 }
 0xd51   : > { %3159 = vmatpush1.msra.mxu0 %v4514_v47  ;;  %3230 = vmatpush1.msra.mxu1 %v4520_v49 }
 0xd52   : > { %3160 = vmatprep.subr.mxu0 %v4505_v44  ;;  %3231 = vmatprep.subr.mxu1 %v4511_v46 }
 0xd53   : > { %3161 = vmatpush1.msra.mxu0 %v4502_v43  ;;  %3232 = vmatpush1.msra.mxu1 %v4508_v45 }
 0xd54   : > { %3162 = vmatprep.subr.mxu0 %v4493_v40  ;;  %3233 = vmatprep.subr.mxu1 %v4499_v42 }
 0xd55   : > { %3163 = vmatpush1.msra.mxu0 %v4490_v39  ;;  %3234 = vmatpush1.msra.mxu1 %v4496_v41 }
 0xd56   : > { %3164 = vmatprep.subr.mxu0 %v4481_v36  ;;  %3235 = vmatprep.subr.mxu1 %v4487_v38 }
 0xd57   : > { %3165 = vmatpush1.msra.mxu0 %v4478_v35  ;;  %3236 = vmatpush1.msra.mxu1 %v4484_v37 }
 0xd58   : > { %3166 = vmatprep.subr.mxu0 %v4469_v32  ;;  %3237 = vmatprep.subr.mxu1 %v4475_v34 }
 0xd59   : > { %3167 = vmatpush1.msra.mxu0 %v4466_v31  ;;  %3238 = vmatpush1.msra.mxu1 %v4472_v33 }
 0xd5a   : > { %3168 = vmatprep.subr.mxu0 %v4457_v28  ;;  %3239 = vmatprep.subr.mxu1 %v4463_v30 }
 0xd5b   : > { %3169 = vmatpush1.msra.mxu0 %v4454_v27  ;;  %3240 = vmatpush1.msra.mxu1 %v4460_v29 }
 0xd5c   : > { %3170 = vmatprep.subr.mxu0 %v4445_v24  ;;  %3241 = vmatprep.subr.mxu1 %v4451_v26 }
 0xd5d   : > { %3171 = vmatpush1.msra.mxu0 %v4442_v23  ;;  %3242 = vmatpush1.msra.mxu1 %v6233_v8 }
 0xd5e   : > { %3172 = vmatprep.subr.mxu0 %v4433_v20  ;;  %3243 = vmatprep.subr.mxu1 %v4439_v22 }
 0xd5f   : > { %3173 = vmatpush1.msra.mxu0 %v6295_v14  ;;  %3244 = vmatpush1.msra.mxu1 %v6296_v12 }
 0xd60   : > { %3174 = vmatprep.subr.mxu0 %v6297_v2  ;;  %3245 = vmatprep.subr.mxu1 %v6298_v17  ;;  %v2969_v17 = vld [vmem:[#allocation2 + $0x8] sm:$0xff] }
 0xd61   : > { %3175 = vmatpush1.msra.mxu0 %v6299_v3  ;;  %3246 = vmatpush1.msra.mxu1 %v6300_v5  ;;  %v2970_v5 = vld [vmem:[#allocation2 + $0x78] sm:$0xff] }
 0xd62   : > { %3176 = vmatprep.subr.mxu0 %v6301_v19  ;;  %3247 = vmatprep.subr.mxu1 %v6302_v25 }
 0xd63   : > { %3177 = vmatpush1.msra.mxu0 %v6303_v21  ;;  %3248 = vmatpush1.msra.mxu1 %v6304_v10  ;;  %v6314_v10 = vld [vmem:[#allocation25_spill] sm:$0xff]  ;;  %v2968_v21 = vld [vmem:[#allocation2 + $0xf0] sm:$0xff] }
 0xd64   : > { %3178 = vmatprep.subr.mxu0 %v6305_v13  ;;  %3249 = vmatprep.subr.mxu1 %v6306_v16  ;;  %v6315_v13 = vld [vmem:[#allocation26_spill] sm:$0xff]  ;;  %v2967_v16 = vld [vmem:[#allocation2 + $0x60] sm:$0xff] }
 0xd65   : > { %3179 = vmatpush1.msra.mxu0 %v6307_v0  ;;  %3250 = vmatpush1.msra.mxu1 %v6308_v6 }
 0xd66   : > { %3180 = vmatprep.subr.mxu0 %v6309_v11  ;;  %3251 = vmatprep.subr.mxu1 %v6310_v9 }
 0xd67   : > { %3181 = vmatpush1.msra.mxu0 %v6311_v15  ;;  %3214 = vmatprep.mubr.f32.mxu0 %v6312_v18 }
 0xd68   : > { %3252 = vmatpush1.msra.mxu1 %v6313_v7  ;;  %3285 = vmatprep.mubr.f32.mxu1 %v6312_v18 }
 0xd69   : > { %3329 = vmatprep.subr.mxu0 %v6314_v10  ;;  %3400 = vmatprep.subr.mxu1 %v6315_v13 }
 0xe08   : > { %v3037_v0 = vpop.f32.mrf.mxu0  ;;  %v3108_v9 = vpop.f32.mrf.mxu1 }
 0xe09   : > { %v3113_v6 = vadd.f32 %v3037_v0, %v2967_v16  ;;  %v3115_v10 = vadd.f32 %v3108_v9, %v2969_v17  ;;  %v6321_v9 = vld [vmem:[#allocation20_spill] sm:$0xff] }
 0xe0a   : > { %v3039_v25 = vpop.f32.mrf.mxu0  ;;  %v3110_v3 = vpop.f32.mrf.mxu1 }
 0xe0b   : > { %v3931_v11 = vmul.f32 -1.442695, %v3113_v6  ;;  %v3114_v19 = vadd.f32 %v3039_v25, %v2968_v21  ;;  %v3116_v7 = vadd.f32 %v3110_v3, %v2970_v5 }
 0xe0d   : > { %4187 = vpow2.f32 %v3931_v11  ;;  %v3932_v15 = vmul.f32 -1.442695, %v3114_v19  ;;  %v3933_v18 = vmul.f32 -1.442695, %v3116_v7  ;;  %v6320_v11 = vld [vmem:[#allocation18_spill] sm:$0xff] }
 0xe0e   : > { %v6324_v7 = vld [vmem:[#allocation14_spill] sm:$0xff] }
 0xe0f   : > { %4189 = vpow2.f32 %v3932_v15  ;;  %v6322_v15 = vld [vmem:[#allocation15_spill] sm:$0xff] }
 0xe10   : > { %4191 = vpow2.f32 %v3933_v18  ;;  %v6323_v18 = vld [vmem:[#allocation17_spill] sm:$0xff] }
 0xe1a   : > { %v4188_v2 = vpop.eup %4187 }
 0xe1b   : > { %v3120_v12 = vadd.f32 1.0, %v4188_v2 }
 0xe1c   : > { %v4190_v13 = vpop.eup %4189 }
 0xe1d   : > { %4193 = vrcp.f32 %v3120_v12  ;;  %v3126_v14 = vadd.f32 1.0, %v4190_v13  ;;  %v4192_v25 = vpop.eup %4191  ;;  %v6319_v13 = vld [vmem:[#allocation21_spill] sm:$0xff] }
 0xe1e   : > { %4195 = vtanh.f32 %v3115_v10  ;;  %v3133_v0 = vadd.f32 1.0, %v4192_v25  ;;  %v6318_v10 = vld [vmem:[#allocation19_spill] sm:$0xff]  ;;  %v6325_v25 = vld [vmem:[#allocation16_spill] sm:$0xff] }
 0xe1f   : > { %4197 = vrcp.f32 %v3126_v14  ;;  %v6317_v14 = vld [vmem:[#allocation23_spill] sm:$0xff] }
 0xe20   : > { %4199 = vrcp.f32 %v3133_v0  ;;  %v6329_v0 = vld [vmem:[#allocation12_spill] sm:$0xff] }
 0xe2a   : > { %v4194_v21 = vpop.eup %4193 }
 0xe2b   : > { %v4196_v16 = vpop.eup %4195 }
 0xe2c   : > { %v4198_v19 = vpop.eup %4197  ;;  %v3137_v6 = vmul.f32 %v4196_v16, %v4194_v21  ;;  %v6326_v21 = vld [vmem:[#allocation11_spill] sm:$0xff]  ;;  %v6327_v16 = vld [vmem:[#allocation13_spill] sm:$0xff] }
 0xe2d   : > { %v3136_v3 = vmul.f32 %v4198_v19, %v5701_v4  ;;  %v4200_v2 = vpop.eup %4199  ;;  %v6316_v4 = vld [vmem:[#allocation22_spill] sm:$0xff] }
 0xe2e   : > { %v6328_v19 = vld [vmem:[#allocation10_spill] sm:$0xff] }
 0xe2f   : > { %v5772_v5 = vadd.f32 %v3137_v6, %v3136_v3  ;;  %v6330_v6 = vld [vmem:[#allocation7_spill] sm:$0xff]  ;;  %v6331_v3 = vld [vmem:[#allocation9_spill] sm:$0xff] }
 0xe31   : > { %4201 = vtanh.f32 %v5772_v5 }
 0xe3e   : > { %v4202_v17 = vpop.eup %4201 }
 0xe3f   : > { %v3140_v12 = vmul.f32 %v4202_v17, %v4200_v2  ;;  %v6332_v2 = vld [vmem:[#allocation6_spill] sm:$0xff]  ;;  %v6333_v17 = vmov 0.0  }
 0xe41   : > { %3934 = vst [vmem:[%s4790_s30 + $0x18] sm:$0xff] %v3140_v12  ;;  %3215 = vmatmul.mubr.f32.vlgmr.msra.gmra.mxu0 %v3140_v12  ;;  %3286 = vmatmul.mubr.f32.vlgmr.msra.gmra.mxu1 %v3140_v12  ;;  %v6334_v12 = vld [vmem:[#allocation8_spill] sm:$0xff] }
 0xe42   : > { %3330 = vmatpush1.msra.mxu0 %v4562_v63  ;;  %3401 = vmatpush1.msra.mxu1 %v4568_v1 }
 0xe43   : > { %3331 = vmatprep.subr.mxu0 %v4553_v60  ;;  %3402 = vmatprep.subr.mxu1 %v4559_v62 }
 0xe44   : > { %3332 = vmatpush1.msra.mxu0 %v4550_v59  ;;  %3403 = vmatpush1.msra.mxu1 %v4556_v61 }
 0xe45   : > { %3333 = vmatprep.subr.mxu0 %v4541_v56  ;;  %3404 = vmatprep.subr.mxu1 %v4547_v58 }
 0xe46   : > { %3334 = vmatpush1.msra.mxu0 %v4538_v55  ;;  %3405 = vmatpush1.msra.mxu1 %v4544_v57 }
 0xe47   : > { %3335 = vmatprep.subr.mxu0 %v4529_v52  ;;  %3406 = vmatprep.subr.mxu1 %v4535_v54 }
 0xe48   : > { %3336 = vmatpush1.msra.mxu0 %v4526_v51  ;;  %3407 = vmatpush1.msra.mxu1 %v4532_v53 }
 0xe49   : > { %3337 = vmatprep.subr.mxu0 %v4517_v48  ;;  %3408 = vmatprep.subr.mxu1 %v4523_v50 }
 0xe4a   : > { %3338 = vmatpush1.msra.mxu0 %v4514_v47  ;;  %3409 = vmatpush1.msra.mxu1 %v4520_v49 }
 0xe4b   : > { %3339 = vmatprep.subr.mxu0 %v4505_v44  ;;  %3410 = vmatprep.subr.mxu1 %v4511_v46 }
 0xe4c   : > { %3340 = vmatpush1.msra.mxu0 %v4502_v43  ;;  %3411 = vmatpush1.msra.mxu1 %v4508_v45 }
 0xe4d   : > { %3341 = vmatprep.subr.mxu0 %v4493_v40  ;;  %3412 = vmatprep.subr.mxu1 %v4499_v42 }
 0xe4e   : > { %3342 = vmatpush1.msra.mxu0 %v4490_v39  ;;  %3413 = vmatpush1.msra.mxu1 %v4496_v41 }
 0xe4f   : > { %3343 = vmatprep.subr.mxu0 %v4481_v36  ;;  %3414 = vmatprep.subr.mxu1 %v4487_v38 }
 0xe50   : > { %3344 = vmatpush1.msra.mxu0 %v4478_v35  ;;  %3415 = vmatpush1.msra.mxu1 %v4484_v37 }
 0xe51   : > { %3345 = vmatprep.subr.mxu0 %v4469_v32  ;;  %3416 = vmatprep.subr.mxu1 %v4475_v34 }
 0xe52   : > { %3346 = vmatpush1.msra.mxu0 %v4466_v31  ;;  %3417 = vmatpush1.msra.mxu1 %v4472_v33 }
 0xe53   : > { %3347 = vmatprep.subr.mxu0 %v4457_v28  ;;  %3418 = vmatprep.subr.mxu1 %v4463_v30 }
 0xe54   : > { %3348 = vmatpush1.msra.mxu0 %v4454_v27  ;;  %3419 = vmatpush1.msra.mxu1 %v4460_v29 }
 0xe55   : > { %3349 = vmatprep.subr.mxu0 %v4445_v24  ;;  %3420 = vmatprep.subr.mxu1 %v4451_v26 }
 0xe56   : > { %3350 = vmatpush1.msra.mxu0 %v4442_v23  ;;  %3421 = vmatpush1.msra.mxu1 %v6233_v8 }
 0xe57   : > { %3351 = vmatprep.subr.mxu0 %v4433_v20  ;;  %3422 = vmatprep.subr.mxu1 %v4439_v22 }
 0xe58   : > { %3352 = vmatpush1.msra.mxu0 %v6316_v4  ;;  %3423 = vmatpush1.msra.mxu1 %v6317_v14 }
 0xe59   : > { %3353 = vmatprep.subr.mxu0 %v6318_v10  ;;  %3424 = vmatprep.subr.mxu1 %v6319_v13  ;;  %v3148_v13 = vld [vmem:[#allocation2 + $0xe8] sm:$0xff] }
 0xe5a   : > { %3354 = vmatpush1.msra.mxu0 %v6320_v11  ;;  %3425 = vmatpush1.msra.mxu1 %v6321_v9  ;;  %v3149_v9 = vld [vmem:[#allocation2 + $0xb8] sm:$0xff] }
 0xe5b   : > { %3355 = vmatprep.subr.mxu0 %v6322_v15  ;;  %3426 = vmatprep.subr.mxu1 %v6323_v18 }
 0xe5c   : > { %3356 = vmatpush1.msra.mxu0 %v6324_v7  ;;  %3427 = vmatpush1.msra.mxu1 %v6325_v25  ;;  %v6335_v25 = vld [vmem:[#allocation25_spill] sm:$0xff] }
 0xe5d   : > { %3357 = vmatprep.subr.mxu0 %v6326_v21  ;;  %3428 = vmatprep.subr.mxu1 %v6327_v16  ;;  %v6336_v21 = vld [vmem:[#allocation26_spill] sm:$0xff]  ;;  %v3146_v16 = vld [vmem:[#allocation2 + $0x80] sm:$0xff]  ;;  %v3147_v7 = vld [vmem:[#allocation2 + $0x88] sm:$0xff] }
 0xe5e   : > { %3358 = vmatpush1.msra.mxu0 %v6328_v19  ;;  %3429 = vmatpush1.msra.mxu1 %v6329_v0 }
 0xe5f   : > { %3359 = vmatprep.subr.mxu0 %v6330_v6  ;;  %3430 = vmatprep.subr.mxu1 %v6331_v3 }
 0xe60   : > { %3360 = vmatpush1.msra.mxu0 %v6332_v2  ;;  %3393 = vmatprep.mubr.f32.mxu0 %v6333_v17 }
 0xe61   : > { %3431 = vmatpush1.msra.mxu1 %v6334_v12  ;;  %3464 = vmatprep.mubr.f32.mxu1 %v6333_v17 }
 0xe62   : > { %3508 = vmatprep.subr.mxu0 %v6335_v25  ;;  %3579 = vmatprep.subr.mxu1 %v6336_v21 }
 0xf01   : > { %v3216_v19 = vpop.f32.mrf.mxu0  ;;  %v3287_v3 = vpop.f32.mrf.mxu1 }
 0xf02   : > { %v3292_v0 = vadd.f32 %v3216_v19, %v3146_v16  ;;  %v3294_v25 = vadd.f32 %v3287_v3, %v3148_v13 }
 0xf03   : > { %v3218_v18 = vpop.f32.mrf.mxu0  ;;  %v3289_v11 = vpop.f32.mrf.mxu1 }
 0xf04   : > { %v3935_v6 = vmul.f32 -1.442695, %v3292_v0  ;;  %v3293_v15 = vadd.f32 %v3218_v18, %v3147_v7  ;;  %v3295_v12 = vadd.f32 %v3289_v11, %v3149_v9 }
 0xf06   : > { %4203 = vpow2.f32 %v3935_v6  ;;  %v3936_v2 = vmul.f32 -1.442695, %v3293_v15  ;;  %v3937_v17 = vmul.f32 -1.442695, %v3295_v12 }
 0xf08   : > { %4205 = vpow2.f32 %v3936_v2 }
 0xf09   : > { %4207 = vpow2.f32 %v3937_v17  ;;  %v3504_v17 = vld [vmem:[#allocation2 + $0xb0] sm:$0xff] }
 0xf13   : > { %v4204_v10 = vpop.eup %4203 }
 0xf14   : > { %v3299_v14 = vadd.f32 1.0, %v4204_v10 }
 0xf15   : > { %v4206_v21 = vpop.eup %4205 }
 0xf16   : > { %4209 = vrcp.f32 %v3299_v14  ;;  %v3305_v4 = vadd.f32 1.0, %v4206_v21  ;;  %v4208_v18 = vpop.eup %4207 }
 0xf17   : > { %4211 = vtanh.f32 %v3294_v25  ;;  %v3312_v19 = vadd.f32 1.0, %v4208_v18  ;;  %v3505_v25 = vld [vmem:[#allocation2] sm:$0xff] }
 0xf18   : > { %4213 = vrcp.f32 %v3305_v4 }
 0xf19   : > { %4215 = vrcp.f32 %v3312_v19 }
 0xf23   : > { %v4210_v7 = vpop.eup %4209 }
 0xf24   : > { %v4212_v16 = vpop.eup %4211 }
 0xf25   : > { %v4214_v15 = vpop.eup %4213  ;;  %v3316_v0 = vmul.f32 %v4212_v16, %v4210_v7 }
 0xf26   : > { %v3315_v11 = vmul.f32 %v4214_v15, %v5772_v5  ;;  %v4216_v10 = vpop.eup %4215 }
 0xf28   : > { %v5843_v9 = vadd.f32 %v3316_v0, %v3315_v11  ;;  %v3507_v0 = vld [vmem:[#allocation2 + $0x18] sm:$0xff] }
 0xf2a   : > { %4217 = vtanh.f32 %v5843_v9 }
 0xf37   : > { %v4218_v13 = vpop.eup %4217 }
 0xf38   : > { %v3319_v14 = vmul.f32 %v4218_v13, %v4216_v10  ;;  %v3506_v10 = vld [vmem:[#allocation2 + $0xd8] sm:$0xff] }
 0xf3a   : > { %3938 = vst [vmem:[%s4790_s30 + $0x10] sm:$0xff] %v3319_v14  ;;  %3394 = vmatmul.mubr.f32.vlgmr.msra.gmra.mxu0 %v3319_v14  ;;  %3465 = vmatmul.mubr.f32.vlgmr.msra.gmra.mxu1 %v3319_v14 }
 0xf3b   : > { %3509 = vmatpush1.msra.mxu0 %v4562_v63  ;;  %3580 = vmatpush1.msra.mxu1 %v4568_v1 }
 0xf3c   : > { %3510 = vmatprep.subr.mxu0 %v4553_v60  ;;  %3581 = vmatprep.subr.mxu1 %v4559_v62 }
 0xf3d   : > { %3511 = vmatpush1.msra.mxu0 %v4550_v59  ;;  %3582 = vmatpush1.msra.mxu1 %v4556_v61 }
 0xf3e   : > { %3512 = vmatprep.subr.mxu0 %v4541_v56  ;;  %3583 = vmatprep.subr.mxu1 %v4547_v58 }
 0xf3f   : > { %3513 = vmatpush1.msra.mxu0 %v4538_v55  ;;  %3584 = vmatpush1.msra.mxu1 %v4544_v57 }
 0xf40   : > { %3514 = vmatprep.subr.mxu0 %v4529_v52  ;;  %3585 = vmatprep.subr.mxu1 %v4535_v54 }
 0xf41   : > { %3515 = vmatpush1.msra.mxu0 %v4526_v51  ;;  %3586 = vmatpush1.msra.mxu1 %v4532_v53  ;;  %v3327_v53 = vld [vmem:[#allocation2 + $0x30] sm:$0xff] }
 0xf42   : > { %3516 = vmatprep.subr.mxu0 %v4517_v48  ;;  %3587 = vmatprep.subr.mxu1 %v4523_v50  ;;  %v3328_v50 = vld [vmem:[#allocation2 + $0x48] sm:$0xff] }
 0xf43   : > { %3517 = vmatpush1.msra.mxu0 %v4514_v47  ;;  %3588 = vmatpush1.msra.mxu1 %v4520_v49 }
 0xf44   : > { %3518 = vmatprep.subr.mxu0 %v4505_v44  ;;  %3589 = vmatprep.subr.mxu1 %v4511_v46 }
 0xf45   : > { %3519 = vmatpush1.msra.mxu0 %v4502_v43  ;;  %3590 = vmatpush1.msra.mxu1 %v4508_v45  ;;  %v3326_v43 = vld [vmem:[#allocation2 + $0x68] sm:$0xff] }
 0xf46   : > { %3520 = vmatprep.subr.mxu0 %v4493_v40  ;;  %3591 = vmatprep.subr.mxu1 %v4499_v42  ;;  %v6355_v40 = vld [vmem:[#allocation8_spill] sm:$0xff] }
 0xf47   : > { %3521 = vmatpush1.msra.mxu0 %v4490_v39  ;;  %3592 = vmatpush1.msra.mxu1 %v4496_v41  ;;  %v6354_v39 = vmov 0.0   ;;  %v3325_v41 = vld [vmem:[#allocation2 + $0x50] sm:$0xff] }
 0xf48   : > { %3522 = vmatprep.subr.mxu0 %v4481_v36  ;;  %3593 = vmatprep.subr.mxu1 %v4487_v38  ;;  %v6351_v36 = vld [vmem:[#allocation7_spill] sm:$0xff]  ;;  %v6353_v38 = vld [vmem:[#allocation6_spill] sm:$0xff] }
 0xf49   : > { %3523 = vmatpush1.msra.mxu0 %v4478_v35  ;;  %3594 = vmatpush1.msra.mxu1 %v4484_v37  ;;  %v6350_v35 = vld [vmem:[#allocation12_spill] sm:$0xff]  ;;  %v6352_v37 = vld [vmem:[#allocation9_spill] sm:$0xff] }
 0xf4a   : > { %3524 = vmatprep.subr.mxu0 %v4469_v32  ;;  %3595 = vmatprep.subr.mxu1 %v4475_v34  ;;  %v6345_v32 = vld [vmem:[#allocation14_spill] sm:$0xff] }
 0xf4b   : > { %3525 = vmatpush1.msra.mxu0 %v4466_v31  ;;  %3596 = vmatpush1.msra.mxu1 %v4472_v33  ;;  %v6337_v31 = vld [vmem:[#allocation22_spill] sm:$0xff]  ;;  %v6348_v33 = vld [vmem:[#allocation13_spill] sm:$0xff] }
 0xf4c   : > { %3526 = vmatprep.subr.mxu0 %v4457_v28  ;;  %3597 = vmatprep.subr.mxu1 %v4463_v30  ;;  %v6338_v28 = vld [vmem:[#allocation23_spill] sm:$0xff]  ;;  %v6349_v34 = vld [vmem:[#allocation10_spill] sm:$0xff] }
 0xf4d   : > { %3527 = vmatpush1.msra.mxu0 %v4454_v27  ;;  %3598 = vmatpush1.msra.mxu1 %v4460_v29  ;;  %v6339_v30 = vld [vmem:[#allocation19_spill] sm:$0xff]  ;;  %v6340_v27 = vld [vmem:[#allocation21_spill] sm:$0xff]  ;;  %v6341_v29 = vld [vmem:[#allocation18_spill] sm:$0xff] }
 0xf4e   : > { %3528 = vmatprep.subr.mxu0 %v4445_v24  ;;  %3599 = vmatprep.subr.mxu1 %v4451_v26  ;;  %v6342_v24 = vld [vmem:[#allocation20_spill] sm:$0xff]  ;;  %v6343_v26 = vld [vmem:[#allocation15_spill] sm:$0xff] }
 0xf4f   : > { %3529 = vmatpush1.msra.mxu0 %v4442_v23  ;;  %3600 = vmatpush1.msra.mxu1 %v6233_v8  ;;  %v6344_v23 = vld [vmem:[#allocation17_spill] sm:$0xff] }
 0xf50   : > { %3530 = vmatprep.subr.mxu0 %v4433_v20  ;;  %3601 = vmatprep.subr.mxu1 %v4439_v22  ;;  %v6346_v20 = vld [vmem:[#allocation16_spill] sm:$0xff]  ;;  %v6347_v22 = vld [vmem:[#allocation11_spill] sm:$0xff] }
 0xf51   : > { %3531 = vmatpush1.msra.mxu0 %v6337_v31  ;;  %3602 = vmatpush1.msra.mxu1 %v6338_v28 }
 0xf52   : > { %3532 = vmatprep.subr.mxu0 %v6339_v30  ;;  %3603 = vmatprep.subr.mxu1 %v6340_v27 }
 0xf53   : > { %3533 = vmatpush1.msra.mxu0 %v6341_v29  ;;  %3604 = vmatpush1.msra.mxu1 %v6342_v24 }
 0xf54   : > { %3534 = vmatprep.subr.mxu0 %v6343_v26  ;;  %3605 = vmatprep.subr.mxu1 %v6344_v23 }
 0xf55   : > { %3535 = vmatpush1.msra.mxu0 %v6345_v32  ;;  %3606 = vmatpush1.msra.mxu1 %v6346_v20 }
 0xf56   : > { %3536 = vmatprep.subr.mxu0 %v6347_v22  ;;  %3607 = vmatprep.subr.mxu1 %v6348_v33 }
 0xf57   : > { %3537 = vmatpush1.msra.mxu0 %v6349_v34  ;;  %3608 = vmatpush1.msra.mxu1 %v6350_v35 }
 0xf58   : > { %3538 = vmatprep.subr.mxu0 %v6351_v36  ;;  %3609 = vmatprep.subr.mxu1 %v6352_v37 }
 0xf59   : > { %3539 = vmatpush1.msra.mxu0 %v6353_v38  ;;  %3572 = vmatprep.mubr.f32.mxu0 %v6354_v39 }
 0xf5a   : > { %3610 = vmatpush1.msra.mxu1 %v6355_v40  ;;  %3643 = vmatprep.mubr.f32.mxu1 %v6354_v39 }
 0xffa   : > { %v3395_v42 = vpop.f32.mrf.mxu0  ;;  %v3466_v48 = vpop.f32.mrf.mxu1 }
 0xffb   : > { %v3471_v44 = vadd.f32 %v3395_v42, %v3325_v41  ;;  %v3473_v56 = vadd.f32 %v3466_v48, %v3327_v53 }
 0xffc   : > { %v3397_v45 = vpop.f32.mrf.mxu0  ;;  %v3468_v51 = vpop.f32.mrf.mxu1 }
 0xffd   : > { %v3939_v46 = vmul.f32 -1.442695, %v3471_v44  ;;  %v3472_v47 = vadd.f32 %v3397_v45, %v3326_v43  ;;  %v3474_v52 = vadd.f32 %v3468_v51, %v3328_v50 }
 0xfff   : > { %4219 = vpow2.f32 %v3939_v46  ;;  %v3940_v49 = vmul.f32 -1.442695, %v3472_v47  ;;  %v3941_v54 = vmul.f32 -1.442695, %v3474_v52 }
0x1001   : > { %4221 = vpow2.f32 %v3940_v49 }
0x1002   : > { %4223 = vpow2.f32 %v3941_v54 }
0x100c   : > { %v4220_v55 = vpop.eup %4219 }
0x100d   : > { %v3478_v57 = vadd.f32 1.0, %v4220_v55 }
0x100e   : > { %v4222_v58 = vpop.eup %4221 }
0x100f   : > { %4225 = vrcp.f32 %v3478_v57  ;;  %v3484_v59 = vadd.f32 1.0, %v4222_v58  ;;  %v4224_v60 = vpop.eup %4223 }
0x1010   : > { %4227 = vtanh.f32 %v3473_v56  ;;  %v3491_v1 = vadd.f32 1.0, %v4224_v60 }
0x1011   : > { %4229 = vrcp.f32 %v3484_v59 }
0x1012   : > { %4231 = vrcp.f32 %v3491_v1 }
0x101c   : > { %v4226_v61 = vpop.eup %4225 }
0x101d   : > { %v4228_v62 = vpop.eup %4227 }
0x101e   : > { %v4230_v63 = vpop.eup %4229  ;;  %v3495_v8 = vmul.f32 %v4228_v62, %v4226_v61 }
0x101f   : > { %v3494_v5 = vmul.f32 %v4230_v63, %v5843_v9  ;;  %v4232_v6 = vpop.eup %4231 }
0x1021   : > { %v3496_v4 = vadd.f32 %v3495_v8, %v3494_v5 }
0x1023   : > { %4233 = vtanh.f32 %v3496_v4 }
0x1030   : > { %v4234_v3 = vpop.eup %4233 }
0x1031   : > { %v3498_v2 = vmul.f32 %v4234_v3, %v4232_v6 }
0x1033   : > { %3942 = vst [vmem:[%s4790_s30 + $0x8] sm:$0xff] %v3498_v2  ;;  %3573 = vmatmul.mubr.f32.vlgmr.msra.gmra.mxu0 %v3498_v2  ;;  %3644 = vmatmul.mubr.f32.vlgmr.msra.gmra.mxu1 %v3498_v2 }
0x10f3   : > { %v3574_v12 = vpop.f32.mrf.mxu0  ;;  %v3645_v15 = vpop.f32.mrf.mxu1 }
0x10f4   : > { %v3650_v21 = vadd.f32 %v3574_v12, %v3504_v17  ;;  %v3652_v31 = vadd.f32 %v3645_v15, %v3506_v10 }
0x10f5   : > { %v3576_v18 = vpop.f32.mrf.mxu0  ;;  %v3647_v11 = vpop.f32.mrf.mxu1 }
0x10f6   : > { %v3943_v7 = vmul.f32 -1.442695, %v3650_v21  ;;  %v3651_v16 = vadd.f32 %v3576_v18, %v3505_v25  ;;  %v3653_v9 = vadd.f32 %v3647_v11, %v3507_v0 }
0x10f8   : > { %4235 = vpow2.f32 %v3943_v7  ;;  %v3944_v19 = vmul.f32 -1.442695, %v3651_v16  ;;  %v3945_v13 = vmul.f32 -1.442695, %v3653_v9 }
0x10fa   : > { %4237 = vpow2.f32 %v3944_v19 }
0x10fb   : > { %4239 = vpow2.f32 %v3945_v13 }
0x1105   : > { %v4236_v14 = vpop.eup %4235 }
0x1106   : > { %v3657_v28 = vadd.f32 1.0, %v4236_v14 }
0x1107   : > { %v4238_v30 = vpop.eup %4237 }
0x1108   : > { %4241 = vrcp.f32 %v3657_v28  ;;  %v3663_v27 = vadd.f32 1.0, %v4238_v30  ;;  %v4240_v29 = vpop.eup %4239 }
0x1109   : > { %4243 = vtanh.f32 %v3652_v31  ;;  %v3670_v32 = vadd.f32 1.0, %v4240_v29 }
0x110a   : > { %4245 = vrcp.f32 %v3663_v27 }
0x110b   : > { %4247 = vrcp.f32 %v3670_v32 }
0x1115   : > { %v4242_v24 = vpop.eup %4241 }
0x1116   : > { %v4244_v26 = vpop.eup %4243 }
0x1117   : > { %v4246_v23 = vpop.eup %4245  ;;  %v3674_v20 = vmul.f32 %v4244_v26, %v4242_v24 }
0x1118   : > { %v3673_v22 = vmul.f32 %v4246_v23, %v3496_v4  ;;  %v4248_v34 = vpop.eup %4247 }
0x111a   : > { %v3675_v33 = vadd.f32 %v3674_v20, %v3673_v22 }
0x111c   : > { %4249 = vtanh.f32 %v3675_v33  ;;  %3680 = vst [vmem:[#allocation4] sm:$0xff] %v3675_v33 }
0x1129   : > { %v4250_v35 = vpop.eup %4249 }
0x112a   : > { %v3677_v36 = vmul.f32 %v4250_v35, %v4248_v34 }
0x112c   : > { %3678 = vst [vmem:[%s4790_s30] sm:$0xff] %v3677_v36  ;;  %3679 = vst [vmem:[#allocation3] sm:$0xff] %v3677_v36 }
0x112d PF: > { %3687 = sbr.rel (!%p4348_p3) target bundleno = 4405 (0x1135), region = 52  ;;  %s3947_s29 = sshll.u32 (%p4348_p3), %s4281_s17, 3  ;;  %v3741_v38 = vld [vmem:[%s4790_s30 + $0x8] sm:$0xff] (%p4348_p3)  ;;  %v3743_v39 = vld [vmem:[%s4790_s30 + $0x10] sm:$0xff] (%p4348_p3)  ;;  %v3745_v40 = vld [vmem:[%s4790_s30 + $0x18] sm:$0xff] (%p4348_p3) }
0x112e   : > { %s3696_s15 = scalar_lea.vmem (%p4348_p3), %s5947_s4, %s3947_s29  ;;  %v3747_v41 = vld [vmem:[%s4790_s30 + $0x20] sm:$0xff] (%p4348_p3)  ;;  %v3749_v42 = vld [vmem:[%s4790_s30 + $0x28] sm:$0xff] (%p4348_p3)  ;;  %v3751_v43 = vld [vmem:[%s4790_s30 + $0x30] sm:$0xff] (%p4348_p3) }
0x112f   : > { %3742 = vst [vmem:[%s3696_s15 + $0x10] sm:$0xff] (%p4348_p3), %v3741_v38  ;;  %3744 = vst [vmem:[%s3696_s15 + $0x20] sm:$0xff] (%p4348_p3), %v3743_v39  ;;  %v3753_v44 = vld [vmem:[%s4790_s30 + $0x38] sm:$0xff] (%p4348_p3) }
0x1130   : > { %3746 = vst [vmem:[%s3696_s15 + $0x30] sm:$0xff] (%p4348_p3), %v3745_v40  ;;  %3748 = vst [vmem:[%s3696_s15 + $0x40] sm:$0xff] (%p4348_p3), %v3747_v41 }
0x1131   : > { %3750 = vst [vmem:[%s3696_s15 + $0x50] sm:$0xff] (%p4348_p3), %v3749_v42  ;;  %3752 = vst [vmem:[%s3696_s15 + $0x60] sm:$0xff] (%p4348_p3), %v3751_v43 }
0x1132   : > { %3754 = vst [vmem:[%s3696_s15 + $0x70] sm:$0xff] %v3753_v44 }
0x1133   : > { %v3739_v37 = vld [vmem:[%s4790_s30] sm:$0xff] }
0x1134   : > { %3740 = vst [vmem:[%s3696_s15] sm:$0xff] %v3739_v37 }
0x1135 PF: > { %s14_s19 = sadd.s32 1, %s4289_s19   ;;  %s6356_s15 = smov %s4277_s16 }
0x1136   : > { %p11_p11 = scmp.ge.s32.totalorder %s14_s19, 4   ;;  %s6357_s16 = smov %s4357_s25 }
0x1137   : > { %s6358_s17 = smov %s4285_s18  ;;  %s6359_s18 = smov %s6361_s21 }
0x1138   :  { %13 = sbr.rel (!%p11_p11) target bundleno = 3 (0x3), region = 155 }

</bundles_post_ra>
